<compile_context>
chip_gen: v5e
topology: v5e:2x2
jax: 0.10.0
libtpu: 0.0.40
codegen_flags: <defaults>
</compile_context>

<pallas_src>
import functools

import jax
import jax.numpy as jnp
from jax.experimental import pallas as pl
from jax.experimental.pallas import tpu as pltpu


def _round_up(n, m):
    return ((n + m - 1) // m) * m


def _pad_to(x, shape):
    pads = [(0, s - d) for d, s in zip(x.shape, shape)]
    return jnp.pad(x, pads)


# ---------------------------------------------------------------------------
# Kernel: whole MLP in one invocation, everything resident in VMEM.
# ---------------------------------------------------------------------------
def qnetwork_kernel(x_ref,
                    w1_ref, b1_ref,
                    w2_ref, b2_ref,
                    w3_ref, b3_ref,
                    w4_ref, b4_ref,
                    o_ref):
    # Activations kept in f32; only the MXU operands are cast to bf16
    # (weights already live in VMEM as bf16).
    h = x_ref[...]                                                   # (Bp, D0) f32

    h = jnp.dot(h.astype(jnp.bfloat16), w1_ref[...],
                preferred_element_type=jnp.float32) + b1_ref[...]
    h = jnp.maximum(h, 0.0)                                          # ReLU

    h = jnp.dot(h.astype(jnp.bfloat16), w2_ref[...],
                preferred_element_type=jnp.float32) + b2_ref[...]
    h = jnp.tanh(h)                                                  # tanh (EUP)

    h = jnp.dot(h.astype(jnp.bfloat16), w3_ref[...],
                preferred_element_type=jnp.float32) + b3_ref[...]
    h = jnp.maximum(h, 0.0)                                          # ReLU

    h = jnp.dot(h.astype(jnp.bfloat16), w4_ref[...],
                preferred_element_type=jnp.float32) + b4_ref[...]
    o_ref[...] = h


# ---------------------------------------------------------------------------
# Host-side wrapper. `prepared` holds pre-padded bf16 weights / f32 biases,
# so per call we only pad x (tiny) and launch the kernel.
# ---------------------------------------------------------------------------
@jax.jit
def qnetwork_forward(x, prepared):
    """x: (B, H, W) float32.  prepared: output of prepare_params()."""
    B = x.shape[0]
    x2d = x.reshape(B, -1).astype(jnp.float32)            # (B, H*W)

    in_p = prepared["w1"].shape[0]                        # padded input dim
    out_dim = prepared["w4"].shape[1]                     # == outputs (unpadded)
    Bp = _round_up(B, 8)

    xp = _pad_to(x2d, (Bp, in_p))

    args = [xp]
    for i in range(4):
        args += [prepared[f"w{i+1}"], prepared[f"b{i+1}"]]

    vmem_spec = pl.BlockSpec(memory_space=pltpu.MemorySpace.VMEM)

    out_p = pl.pallas_call(
        qnetwork_kernel,
        out_shape=jax.ShapeDtypeStruct((Bp, out_dim), jnp.float32),
        in_specs=[vmem_spec] * len(args),
        out_specs=vmem_spec,
        # Actual footprint ~6 MiB (bf16 weights); 32 MiB is safe on v5e/v6e
        # (128 MiB VMEM) and v7x (64 MiB VMEM).
        compiler_params=pltpu.CompilerParams(vmem_limit_bytes=32 << 20),
    )(*args)

    return out_p[:B]                                      # (B, outputs)


# ---------------------------------------------------------------------------
# Parameter init (f32, PyTorch-equivalent layout (in, out)) and one-time
# preparation (pad to TPU-friendly shapes + cast weights to bf16).
# ---------------------------------------------------------------------------
def init_params(key, h, w, outputs):
    """Mirrors nn.Linear's U(-1/sqrt(fan_in), 1/sqrt(fan_in)); weights as (in,out)."""
    dims = [h * w, 750, 1000, 1500, outputs]
    params = {}
    keys = jax.random.split(key, 8)
    for i in range(4):
        fan_in = dims[i]
        bound = 1.0 / jnp.sqrt(fan_in)
        params[f"w{i+1}"] = jax.random.uniform(
            keys[2 * i], (dims[i], dims[i + 1]), jnp.float32, -bound, bound)
        params[f"b{i+1}"] = jax.random.uniform(
            keys[2 * i + 1], (dims[i + 1],), jnp.float32, -bound, bound)
    return params


def prepare_params(params, h, w, outputs):
    """One-time: zero-pad hidden dims to multiples of 128 (batch-of-8 sublane
    padding is handled on x), cast weights to bf16, keep biases in f32.
    The last layer's output dim is intentionally NOT padded in HBM."""
    dims = [h * w, 750, 1000, 1500, outputs]
    pdims = [_round_up(d, 128) for d in dims[:4]] + [outputs]
    prepared = {}
    for i in range(4):
        w_f32 = params[f"w{i+1}"].astype(jnp.float32)
        b_f32 = params[f"b{i+1}"].astype(jnp.float32)
        prepared[f"w{i+1}"] = _pad_to(w_f32, (pdims[i], pdims[i + 1])).astype(jnp.bfloat16)
        prepared[f"b{i+1}"] = _pad_to(b_f32.reshape(1, -1), (1, pdims[i + 1]))
    return jax.tree_util.tree_map(jax.device_put, prepared)


# ---------------------------------------------------------------------------
# References.
# ---------------------------------------------------------------------------
def qnetwork_ref_f32(x, params):
    """Exact f32 reference of the PyTorch forward (unquantized weights)."""
    B = x.shape[0]
    h = x.reshape(B, -1).astype(jnp.float32)
    h = jnp.maximum(h @ params["w1"] + params["b1"], 0.0)
    h = jnp.tanh(h @ params["w2"] + params["b2"])
    h = jnp.maximum(h @ params["w3"] + params["b3"], 0.0)
    return h @ params["w4"] + params["b4"]


def qnetwork_ref_bf16(x, params):
    """Reference emulating the kernel's bf16-operand / f32-accumulate math."""
    def mm(a, wkey):
        ab = a.astype(jnp.bfloat16).astype(jnp.float32)
        wb = params[wkey].astype(jnp.bfloat16).astype(jnp.float32)
        return ab @ wb
    B = x.shape[0]
    h = x.reshape(B, -1).astype(jnp.float32)
    h = jnp.maximum(mm(h, "w1") + params["b1"], 0.0)
    h = jnp.tanh(mm(h, "w2") + params["b2"])
    h = jnp.maximum(mm(h, "w3") + params["b3"], 0.0)
    return mm(h, "w4") + params["b4"]


if __name__ == "__main__":
    B, H, W, OUTPUTS = 2, 16, 16, 4

    key = jax.random.PRNGKey(0)
    k_params, k_x = jax.random.split(key)
    params = init_params(k_params, H, W, OUTPUTS)
    prepared = prepare_params(params, H, W, OUTPUTS)   # once, outside jit
    x = jax.random.normal(k_x, (B, H, W), dtype=jnp.float32)

    out = qnetwork_forward(x, prepared)
    out = jax.block_until_ready(out)

    assert out.shape == (B, OUTPUTS), out.shape

    # Tight check against a reference that uses the same bf16-weight math.
    ref_q = qnetwork_ref_bf16(x, params)
    assert jnp.allclose(out, ref_q, atol=1e-3, rtol=1e-3), (
        float(jnp.max(jnp.abs(out - ref_q))))

    # Loose check against the exact f32 PyTorch-equivalent forward
    # (difference is just bf16 weight quantization noise).
    ref_f = qnetwork_ref_f32(x, params)
    assert jnp.allclose(out, ref_f, atol=5e-2, rtol=5e-2), (
        float(jnp.max(jnp.abs(out - ref_f))))

    print("KERNEL_OK")
</pallas_src>

<mosaic_0001>
module attributes {stable_mosaic.version = 11 : i64} {
  func.func @qnetwork_kernel(%arg0: memref<8x256xf32, #tpu.memory_space<vmem>>, %arg1: memref<256x768xbf16, #tpu.memory_space<vmem>>, %arg2: memref<1x768xf32, #tpu.memory_space<vmem>>, %arg3: memref<768x1024xbf16, #tpu.memory_space<vmem>>, %arg4: memref<1x1024xf32, #tpu.memory_space<vmem>>, %arg5: memref<1024x1536xbf16, #tpu.memory_space<vmem>>, %arg6: memref<1x1536xf32, #tpu.memory_space<vmem>>, %arg7: memref<1536x4xbf16, #tpu.memory_space<vmem>>, %arg8: memref<1x4xf32, #tpu.memory_space<vmem>>, %arg9: memref<8x4xf32, #tpu.memory_space<vmem>>) attributes {dimension_semantics = [], scalar_prefetch = 0 : i64, scratch_operands = 0 : i64, tpu.core_type = #tpu.core_type<tc>} {
    %c0 = arith.constant 0 : index
    %c0_0 = arith.constant 0 : index
    %0 = vector.load %arg0[%c0, %c0_0] : memref<8x256xf32, #tpu.memory_space<vmem>>, vector<8x256xf32>
    %1 = arith.truncf %0 : vector<8x256xf32> to vector<8x256xbf16>
    %c0_1 = arith.constant 0 : index
    %c0_2 = arith.constant 0 : index
    %2 = vector.load %arg1[%c0_1, %c0_2] : memref<256x768xbf16, #tpu.memory_space<vmem>>, vector<256x768xbf16>
    %cst = arith.constant dense<0.000000e+00> : vector<8x768xf32>
    %3 = tpu.matmul %1, %2, %cst {dimension_numbers = #tpu.dot_dimension_numbers<[1], [0], [0], [1], [0, 0, 1, 1], [], []>} : vector<8x256xbf16>, vector<256x768xbf16>, vector<8x768xf32> -> vector<8x768xf32>
    %c0_3 = arith.constant 0 : index
    %c0_4 = arith.constant 0 : index
    %4 = vector.load %arg2[%c0_3, %c0_4] : memref<1x768xf32, #tpu.memory_space<vmem>>, vector<1x768xf32>
    %5 = vector.broadcast %4 : vector<1x768xf32> to vector<8x768xf32>
    %6 = arith.addf %3, %5 : vector<8x768xf32>
    %cst_5 = arith.constant 0.000000e+00 : f32
    %7 = vector.broadcast %cst_5 : f32 to vector<8x768xf32>
    %8 = arith.maximumf %6, %7 : vector<8x768xf32>
    %9 = arith.truncf %8 : vector<8x768xf32> to vector<8x768xbf16>
    %c0_6 = arith.constant 0 : index
    %c0_7 = arith.constant 0 : index
    %10 = vector.load %arg3[%c0_6, %c0_7] : memref<768x1024xbf16, #tpu.memory_space<vmem>>, vector<768x1024xbf16>
    %cst_8 = arith.constant dense<0.000000e+00> : vector<8x1024xf32>
    %11 = tpu.matmul %9, %10, %cst_8 {dimension_numbers = #tpu.dot_dimension_numbers<[1], [0], [0], [1], [0, 0, 1, 1], [], []>} : vector<8x768xbf16>, vector<768x1024xbf16>, vector<8x1024xf32> -> vector<8x1024xf32>
    %c0_9 = arith.constant 0 : index
    %c0_10 = arith.constant 0 : index
    %12 = vector.load %arg4[%c0_9, %c0_10] : memref<1x1024xf32, #tpu.memory_space<vmem>>, vector<1x1024xf32>
    %13 = vector.broadcast %12 : vector<1x1024xf32> to vector<8x1024xf32>
    %14 = arith.addf %11, %13 : vector<8x1024xf32>
    %15 = math.tanh %14 : vector<8x1024xf32>
    %16 = arith.truncf %15 : vector<8x1024xf32> to vector<8x1024xbf16>
    %c0_11 = arith.constant 0 : index
    %c0_12 = arith.constant 0 : index
    %17 = vector.load %arg5[%c0_11, %c0_12] : memref<1024x1536xbf16, #tpu.memory_space<vmem>>, vector<1024x1536xbf16>
    %cst_13 = arith.constant dense<0.000000e+00> : vector<8x1536xf32>
    %18 = tpu.matmul %16, %17, %cst_13 {dimension_numbers = #tpu.dot_dimension_numbers<[1], [0], [0], [1], [0, 0, 1, 1], [], []>} : vector<8x1024xbf16>, vector<1024x1536xbf16>, vector<8x1536xf32> -> vector<8x1536xf32>
    %c0_14 = arith.constant 0 : index
    %c0_15 = arith.constant 0 : index
    %19 = vector.load %arg6[%c0_14, %c0_15] : memref<1x1536xf32, #tpu.memory_space<vmem>>, vector<1x1536xf32>
    %20 = vector.broadcast %19 : vector<1x1536xf32> to vector<8x1536xf32>
    %21 = arith.addf %18, %20 : vector<8x1536xf32>
    %cst_16 = arith.constant 0.000000e+00 : f32
    %22 = vector.broadcast %cst_16 : f32 to vector<8x1536xf32>
    %23 = arith.maximumf %21, %22 : vector<8x1536xf32>
    %24 = arith.truncf %23 : vector<8x1536xf32> to vector<8x1536xbf16>
    %c0_17 = arith.constant 0 : index
    %c0_18 = arith.constant 0 : index
    %25 = vector.load %arg7[%c0_17, %c0_18] : memref<1536x4xbf16, #tpu.memory_space<vmem>>, vector<1536x4xbf16>
    %cst_19 = arith.constant dense<0.000000e+00> : vector<8x4xf32>
    %26 = tpu.matmul %24, %25, %cst_19 {dimension_numbers = #tpu.dot_dimension_numbers<[1], [0], [0], [1], [0, 0, 1, 1], [], []>} : vector<8x1536xbf16>, vector<1536x4xbf16>, vector<8x4xf32> -> vector<8x4xf32>
    %c0_20 = arith.constant 0 : index
    %c0_21 = arith.constant 0 : index
    %27 = vector.load %arg8[%c0_20, %c0_21] : memref<1x4xf32, #tpu.memory_space<vmem>>, vector<1x4xf32>
    %28 = vector.broadcast %27 : vector<1x4xf32> to vector<8x4xf32>
    %29 = arith.addf %26, %28 : vector<8x4xf32>
    %c0_22 = arith.constant 0 : index
    %c0_23 = arith.constant 0 : index
    %30 = vector.load %arg9[%c0_22, %c0_23] : memref<8x4xf32, #tpu.memory_space<vmem>>, vector<8x4xf32>
    tpu.vector_store %arg9[%c0_22, %c0_23], %29 {strides = array<i32>} : memref<8x4xf32, #tpu.memory_space<vmem>>, vector<8x4xf32>,
    return
  }
}

</mosaic_0001>

<bundles_post_ra>
// kernel: qnetwork_forward.1
= control target key start
LH: loop header
LB: loop body
LE: loop exit
PB: predicated region body
PF: predicated region fallthrough
CT: control target
= control target key end

     0   :  { %14 = vsyncpa [#allocation3], 0  ;;  %s18535_s0 = inlined_call_operand.vmem [shape: f32[8,256], index: 0, kind: input, shape index: {}]   ;;  %s18536_s1 = inlined_call_operand.hbm [shape: bf16[256,768], index: 1, kind: input, shape index: {}]   ;;  %s18537_s2 = inlined_call_operand.hbm [shape: f32[1,768], index: 2, kind: input, shape index: {}]   ;;  %s18538_s3 = inlined_call_operand.hbm [shape: bf16[768,1024], index: 3, kind: input, shape index: {}]   ;;  %s18539_s4 = inlined_call_operand.hbm [shape: f32[1,1024], index: 4, kind: input, shape index: {}]   ;;  %s18540_s5 = inlined_call_operand.hbm [shape: bf16[1024,1536], index: 5, kind: input, shape index: {}]   ;;  %s18541_s6 = inlined_call_operand.hbm [shape: f32[1,1536], index: 6, kind: input, shape index: {}]   ;;  %s18542_s7 = inlined_call_operand.vmem [shape: bf16[1536,4], index: 7, kind: input, shape index: {}]   ;;  %s18543_s8 = inlined_call_operand.hbm [shape: f32[1,4], index: 8, kind: input, shape index: {}]   ;;  %s18544_s9 = inlined_call_operand.vmem [shape: f32[8,4], index: 9, kind: output, shape index: {}]  }
   0x1   :  { %15 = vsyncpa [#allocation5], 0 }
   0x2   :  { %16 = vsyncpa [#allocation8], 0  ;;  %s38_s11 = sshll.u32 %s18537_s2, 4  ;;  %s39_s11 = int_to_ptr.hbm [resolvable:$true] %s38_s11 }
   0x3   :  { %17 = vsyncpa [#allocation11], 0  ;;  %s17635_s12 = smov [#allocation4]   ;;  %s62_s16 = sshll.u32 %s18539_s4, 4  ;;  %s63_s16 = int_to_ptr.hbm [resolvable:$true] %s62_s16 }
   0x4   :  { %s40_s13 = sshll.u32 %s17635_s12, 4  ;;  %s17636_s17 = smov [#allocation7]   ;;  %s41_s13 = int_to_ptr.vmem [resolvable:$true] %s40_s13 }
   0x5   :  { %43 = dma.hbm_to_vmem [thread:$0]  %s39_s11, 96, %s41_s13, [#allocation5]  }
   0x6   :  { %s64_s18 = sshll.u32 %s17636_s17, 4  ;;  %s86_s21 = sshll.u32 %s18541_s6, 4  ;;  %s65_s18 = int_to_ptr.vmem [resolvable:$true] %s64_s18  ;;  %s87_s21 = int_to_ptr.hbm [resolvable:$true] %s86_s21 }
   0x7   :  { %67 = dma.hbm_to_vmem [thread:$0]  %s63_s16, 128, %s65_s18, [#allocation8]  }
   0x8   :  { %s24_s23 = sshll.u32 %s18536_s1, 4  ;;  %s17637_s24 = smov [#allocation10]   ;;  %s25_s23 = int_to_ptr.hbm [resolvable:$true] %s24_s23 }
   0x9   :  { %s88_s25 = sshll.u32 %s17637_s24, 4  ;;  %s17638_s4 = smov [#allocation2]   ;;  %s89_s25 = int_to_ptr.vmem [resolvable:$true] %s88_s25 }
   0xa   :  { %91 = dma.hbm_to_vmem [thread:$0]  %s87_s21, 192, %s89_s25, [#allocation11]  }
   0xb   :  { %s26_s26 = sshll.u32 %s17638_s4, 4  ;;  %s17639_s27 = smov 384   ;;  %s27_s26 = int_to_ptr.vmem [resolvable:$true] %s26_s26 }
   0xc   :  { %s17640_s28 = smov 24   ;;  %s48_s30 = sshll.u32 %s18538_s3, 4  ;;  %s49_s30 = int_to_ptr.hbm [resolvable:$true] %s48_s30 }
   0xd   :  { %32 = dma.hbm_to_vmem [thread:$0]  %s25_s23, 12288, %s27_s26, [#allocation3], %s17639_s27, %s17639_s27, %s17640_s28  }
   0xe   :  { %s17641_s10 = smov [#allocation6]   ;;  %s72_s13 = sshll.u32 %s18540_s5, 4  ;;  %s73_s13 = int_to_ptr.hbm [resolvable:$true] %s72_s13 }
   0xf   :  { %s50_s11 = sshll.u32 %s17641_s10, 4  ;;  %s17642_s14 = smov 512   ;;  %s51_s11 = int_to_ptr.vmem [resolvable:$true] %s50_s11 }
  0x10   :  { %s17643_s15 = smov 32   ;;  %s17644_s16 = smov [#allocation9]  }
  0x11   :  { %56 = dma.hbm_to_vmem [thread:$0]  %s49_s30, 49152, %s51_s11, [#allocation5], %s17642_s14, %s17642_s14, %s17643_s15  }
  0x12   :  { %s74_s17 = sshll.u32 %s17644_s16, 4  ;;  %s17645_s18 = smov 768   ;;  %s75_s17 = int_to_ptr.vmem [resolvable:$true] %s74_s17 }
  0x13   :  { %s17646_s19 = smov 48   ;;  %s99_s21 = sshll.u32 %s18543_s8, 4  ;;  %s100_s21 = int_to_ptr.hbm [resolvable:$true] %s99_s21 }
  0x14   :  { %80 = dma.hbm_to_vmem [thread:$0]  %s73_s13, 98304, %s75_s17, [#allocation8], %s17645_s18, %s17645_s18, %s17646_s19  }
  0x15   :  { %s17647_s2 = smov [#allocation12]  }
  0x16   :  { %s101_s22 = sshll.u32 %s17647_s2, 4  ;;  %s102_s22 = int_to_ptr.vmem [resolvable:$true] %s101_s22 }
  0x17   :  { %104 = dma.hbm_to_vmem [thread:$0]  %s100_s21, 16, %s102_s22, [#allocation11]  }
  0x18   :  { %17627 = dma.done.wait [#allocation3], 12288  }
  0x19   :  { %17628 = vsyncadd [#allocation3], 4294955008 }
  0x1a   :  { %17629 = dma.done.wait [#allocation5], 49248  }
  0x1b   :  { %17630 = vsyncadd [#allocation5], 4294918048 }
  0x1c   :  { %17631 = dma.done.wait [#allocation8], 98432  }
  0x1d   :  { %17632 = vsyncadd [#allocation8], 4294868864 }
  0x1e   :  { %17633 = dma.done.wait [#allocation11], 208  }
  0x1f   :  { %17634 = vsyncadd [#allocation11], 4294967088  ;;  %v10873_v0 = vld [vmem:[#allocation2 + $0x150] sm:$0xf]  ;;  %v16124_v1 = vld [vmem:[#allocation2 + $0x164] sm:$0xf0] }
  0x20   :  { %v11065_v2 = vld [vmem:[#allocation2 + $0x2d0] sm:$0xf]  ;;  %v10874_v3 = vor.u32 %v16124_v1, %v10873_v0  ;;  %v16172_v4 = vld [vmem:[#allocation2 + $0x2e4] sm:$0xf0]  ;;  %v16121_v5 = vld [vmem:[#allocation2 + $0x154] sm:$0xf] }
  0x21   :  { %v10875_v6 = vld [vmem:[#allocation2 + $0x168] sm:$0xf0]  ;;  %v11066_v7 = vor.u32 %v16172_v4, %v11065_v2  ;;  %v16169_v9 = vld [vmem:[#allocation2 + $0x2d4] sm:$0xf]  ;;  %v10849_v11 = vld [vmem:[#allocation2 + $0x120] sm:$0xf] }
  0x22   :  { %v10878_v8 = vor.u32 %v16121_v5, %v10875_v6  ;;  %v11067_v10 = vld [vmem:[#allocation2 + $0x2e8] sm:$0xf0]  ;;  %727 = vmatpush.bf16.msra.mxu0 %v10874_v3  ;;  %v16118_v13 = vld [vmem:[#allocation2 + $0x134] sm:$0xf0]  ;;  %v11041_v14 = vld [vmem:[#allocation2 + $0x2a0] sm:$0xf] }
  0x23   :  { %v11070_v12 = vor.u32 %v16169_v9, %v11067_v10  ;;  %v16166_v15 = vld [vmem:[#allocation2 + $0x2b4] sm:$0xf0]  ;;  %740 = vmatpush.bf16.msra.mxu1 %v11066_v7  ;;  %v10850_v16 = vor.u32 %v16118_v13, %v10849_v11  ;;  %v16115_v18 = vld [vmem:[#allocation2 + $0x124] sm:$0xf]  ;;  %v10851_v19 = vld [vmem:[#allocation2 + $0x138] sm:$0xf0] }
  0x24   :  { %753 = vmatpush.bf16.msra.mxu2 %v10878_v8  ;;  %v11042_v17 = vor.u32 %v16166_v15, %v11041_v14  ;;  %v16163_v20 = vld [vmem:[#allocation2 + $0x2a4] sm:$0xf]  ;;  %v10854_v21 = vor.u32 %v16115_v18, %v10851_v19  ;;  %v11043_v22 = vld [vmem:[#allocation2 + $0x2b8] sm:$0xf0]  ;;  %v10825_v23 = vld [vmem:[#allocation2 + $0xf0] sm:$0xf] }
  0x25   :  { %766 = vmatpush.bf16.msra.mxu3 %v11070_v12  ;;  %v16112_v24 = vld [vmem:[#allocation2 + $0x104] sm:$0xf0]  ;;  %v11046_v25 = vor.u32 %v16163_v20, %v11043_v22  ;;  %v11017_v26 = vld [vmem:[#allocation2 + $0x270] sm:$0xf]  ;;  %v16109_v28 = vld [vmem:[#allocation2 + $0xf4] sm:$0xf] }
  0x26   :  { %v16160_v27 = vld [vmem:[#allocation2 + $0x284] sm:$0xf0]  ;;  %728 = vmatpush.bf16.msra.mxu0 %v10850_v16  ;;  %v10826_v29 = vor.u32 %v16112_v24, %v10825_v23  ;;  %v10827_v30 = vld [vmem:[#allocation2 + $0x108] sm:$0xf0]  ;;  %v16157_v31 = vld [vmem:[#allocation2 + $0x274] sm:$0xf] }
  0x27   :  { %v11019_v32 = vld [vmem:[#allocation2 + $0x288] sm:$0xf0]  ;;  %741 = vmatpush.bf16.msra.mxu1 %v11042_v17  ;;  %v11018_v33 = vor.u32 %v16160_v27, %v11017_v26  ;;  %v10830_v34 = vor.u32 %v16109_v28, %v10827_v30  ;;  %v10801_v35 = vld [vmem:[#allocation2 + $0xc0] sm:$0xf]  ;;  %v16106_v36 = vld [vmem:[#allocation2 + $0xd4] sm:$0xf0] }
  0x28   :  { %754 = vmatpush.bf16.msra.mxu2 %v10854_v21  ;;  %v10993_v37 = vld [vmem:[#allocation2 + $0x240] sm:$0xf]  ;;  %v11022_v38 = vor.u32 %v16157_v31, %v11019_v32  ;;  %v16154_v39 = vld [vmem:[#allocation2 + $0x254] sm:$0xf0]  ;;  %v16103_v40 = vld [vmem:[#allocation2 + $0xc4] sm:$0xf]  ;;  %v10802_v44 = vor.u32 %v16106_v36, %v10801_v35 }
  0x29   :  { %767 = vmatpush.bf16.msra.mxu3 %v11046_v25  ;;  %v10803_v41 = vld [vmem:[#allocation2 + $0xd8] sm:$0xf0]  ;;  %v16151_v42 = vld [vmem:[#allocation2 + $0x244] sm:$0xf]  ;;  %v10994_v45 = vor.u32 %v16154_v39, %v10993_v37  ;;  %v10777_v47 = vld [vmem:[#allocation2 + $0x90] sm:$0xf] }
  0x2a   :  { %v10995_v43 = vld [vmem:[#allocation2 + $0x258] sm:$0xf0]  ;;  %729 = vmatpush.bf16.msra.mxu0 %v10826_v29  ;;  %v10806_v46 = vor.u32 %v16103_v40, %v10803_v41  ;;  %v16100_v48 = vld [vmem:[#allocation2 + $0xa4] sm:$0xf0]  ;;  %v10969_v49 = vld [vmem:[#allocation2 + $0x210] sm:$0xf] }
  0x2b   :  { %742 = vmatpush.bf16.msra.mxu1 %v11018_v33  ;;  %v10998_v50 = vor.u32 %v16151_v42, %v10995_v43  ;;  %v16148_v51 = vld [vmem:[#allocation2 + $0x224] sm:$0xf0]  ;;  %v16097_v52 = vld [vmem:[#allocation2 + $0x94] sm:$0xf]  ;;  %v10779_v53 = vld [vmem:[#allocation2 + $0xa8] sm:$0xf0]  ;;  %v10778_v56 = vor.u32 %v16100_v48, %v10777_v47 }
  0x2c   :  { %755 = vmatpush.bf16.msra.mxu2 %v10830_v34  ;;  %v16145_v54 = vld [vmem:[#allocation2 + $0x214] sm:$0xf]  ;;  %v10971_v55 = vld [vmem:[#allocation2 + $0x228] sm:$0xf0]  ;;  %v10970_v57 = vor.u32 %v16148_v51, %v10969_v49  ;;  %v10782_v58 = vor.u32 %v16097_v52, %v10779_v53  ;;  %v10753_v59 = vld [vmem:[#allocation2 + $0x60] sm:$0xf] }
  0x2d   :  { %768 = vmatpush.bf16.msra.mxu3 %v11022_v38  ;;  %v16094_v60 = vld [vmem:[#allocation2 + $0x74] sm:$0xf0]  ;;  %v10945_v61 = vld [vmem:[#allocation2 + $0x1e0] sm:$0xf]  ;;  %v10974_v62 = vor.u32 %v16145_v54, %v10971_v55  ;;  %v16091_v0 = vld [vmem:[#allocation2 + $0x64] sm:$0xf] }
  0x2e   :  { %730 = vmatpush.bf16.msra.mxu0 %v10802_v44  ;;  %v16142_v63 = vld [vmem:[#allocation2 + $0x1f4] sm:$0xf0]  ;;  %v10755_v1 = vld [vmem:[#allocation2 + $0x78] sm:$0xf0]  ;;  %v16139_v2 = vld [vmem:[#allocation2 + $0x1e4] sm:$0xf]  ;;  %v10754_v4 = vor.u32 %v16094_v60, %v10753_v59 }
  0x2f   :  { %743 = vmatpush.bf16.msra.mxu1 %v10994_v45  ;;  %v10947_v3 = vld [vmem:[#allocation2 + $0x1f8] sm:$0xf0]  ;;  %v10946_v5 = vor.u32 %v16142_v63, %v10945_v61  ;;  %v10758_v6 = vor.u32 %v16091_v0, %v10755_v1  ;;  %v10729_v7 = vld [vmem:[#allocation2 + $0x30] sm:$0xf]  ;;  %v16088_v8 = vld [vmem:[#allocation2 + $0x44] sm:$0xf0] }
  0x30   :  { %756 = vmatpush.bf16.msra.mxu2 %v10806_v46  ;;  %v10921_v9 = vld [vmem:[#allocation2 + $0x1b0] sm:$0xf]  ;;  %v10950_v10 = vor.u32 %v16139_v2, %v10947_v3  ;;  %v16136_v11 = vld [vmem:[#allocation2 + $0x1c4] sm:$0xf0]  ;;  %v16085_v12 = vld [vmem:[#allocation2 + $0x34] sm:$0xf]  ;;  %v10730_v16 = vor.u32 %v16088_v8, %v10729_v7 }
  0x31   :  { %769 = vmatpush.bf16.msra.mxu3 %v10998_v50  ;;  %v10731_v13 = vld [vmem:[#allocation2 + $0x48] sm:$0xf0]  ;;  %v16133_v14 = vld [vmem:[#allocation2 + $0x1b4] sm:$0xf]  ;;  %v10705_v17 = vld [vmem:[#allocation2] sm:$0xf]  ;;  %v10922_v19 = vor.u32 %v16136_v11, %v10921_v9 }
  0x32   :  { %731 = vmatpush.bf16.msra.mxu0 %v10778_v56  ;;  %v10923_v15 = vld [vmem:[#allocation2 + $0x1c8] sm:$0xf0]  ;;  %v16082_v18 = vld [vmem:[#allocation2 + $0x14] sm:$0xf0]  ;;  %v10734_v20 = vor.u32 %v16085_v12, %v10731_v13  ;;  %v10897_v21 = vld [vmem:[#allocation2 + $0x180] sm:$0xf] }
  0x33   :  { %744 = vmatpush.bf16.msra.mxu1 %v10970_v57  ;;  %v16130_v22 = vld [vmem:[#allocation2 + $0x194] sm:$0xf0]  ;;  %v16079_v23 = vld [vmem:[#allocation2 + $0x4] sm:$0xf]  ;;  %v10926_v24 = vor.u32 %v16133_v14, %v10923_v15  ;;  %v10707_v25 = vld [vmem:[#allocation2 + $0x18] sm:$0xf0]  ;;  %v10706_v31 = vor.u32 %v16082_v18, %v10705_v17 }
  0x34   :  { %757 = vmatpush.bf16.msra.mxu2 %v10782_v58  ;;  %v16127_v26 = vld [vmem:[#allocation2 + $0x184] sm:$0xf]  ;;  %v10899_v27 = vld [vmem:[#allocation2 + $0x198] sm:$0xf0]  ;;  %v10881_v28 = vld [vmem:[#allocation2 + $0x158] sm:$0xf]  ;;  %v10898_v35 = vor.u32 %v16130_v22, %v10897_v21  ;;  %v10710_v36 = vor.u32 %v16079_v23, %v10707_v25 }
  0x35   :  { %770 = vmatpush.bf16.msra.mxu3 %v10974_v62  ;;  %v16125_v29 = vld [vmem:[#allocation2 + $0x16c] sm:$0xf0]  ;;  %v11073_v30 = vld [vmem:[#allocation2 + $0x2d8] sm:$0xf]  ;;  %v16122_v33 = vld [vmem:[#allocation2 + $0x15c] sm:$0xf]  ;;  %v10902_v40 = vor.u32 %v16127_v26, %v10899_v27 }
  0x36   :  { %732 = vmatpush.bf16.msra.mxu0 %v10754_v4  ;;  %v16173_v32 = vld [vmem:[#allocation2 + $0x2ec] sm:$0xf0]  ;;  %v10883_v34 = vld [vmem:[#allocation2 + $0x170] sm:$0xf0]  ;;  %v16170_v37 = vld [vmem:[#allocation2 + $0x2dc] sm:$0xf]  ;;  %v10882_v41 = vor.u32 %v16125_v29, %v10881_v28 }
  0x37   :  { %745 = vmatpush.bf16.msra.mxu1 %v10946_v5  ;;  %v11075_v38 = vld [vmem:[#allocation2 + $0x2f0] sm:$0xf0]  ;;  %v133_v39 = vld [vmem:[%s18535_s0] sm:$0xff]  ;;  %v134_v42 = vld [vmem:[%s18535_s0 + $0x8] sm:$0xff]  ;;  %v11074_v43 = vor.u32 %v16173_v32, %v11073_v30  ;;  %v10886_v44 = vor.u32 %v16122_v33, %v10883_v34  ;;  %vm10693_vm0 = vcmask 31744  }
  0x38   :  { %758 = vmatpush.bf16.msra.mxu2 %v10758_v6  ;;  %v10857_v45 = vld [vmem:[#allocation2 + $0x128] sm:$0xf]  ;;  %v16119_v46 = vld [vmem:[#allocation2 + $0x13c] sm:$0xf0]  ;;  %v11078_v48 = vor.u32 %v16170_v37, %v11075_v38  ;;  %v16116_v50 = vld [vmem:[#allocation2 + $0x12c] sm:$0xf]  ;;  %v17725_v52 = vpack.c.bf16 %v133_v39, %v133_v39  ;;  %v17727_v55 = vpack.c.bf16 %v134_v42, %v134_v42 }
  0x39   :  { %771 = vmatpush.bf16.msra.mxu3 %v10950_v10  ;;  %v11049_v47 = vld [vmem:[#allocation2 + $0x2a8] sm:$0xf]  ;;  %v16167_v49 = vld [vmem:[#allocation2 + $0x2bc] sm:$0xf0]  ;;  %v10859_v51 = vld [vmem:[#allocation2 + $0x140] sm:$0xf0]  ;;  %v10858_v56 = vor.u32 %v16119_v46, %v10857_v45 }
  0x3a   :  { %733 = vmatpush.bf16.msra.mxu0 %v10730_v16  ;;  %v16164_v53 = vld [vmem:[#allocation2 + $0x2ac] sm:$0xf]  ;;  %v11051_v54 = vld [vmem:[#allocation2 + $0x2c0] sm:$0xf0]  ;;  %v11050_v57 = vor.u32 %v16167_v49, %v11049_v47  ;;  %v10862_v58 = vor.u32 %v16116_v50, %v10859_v51  ;;  %v10833_v59 = vld [vmem:[#allocation2 + $0xf8] sm:$0xf] }
  0x3b   :  { %746 = vmatpush.bf16.msra.mxu1 %v10922_v19  ;;  %v16113_v60 = vld [vmem:[#allocation2 + $0x10c] sm:$0xf0]  ;;  %v11025_v61 = vld [vmem:[#allocation2 + $0x278] sm:$0xf]  ;;  %v11054_v62 = vor.u32 %v16164_v53, %v11051_v54  ;;  %v16110_v0 = vld [vmem:[#allocation2 + $0xfc] sm:$0xf] }
  0x3c   :  { %759 = vmatpush.bf16.msra.mxu2 %v10734_v20  ;;  %v16161_v63 = vld [vmem:[#allocation2 + $0x28c] sm:$0xf0]  ;;  %v10835_v1 = vld [vmem:[#allocation2 + $0x110] sm:$0xf0]  ;;  %v16158_v2 = vld [vmem:[#allocation2 + $0x27c] sm:$0xf]  ;;  %v10834_v4 = vor.u32 %v16113_v60, %v10833_v59 }
  0x3d   :  { %772 = vmatpush.bf16.msra.mxu3 %v10926_v24  ;;  %v11027_v3 = vld [vmem:[#allocation2 + $0x290] sm:$0xf0]  ;;  %v11026_v5 = vor.u32 %v16161_v63, %v11025_v61  ;;  %v10838_v6 = vor.u32 %v16110_v0, %v10835_v1  ;;  %v10809_v7 = vld [vmem:[#allocation2 + $0xc8] sm:$0xf]  ;;  %v16107_v8 = vld [vmem:[#allocation2 + $0xdc] sm:$0xf0] }
  0x3e   :  { %734 = vmatpush.bf16.msra.mxu0 %v10706_v31  ;;  %v11001_v9 = vld [vmem:[#allocation2 + $0x248] sm:$0xf]  ;;  %v11030_v10 = vor.u32 %v16158_v2, %v11027_v3  ;;  %v16155_v11 = vld [vmem:[#allocation2 + $0x25c] sm:$0xf0]  ;;  %v16104_v12 = vld [vmem:[#allocation2 + $0xcc] sm:$0xf]  ;;  %v10810_v16 = vor.u32 %v16107_v8, %v10809_v7 }
  0x3f   :  { %747 = vmatpush.bf16.msra.mxu1 %v10898_v35  ;;  %v10811_v13 = vld [vmem:[#allocation2 + $0xe0] sm:$0xf0]  ;;  %v16152_v14 = vld [vmem:[#allocation2 + $0x24c] sm:$0xf]  ;;  %v11002_v17 = vor.u32 %v16155_v11, %v11001_v9  ;;  %v10785_v19 = vld [vmem:[#allocation2 + $0x98] sm:$0xf] }
  0x40   :  { %760 = vmatpush.bf16.msra.mxu2 %v10710_v36  ;;  %v11003_v15 = vld [vmem:[#allocation2 + $0x260] sm:$0xf0]  ;;  %v10814_v18 = vor.u32 %v16104_v12, %v10811_v13  ;;  %v16101_v20 = vld [vmem:[#allocation2 + $0xac] sm:$0xf0]  ;;  %v10977_v21 = vld [vmem:[#allocation2 + $0x218] sm:$0xf] }
  0x41   :  { %773 = vmatpush.bf16.msra.mxu3 %v10902_v40  ;;  %735 = vmatmul.bf16.vlgmr.msra.gmra.mxu0 %v17725_v52  ;;  %v11006_v22 = vor.u32 %v16152_v14, %v11003_v15  ;;  %v16149_v23 = vld [vmem:[#allocation2 + $0x22c] sm:$0xf0]  ;;  %v16098_v24 = vld [vmem:[#allocation2 + $0x9c] sm:$0xf]  ;;  %v10787_v25 = vld [vmem:[#allocation2 + $0xb0] sm:$0xf0]  ;;  %v10786_v28 = vor.u32 %v16101_v20, %v10785_v19 }
  0x42   :  { %779 = vmatpush.bf16.msrb.mxu0 %v10882_v41  ;;  %748 = vmatmul.bf16.vlgmr.msra.gmra.mxu1 %v17727_v55  ;;  %v16146_v26 = vld [vmem:[#allocation2 + $0x21c] sm:$0xf]  ;;  %v10979_v27 = vld [vmem:[#allocation2 + $0x230] sm:$0xf0]  ;;  %v10978_v29 = vor.u32 %v16149_v23, %v10977_v21  ;;  %v10790_v30 = vor.u32 %v16098_v24, %v10787_v25  ;;  %v10761_v31 = vld [vmem:[#allocation2 + $0x68] sm:$0xf] }
  0x43   :  { %792 = vmatpush.bf16.msrb.mxu1 %v11074_v43  ;;  %761 = vmatmul.bf16.vlgmr.msra.gmra.mxu2 %v17725_v52  ;;  %v16095_v32 = vld [vmem:[#allocation2 + $0x7c] sm:$0xf0]  ;;  %v10953_v33 = vld [vmem:[#allocation2 + $0x1e8] sm:$0xf]  ;;  %v10982_v34 = vor.u32 %v16146_v26, %v10979_v27  ;;  %v16092_v36 = vld [vmem:[#allocation2 + $0x6c] sm:$0xf] }
  0x44   :  { %805 = vmatpush.bf16.msrb.mxu2 %v10886_v44  ;;  %774 = vmatmul.bf16.vlgmr.msra.gmra.mxu3 %v17727_v55  ;;  %v16143_v35 = vld [vmem:[#allocation2 + $0x1fc] sm:$0xf0]  ;;  %v10763_v37 = vld [vmem:[#allocation2 + $0x80] sm:$0xf0]  ;;  %v16140_v38 = vld [vmem:[#allocation2 + $0x1ec] sm:$0xf]  ;;  %v10762_v40 = vor.u32 %v16095_v32, %v10761_v31 }
  0x45   :  { %818 = vmatpush.bf16.msrb.mxu3 %v11078_v48  ;;  %v10955_v39 = vld [vmem:[#allocation2 + $0x200] sm:$0xf0]  ;;  %v10954_v41 = vor.u32 %v16143_v35, %v10953_v33  ;;  %v10766_v42 = vor.u32 %v16092_v36, %v10763_v37  ;;  %v10737_v43 = vld [vmem:[#allocation2 + $0x38] sm:$0xf]  ;;  %v16089_v44 = vld [vmem:[#allocation2 + $0x4c] sm:$0xf0] }
  0x46   :  { %780 = vmatpush.bf16.msrb.mxu0 %v10858_v56  ;;  %v10929_v45 = vld [vmem:[#allocation2 + $0x1b8] sm:$0xf]  ;;  %v10958_v46 = vor.u32 %v16140_v38, %v10955_v39  ;;  %v16137_v47 = vld [vmem:[#allocation2 + $0x1cc] sm:$0xf0]  ;;  %v16086_v48 = vld [vmem:[#allocation2 + $0x3c] sm:$0xf]  ;;  %v10738_v53 = vor.u32 %v16089_v44, %v10737_v43 }
  0x47   :  { %793 = vmatpush.bf16.msrb.mxu1 %v11050_v57  ;;  %v10739_v49 = vld [vmem:[#allocation2 + $0x50] sm:$0xf0]  ;;  %v16134_v50 = vld [vmem:[#allocation2 + $0x1bc] sm:$0xf]  ;;  %v10713_v54 = vld [vmem:[#allocation2 + $0x8] sm:$0xf]  ;;  %v10930_v57 = vor.u32 %v16137_v47, %v10929_v45 }
  0x48   :  { %806 = vmatpush.bf16.msrb.mxu2 %v10862_v58  ;;  %v10931_v51 = vld [vmem:[#allocation2 + $0x1d0] sm:$0xf0]  ;;  %v16083_v56 = vld [vmem:[#allocation2 + $0x1c] sm:$0xf0]  ;;  %v10742_v58 = vor.u32 %v16086_v48, %v10739_v49  ;;  %v10905_v59 = vld [vmem:[#allocation2 + $0x188] sm:$0xf] }
  0x49   :  { %819 = vmatpush.bf16.msrb.mxu3 %v11054_v62  ;;  %v16131_v60 = vld [vmem:[#allocation2 + $0x19c] sm:$0xf0]  ;;  %v16080_v61 = vld [vmem:[#allocation2 + $0xc] sm:$0xf]  ;;  %v10934_v62 = vor.u32 %v16134_v50, %v10931_v51  ;;  %v10715_v63 = vld [vmem:[#allocation2 + $0x20] sm:$0xf0] }
  0x4a   :  { %781 = vmatpush.bf16.msrb.mxu0 %v10834_v4  ;;  %v16128_v0 = vld [vmem:[#allocation2 + $0x18c] sm:$0xf]  ;;  %v10907_v1 = vld [vmem:[#allocation2 + $0x1a0] sm:$0xf0]  ;;  %v10889_v2 = vld [vmem:[#allocation2 + $0x160] sm:$0xf]  ;;  %v10906_v9 = vor.u32 %v16131_v60, %v10905_v59 }
  0x4b   :  { %794 = vmatpush.bf16.msrb.mxu1 %v11026_v5  ;;  %v16126_v3 = vld [vmem:[#allocation2 + $0x174] sm:$0xf0]  ;;  %v11081_v4 = vld [vmem:[#allocation2 + $0x2e0] sm:$0xf]  ;;  %v10714_v5 = vor.u32 %v16083_v56, %v10713_v54  ;;  %v16123_v7 = vld [vmem:[#allocation2 + $0x164] sm:$0xf]  ;;  %v10910_v13 = vor.u32 %v16128_v0, %v10907_v1 }
  0x4c   :  { %807 = vmatpush.bf16.msrb.mxu2 %v10838_v6  ;;  %v16174_v6 = vld [vmem:[#allocation2 + $0x2f4] sm:$0xf0]  ;;  %v10891_v8 = vld [vmem:[#allocation2 + $0x178] sm:$0xf0]  ;;  %v16171_v11 = vld [vmem:[#allocation2 + $0x2e4] sm:$0xf]  ;;  %v10890_v14 = vor.u32 %v16126_v3, %v10889_v2 }
  0x4d   :  { %820 = vmatpush.bf16.msrb.mxu3 %v11030_v10  ;;  %v10718_v10 = vor.u32 %v16080_v61, %v10715_v63  ;;  %v11083_v12 = vld [vmem:[#allocation2 + $0x2f8] sm:$0xf0]  ;;  %v11082_v15 = vor.u32 %v16174_v6, %v11081_v4  ;;  %v11057_v19 = vld [vmem:[#allocation2 + $0x2b0] sm:$0xf]  ;;  %v16168_v21 = vld [vmem:[#allocation2 + $0x2c4] sm:$0xf0] }
  0x4e   :  { %782 = vmatpush.bf16.msrb.mxu0 %v10810_v16  ;;  %v10894_v16 = vor.u32 %v16123_v7, %v10891_v8  ;;  %v11086_v20 = vor.u32 %v16171_v11, %v11083_v12  ;;  %v10867_v23 = vld [vmem:[#allocation2 + $0x148] sm:$0xf0]  ;;  %v16165_v24 = vld [vmem:[#allocation2 + $0x2b4] sm:$0xf]  ;;  %v11058_v27 = vor.u32 %v16168_v21, %v11057_v19  ;;  %v11033_v31 = vld [vmem:[#allocation2 + $0x280] sm:$0xf] }
  0x4f   :  { %795 = vmatpush.bf16.msrb.mxu1 %v11002_v17  ;;  %v10865_v17 = vld [vmem:[#allocation2 + $0x130] sm:$0xf]  ;;  %v11059_v25 = vld [vmem:[#allocation2 + $0x2c8] sm:$0xf0]  ;;  %v16162_v33 = vld [vmem:[#allocation2 + $0x294] sm:$0xf0] }
  0x50   :  { %808 = vmatpush.bf16.msrb.mxu2 %v10814_v18  ;;  %v16120_v18 = vld [vmem:[#allocation2 + $0x144] sm:$0xf0]  ;;  %v11062_v32 = vor.u32 %v16165_v24, %v11059_v25  ;;  %v10843_v35 = vld [vmem:[#allocation2 + $0x118] sm:$0xf0]  ;;  %v16159_v36 = vld [vmem:[#allocation2 + $0x284] sm:$0xf]  ;;  %v11034_v39 = vor.u32 %v16162_v33, %v11033_v31 }
  0x51   :  { %821 = vmatpush.bf16.msrb.mxu3 %v11006_v22  ;;  %v16117_v22 = vld [vmem:[#allocation2 + $0x134] sm:$0xf]  ;;  %v10866_v26 = vor.u32 %v16120_v18, %v10865_v17  ;;  %v11035_v37 = vld [vmem:[#allocation2 + $0x298] sm:$0xf0]  ;;  %v11009_v43 = vld [vmem:[#allocation2 + $0x250] sm:$0xf] }
  0x52   :  { %783 = vmatpush.bf16.msrb.mxu0 %v10786_v28  ;;  %v10870_v28 = vor.u32 %v16117_v22, %v10867_v23  ;;  %v11038_v44 = vor.u32 %v16159_v36, %v11035_v37  ;;  %v16156_v45 = vld [vmem:[#allocation2 + $0x264] sm:$0xf0]  ;;  %v10819_v47 = vld [vmem:[#allocation2 + $0xe8] sm:$0xf0]  ;;  %v16153_v48 = vld [vmem:[#allocation2 + $0x254] sm:$0xf] }
  0x53   :  { %796 = vmatpush.bf16.msrb.mxu1 %v10978_v29  ;;  %v10841_v29 = vld [vmem:[#allocation2 + $0x100] sm:$0xf]  ;;  %v11011_v49 = vld [vmem:[#allocation2 + $0x268] sm:$0xf0]  ;;  %v16102_v56 = vld [vmem:[#allocation2 + $0xb4] sm:$0xf0] }
  0x54   :  { %809 = vmatpush.bf16.msrb.mxu2 %v10790_v30  ;;  %v16114_v30 = vld [vmem:[#allocation2 + $0x114] sm:$0xf0]  ;;  %v10793_v51 = vld [vmem:[#allocation2 + $0xa0] sm:$0xf]  ;;  %v16099_v60 = vld [vmem:[#allocation2 + $0xa4] sm:$0xf] }
  0x55   :  { %822 = vmatpush.bf16.msrb.mxu3 %v10982_v34  ;;  %v16111_v34 = vld [vmem:[#allocation2 + $0x104] sm:$0xf]  ;;  %v10842_v38 = vor.u32 %v16114_v30, %v10841_v29  ;;  %v16150_v59 = vld [vmem:[#allocation2 + $0x234] sm:$0xf0]  ;;  %v10795_v61 = vld [vmem:[#allocation2 + $0xb8] sm:$0xf0]  ;;  %v10794_v0 = vor.u32 %v16102_v56, %v10793_v51 }
  0x56   :  { %784 = vmatpush.bf16.msrb.mxu0 %v10762_v40  ;;  %v10846_v40 = vor.u32 %v16111_v34, %v10843_v35  ;;  %v10987_v63 = vld [vmem:[#allocation2 + $0x238] sm:$0xf0]  ;;  %v10798_v2 = vor.u32 %v16099_v60, %v10795_v61  ;;  %v10769_v3 = vld [vmem:[#allocation2 + $0x70] sm:$0xf]  ;;  %v16096_v4 = vld [vmem:[#allocation2 + $0x84] sm:$0xf0] }
  0x57   :  { %797 = vmatpush.bf16.msrb.mxu1 %v10954_v41  ;;  %v10817_v41 = vld [vmem:[#allocation2 + $0xd0] sm:$0xf]  ;;  %v16144_v7 = vld [vmem:[#allocation2 + $0x204] sm:$0xf0]  ;;  %v16093_v8 = vld [vmem:[#allocation2 + $0x74] sm:$0xf]  ;;  %v10770_v12 = vor.u32 %v16096_v4, %v10769_v3 }
  0x58   :  { %810 = vmatpush.bf16.msrb.mxu2 %v10766_v42  ;;  %v16108_v42 = vld [vmem:[#allocation2 + $0xe4] sm:$0xf0]  ;;  %v10963_v11 = vld [vmem:[#allocation2 + $0x208] sm:$0xf0]  ;;  %v10937_v17 = vld [vmem:[#allocation2 + $0x1c0] sm:$0xf] }
  0x59   :  { %823 = vmatpush.bf16.msrb.mxu3 %v10958_v46  ;;  %v16105_v46 = vld [vmem:[#allocation2 + $0xd4] sm:$0xf]  ;;  %v10818_v50 = vor.u32 %v16108_v42, %v10817_v41  ;;  %v16138_v19 = vld [vmem:[#allocation2 + $0x1d4] sm:$0xf0]  ;;  %v10747_v21 = vld [vmem:[#allocation2 + $0x58] sm:$0xf0] }
  0x5a   :  { %785 = vmatpush.bf16.msrb.mxu0 %v10738_v53  ;;  %v11010_v53 = vor.u32 %v16156_v45, %v11009_v43  ;;  %v10822_v54 = vor.u32 %v16105_v46, %v10819_v47  ;;  %v16135_v22 = vld [vmem:[#allocation2 + $0x1c4] sm:$0xf]  ;;  %v10939_v23 = vld [vmem:[#allocation2 + $0x1d8] sm:$0xf0]  ;;  %v10721_v25 = vld [vmem:[#allocation2 + $0x10] sm:$0xf] }
  0x5b   :  { %798 = vmatpush.bf16.msrb.mxu1 %v10930_v57  ;;  %v10985_v57 = vld [vmem:[#allocation2 + $0x220] sm:$0xf]  ;;  %v10913_v29 = vld [vmem:[#allocation2 + $0x190] sm:$0xf]  ;;  %v16132_v30 = vld [vmem:[#allocation2 + $0x1a4] sm:$0xf0]  ;;  %v10942_v31 = vor.u32 %v16135_v22, %v10939_v23 }
  0x5c   :  { %811 = vmatpush.bf16.msrb.mxu2 %v10742_v58  ;;  %v11014_v58 = vor.u32 %v16153_v48, %v11011_v49  ;;  %v10986_v1 = vor.u32 %v16150_v59, %v10985_v57  ;;  %v10723_v33 = vld [vmem:[#allocation2 + $0x28] sm:$0xf0]  ;;  %v16129_v34 = vld [vmem:[#allocation2 + $0x194] sm:$0xf]  ;;  %v11313_v36 = vld [vmem:[#allocation6 + $0x1c0] sm:$0xf]  ;;  %v10914_v41 = vor.u32 %v16132_v30, %v10913_v29 }
  0x5d   :  { %824 = vmatpush.bf16.msrb.mxu3 %v10934_v62  ;;  %v16147_v62 = vld [vmem:[#allocation2 + $0x224] sm:$0xf]  ;;  %v10915_v35 = vld [vmem:[#allocation2 + $0x1a8] sm:$0xf0] }
  0x5e   :  { %786 = vmatpush.bf16.msrb.mxu0 %v10714_v5  ;;  %v10961_v5 = vld [vmem:[#allocation2 + $0x1f0] sm:$0xf]  ;;  %v10990_v6 = vor.u32 %v16147_v62, %v10987_v63  ;;  %v16235_v37 = vld [vmem:[#allocation6 + $0x1dc] sm:$0xf0]  ;;  %v10918_v43 = vor.u32 %v16129_v34, %v10915_v35 }
  0x5f   :  { %799 = vmatpush.bf16.msrb.mxu1 %v10906_v9  ;;  %v10771_v9 = vld [vmem:[#allocation2 + $0x88] sm:$0xf0]  ;;  %v11281_v45 = vld [vmem:[#allocation6 + $0x180] sm:$0xf] }
  0x60   :  { %812 = vmatpush.bf16.msrb.mxu2 %v10718_v10  ;;  %v16141_v10 = vld [vmem:[#allocation2 + $0x1f4] sm:$0xf]  ;;  %v11569_v46 = vld [vmem:[#allocation6 + $0x3c0] sm:$0xf] }
  0x61   :  { %825 = vmatpush.bf16.msrb.mxu3 %v10910_v13  ;;  %787 = vmatmul.bf16.vlgmr.msrb.gmra.mxu0 %v17725_v52  ;;  %v10962_v13 = vor.u32 %v16144_v7, %v10961_v5  ;;  %v10966_v18 = vor.u32 %v16141_v10, %v10963_v11  ;;  %v16299_v47 = vld [vmem:[#allocation6 + $0x3dc] sm:$0xf0] }
  0x62   :  { %831 = vmatpush.bf16.msra.mxu0 %v10890_v14  ;;  %800 = vmatmul.bf16.vlgmr.msrb.gmra.mxu1 %v17727_v55  ;;  %v10774_v14 = vor.u32 %v16093_v8, %v10771_v9  ;;  %v16227_v49 = vld [vmem:[#allocation6 + $0x19c] sm:$0xf0]  ;;  %v11570_v56 = vor.u32 %v16299_v47, %v11569_v46 }
  0x63   :  { %844 = vmatpush.bf16.msra.mxu1 %v11082_v15  ;;  %813 = vmatmul.bf16.vlgmr.msrb.gmra.mxu2 %v17725_v52  ;;  %v10745_v15 = vld [vmem:[#allocation2 + $0x40] sm:$0xf]  ;;  %v16427_v51 = vld [vmem:[#allocation6 + $0x7dc] sm:$0xf0]  ;;  %v11282_v57 = vor.u32 %v16227_v49, %v11281_v45 }
  0x64   :  { %857 = vmatpush.bf16.msra.mxu2 %v10894_v16  ;;  %826 = vmatmul.bf16.vlgmr.msrb.gmra.mxu3 %v17727_v55  ;;  %v16090_v16 = vld [vmem:[#allocation2 + $0x54] sm:$0xf0]  ;;  %v11249_v59 = vld [vmem:[#allocation6 + $0x140] sm:$0xf] }
  0x65   :  { %870 = vmatpush.bf16.msra.mxu3 %v11086_v20  ;;  %v16087_v20 = vld [vmem:[#allocation2 + $0x44] sm:$0xf]  ;;  %v10746_v24 = vor.u32 %v16090_v16, %v10745_v15 }
  0x66   :  { %832 = vmatpush.bf16.msra.mxu0 %v10866_v26  ;;  %v10938_v26 = vor.u32 %v16138_v19, %v10937_v17  ;;  %v11537_v60 = vld [vmem:[#allocation6 + $0x380] sm:$0xf] }
  0x67   :  { %845 = vmatpush.bf16.msra.mxu1 %v11058_v27  ;;  %v10750_v27 = vor.u32 %v16087_v20, %v10747_v21  ;;  %v16291_v61 = vld [vmem:[#allocation6 + $0x39c] sm:$0xf0] }
  0x68   :  { %858 = vmatpush.bf16.msra.mxu2 %v10870_v28  ;;  %v16084_v28 = vld [vmem:[#allocation2 + $0x24] sm:$0xf0]  ;;  %v11538_v4 = vor.u32 %v16291_v61, %v11537_v60 }
  0x69   :  { %871 = vmatpush.bf16.msra.mxu3 %v11062_v32  ;;  %v16081_v32 = vld [vmem:[#allocation2 + $0x14] sm:$0xf]  ;;  %v16219_v63 = vld [vmem:[#allocation6 + $0x15c] sm:$0xf0] }
  0x6a   :  { %833 = vmatpush.bf16.msra.mxu0 %v10842_v38  ;;  %v10722_v38 = vor.u32 %v16084_v28, %v10721_v25  ;;  %v10726_v42 = vor.u32 %v16081_v32, %v10723_v33  ;;  %v16347_v3 = vld [vmem:[#allocation6 + $0x55c] sm:$0xf0]  ;;  %v11250_v5 = vor.u32 %v16219_v63, %v11249_v59 }
  0x6b   :  { %846 = vmatpush.bf16.msra.mxu1 %v11034_v39  ;;  %v11825_v39 = vld [vmem:[#allocation6 + $0x5c0] sm:$0xf] }
  0x6c   :  { %859 = vmatpush.bf16.msra.mxu2 %v10846_v40  ;;  %v16363_v40 = vld [vmem:[#allocation6 + $0x5dc] sm:$0xf0] }
  0x6d   :  { %872 = vmatpush.bf16.msra.mxu3 %v11038_v44  ;;  %v11314_v44 = vor.u32 %v16235_v37, %v11313_v36  ;;  %v11826_v48 = vor.u32 %v16363_v40, %v11825_v39  ;;  %v11217_v7 = vld [vmem:[#allocation6 + $0x100] sm:$0xf] }
  0x6e   :  { %834 = vmatpush.bf16.msra.mxu0 %v10818_v50  ;;  %v12081_v50 = vld [vmem:[#allocation6 + $0x7c0] sm:$0xf] }
  0x6f   :  { %847 = vmatpush.bf16.msra.mxu1 %v11010_v53  ;;  %v11793_v53 = vld [vmem:[#allocation6 + $0x580] sm:$0xf] }
  0x70   :  { %860 = vmatpush.bf16.msra.mxu2 %v10822_v54  ;;  %v16355_v54 = vld [vmem:[#allocation6 + $0x59c] sm:$0xf0] }
  0x71   :  { %873 = vmatpush.bf16.msra.mxu3 %v11014_v58  ;;  %v12082_v58 = vor.u32 %v16427_v51, %v12081_v50  ;;  %v11794_v62 = vor.u32 %v16355_v54, %v11793_v53  ;;  %v11505_v8 = vld [vmem:[#allocation6 + $0x340] sm:$0xf] }
  0x72   :  { %835 = vmatpush.bf16.msra.mxu0 %v10794_v0  ;;  %v12049_v0 = vld [vmem:[#allocation6 + $0x780] sm:$0xf] }
  0x73   :  { %848 = vmatpush.bf16.msra.mxu1 %v10986_v1  ;;  %v16419_v1 = vld [vmem:[#allocation6 + $0x79c] sm:$0xf0] }
  0x74   :  { %861 = vmatpush.bf16.msra.mxu2 %v10798_v2  ;;  %v11761_v2 = vld [vmem:[#allocation6 + $0x540] sm:$0xf] }
  0x75   :  { %874 = vmatpush.bf16.msra.mxu3 %v10990_v6  ;;  %v12050_v6 = vor.u32 %v16419_v1, %v12049_v0  ;;  %v16283_v9 = vld [vmem:[#allocation6 + $0x35c] sm:$0xf0]  ;;  %v11762_v10 = vor.u32 %v16347_v3, %v11761_v2  ;;  %v16231_v0 = vld [vmem:[#allocation6 + $0x1c4] sm:$0xf] }
  0x76   :  { %836 = vmatpush.bf16.msra.mxu0 %v10770_v12  ;;  %v16211_v11 = vld [vmem:[#allocation6 + $0x11c] sm:$0xf0]  ;;  %v11506_v15 = vor.u32 %v16283_v9, %v11505_v8  ;;  %v11315_v2 = vld [vmem:[#allocation6 + $0x1e0] sm:$0xf0] }
  0x77   :  { %849 = vmatpush.bf16.msra.mxu1 %v10962_v13  ;;  %v12017_v12 = vld [vmem:[#allocation6 + $0x740] sm:$0xf] }
  0x78   :  { %862 = vmatpush.bf16.msra.mxu2 %v10774_v14  ;;  %v16411_v13 = vld [vmem:[#allocation6 + $0x75c] sm:$0xf0] }
  0x79   :  { %875 = vmatpush.bf16.msra.mxu3 %v10966_v18  ;;  %v11729_v14 = vld [vmem:[#allocation6 + $0x500] sm:$0xf]  ;;  %v12018_v16 = vor.u32 %v16411_v13, %v12017_v12  ;;  %v16223_v12 = vld [vmem:[#allocation6 + $0x184] sm:$0xf] }
  0x7a   :  { %837 = vmatpush.bf16.msra.mxu0 %v10746_v24  ;;  %v11185_v17 = vld [vmem:[#allocation6 + $0xc0] sm:$0xf] }
  0x7b   :  { %850 = vmatpush.bf16.msra.mxu1 %v10938_v26  ;;  %v11473_v18 = vld [vmem:[#allocation6 + $0x300] sm:$0xf] }
  0x7c   :  { %863 = vmatpush.bf16.msra.mxu2 %v10750_v27  ;;  %v16275_v19 = vld [vmem:[#allocation6 + $0x31c] sm:$0xf0] }
  0x7d   :  { %876 = vmatpush.bf16.msra.mxu3 %v10942_v31  ;;  %v16203_v21 = vld [vmem:[#allocation6 + $0xdc] sm:$0xf0]  ;;  %v11474_v26 = vor.u32 %v16275_v19, %v11473_v18 }
  0x7e   :  { %838 = vmatpush.bf16.msra.mxu0 %v10722_v38  ;;  %v11985_v22 = vld [vmem:[#allocation6 + $0x700] sm:$0xf]  ;;  %v11186_v27 = vor.u32 %v16203_v21, %v11185_v17 }
  0x7f   :  { %851 = vmatpush.bf16.msra.mxu1 %v10914_v41  ;;  %v16403_v23 = vld [vmem:[#allocation6 + $0x71c] sm:$0xf0] }
  0x80   :  { %864 = vmatpush.bf16.msra.mxu2 %v10726_v42  ;;  %v11697_v24 = vld [vmem:[#allocation6 + $0x4c0] sm:$0xf]  ;;  %v11986_v28 = vor.u32 %v16403_v23, %v11985_v22  ;;  %v16295_v22 = vld [vmem:[#allocation6 + $0x3c4] sm:$0xf] }
  0x81   :  { %877 = vmatpush.bf16.msra.mxu3 %v10918_v43  ;;  %839 = vmatmul.bf16.vlgmr.msra.gmra.mxu0 %v17725_v52  ;;  %v16331_v25 = vld [vmem:[#allocation6 + $0x4dc] sm:$0xf0]  ;;  %v11571_v23 = vld [vmem:[#allocation6 + $0x3e0] sm:$0xf0] }
  0x82   :  { %3217 = vmatpush.bf16.msrb.mxu0 %v11314_v44  ;;  %852 = vmatmul.bf16.vlgmr.msra.gmra.mxu1 %v17727_v55  ;;  %v11153_v29 = vld [vmem:[#allocation6 + $0x80] sm:$0xf]  ;;  %v11698_v32 = vor.u32 %v16331_v25, %v11697_v24  ;;  %v11574_v25 = vor.u32 %v16295_v22, %v11571_v23 }
  0x83   :  { %865 = vmatmul.bf16.vlgmr.msra.gmra.mxu2 %v17725_v52  ;;  %3230 = vmatpush.bf16.msrb.mxu1 %v11570_v56  ;;  %v16339_v52 = vld [vmem:[#allocation6 + $0x51c] sm:$0xf0] }
  0x84   :  { %3243 = vmatpush.bf16.msrb.mxu2 %v11826_v48  ;;  %878 = vmatmul.bf16.vlgmr.msra.gmra.mxu3 %v17727_v55  ;;  %v11218_v55 = vor.u32 %v16211_v11, %v11217_v7  ;;  %v11730_v20 = vor.u32 %v16339_v52, %v11729_v14  ;;  %v11441_v30 = vld [vmem:[#allocation6 + $0x2c0] sm:$0xf]  ;;  %v11283_v14 = vld [vmem:[#allocation6 + $0x1a0] sm:$0xf0] }
  0x85   :  { %3256 = vmatpush.bf16.msrb.mxu3 %v12082_v58  ;;  %v16267_v31 = vld [vmem:[#allocation6 + $0x2dc] sm:$0xf0] }
  0x86   :  { %3218 = vmatpush.bf16.msrb.mxu0 %v11282_v57  ;;  %v16195_v33 = vld [vmem:[#allocation6 + $0x9c] sm:$0xf0]  ;;  %v11442_v38 = vor.u32 %v16267_v31, %v11441_v30  ;;  %v11251_v30 = vld [vmem:[#allocation6 + $0x160] sm:$0xf0] }
  0x87   :  { %3231 = vmatpush.bf16.msrb.mxu1 %v11538_v4  ;;  %v11953_v34 = vld [vmem:[#allocation6 + $0x6c0] sm:$0xf]  ;;  %v11154_v39 = vor.u32 %v16195_v33, %v11153_v29 }
  0x88   :  { %3244 = vmatpush.bf16.msrb.mxu2 %v11794_v62  ;;  %v16395_v35 = vld [vmem:[#allocation6 + $0x6dc] sm:$0xf0] }
  0x89   :  { %3257 = vmatpush.bf16.msrb.mxu3 %v12050_v6  ;;  %v11665_v36 = vld [vmem:[#allocation6 + $0x480] sm:$0xf]  ;;  %v11954_v40 = vor.u32 %v16395_v35, %v11953_v34  ;;  %v16287_v35 = vld [vmem:[#allocation6 + $0x384] sm:$0xf] }
  0x8a   :  { %3219 = vmatpush.bf16.msrb.mxu0 %v11250_v5  ;;  %v16323_v37 = vld [vmem:[#allocation6 + $0x49c] sm:$0xf0]  ;;  %v11318_v5 = vor.u32 %v16231_v0, %v11315_v2 }
  0x8b   :  { %3232 = vmatpush.bf16.msrb.mxu1 %v11506_v15  ;;  %v11121_v41 = vld [vmem:[#allocation6 + $0x40] sm:$0xf]  ;;  %v11666_v44 = vor.u32 %v16323_v37, %v11665_v36  ;;  %v11539_v36 = vld [vmem:[#allocation6 + $0x3a0] sm:$0xf0] }
  0x8c   :  { %3245 = vmatpush.bf16.msrb.mxu2 %v11762_v10  ;;  %v11409_v42 = vld [vmem:[#allocation6 + $0x280] sm:$0xf] }
  0x8d   :  { %3258 = vmatpush.bf16.msrb.mxu3 %v12018_v16  ;;  %v16259_v43 = vld [vmem:[#allocation6 + $0x29c] sm:$0xf0] }
  0x8e   :  { %3220 = vmatpush.bf16.msrb.mxu0 %v11218_v55  ;;  %v16187_v45 = vld [vmem:[#allocation6 + $0x5c] sm:$0xf0]  ;;  %v11410_v50 = vor.u32 %v16259_v43, %v11409_v42  ;;  %v11286_v55 = vor.u32 %v16223_v12, %v11283_v14  ;;  %v11443_v12 = vld [vmem:[#allocation6 + $0x2e0] sm:$0xf0] }
  0x8f   :  { %3233 = vmatpush.bf16.msrb.mxu1 %v11474_v26  ;;  %v11921_v46 = vld [vmem:[#allocation6 + $0x680] sm:$0xf]  ;;  %v11122_v51 = vor.u32 %v16187_v45, %v11121_v41  ;;  %v11219_v41 = vld [vmem:[#allocation6 + $0x120] sm:$0xf0] }
  0x90   :  { %3246 = vmatpush.bf16.msrb.mxu2 %v11730_v20  ;;  %v16387_v47 = vld [vmem:[#allocation6 + $0x69c] sm:$0xf0] }
  0x91   :  { %3259 = vmatpush.bf16.msrb.mxu3 %v11986_v28  ;;  %v11633_v48 = vld [vmem:[#allocation6 + $0x440] sm:$0xf]  ;;  %v11922_v53 = vor.u32 %v16387_v47, %v11921_v46  ;;  %v16215_v28 = vld [vmem:[#allocation6 + $0x144] sm:$0xf] }
  0x92   :  { %3221 = vmatpush.bf16.msrb.mxu0 %v11186_v27  ;;  %v16315_v49 = vld [vmem:[#allocation6 + $0x45c] sm:$0xf0]  ;;  %v11254_v33 = vor.u32 %v16215_v28, %v11251_v30  ;;  %v16279_v46 = vld [vmem:[#allocation6 + $0x344] sm:$0xf] }
  0x93   :  { %3234 = vmatpush.bf16.msrb.mxu1 %v11442_v38  ;;  %v11634_v54 = vor.u32 %v16315_v49, %v11633_v48  ;;  %v11089_v56 = vld [vmem:[#allocation6] sm:$0xf]  ;;  %v11542_v38 = vor.u32 %v16287_v35, %v11539_v36  ;;  %v11507_v47 = vld [vmem:[#allocation6 + $0x360] sm:$0xf0] }
  0x94   :  { %3247 = vmatpush.bf16.msrb.mxu2 %v11698_v32  ;;  %v16179_v57 = vld [vmem:[#allocation6 + $0x1c] sm:$0xf0]  ;;  %v11091_v35 = vld [vmem:[#allocation6 + $0x20] sm:$0xf0] }
  0x95   :  { %3260 = vmatpush.bf16.msrb.mxu3 %v11954_v40  ;;  %v11601_v58 = vld [vmem:[#allocation6 + $0x400] sm:$0xf]  ;;  %v11090_v60 = vor.u32 %v16179_v57, %v11089_v56  ;;  %v16207_v40 = vld [vmem:[#allocation6 + $0x104] sm:$0xf] }
  0x96   :  { %3222 = vmatpush.bf16.msrb.mxu0 %v11154_v39  ;;  %v16307_v59 = vld [vmem:[#allocation6 + $0x41c] sm:$0xf0]  ;;  %v11222_v43 = vor.u32 %v16207_v40, %v11219_v41  ;;  %v11827_v40 = vld [vmem:[#allocation6 + $0x5e0] sm:$0xf0] }
  0x97   :  { %3235 = vmatpush.bf16.msrb.mxu1 %v11410_v50  ;;  %v11602_v61 = vor.u32 %v16307_v59, %v11601_v58  ;;  %v12337_v62 = vld [vmem:[#allocation6 + $0x9c0] sm:$0xf]  ;;  %v16271_v59 = vld [vmem:[#allocation6 + $0x304] sm:$0xf] }
  0x98   :  { %3248 = vmatpush.bf16.msrb.mxu2 %v11666_v44  ;;  %v16491_v63 = vld [vmem:[#allocation6 + $0x9dc] sm:$0xf0] }
  0x99   :  { %3261 = vmatpush.bf16.msrb.mxu3 %v11922_v53  ;;  %v12338_v1 = vor.u32 %v16491_v63, %v12337_v62  ;;  %v11377_v3 = vld [vmem:[#allocation6 + $0x240] sm:$0xf]  ;;  %v16199_v53 = vld [vmem:[#allocation6 + $0xc4] sm:$0xf]  ;;  %v17741_v62 = vld [vmem:[#allocation4] sm:$0x3f] }
  0x9a   :  { %3223 = vmatpush.bf16.msrb.mxu0 %v11122_v51  ;;  %v16251_v4 = vld [vmem:[#allocation6 + $0x25c] sm:$0xf0]  ;;  %v11510_v51 = vor.u32 %v16279_v46, %v11507_v47 }
  0x9b   :  { %v11378_v6 = vor.u32 %v16251_v4, %v11377_v3  ;;  %v11889_v7 = vld [vmem:[#allocation6 + $0x640] sm:$0xf]  ;;  %v16191_v3 = vld [vmem:[#allocation6 + $0x84] sm:$0xf]  ;;  %v235_v4 = vperm.slane %v17741_v62, 0 }
  0x9c   :  { %3249 = vmatpush.bf16.msrb.mxu2 %v11634_v54  ;;  %v16379_v8 = vld [vmem:[#allocation6 + $0x65c] sm:$0xf0]  ;;  %v11187_v54 = vld [vmem:[#allocation6 + $0xe0] sm:$0xf0] }
  0x9d   :  { %v11890_v9 = vor.u32 %v16379_v8, %v11889_v7  ;;  %3236 = vmatpush.bf16.msrb.mxu1 %v11378_v6  ;;  %v12305_v10 = vld [vmem:[#allocation6 + $0x980] sm:$0xf]  ;;  %v11155_v6 = vld [vmem:[#allocation6 + $0xa0] sm:$0xf0] }
  0x9e   :  { %3224 = vmatpush.bf16.msrb.mxu0 %v11090_v60  ;;  %v16483_v11 = vld [vmem:[#allocation6 + $0x99c] sm:$0xf0]  ;;  %v11475_v60 = vld [vmem:[#allocation6 + $0x320] sm:$0xf0]  ;;  %v11158_v7 = vor.u32 %v16191_v3, %v11155_v6 }
  0x9f   :  { %3262 = vmatpush.bf16.msrb.mxu3 %v11890_v9  ;;  %v12306_v13 = vor.u32 %v16483_v11, %v12305_v10  ;;  %v11345_v52 = vld [vmem:[#allocation6 + $0x200] sm:$0xf]  ;;  %v11478_v0 = vor.u32 %v16271_v59, %v11475_v60  ;;  %v16263_v10 = vld [vmem:[#allocation6 + $0x2c4] sm:$0xf] }
  0xa0   :  { %3250 = vmatpush.bf16.msrb.mxu2 %v11602_v61  ;;  %v16243_v15 = vld [vmem:[#allocation6 + $0x21c] sm:$0xf0]  ;;  %v11190_v61 = vor.u32 %v16199_v53, %v11187_v54  ;;  %v11446_v14 = vor.u32 %v16263_v10, %v11443_v12  ;;  %v16351_v53 = vld [vmem:[#allocation6 + $0x584] sm:$0xf] }
  0xa1   :  { %v11346_v16 = vor.u32 %v16243_v15, %v11345_v52  ;;  %v11857_v17 = vld [vmem:[#allocation6 + $0x600] sm:$0xf]  ;;  %v11795_v54 = vld [vmem:[#allocation6 + $0x5a0] sm:$0xf0] }
  0xa2   :  { %3269 = vmatpush.bf16.msra.mxu0 %v12338_v1  ;;  %v16371_v18 = vld [vmem:[#allocation6 + $0x61c] sm:$0xf0]  ;;  %v16239_v60 = vld [vmem:[#allocation6 + $0x204] sm:$0xf] }
  0xa3   :  { %v12593_v19 = vld [vmem:[#allocation6 + $0xbc0] sm:$0xf]  ;;  %v11858_v20 = vor.u32 %v16371_v18, %v11857_v17  ;;  %3237 = vmatpush.bf16.msrb.mxu1 %v11346_v16  ;;  %v236_v18 = vperm.slane %v17741_v62, 1  ;;  %v12083_v3 = vld [vmem:[#allocation6 + $0x7e0] sm:$0xf0] }
  0xa4   :  { %3295 = vmatpush.bf16.msra.mxu2 %v11318_v5  ;;  %v16555_v21 = vld [vmem:[#allocation6 + $0xbdc] sm:$0xf0]  ;;  %v16343_v6 = vld [vmem:[#allocation6 + $0x544] sm:$0xf] }
  0xa5   :  { %v12594_v24 = vor.u32 %v16555_v21, %v12593_v19  ;;  %v12273_v26 = vld [vmem:[#allocation6 + $0x940] sm:$0xf]  ;;  %3263 = vmatpush.bf16.msrb.mxu3 %v11858_v20  ;;  %v11123_v20 = vld [vmem:[#allocation6 + $0x60] sm:$0xf0] }
  0xa6   :  { %3270 = vmatpush.bf16.msra.mxu0 %v12306_v13  ;;  %v16475_v27 = vld [vmem:[#allocation6 + $0x95c] sm:$0xf0]  ;;  %v16415_v10 = vld [vmem:[#allocation6 + $0x784] sm:$0xf] }
  0xa7   :  { %v12274_v29 = vor.u32 %v16475_v27, %v12273_v26  ;;  %v12561_v31 = vld [vmem:[#allocation6 + $0xb80] sm:$0xf]  ;;  %3282 = vmatpush.bf16.msra.mxu1 %v12594_v24  ;;  %v16255_v24 = vld [vmem:[#allocation6 + $0x284] sm:$0xf] }
  0xa8   :  { %3296 = vmatpush.bf16.msra.mxu2 %v11286_v55  ;;  %v16547_v32 = vld [vmem:[#allocation6 + $0xb9c] sm:$0xf0]  ;;  %v16183_v55 = vld [vmem:[#allocation6 + $0x44] sm:$0xf] }
  0xa9   :  { %3308 = vmatpush.bf16.msra.mxu3 %v11574_v25  ;;  %v12562_v34 = vor.u32 %v16547_v32, %v12561_v31  ;;  %v12241_v37 = vld [vmem:[#allocation6 + $0x900] sm:$0xf]  ;;  %v11126_v21 = vor.u32 %v16183_v55, %v11123_v20  ;;  %v11411_v27 = vld [vmem:[#allocation6 + $0x2a0] sm:$0xf0] }
  0xaa   :  { %3271 = vmatpush.bf16.msra.mxu0 %v12274_v29  ;;  %v16467_v39 = vld [vmem:[#allocation6 + $0x91c] sm:$0xf0]  ;;  %v11414_v28 = vor.u32 %v16255_v24, %v11411_v27  ;;  %v12019_v55 = vld [vmem:[#allocation6 + $0x760] sm:$0xf0] }
  0xab   :  { %v12242_v42 = vor.u32 %v16467_v39, %v12241_v37  ;;  %v12529_v44 = vld [vmem:[#allocation6 + $0xb40] sm:$0xf]  ;;  %3283 = vmatpush.bf16.msra.mxu1 %v12562_v34  ;;  %v16175_v34 = vld [vmem:[#allocation6 + $0x4] sm:$0xf] }
  0xac   :  { %3297 = vmatpush.bf16.msra.mxu2 %v11254_v33  ;;  %v16539_v45 = vld [vmem:[#allocation6 + $0xb5c] sm:$0xf0]  ;;  %v16359_v39 = vld [vmem:[#allocation6 + $0x5c4] sm:$0xf] }
  0xad   :  { %v12209_v48 = vld [vmem:[#allocation6 + $0x8c0] sm:$0xf]  ;;  %3309 = vmatpush.bf16.msra.mxu3 %v11542_v38  ;;  %v12530_v50 = vor.u32 %v16539_v45, %v12529_v44  ;;  %v11094_v38 = vor.u32 %v16175_v34, %v11091_v35  ;;  %v16399_v20 = vld [vmem:[#allocation6 + $0x704] sm:$0xf] }
  0xae   :  { %v16459_v49 = vld [vmem:[#allocation6 + $0x8dc] sm:$0xf0]  ;;  %3272 = vmatpush.bf16.msra.mxu0 %v12242_v42  ;;  %v11830_v42 = vor.u32 %v16359_v39, %v11827_v40  ;;  %v11667_v24 = vld [vmem:[#allocation6 + $0x4a0] sm:$0xf0] }
  0xaf   :  { %v12497_v56 = vld [vmem:[#allocation6 + $0xb00] sm:$0xf]  ;;  %v12210_v57 = vor.u32 %v16459_v49, %v12209_v48  ;;  %3284 = vmatpush.bf16.msra.mxu1 %v12530_v50  ;;  %v16247_v48 = vld [vmem:[#allocation6 + $0x244] sm:$0xf] }
  0xb0   :  { %v16531_v58 = vld [vmem:[#allocation6 + $0xb1c] sm:$0xf0]  ;;  %3298 = vmatpush.bf16.msra.mxu2 %v11222_v43  ;;  %v11379_v49 = vld [vmem:[#allocation6 + $0x260] sm:$0xf0] }
  0xb1   :  { %3310 = vmatpush.bf16.msra.mxu3 %v11510_v51  ;;  %v12498_v63 = vor.u32 %v16531_v58, %v12497_v56  ;;  %v12177_v1 = vld [vmem:[#allocation6 + $0x880] sm:$0xf]  ;;  %v11382_v51 = vor.u32 %v16247_v48, %v11379_v49  ;;  %v16391_v27 = vld [vmem:[#allocation6 + $0x6c4] sm:$0xf] }
  0xb2   :  { %3273 = vmatpush.bf16.msra.mxu0 %v12210_v57  ;;  %v16451_v2 = vld [vmem:[#allocation6 + $0x89c] sm:$0xf0]  ;;  %v11798_v57 = vor.u32 %v16351_v53, %v11795_v54  ;;  %v16487_v39 = vld [vmem:[#allocation6 + $0x9c4] sm:$0xf] }
  0xb3   :  { %v12178_v5 = vor.u32 %v16451_v2, %v12177_v1  ;;  %3285 = vmatpush.bf16.msra.mxu1 %v12498_v63  ;;  %v12465_v8 = vld [vmem:[#allocation6 + $0xac0] sm:$0xf]  ;;  %v16423_v2 = vld [vmem:[#allocation6 + $0x7c4] sm:$0xf] }
  0xb4   :  { %3299 = vmatpush.bf16.msra.mxu2 %v11190_v61  ;;  %v16523_v9 = vld [vmem:[#allocation6 + $0xadc] sm:$0xf0]  ;;  %v11347_v61 = vld [vmem:[#allocation6 + $0x220] sm:$0xf0] }
  0xb5   :  { %3311 = vmatpush.bf16.msra.mxu3 %v11478_v0  ;;  %v12466_v11 = vor.u32 %v16523_v9, %v12465_v8  ;;  %v12145_v52 = vld [vmem:[#allocation6 + $0x840] sm:$0xf]  ;;  %v11350_v1 = vor.u32 %v16239_v60, %v11347_v61  ;;  %v12339_v40 = vld [vmem:[#allocation6 + $0x9e0] sm:$0xf0] }
  0xb6   :  { %3274 = vmatpush.bf16.msra.mxu0 %v12178_v5  ;;  %v16443_v15 = vld [vmem:[#allocation6 + $0x85c] sm:$0xf0]  ;;  %v12086_v5 = vor.u32 %v16423_v2, %v12083_v3  ;;  %v12342_v48 = vor.u32 %v16487_v39, %v12339_v40  ;;  %v16479_v49 = vld [vmem:[#allocation6 + $0x984] sm:$0xf] }
  0xb7   :  { %v12146_v19 = vor.u32 %v16443_v15, %v12145_v52  ;;  %3286 = vmatpush.bf16.msra.mxu1 %v12466_v11  ;;  %v12433_v22 = vld [vmem:[#allocation6 + $0xa80] sm:$0xf]  ;;  %v12051_v11 = vld [vmem:[#allocation6 + $0x7a0] sm:$0xf0] }
  0xb8   :  { %3300 = vmatpush.bf16.msra.mxu2 %v11158_v7  ;;  %v16515_v23 = vld [vmem:[#allocation6 + $0xa9c] sm:$0xf0]  ;;  %v11763_v7 = vld [vmem:[#allocation6 + $0x560] sm:$0xf0]  ;;  %v12054_v12 = vor.u32 %v16415_v10, %v12051_v11 }
  0xb9   :  { %3312 = vmatpush.bf16.msra.mxu3 %v11446_v14  ;;  %v12434_v26 = vor.u32 %v16515_v23, %v12433_v22  ;;  %v12113_v29 = vld [vmem:[#allocation6 + $0x800] sm:$0xf]  ;;  %v11766_v9 = vor.u32 %v16343_v6, %v11763_v7  ;;  %v11731_v14 = vld [vmem:[#allocation6 + $0x520] sm:$0xf0] }
  0xba   :  { %3275 = vmatpush.bf16.msra.mxu0 %v12146_v19  ;;  %v16435_v30 = vld [vmem:[#allocation6 + $0x81c] sm:$0xf0]  ;;  %v16407_v15 = vld [vmem:[#allocation6 + $0x744] sm:$0xf] }
  0xbb   :  { %v12114_v33 = vor.u32 %v16435_v30, %v12113_v29  ;;  %3287 = vmatpush.bf16.msra.mxu1 %v12434_v26  ;;  %v12401_v43 = vld [vmem:[#allocation6 + $0xa40] sm:$0xf]  ;;  %v16319_v23 = vld [vmem:[#allocation6 + $0x484] sm:$0xf] }
  0xbc   :  { %3301 = vmatpush.bf16.msra.mxu2 %v11126_v21  ;;  %v16507_v44 = vld [vmem:[#allocation6 + $0xa5c] sm:$0xf0]  ;;  %v11987_v21 = vld [vmem:[#allocation6 + $0x720] sm:$0xf0]  ;;  %v11670_v26 = vor.u32 %v16319_v23, %v11667_v24 }
  0xbd   :  { %3313 = vmatpush.bf16.msra.mxu3 %v11414_v28  ;;  %v12402_v47 = vor.u32 %v16507_v44, %v12401_v43  ;;  %v12369_v58 = vld [vmem:[#allocation6 + $0xa00] sm:$0xf]  ;;  %v11990_v22 = vor.u32 %v16399_v20, %v11987_v21  ;;  %v11955_v28 = vld [vmem:[#allocation6 + $0x6e0] sm:$0xf0]  ;;  %v238_v43 = vperm.slane %v17741_v62, 3 }
  0xbe   :  { %v736_v13 = vpop.f32.mrf.mxu0  ;;  %3276 = vmatpush.bf16.msra.mxu0 %v12114_v33  ;;  %v16499_v59 = vld [vmem:[#allocation6 + $0xa1c] sm:$0xf0]  ;;  %v11958_v29 = vor.u32 %v16391_v27, %v11955_v28  ;;  %v16303_v44 = vld [vmem:[#allocation6 + $0x404] sm:$0xf] }
  0xbf   :  { %v737_v16 = vadd.f32 %v736_v13, %v235_v4  ;;  %v749_v17 = vpop.f32.mrf.mxu1  ;;  %3288 = vmatpush.bf16.msra.mxu1 %v12402_v47  ;;  %v12370_v0 = vor.u32 %v16499_v59, %v12369_v58  ;;  %v16335_v13 = vld [vmem:[#allocation6 + $0x504] sm:$0xf] }
  0xc0   :  { %3302 = vmatpush.bf16.msra.mxu2 %v11094_v38  ;;  %v11734_v52 = vor.u32 %v16335_v13, %v11731_v14  ;;  %v12307_v53 = vld [vmem:[#allocation6 + $0x9a0] sm:$0xf0] }
  0xc1   :  { %v750_v25 = vadd.f32 %v749_v17, %v737_v16  ;;  %3314 = vmatpush.bf16.msra.mxu3 %v11382_v51  ;;  %v12022_v16 = vor.u32 %v16407_v15, %v12019_v55  ;;  %v16327_v17 = vld [vmem:[#allocation6 + $0x4c4] sm:$0xf]  ;;  %v12310_v2 = vor.u32 %v16479_v49, %v12307_v53  ;;  %v11833_v49 = vld [vmem:[#allocation6 + $0x5c8] sm:$0xf]  ;;  %v240_v53 = vperm.slane %v17741_v62, 5 }
  0xc2   :  { %v16375_v54 = vld [vmem:[#allocation6 + $0x644] sm:$0xf] }
  0xc3   :  { %v883_v31 = vmax.f32 %v750_v25, 0.0  ;;  %3289 = vmatpush.bf16.msra.mxu1 %v12370_v0  ;;  %v237_v25 = vperm.slane %v17741_v62, 2  ;;  %v16551_v0 = vld [vmem:[#allocation6 + $0xbc4] sm:$0xf] }
  0xc4   :  { %v12595_v3 = vld [vmem:[#allocation6 + $0xbe0] sm:$0xf0] }
  0xc5   :  { %v17745_v41 = vpack.c.bf16 %v883_v31, %v883_v31  ;;  %3315 = vmatpush.bf16.msra.mxu3 %v11350_v1  ;;  %v16311_v31 = vld [vmem:[#allocation6 + $0x444] sm:$0xf]  ;;  %v12598_v10 = vor.u32 %v16551_v0, %v12595_v3  ;;  %v11289_v0 = vld [vmem:[#allocation6 + $0x188] sm:$0xf] }
  0xc6   :  { %v762_v32 = vpop.f32.mrf.mxu2  ;;  %v738_v46 = vpop.f32.mrf.mxu0  ;;  %v16471_v6 = vld [vmem:[#allocation6 + $0x944] sm:$0xf]  ;;  %v16228_v3 = vld [vmem:[#allocation6 + $0x1a4] sm:$0xf0] }
  0xc7   :  { %v763_v36 = vadd.f32 %v762_v32, %v236_v18  ;;  %v775_v37 = vpop.f32.mrf.mxu3  ;;  %3225 = vmatmul.bf16.vlgmr.msrb.gmra.mxu0 %v17745_v41  ;;  %v751_v50 = vpop.f32.mrf.mxu1  ;;  %v11699_v18 = vld [vmem:[#allocation6 + $0x4e0] sm:$0xf0] }
  0xc8   :  { %3321 = vmatpush.bf16.msrb.mxu0 %v11830_v42  ;;  %v11702_v19 = vor.u32 %v16327_v17, %v11699_v18  ;;  %v11635_v32 = vld [vmem:[#allocation6 + $0x460] sm:$0xf0] }
  0xc9   :  { %v776_v45 = vadd.f32 %v775_v37, %v763_v36  ;;  %v11638_v35 = vor.u32 %v16311_v31, %v11635_v32  ;;  %v16383_v36 = vld [vmem:[#allocation6 + $0x684] sm:$0xf] }
  0xca   :  { %v11923_v37 = vld [vmem:[#allocation6 + $0x6a0] sm:$0xf0] }
  0xcb   :  { %v884_v56 = vmax.f32 %v776_v45, 0.0  ;;  %v11926_v42 = vor.u32 %v16383_v36, %v11923_v37  ;;  %v11603_v45 = vld [vmem:[#allocation6 + $0x420] sm:$0xf0] }
  0xcc   :  { %3322 = vmatpush.bf16.msrb.mxu0 %v11798_v57  ;;  %v11606_v47 = vor.u32 %v16303_v44, %v11603_v45  ;;  %v12275_v7 = vld [vmem:[#allocation6 + $0x960] sm:$0xf0] }
  0xcd   :  { %v17748_v63 = vpack.c.bf16 %v884_v56, %v884_v56  ;;  %v11891_v56 = vld [vmem:[#allocation6 + $0x660] sm:$0xf0] }
  0xce   :  { %v764_v4 = vpop.f32.mrf.mxu2  ;;  %v11894_v60 = vor.u32 %v16375_v54, %v11891_v56  ;;  %v16543_v13 = vld [vmem:[#allocation6 + $0xb84] sm:$0xf] }
  0xcf   :  { %3238 = vmatmul.bf16.vlgmr.msrb.gmra.mxu1 %v17748_v63  ;;  %v777_v8 = vpop.f32.mrf.mxu3  ;;  %v16367_v4 = vld [vmem:[#allocation6 + $0x604] sm:$0xf] }
  0xd0   :  { %3334 = vmatpush.bf16.msrb.mxu1 %v12086_v5  ;;  %3323 = vmatpush.bf16.msrb.mxu0 %v11766_v9  ;;  %v11859_v5 = vld [vmem:[#allocation6 + $0x620] sm:$0xf0] }
  0xd1   :  { %v11862_v8 = vor.u32 %v16367_v4, %v11859_v5  ;;  %v12563_v14 = vld [vmem:[#allocation6 + $0xba0] sm:$0xf0]  ;;  %v11801_v4 = vld [vmem:[#allocation6 + $0x588] sm:$0xf] }
  0xd2   :  { %v16463_v15 = vld [vmem:[#allocation6 + $0x904] sm:$0xf]  ;;  %v12566_v17 = vor.u32 %v16543_v13, %v12563_v14  ;;  %v16356_v5 = vld [vmem:[#allocation6 + $0x5a4] sm:$0xf0] }
  0xd3   :  { %v12243_v55 = vld [vmem:[#allocation6 + $0x920] sm:$0xf0]  ;;  %v11577_v13 = vld [vmem:[#allocation6 + $0x3c8] sm:$0xf] }
  0xd4   :  { %3335 = vmatpush.bf16.msrb.mxu1 %v12054_v12  ;;  %3324 = vmatpush.bf16.msrb.mxu0 %v11734_v52  ;;  %v12278_v12 = vor.u32 %v16471_v6, %v12275_v7  ;;  %v12246_v18 = vor.u32 %v16463_v15, %v12243_v55  ;;  %v12531_v20 = vld [vmem:[#allocation6 + $0xb60] sm:$0xf0]  ;;  %v16300_v14 = vld [vmem:[#allocation6 + $0x3e4] sm:$0xf0]  ;;  %v11290_v15 = vor.u32 %v16228_v3, %v11289_v0 }
  0xd5   :  { %v16455_v21 = vld [vmem:[#allocation6 + $0x8c4] sm:$0xf]  ;;  %v11802_v55 = vor.u32 %v16356_v5, %v11801_v4  ;;  %v16324_v3 = vld [vmem:[#allocation6 + $0x4a4] sm:$0xf0] }
  0xd6   :  { %v16447_v27 = vld [vmem:[#allocation6 + $0x884] sm:$0xf]  ;;  %v11161_v4 = vld [vmem:[#allocation6 + $0x88] sm:$0xf] }
  0xd7   :  { %v12179_v28 = vld [vmem:[#allocation6 + $0x8a0] sm:$0xf0]  ;;  %v16196_v5 = vld [vmem:[#allocation6 + $0xa4] sm:$0xf0] }
  0xd8   :  { %3336 = vmatpush.bf16.msrb.mxu1 %v12022_v16  ;;  %3325 = vmatpush.bf16.msrb.mxu0 %v11702_v19  ;;  %v16535_v19 = vld [vmem:[#allocation6 + $0xb44] sm:$0xf]  ;;  %v12182_v31 = vor.u32 %v16447_v27, %v12179_v28  ;;  %v16292_v27 = vld [vmem:[#allocation6 + $0x3a4] sm:$0xf0] }
  0xd9   :  { %v12534_v23 = vor.u32 %v16535_v19, %v12531_v20  ;;  %v16519_v32 = vld [vmem:[#allocation6 + $0xac4] sm:$0xf]  ;;  %v16220_v19 = vld [vmem:[#allocation6 + $0x164] sm:$0xf0] }
  0xda   :  { %v16431_v44 = vld [vmem:[#allocation6 + $0x804] sm:$0xf]  ;;  %v11769_v20 = vld [vmem:[#allocation6 + $0x548] sm:$0xf] }
  0xdb   :  { %v12115_v45 = vld [vmem:[#allocation6 + $0x820] sm:$0xf0] }
  0xdc   :  { %3337 = vmatpush.bf16.msrb.mxu1 %v11990_v22  ;;  %3326 = vmatpush.bf16.msrb.mxu0 %v11670_v26  ;;  %v12211_v22 = vld [vmem:[#allocation6 + $0x8e0] sm:$0xf0] }
  0xdd   :  { %v12214_v24 = vor.u32 %v16455_v21, %v12211_v22  ;;  %v12499_v26 = vld [vmem:[#allocation6 + $0xb20] sm:$0xf0]  ;;  %v16348_v21 = vld [vmem:[#allocation6 + $0x564] sm:$0xf0] }
  0xde   :  { %v788_v30 = vpop.f32.mrf.mxu0 }
  0xdf   :  { %v789_v33 = vadd.f32 %v788_v30, %v237_v25  ;;  %v801_v34 = vpop.f32.mrf.mxu1  ;;  %v16527_v25 = vld [vmem:[#allocation6 + $0xb04] sm:$0xf]  ;;  %v239_v30 = vperm.slane %v17741_v62, 4 }
  0xe0   :  { %3338 = vmatpush.bf16.msrb.mxu1 %v11958_v29  ;;  %3327 = vmatpush.bf16.msrb.mxu0 %v11638_v35  ;;  %v12502_v29 = vor.u32 %v16527_v25, %v12499_v26  ;;  %v12147_v35 = vld [vmem:[#allocation6 + $0x860] sm:$0xf0]  ;;  %v11545_v26 = vld [vmem:[#allocation6 + $0x388] sm:$0xf] }
  0xe1   :  { %v802_v38 = vadd.f32 %v801_v34, %v789_v33  ;;  %v12467_v33 = vld [vmem:[#allocation6 + $0xae0] sm:$0xf0] }
  0xe2   :  { %v16439_v34 = vld [vmem:[#allocation6 + $0x844] sm:$0xf]  ;;  %v12470_v37 = vor.u32 %v16519_v32, %v12467_v33  ;;  %v16420_v32 = vld [vmem:[#allocation6 + $0x7a4] sm:$0xf0] }
  0xe3   :  { %v885_v46 = vmax.f32 %v802_v38, 0.0  ;;  %v12150_v40 = vor.u32 %v16439_v34, %v12147_v35  ;;  %v11225_v33 = vld [vmem:[#allocation6 + $0x108] sm:$0xf] }
  0xe4   :  { %3339 = vmatpush.bf16.msrb.mxu1 %v11926_v42  ;;  %3328 = vmatpush.bf16.msrb.mxu0 %v11606_v47  ;;  %v16511_v42 = vld [vmem:[#allocation6 + $0xa84] sm:$0xf]  ;;  %v16212_v35 = vld [vmem:[#allocation6 + $0x124] sm:$0xf0] }
  0xe5   :  { %v17753_v50 = vpack.c.bf16 %v885_v46, %v885_v46  ;;  %v11321_v46 = vld [vmem:[#allocation6 + $0x1c8] sm:$0xf] }
  0xe6   :  { %v814_v51 = vpop.f32.mrf.mxu2  ;;  %v790_v59 = vpop.f32.mrf.mxu0 }
  0xe7   :  { %v815_v57 = vadd.f32 %v814_v51, %v238_v43  ;;  %v827_v58 = vpop.f32.mrf.mxu3  ;;  %v803_v61 = vpop.f32.mrf.mxu1  ;;  %3251 = vmatmul.bf16.vlgmr.msrb.gmra.mxu2 %v17753_v50  ;;  %v12435_v43 = vld [vmem:[#allocation6 + $0xaa0] sm:$0xf0]  ;;  %v16364_v51 = vld [vmem:[#allocation6 + $0x5e4] sm:$0xf0] }
  0xe8   :  { %3347 = vmatpush.bf16.msrb.mxu2 %v12342_v48  ;;  %3340 = vmatpush.bf16.msrb.mxu1 %v11894_v60  ;;  %v16236_v48 = vld [vmem:[#allocation6 + $0x1e4] sm:$0xf0]  ;;  %v12438_v54 = vor.u32 %v16511_v42, %v12435_v43  ;;  %v12403_v59 = vld [vmem:[#allocation6 + $0xa60] sm:$0xf0]  ;;  %v11834_v61 = vor.u32 %v16364_v51, %v11833_v49  ;;  %v11226_v43 = vor.u32 %v16212_v35, %v11225_v33 }
  0xe9   :  { %v828_v1 = vadd.f32 %v827_v58, %v815_v57  ;;  %v12118_v57 = vor.u32 %v16431_v44, %v12115_v45  ;;  %v16503_v58 = vld [vmem:[#allocation6 + $0xa44] sm:$0xf]  ;;  %v11322_v60 = vor.u32 %v16236_v48, %v11321_v46  ;;  %v11513_v42 = vld [vmem:[#allocation6 + $0x348] sm:$0xf] }
  0xea   :  { %v12406_v62 = vor.u32 %v16503_v58, %v12403_v59  ;;  %v16284_v45 = vld [vmem:[#allocation6 + $0x364] sm:$0xf0] }
  0xeb   :  { %v886_v9 = vmax.f32 %v828_v1, 0.0  ;;  %v12025_v46 = vld [vmem:[#allocation6 + $0x748] sm:$0xf] }
  0xec   :  { %3348 = vmatpush.bf16.msrb.mxu2 %v12310_v2  ;;  %3341 = vmatpush.bf16.msrb.mxu1 %v11862_v8  ;;  %v11705_v48 = vld [vmem:[#allocation6 + $0x4c8] sm:$0xf] }
  0xed   :  { %v17756_v11 = vpack.c.bf16 %v886_v9, %v886_v9  ;;  %v16495_v9 = vld [vmem:[#allocation6 + $0xa04] sm:$0xf]  ;;  %v16332_v49 = vld [vmem:[#allocation6 + $0x4e4] sm:$0xf0] }
  0xee   :  { %v816_v52 = vpop.f32.mrf.mxu2  ;;  %v11193_v51 = vld [vmem:[#allocation6 + $0xc8] sm:$0xf]  ;;  %v11706_v58 = vor.u32 %v16332_v49, %v11705_v48 }
  0xef   :  { %v829_v16 = vpop.f32.mrf.mxu3  ;;  %3264 = vmatmul.bf16.vlgmr.msrb.gmra.mxu3 %v17756_v11  ;;  %v16276_v59 = vld [vmem:[#allocation6 + $0x324] sm:$0xf0] }
  0xf0   :  { %3360 = vmatpush.bf16.msrb.mxu3 %v12598_v10  ;;  %3349 = vmatpush.bf16.msrb.mxu2 %v12278_v12  ;;  %v12371_v12 = vld [vmem:[#allocation6 + $0xa20] sm:$0xf0]  ;;  %v12089_v16 = vld [vmem:[#allocation6 + $0x7c8] sm:$0xf] }
  0xf1   :  { %v12345_v33 = vld [vmem:[#allocation6 + $0x9c8] sm:$0xf] }
  0xf2   :  { %v11385_v35 = vld [vmem:[#allocation6 + $0x248] sm:$0xf] }
  0xf3   :  { %v16484_v49 = vld [vmem:[#allocation6 + $0x9a4] sm:$0xf0] }
  0xf4   :  { %3361 = vmatpush.bf16.msrb.mxu3 %v12566_v17  ;;  %3350 = vmatpush.bf16.msrb.mxu2 %v12246_v18  ;;  %v16428_v17 = vld [vmem:[#allocation6 + $0x7e4] sm:$0xf0] }
  0xf5   :  { %v11257_v18 = vld [vmem:[#allocation6 + $0x148] sm:$0xf]  ;;  %v12090_v25 = vor.u32 %v16428_v17, %v12089_v16 }
  0xf7   :  { %3303 = vmatmul.bf16.vlgmr.msra.gmra.mxu2 %v17745_v41 }
  0xf8   :  { %3362 = vmatpush.bf16.msrb.mxu3 %v12534_v23  ;;  %3351 = vmatpush.bf16.msrb.mxu2 %v12214_v24  ;;  %v12374_v23 = vor.u32 %v16495_v9, %v12371_v12  ;;  %v11578_v24 = vor.u32 %v16300_v14, %v11577_v13  ;;  %v16268_v9 = vld [vmem:[#allocation6 + $0x2e4] sm:$0xf0]  ;;  %v11162_v13 = vor.u32 %v16196_v5, %v11161_v4 }
  0xf9   :  { %v16396_v12 = vld [vmem:[#allocation6 + $0x6e4] sm:$0xf0] }
  0xfa   :  { %v11641_v14 = vld [vmem:[#allocation6 + $0x448] sm:$0xf] }
  0xfc   :  { %3363 = vmatpush.bf16.msrb.mxu3 %v12502_v29  ;;  %3352 = vmatpush.bf16.msrb.mxu2 %v12182_v31  ;;  %v11258_v29 = vor.u32 %v16220_v19, %v11257_v18  ;;  %v12057_v31 = vld [vmem:[#allocation6 + $0x788] sm:$0xf] }
  0xfd   :  { %v11417_v18 = vld [vmem:[#allocation6 + $0x288] sm:$0xf] }
  0xfe   :  { %v840_v36 = vpop.f32.mrf.mxu0 }
  0xff   :  { %v841_v38 = vadd.f32 %v840_v36, %v239_v30  ;;  %v853_v39 = vpop.f32.mrf.mxu1  ;;  %3316 = vmatmul.bf16.vlgmr.msra.gmra.mxu3 %v17748_v63  ;;  %v11770_v30 = vor.u32 %v16348_v21, %v11769_v20  ;;  %v11737_v36 = vld [vmem:[#allocation6 + $0x508] sm:$0xf] }
 0x100   :  { %3364 = vmatpush.bf16.msrb.mxu3 %v12470_v37  ;;  %3353 = vmatpush.bf16.msrb.mxu2 %v12150_v40  ;;  %v16340_v37 = vld [vmem:[#allocation6 + $0x524] sm:$0xf0]  ;;  %v12058_v40 = vor.u32 %v16420_v32, %v12057_v31 }
 0x101   :  { %v854_v47 = vadd.f32 %v853_v39, %v841_v38  ;;  %v11546_v39 = vor.u32 %v16292_v27, %v11545_v26  ;;  %v11738_v44 = vor.u32 %v16340_v37, %v11737_v36  ;;  %v16260_v20 = vld [vmem:[#allocation6 + $0x2a4] sm:$0xf0] }
 0x102   :  { %v11929_v21 = vld [vmem:[#allocation6 + $0x688] sm:$0xf]  ;;  %v11418_v31 = vor.u32 %v16260_v20, %v11417_v18 }
 0x103   :  { %v887_v56 = vmax.f32 %v854_v47, 0.0  ;;  %v16412_v47 = vld [vmem:[#allocation6 + $0x764] sm:$0xf0] }
 0x104   :  { %3365 = vmatpush.bf16.msrb.mxu3 %v12438_v54  ;;  %3354 = vmatpush.bf16.msrb.mxu2 %v12118_v57  ;;  %v11514_v54 = vor.u32 %v16284_v45, %v11513_v42  ;;  %v11481_v57 = vld [vmem:[#allocation6 + $0x308] sm:$0xf]  ;;  %v16224_v45 = vld [vmem:[#allocation6 + $0x18c] sm:$0xf] }
 0x105   :  { %v17763_v1 = vpack.c.bf16 %v887_v56, %v887_v56  ;;  %v12026_v56 = vor.u32 %v16412_v47, %v12025_v46  ;;  %v16308_v26 = vld [vmem:[#allocation6 + $0x424] sm:$0xf0]  ;;  %v11291_v46 = vld [vmem:[#allocation6 + $0x1a8] sm:$0xf0] }
 0x106   :  { %v866_v2 = vpop.f32.mrf.mxu2  ;;  %v842_v8 = vpop.f32.mrf.mxu0  ;;  %v16180_v27 = vld [vmem:[#allocation6 + $0x24] sm:$0xf0] }
 0x107   :  { %v867_v6 = vadd.f32 %v866_v2, %v240_v53  ;;  %v879_v7 = vpop.f32.mrf.mxu3  ;;  %v855_v10 = vpop.f32.mrf.mxu1  ;;  %3277 = vmatmul.bf16.vlgmr.msra.gmra.mxu0 %v17763_v1  ;;  %3355 = vmatmul.bf16.vlgmr.msrb.gmra.mxu2 %v17763_v1  ;;  %v16204_v53 = vld [vmem:[#allocation6 + $0xe4] sm:$0xf0] }
 0x108   :  { %3373 = vmatpush.bf16.msra.mxu0 %v11322_v60  ;;  %3399 = vmatpush.bf16.msra.mxu2 %v11834_v61  ;;  %v11993_v60 = vld [vmem:[#allocation6 + $0x708] sm:$0xf]  ;;  %v11194_v0 = vor.u32 %v16204_v53, %v11193_v51 }
 0x109   :  { %v880_v52 = vadd.f32 %v879_v7, %v867_v6  ;;  %3366 = vmatpush.bf16.msrb.mxu3 %v12406_v62  ;;  %v16404_v61 = vld [vmem:[#allocation6 + $0x724] sm:$0xf0]  ;;  %v11482_v6 = vor.u32 %v16276_v59, %v11481_v57 }
 0x10a   :  { %v11673_v2 = vld [vmem:[#allocation6 + $0x488] sm:$0xf]  ;;  %v11994_v7 = vor.u32 %v16404_v61, %v11993_v60  ;;  %v16296_v60 = vld [vmem:[#allocation6 + $0x3cc] sm:$0xf] }
 0x10b   :  { %v888_v22 = vmax.f32 %v880_v52, 0.0  ;;  %v11449_v8 = vld [vmem:[#allocation6 + $0x2c8] sm:$0xf]  ;;  %v11674_v62 = vor.u32 %v16324_v3, %v11673_v2  ;;  %v11579_v61 = vld [vmem:[#allocation6 + $0x3e8] sm:$0xf0] }
 0x10c   :  { %3374 = vmatpush.bf16.msra.mxu0 %v11290_v15  ;;  %3400 = vmatpush.bf16.msra.mxu2 %v11802_v55  ;;  %v11961_v10 = vld [vmem:[#allocation6 + $0x6c8] sm:$0xf]  ;;  %v11450_v16 = vor.u32 %v16268_v9, %v11449_v8  ;;  %v16216_v2 = vld [vmem:[#allocation6 + $0x14c] sm:$0xf] }
 0x10d   :  { %v17767_v28 = vpack.c.bf16 %v888_v22, %v888_v22  ;;  %3367 = vmatpush.bf16.msrb.mxu3 %v12374_v23  ;;  %v16316_v52 = vld [vmem:[#allocation6 + $0x464] sm:$0xf0]  ;;  %v11962_v17 = vor.u32 %v16396_v12, %v11961_v10  ;;  %v11259_v3 = vld [vmem:[#allocation6 + $0x168] sm:$0xf0] }
 0x10e   :  { %v868_v34 = vpop.f32.mrf.mxu2  ;;  %v11129_v15 = vld [vmem:[#allocation6 + $0x48] sm:$0xf]  ;;  %v11642_v19 = vor.u32 %v16316_v52, %v11641_v14  ;;  %v11262_v10 = vor.u32 %v16216_v2, %v11259_v3  ;;  %v11547_v14 = vld [vmem:[#allocation6 + $0x3a8] sm:$0xf0] }
 0x10f   :  { %v881_v38 = vpop.f32.mrf.mxu3  ;;  %3290 = vmatmul.bf16.vlgmr.msra.gmra.mxu1 %v17767_v28  ;;  %v16188_v55 = vld [vmem:[#allocation6 + $0x64] sm:$0xf0]  ;;  %v16256_v3 = vld [vmem:[#allocation6 + $0x28c] sm:$0xf] }
 0x110   :  { %3386 = vmatpush.bf16.msra.mxu1 %v11578_v24  ;;  %3375 = vmatpush.bf16.msra.mxu0 %v11258_v29  ;;  %v16388_v22 = vld [vmem:[#allocation6 + $0x6a4] sm:$0xf0]  ;;  %v11130_v23 = vor.u32 %v16188_v55, %v11129_v15  ;;  %v16232_v29 = vld [vmem:[#allocation6 + $0x1cc] sm:$0xf] }
 0x111   :  { %3412 = vmatpush.bf16.msra.mxu3 %v12090_v25  ;;  %3401 = vmatpush.bf16.msra.mxu2 %v11770_v30  ;;  %v11097_v24 = vld [vmem:[#allocation6 + $0x8] sm:$0xf]  ;;  %v11323_v30 = vld [vmem:[#allocation6 + $0x1e8] sm:$0xf0]  ;;  %v11930_v32 = vor.u32 %v16388_v22, %v11929_v21 }
 0x112   :  { %3368 = vmatmul.bf16.vlgmr.msrb.gmra.mxu3 %v17767_v28  ;;  %v11609_v25 = vld [vmem:[#allocation6 + $0x408] sm:$0xf]  ;;  %v11326_v42 = vor.u32 %v16232_v29, %v11323_v30  ;;  %v16208_v15 = vld [vmem:[#allocation6 + $0x10c] sm:$0xf] }
 0x113   :  { %v16492_v34 = vld [vmem:[#allocation6 + $0x9e4] sm:$0xf0]  ;;  %v11610_v36 = vor.u32 %v16308_v26, %v11609_v25  ;;  %v11227_v55 = vld [vmem:[#allocation6 + $0x128] sm:$0xf0] }
 0x114   :  { %3387 = vmatpush.bf16.msra.mxu1 %v11546_v39  ;;  %3376 = vmatpush.bf16.msra.mxu0 %v11226_v43  ;;  %v16252_v37 = vld [vmem:[#allocation6 + $0x264] sm:$0xf0]  ;;  %v12346_v43 = vor.u32 %v16492_v34, %v12345_v33  ;;  %v11230_v21 = vor.u32 %v16208_v15, %v11227_v55  ;;  %v16200_v26 = vld [vmem:[#allocation6 + $0xcc] sm:$0xf] }
 0x115   :  { %3413 = vmatpush.bf16.msra.mxu3 %v12058_v40  ;;  %3402 = vmatpush.bf16.msra.mxu2 %v11738_v44  ;;  %v11897_v38 = vld [vmem:[#allocation6 + $0x648] sm:$0xf]  ;;  %v11098_v40 = vor.u32 %v16180_v27, %v11097_v24  ;;  %v11386_v47 = vor.u32 %v16252_v37, %v11385_v35  ;;  %v11515_v24 = vld [vmem:[#allocation6 + $0x368] sm:$0xf0] }
 0x116   :  { %v16380_v39 = vld [vmem:[#allocation6 + $0x664] sm:$0xf0]  ;;  %v11195_v27 = vld [vmem:[#allocation6 + $0xe8] sm:$0xf0] }
 0x117   :  { %3329 = vmatmul.bf16.vlgmr.msrb.gmra.mxu0 %v17753_v50  ;;  %v12313_v44 = vld [vmem:[#allocation6 + $0x988] sm:$0xf]  ;;  %v11898_v48 = vor.u32 %v16380_v39, %v11897_v38  ;;  %v11198_v34 = vor.u32 %v16200_v26, %v11195_v27  ;;  %v11483_v37 = vld [vmem:[#allocation6 + $0x328] sm:$0xf0] }
 0x118   :  { %3388 = vmatpush.bf16.msra.mxu1 %v11514_v54  ;;  %3377 = vmatpush.bf16.msra.mxu0 %v11194_v0  ;;  %v11353_v51 = vld [vmem:[#allocation6 + $0x208] sm:$0xf]  ;;  %v12314_v0 = vor.u32 %v16484_v49, %v12313_v44  ;;  %v16192_v39 = vld [vmem:[#allocation6 + $0x8c] sm:$0xf] }
 0x119   :  { %3414 = vmatpush.bf16.msra.mxu3 %v12026_v56  ;;  %3403 = vmatpush.bf16.msra.mxu2 %v11706_v58  ;;  %v16244_v53 = vld [vmem:[#allocation6 + $0x224] sm:$0xf0]  ;;  %v11294_v58 = vor.u32 %v16224_v45, %v11291_v46  ;;  %v16264_v49 = vld [vmem:[#allocation6 + $0x2cc] sm:$0xf] }
 0x11a   :  { %v11865_v54 = vld [vmem:[#allocation6 + $0x608] sm:$0xf]  ;;  %v11354_v4 = vor.u32 %v16244_v53, %v11353_v51  ;;  %v11451_v51 = vld [vmem:[#allocation6 + $0x2e8] sm:$0xf0] }
 0x11b   :  { %v16372_v56 = vld [vmem:[#allocation6 + $0x624] sm:$0xf0]  ;;  %v11803_v27 = vld [vmem:[#allocation6 + $0x5a8] sm:$0xf0] }
 0x11c   :  { %3389 = vmatpush.bf16.msra.mxu1 %v11482_v6  ;;  %3378 = vmatpush.bf16.msra.mxu0 %v11162_v13  ;;  %v12601_v57 = vld [vmem:[#allocation6 + $0xbc8] sm:$0xf]  ;;  %v11866_v5 = vor.u32 %v16372_v56, %v11865_v54  ;;  %v16288_v13 = vld [vmem:[#allocation6 + $0x38c] sm:$0xf] }
 0x11d   :  { %3415 = vmatpush.bf16.msra.mxu3 %v11994_v7  ;;  %3404 = vmatpush.bf16.msra.mxu2 %v11674_v62  ;;  %v16556_v59 = vld [vmem:[#allocation6 + $0xbe4] sm:$0xf0]  ;;  %v11582_v62 = vor.u32 %v16296_v60, %v11579_v61  ;;  %v16184_v54 = vld [vmem:[#allocation6 + $0x4c] sm:$0xf]  ;;  %v11454_v60 = vor.u32 %v16264_v49, %v11451_v51  ;;  %v17779_v49 = vld [vmem:[#allocation7] sm:$0xff] }
 0x11e   :  { %v12281_v6 = vld [vmem:[#allocation6 + $0x948] sm:$0xf]  ;;  %v12602_v8 = vor.u32 %v16556_v59, %v12601_v57  ;;  %v11131_v56 = vld [vmem:[#allocation6 + $0x68] sm:$0xf0] }
 0x11f   :  { %3342 = vmatmul.bf16.vlgmr.msrb.gmra.mxu1 %v17756_v11  ;;  %v16476_v7 = vld [vmem:[#allocation6 + $0x964] sm:$0xf0] }
 0x120   :  { %3390 = vmatpush.bf16.msra.mxu1 %v11450_v16  ;;  %3379 = vmatpush.bf16.msra.mxu0 %v11130_v23  ;;  %v12569_v9 = vld [vmem:[#allocation6 + $0xb88] sm:$0xf]  ;;  %v12282_v52 = vor.u32 %v16476_v7, %v12281_v6  ;;  %v16280_v23 = vld [vmem:[#allocation6 + $0x34c] sm:$0xf] }
 0x121   :  { %3416 = vmatpush.bf16.msra.mxu3 %v11962_v17  ;;  %3405 = vmatpush.bf16.msra.mxu2 %v11642_v19  ;;  %v16548_v12 = vld [vmem:[#allocation6 + $0xba4] sm:$0xf0]  ;;  %v11550_v19 = vor.u32 %v16288_v13, %v11547_v14  ;;  %v16176_v7 = vld [vmem:[#allocation6 + $0xc] sm:$0xf] }
 0x122   :  { %v12249_v16 = vld [vmem:[#allocation6 + $0x908] sm:$0xf]  ;;  %v12570_v18 = vor.u32 %v16548_v12, %v12569_v9  ;;  %v16488_v9 = vld [vmem:[#allocation6 + $0x9cc] sm:$0xf] }
 0x123   :  { %v16468_v17 = vld [vmem:[#allocation6 + $0x924] sm:$0xf0]  ;;  %v16360_v14 = vld [vmem:[#allocation6 + $0x5cc] sm:$0xf] }
 0x124   :  { %3391 = vmatpush.bf16.msra.mxu1 %v11418_v31  ;;  %3380 = vmatpush.bf16.msra.mxu0 %v11098_v40  ;;  %v12537_v20 = vld [vmem:[#allocation6 + $0xb48] sm:$0xf]  ;;  %v12250_v25 = vor.u32 %v16468_v17, %v12249_v16  ;;  %v11163_v40 = vld [vmem:[#allocation6 + $0xa8] sm:$0xf0] }
 0x125   :  { %3417 = vmatpush.bf16.msra.mxu3 %v11930_v32  ;;  %3406 = vmatpush.bf16.msra.mxu2 %v11610_v36  ;;  %v16540_v22 = vld [vmem:[#allocation6 + $0xb64] sm:$0xf0]  ;;  %v11518_v32 = vor.u32 %v16280_v23, %v11515_v24  ;;  %v16272_v36 = vld [vmem:[#allocation6 + $0x30c] sm:$0xf] }
 0x126   :  { %v12217_v29 = vld [vmem:[#allocation6 + $0x8c8] sm:$0xf]  ;;  %v12538_v31 = vor.u32 %v16540_v22, %v12537_v20  ;;  %v11486_v45 = vor.u32 %v16272_v36, %v11483_v37  ;;  %v16248_v17 = vld [vmem:[#allocation6 + $0x24c] sm:$0xf] }
 0x127   :  { %3381 = vmatmul.bf16.vlgmr.msra.gmra.mxu0 %v17745_v41  ;;  %v16460_v30 = vld [vmem:[#allocation6 + $0x8e4] sm:$0xf0]  ;;  %v16352_v22 = vld [vmem:[#allocation6 + $0x58c] sm:$0xf] }
 0x128   :  { %3425 = vmatpush.bf16.msrb.mxu0 %v12346_v43  ;;  %3392 = vmatpush.bf16.msra.mxu1 %v11386_v47  ;;  %v12505_v33 = vld [vmem:[#allocation6 + $0xb08] sm:$0xf]  ;;  %v12218_v38 = vor.u32 %v16460_v30, %v12217_v29  ;;  %v11166_v47 = vor.u32 %v16192_v39, %v11163_v40  ;;  %v16480_v23 = vld [vmem:[#allocation6 + $0x98c] sm:$0xf] }
 0x129   :  { %3451 = vmatpush.bf16.msrb.mxu2 %v11326_v42  ;;  %3418 = vmatpush.bf16.msra.mxu3 %v11898_v48  ;;  %v16532_v35 = vld [vmem:[#allocation6 + $0xb24] sm:$0xf0]  ;;  %v12315_v24 = vld [vmem:[#allocation6 + $0x9a8] sm:$0xf0] }
 0x12a   :  { %3407 = vmatmul.bf16.vlgmr.msra.gmra.mxu2 %v17753_v50  ;;  %v12185_v42 = vld [vmem:[#allocation6 + $0x888] sm:$0xf]  ;;  %v12506_v44 = vor.u32 %v16532_v35, %v12505_v33  ;;  %v16424_v33 = vld [vmem:[#allocation6 + $0x7cc] sm:$0xf] }
 0x12b   :  { %v16452_v43 = vld [vmem:[#allocation6 + $0x8a4] sm:$0xf0]  ;;  %v12091_v35 = vld [vmem:[#allocation6 + $0x7e8] sm:$0xf0] }
 0x12c   :  { %3426 = vmatpush.bf16.msrb.mxu0 %v12314_v0  ;;  %3393 = vmatpush.bf16.msra.mxu1 %v11354_v4  ;;  %v12473_v46 = vld [vmem:[#allocation6 + $0xac8] sm:$0xf]  ;;  %v12186_v53 = vor.u32 %v16452_v43, %v12185_v42  ;;  %v11134_v0 = vor.u32 %v16184_v54, %v11131_v56  ;;  %v11419_v4 = vld [vmem:[#allocation6 + $0x2a8] sm:$0xf0] }
 0x12d   :  { %3452 = vmatpush.bf16.msrb.mxu2 %v11294_v58  ;;  %3419 = vmatpush.bf16.msra.mxu3 %v11866_v5  ;;  %v16524_v48 = vld [vmem:[#allocation6 + $0xae4] sm:$0xf0]  ;;  %v11422_v13 = vor.u32 %v16256_v3, %v11419_v4  ;;  %v16552_v36 = vld [vmem:[#allocation6 + $0xbcc] sm:$0xf] }
 0x12e   :  { %v12153_v57 = vld [vmem:[#allocation6 + $0x848] sm:$0xf]  ;;  %v12474_v59 = vor.u32 %v16524_v48, %v12473_v46  ;;  %v12603_v37 = vld [vmem:[#allocation6 + $0xbe8] sm:$0xf0] }
 0x12f   :  { %3394 = vmatmul.bf16.vlgmr.msra.gmra.mxu1 %v17748_v63  ;;  %v16444_v58 = vld [vmem:[#allocation6 + $0x864] sm:$0xf0]  ;;  %v16472_v39 = vld [vmem:[#allocation6 + $0x94c] sm:$0xf]  ;;  %v12606_v46 = vor.u32 %v16552_v36, %v12603_v37 }
 0x130   :  { %3438 = vmatpush.bf16.msrb.mxu1 %v12602_v8  ;;  %3420 = vmatmul.bf16.vlgmr.msra.gmra.mxu3 %v17756_v11  ;;  %v12441_v61 = vld [vmem:[#allocation6 + $0xa88] sm:$0xf]  ;;  %v12154_v5 = vor.u32 %v16444_v58, %v12153_v57  ;;  %v11099_v8 = vld [vmem:[#allocation6 + $0x28] sm:$0xf0] }
 0x131   :  { %3464 = vmatpush.bf16.msrb.mxu3 %v11582_v62  ;;  %3453 = vmatpush.bf16.msrb.mxu2 %v11262_v10  ;;  %v16516_v2 = vld [vmem:[#allocation6 + $0xaa4] sm:$0xf0]  ;;  %v12347_v10 = vld [vmem:[#allocation6 + $0x9e8] sm:$0xf0]  ;;  %v11102_v55 = vor.u32 %v16176_v7, %v11099_v8 }
 0x132   :  { %3427 = vmatpush.bf16.msrb.mxu0 %v12282_v52  ;;  %v12121_v6 = vld [vmem:[#allocation6 + $0x808] sm:$0xf]  ;;  %v12442_v12 = vor.u32 %v16516_v2, %v12441_v61  ;;  %v11835_v52 = vld [vmem:[#allocation6 + $0x5e8] sm:$0xf0]  ;;  %v12350_v20 = vor.u32 %v16488_v9, %v12347_v10 }
 0x133   :  { %v16436_v62 = vld [vmem:[#allocation6 + $0x824] sm:$0xf0]  ;;  %v12283_v40 = vld [vmem:[#allocation6 + $0x968] sm:$0xf0] }
 0x134   :  { %3439 = vmatpush.bf16.msrb.mxu1 %v12570_v18  ;;  %v12409_v15 = vld [vmem:[#allocation6 + $0xa48] sm:$0xf]  ;;  %v11387_v18 = vld [vmem:[#allocation6 + $0x268] sm:$0xf0]  ;;  %v12286_v51 = vor.u32 %v16472_v39, %v12283_v40 }
 0x135   :  { %3465 = vmatpush.bf16.msrb.mxu3 %v11550_v19  ;;  %3454 = vmatpush.bf16.msrb.mxu2 %v11230_v21  ;;  %v16508_v16 = vld [vmem:[#allocation6 + $0xa64] sm:$0xf0]  ;;  %v12122_v19 = vor.u32 %v16436_v62, %v12121_v6  ;;  %v11838_v21 = vor.u32 %v16360_v14, %v11835_v52  ;;  %v11390_v26 = vor.u32 %v16248_v17, %v11387_v18  ;;  %v16416_v48 = vld [vmem:[#allocation6 + $0x78c] sm:$0xf] }
 0x136   :  { %3428 = vmatpush.bf16.msrb.mxu0 %v12250_v25  ;;  %v12410_v25 = vor.u32 %v16508_v16, %v12409_v15  ;;  %v12377_v29 = vld [vmem:[#allocation6 + $0xa08] sm:$0xf]  ;;  %v16544_v54 = vld [vmem:[#allocation6 + $0xb8c] sm:$0xf] }
 0x137   :  { %v16500_v30 = vld [vmem:[#allocation6 + $0xa24] sm:$0xf0]  ;;  %v12571_v56 = vld [vmem:[#allocation6 + $0xba8] sm:$0xf0] }
 0x138   :  { %3440 = vmatpush.bf16.msrb.mxu1 %v12538_v31  ;;  %v16240_v31 = vld [vmem:[#allocation6 + $0x20c] sm:$0xf]  ;;  %v12378_v42 = vor.u32 %v16500_v30, %v12377_v29 }
 0x139   :  { %3466 = vmatpush.bf16.msrb.mxu3 %v11518_v32  ;;  %3455 = vmatpush.bf16.msrb.mxu2 %v11198_v34  ;;  %v11355_v32 = vld [vmem:[#allocation6 + $0x228] sm:$0xf0]  ;;  %v12318_v34 = vor.u32 %v16480_v23, %v12315_v24 }
 0x13a   :  { %3429 = vmatpush.bf16.msrb.mxu0 %v12218_v38  ;;  %v11806_v38 = vor.u32 %v16352_v22, %v11803_v27  ;;  %v11358_v43 = vor.u32 %v16240_v31, %v11355_v32  ;;  %v16464_v57 = vld [vmem:[#allocation6 + $0x90c] sm:$0xf] }
 0x13b   :  { %v12251_v58 = vld [vmem:[#allocation6 + $0x928] sm:$0xf0] }
 0x13c   :  { %3441 = vmatpush.bf16.msrb.mxu1 %v12506_v44  ;;  %v16344_v44 = vld [vmem:[#allocation6 + $0x54c] sm:$0xf] }
 0x13d   :  { %3467 = vmatpush.bf16.msrb.mxu3 %v11486_v45  ;;  %3456 = vmatpush.bf16.msrb.mxu2 %v11166_v47  ;;  %v12094_v45 = vor.u32 %v16424_v33, %v12091_v35  ;;  %v11771_v47 = vld [vmem:[#allocation6 + $0x568] sm:$0xf0] }
 0x13e   :  { %3430 = vmatpush.bf16.msrb.mxu0 %v12186_v53  ;;  %v12059_v53 = vld [vmem:[#allocation6 + $0x7a8] sm:$0xf0] }
 0x13f   :  { %v12062_v61 = vor.u32 %v16416_v48, %v12059_v53  ;;  %v16336_v2 = vld [vmem:[#allocation6 + $0x50c] sm:$0xf] }
 0x140   :  { %3442 = vmatpush.bf16.msrb.mxu1 %v12474_v59  ;;  %v11774_v59 = vor.u32 %v16344_v44, %v11771_v47  ;;  %v11739_v3 = vld [vmem:[#allocation6 + $0x528] sm:$0xf0] }
 0x141   :  { %3468 = vmatpush.bf16.msrb.mxu3 %v11454_v60  ;;  %3457 = vmatpush.bf16.msrb.mxu2 %v11134_v0  ;;  %v1281_v60 = vperm.slane %v17779_v49, 0  ;;  %v12574_v0 = vor.u32 %v16544_v54, %v12571_v56  ;;  %v16408_v4 = vld [vmem:[#allocation6 + $0x74c] sm:$0xf] }
 0x142   :  { %3431 = vmatpush.bf16.msrb.mxu0 %v12154_v5  ;;  %v12254_v5 = vor.u32 %v16464_v57, %v12251_v58  ;;  %v12027_v6 = vld [vmem:[#allocation6 + $0x768] sm:$0xf0]  ;;  %v11841_v58 = vld [vmem:[#allocation6 + $0x5d0] sm:$0xf] }
 0x143   :  { %v16536_v7 = vld [vmem:[#allocation6 + $0xb4c] sm:$0xf]  ;;  %v12030_v14 = vor.u32 %v16408_v4, %v12027_v6 }
 0x144   :  { %3443 = vmatpush.bf16.msrb.mxu1 %v12442_v12  ;;  %v12539_v8 = vld [vmem:[#allocation6 + $0xb68] sm:$0xf0]  ;;  %v3226_v62 = vpop.f32.mrf.mxu0  ;;  %v11742_v12 = vor.u32 %v16336_v2, %v11739_v3  ;;  %v11329_v3 = vld [vmem:[#allocation6 + $0x1d0] sm:$0xf] }
 0x145   :  { %3469 = vmatpush.bf16.msrb.mxu3 %v11422_v13  ;;  %3458 = vmatpush.bf16.msrb.mxu2 %v11102_v55  ;;  %v16456_v9 = vld [vmem:[#allocation6 + $0x8cc] sm:$0xf]  ;;  %v3227_v13 = vadd.f32 %v3226_v62, %v1281_v60  ;;  %v12542_v52 = vor.u32 %v16536_v7, %v12539_v8 }
 0x146   :  { %3432 = vmatpush.bf16.msrb.mxu0 %v12122_v19  ;;  %v12219_v10 = vld [vmem:[#allocation6 + $0x8e8] sm:$0xf0] }
 0x147   :  { %v16328_v15 = vld [vmem:[#allocation6 + $0x4cc] sm:$0xf]  ;;  %v12222_v17 = vor.u32 %v16456_v9, %v12219_v10 }
 0x148   :  { %3444 = vmatpush.bf16.msrb.mxu1 %v12410_v25  ;;  %3459 = vmatmul.bf16.vlgmr.msrb.gmra.mxu2 %v17745_v41  ;;  %v11707_v55 = vld [vmem:[#allocation6 + $0x4e8] sm:$0xf0] }
 0x149   :  { %3503 = vmatpush.bf16.msra.mxu2 %v12350_v20  ;;  %3470 = vmatpush.bf16.msrb.mxu3 %v11390_v26  ;;  %v16400_v16 = vld [vmem:[#allocation6 + $0x70c] sm:$0xf]  ;;  %v11710_v24 = vor.u32 %v16328_v15, %v11707_v55  ;;  %v11297_v15 = vld [vmem:[#allocation6 + $0x190] sm:$0xf] }
 0x14a   :  { %3477 = vmatpush.bf16.msra.mxu0 %v11838_v21  ;;  %v11995_v18 = vld [vmem:[#allocation6 + $0x728] sm:$0xf0]  ;;  %v16229_v55 = vld [vmem:[#allocation6 + $0x1ac] sm:$0xf0] }
 0x14b   :  { %3433 = vmatmul.bf16.vlgmr.msrb.gmra.mxu0 %v17763_v1  ;;  %v16528_v19 = vld [vmem:[#allocation6 + $0xb0c] sm:$0xf]  ;;  %v11998_v26 = vor.u32 %v16400_v16, %v11995_v18 }
 0x14c   :  { %3445 = vmatpush.bf16.msrb.mxu1 %v12378_v42  ;;  %v12507_v20 = vld [vmem:[#allocation6 + $0xb28] sm:$0xf0]  ;;  %v3239_v21 = vpop.f32.mrf.mxu1  ;;  %v3228_v36 = vpop.f32.mrf.mxu0 }
 0x14d   :  { %3504 = vmatpush.bf16.msra.mxu2 %v12318_v34  ;;  %3471 = vmatpush.bf16.msrb.mxu3 %v11358_v43  ;;  %v16448_v22 = vld [vmem:[#allocation6 + $0x88c] sm:$0xf]  ;;  %v17784_v25 = vadd.f32 %v3239_v21, %v3227_v13  ;;  %v12510_v27 = vor.u32 %v16528_v19, %v12507_v20  ;;  %v16357_v13 = vld [vmem:[#allocation6 + $0x5ac] sm:$0xf0] }
 0x14e   :  { %3478 = vmatpush.bf16.msra.mxu0 %v11806_v38  ;;  %v12187_v23 = vld [vmem:[#allocation6 + $0x8a8] sm:$0xf0] }
 0x14f   :  { %3446 = vmatmul.bf16.vlgmr.msrb.gmra.mxu1 %v17767_v28  ;;  %v16320_v29 = vld [vmem:[#allocation6 + $0x48c] sm:$0xf]  ;;  %v12190_v32 = vor.u32 %v16448_v22, %v12187_v23  ;;  %v11585_v22 = vld [vmem:[#allocation6 + $0x3d0] sm:$0xf] }
 0x150   :  { %3490 = vmatpush.bf16.msra.mxu1 %v12094_v45  ;;  %3472 = vmatmul.bf16.vlgmr.msrb.gmra.mxu3 %v17748_v63  ;;  %v11675_v30 = vld [vmem:[#allocation6 + $0x4a8] sm:$0xf0]  ;;  %v16301_v23 = vld [vmem:[#allocation6 + $0x3ec] sm:$0xf0] }
 0x151   :  { %3516 = vmatpush.bf16.msra.mxu3 %v12606_v46  ;;  %3505 = vmatpush.bf16.msra.mxu2 %v12286_v51  ;;  %v16392_v31 = vld [vmem:[#allocation6 + $0x6cc] sm:$0xf]  ;;  %v11678_v39 = vor.u32 %v16320_v29, %v11675_v30  ;;  %v16349_v29 = vld [vmem:[#allocation6 + $0x56c] sm:$0xf0]  ;;  %v11298_v30 = vor.u32 %v16229_v55, %v11297_v15 }
 0x152   :  { %3479 = vmatpush.bf16.msra.mxu0 %v11774_v59  ;;  %v11963_v33 = vld [vmem:[#allocation6 + $0x6e8] sm:$0xf0]  ;;  %v16365_v59 = vld [vmem:[#allocation6 + $0x5ec] sm:$0xf0] }
 0x153   :  { %v16520_v34 = vld [vmem:[#allocation6 + $0xacc] sm:$0xf]  ;;  %v11966_v40 = vor.u32 %v16392_v31, %v11963_v33  ;;  %v11842_v8 = vor.u32 %v16365_v59, %v11841_v58  ;;  %v11586_v33 = vor.u32 %v16301_v23, %v11585_v22  ;;  %v16413_v58 = vld [vmem:[#allocation6 + $0x76c] sm:$0xf0] }
 0x154   :  { %3491 = vmatpush.bf16.msra.mxu1 %v12062_v61  ;;  %v12475_v35 = vld [vmem:[#allocation6 + $0xae8] sm:$0xf0]  ;;  %v3241_v53 = vpop.f32.mrf.mxu1  ;;  %v11713_v59 = vld [vmem:[#allocation6 + $0x4d0] sm:$0xf] }
 0x155   :  { %3517 = vmatpush.bf16.msra.mxu3 %v12574_v0  ;;  %3506 = vmatpush.bf16.msra.mxu2 %v12254_v5  ;;  %v16440_v37 = vld [vmem:[#allocation6 + $0x84c] sm:$0xf]  ;;  %v12478_v42 = vor.u32 %v16520_v34, %v12475_v35  ;;  %v16237_v5 = vld [vmem:[#allocation6 + $0x1ec] sm:$0xf0] }
 0x156   :  { %3480 = vmatpush.bf16.msra.mxu0 %v11742_v12  ;;  %v12155_v38 = vld [vmem:[#allocation6 + $0x868] sm:$0xf0]  ;;  %v11809_v12 = vld [vmem:[#allocation6 + $0x590] sm:$0xf] }
 0x157   :  { %v16312_v43 = vld [vmem:[#allocation6 + $0x44c] sm:$0xf]  ;;  %v12158_v46 = vor.u32 %v16440_v37, %v12155_v38  ;;  %v11810_v21 = vor.u32 %v16357_v13, %v11809_v12  ;;  %v11265_v34 = vld [vmem:[#allocation6 + $0x150] sm:$0xf] }
 0x158   :  { %3492 = vmatpush.bf16.msra.mxu1 %v12030_v14  ;;  %v11643_v44 = vld [vmem:[#allocation6 + $0x468] sm:$0xf0]  ;;  %v11330_v14 = vor.u32 %v16237_v5, %v11329_v3  ;;  %v16221_v35 = vld [vmem:[#allocation6 + $0x16c] sm:$0xf0] }
 0x159   :  { %3518 = vmatpush.bf16.msra.mxu3 %v12542_v52  ;;  %3507 = vmatpush.bf16.msra.mxu2 %v12222_v17  ;;  %v16384_v45 = vld [vmem:[#allocation6 + $0x68c] sm:$0xf]  ;;  %v11646_v57 = vor.u32 %v16312_v43, %v11643_v44  ;;  %v11553_v38 = vld [vmem:[#allocation6 + $0x390] sm:$0xf] }
 0x15a   :  { %3481 = vmatpush.bf16.msra.mxu0 %v11710_v24  ;;  %v11931_v47 = vld [vmem:[#allocation6 + $0x6a8] sm:$0xf0]  ;;  %v12097_v24 = vld [vmem:[#allocation6 + $0x7d0] sm:$0xf] }
 0x15b   :  { %v16512_v48 = vld [vmem:[#allocation6 + $0xa8c] sm:$0xf]  ;;  %v11934_v60 = vor.u32 %v16384_v45, %v11931_v47  ;;  %v11745_v43 = vld [vmem:[#allocation6 + $0x510] sm:$0xf]  ;;  %v11266_v45 = vor.u32 %v16221_v35, %v11265_v34 }
 0x15c   :  { %3493 = vmatpush.bf16.msra.mxu1 %v11998_v26  ;;  %v12443_v51 = vld [vmem:[#allocation6 + $0xaa8] sm:$0xf0]  ;;  %v16429_v26 = vld [vmem:[#allocation6 + $0x7ec] sm:$0xf0] }
 0x15d   :  { %3519 = vmatpush.bf16.msra.mxu3 %v12510_v27  ;;  %3508 = vmatpush.bf16.msra.mxu2 %v12190_v32  ;;  %v16432_v54 = vld [vmem:[#allocation6 + $0x80c] sm:$0xf]  ;;  %v12446_v61 = vor.u32 %v16512_v48, %v12443_v51  ;;  %v11777_v27 = vld [vmem:[#allocation6 + $0x550] sm:$0xf]  ;;  %v12098_v36 = vor.u32 %v16429_v26, %v12097_v24 }
 0x15e   :  { %v12123_v56 = vld [vmem:[#allocation6 + $0x828] sm:$0xf0]  ;;  %3482 = vmatpush.bf16.msra.mxu0 %v11678_v39  ;;  %v11778_v37 = vor.u32 %v16349_v29, %v11777_v27  ;;  %v16293_v39 = vld [vmem:[#allocation6 + $0x3ac] sm:$0xf0] }
 0x15f   :  { %v16304_v0 = vld [vmem:[#allocation6 + $0x40c] sm:$0xf]  ;;  %v12126_v4 = vor.u32 %v16432_v54, %v12123_v56  ;;  %v16341_v44 = vld [vmem:[#allocation6 + $0x52c] sm:$0xf0] }
 0x160   :  { %3494 = vmatpush.bf16.msra.mxu1 %v11966_v40  ;;  %v11611_v2 = vld [vmem:[#allocation6 + $0x428] sm:$0xf0]  ;;  %v12065_v40 = vld [vmem:[#allocation6 + $0x790] sm:$0xf]  ;;  %v11746_v53 = vor.u32 %v16341_v44, %v11745_v43  ;;  %v11331_v43 = vld [vmem:[#allocation6 + $0x1f0] sm:$0xf0] }
 0x161   :  { %3520 = vmatpush.bf16.msra.mxu3 %v12478_v42  ;;  %3509 = vmatpush.bf16.msra.mxu2 %v12158_v46  ;;  %v16376_v6 = vld [vmem:[#allocation6 + $0x64c] sm:$0xf]  ;;  %v11614_v10 = vor.u32 %v16304_v0, %v11611_v2  ;;  %v16421_v42 = vld [vmem:[#allocation6 + $0x7ac] sm:$0xf0]  ;;  %v11554_v46 = vor.u32 %v16293_v39, %v11553_v38 }
 0x162   :  { %v11899_v7 = vld [vmem:[#allocation6 + $0x668] sm:$0xf0]  ;;  %3483 = vmatpush.bf16.msra.mxu0 %v11646_v57  ;;  %v11233_v47 = vld [vmem:[#allocation6 + $0x110] sm:$0xf]  ;;  %v12066_v51 = vor.u32 %v16421_v42, %v12065_v40  ;;  %v16233_v42 = vld [vmem:[#allocation6 + $0x1d4] sm:$0xf] }
 0x163   :  { %v16504_v62 = vld [vmem:[#allocation6 + $0xa4c] sm:$0xf]  ;;  %v11902_v52 = vor.u32 %v16376_v6, %v11899_v7  ;;  %v16213_v48 = vld [vmem:[#allocation6 + $0x12c] sm:$0xf0] }
 0x164   :  { %v12411_v9 = vld [vmem:[#allocation6 + $0xa68] sm:$0xf0]  ;;  %3495 = vmatpush.bf16.msra.mxu1 %v11934_v60  ;;  %v11521_v54 = vld [vmem:[#allocation6 + $0x350] sm:$0xf] }
 0x165   :  { %3521 = vmatpush.bf16.msra.mxu3 %v12446_v61  ;;  %v16368_v16 = vld [vmem:[#allocation6 + $0x60c] sm:$0xf]  ;;  %3510 = vmatpush.bf16.msra.mxu2 %v12126_v4  ;;  %v12414_v17 = vor.u32 %v16504_v62, %v12411_v9  ;;  %v16285_v56 = vld [vmem:[#allocation6 + $0x36c] sm:$0xf0]  ;;  %v11234_v61 = vor.u32 %v16213_v48, %v11233_v47 }
 0x166   :  { %v11867_v18 = vld [vmem:[#allocation6 + $0x628] sm:$0xf0]  ;;  %3484 = vmatpush.bf16.msra.mxu0 %v11614_v10  ;;  %v12033_v57 = vld [vmem:[#allocation6 + $0x750] sm:$0xf]  ;;  %v11522_v0 = vor.u32 %v16285_v56, %v11521_v54 }
 0x167   :  { %v16496_v19 = vld [vmem:[#allocation6 + $0xa0c] sm:$0xf]  ;;  %v11870_v31 = vor.u32 %v16368_v16, %v11867_v18  ;;  %v16333_v60 = vld [vmem:[#allocation6 + $0x4ec] sm:$0xf0]  ;;  %v12034_v4 = vor.u32 %v16413_v58, %v12033_v57  ;;  %v11334_v57 = vor.u32 %v16233_v42, %v11331_v43 }
 0x168   :  { %v12379_v20 = vld [vmem:[#allocation6 + $0xa28] sm:$0xf0]  ;;  %3496 = vmatpush.bf16.msra.mxu1 %v11902_v52  ;;  %3511 = vmatmul.bf16.vlgmr.msra.gmra.mxu2 %v17763_v1  ;;  %v11201_v2 = vld [vmem:[#allocation6 + $0xd0] sm:$0xf]  ;;  %v11714_v5 = vor.u32 %v16333_v60, %v11713_v59 }
 0x169   :  { %3555 = vmatpush.bf16.msrb.mxu2 %v11842_v8  ;;  %3522 = vmatpush.bf16.msra.mxu3 %v12414_v17  ;;  %v12382_v32 = vor.u32 %v16496_v19, %v12379_v20  ;;  %v16205_v3 = vld [vmem:[#allocation6 + $0xec] sm:$0xf0] }
 0x16a   :  { %3529 = vmatpush.bf16.msrb.mxu0 %v11330_v14  ;;  %v11489_v6 = vld [vmem:[#allocation6 + $0x310] sm:$0xf]  ;;  %v3252_v12 = vpop.f32.mrf.mxu2  ;;  %v11202_v13 = vor.u32 %v16205_v3, %v11201_v2 }
 0x16b   :  { %3485 = vmatmul.bf16.vlgmr.msra.gmra.mxu0 %v17753_v50  ;;  %v16277_v7 = vld [vmem:[#allocation6 + $0x32c] sm:$0xf0]  ;;  %v3253_v14 = vadd.f32 %v3252_v12, %v17784_v25 }
 0x16c   :  { %3497 = vmatpush.bf16.msra.mxu1 %v11870_v31  ;;  %v12001_v8 = vld [vmem:[#allocation6 + $0x710] sm:$0xf]  ;;  %v11490_v52 = vor.u32 %v16277_v7, %v11489_v6 }
 0x16d   :  { %3556 = vmatpush.bf16.msrb.mxu2 %v11810_v21  ;;  %3523 = vmatpush.bf16.msra.mxu3 %v12382_v32  ;;  %v16405_v62 = vld [vmem:[#allocation6 + $0x72c] sm:$0xf0] }
 0x16e   :  { %3530 = vmatpush.bf16.msrb.mxu0 %v11298_v30  ;;  %v11681_v9 = vld [vmem:[#allocation6 + $0x490] sm:$0xf]  ;;  %v12002_v16 = vor.u32 %v16405_v62, %v12001_v8 }
 0x16f   :  { %3498 = vmatmul.bf16.vlgmr.msra.gmra.mxu1 %v17756_v11  ;;  %v16325_v10 = vld [vmem:[#allocation6 + $0x4ac] sm:$0xf0] }
 0x170   :  { %3542 = vmatpush.bf16.msrb.mxu1 %v11586_v33  ;;  %3524 = vmatmul.bf16.vlgmr.msra.gmra.mxu3 %v17767_v28  ;;  %v11169_v15 = vld [vmem:[#allocation6 + $0x90] sm:$0xf]  ;;  %v11682_v17 = vor.u32 %v16325_v10, %v11681_v9 }
 0x171   :  { %3568 = vmatpush.bf16.msrb.mxu3 %v12098_v36  ;;  %3557 = vmatpush.bf16.msrb.mxu2 %v11778_v37  ;;  %v16197_v55 = vld [vmem:[#allocation6 + $0xac] sm:$0xf0] }
 0x172   :  { %3531 = vmatpush.bf16.msrb.mxu0 %v11266_v45  ;;  %v11457_v18 = vld [vmem:[#allocation6 + $0x2d0] sm:$0xf]  ;;  %v11170_v24 = vor.u32 %v16197_v55, %v11169_v15  ;;  %v3265_v34 = vpop.f32.mrf.mxu3  ;;  %v3254_v39 = vpop.f32.mrf.mxu2  ;;  %v11587_v55 = vld [vmem:[#allocation6 + $0x3f0] sm:$0xf0] }
 0x173   :  { %v16269_v19 = vld [vmem:[#allocation6 + $0x2ec] sm:$0xf0]  ;;  %v17791_v38 = vadd.f32 %v3265_v34, %v3253_v14 }
 0x174   :  { %3543 = vmatpush.bf16.msrb.mxu1 %v11554_v46  ;;  %v11969_v20 = vld [vmem:[#allocation6 + $0x6d0] sm:$0xf]  ;;  %v11458_v26 = vor.u32 %v16269_v19, %v11457_v18 }
 0x175   :  { %3569 = vmatpush.bf16.msrb.mxu3 %v12066_v51  ;;  %3558 = vmatpush.bf16.msrb.mxu2 %v11746_v53  ;;  %v16397_v21 = vld [vmem:[#allocation6 + $0x6ec] sm:$0xf0] }
 0x176   :  { %3532 = vmatpush.bf16.msrb.mxu0 %v11234_v61  ;;  %v11649_v22 = vld [vmem:[#allocation6 + $0x450] sm:$0xf]  ;;  %v11970_v25 = vor.u32 %v16397_v21, %v11969_v20  ;;  %v16225_v61 = vld [vmem:[#allocation6 + $0x194] sm:$0xf]  ;;  %v1282_v20 = vperm.slane %v17779_v49, 1 }
 0x177   :  { %v16317_v23 = vld [vmem:[#allocation6 + $0x46c] sm:$0xf0] }
 0x178   :  { %3544 = vmatpush.bf16.msrb.mxu1 %v11522_v0  ;;  %v11137_v27 = vld [vmem:[#allocation6 + $0x50] sm:$0xf]  ;;  %v11650_v30 = vor.u32 %v16317_v23, %v11649_v22  ;;  %v11299_v0 = vld [vmem:[#allocation6 + $0x1b0] sm:$0xf0] }
 0x179   :  { %3570 = vmatpush.bf16.msrb.mxu3 %v12034_v4  ;;  %3559 = vmatpush.bf16.msrb.mxu2 %v11714_v5  ;;  %v16189_v29 = vld [vmem:[#allocation6 + $0x6c] sm:$0xf0]  ;;  %v11302_v12 = vor.u32 %v16225_v61, %v11299_v0 }
 0x17a   :  { %3533 = vmatpush.bf16.msrb.mxu0 %v11202_v13  ;;  %v11425_v31 = vld [vmem:[#allocation6 + $0x290] sm:$0xf]  ;;  %v11138_v40 = vor.u32 %v16189_v29, %v11137_v27  ;;  %v3267_v10 = vpop.f32.mrf.mxu3  ;;  %v3304_v15 = vpop.f32.mrf.mxu2 }
 0x17b   :  { %v16261_v32 = vld [vmem:[#allocation6 + $0x2ac] sm:$0xf0] }
 0x17c   :  { %3545 = vmatpush.bf16.msrb.mxu1 %v11490_v52  ;;  %v11937_v33 = vld [vmem:[#allocation6 + $0x690] sm:$0xf]  ;;  %v11426_v44 = vor.u32 %v16261_v32, %v11425_v31  ;;  %v16297_v52 = vld [vmem:[#allocation6 + $0x3d4] sm:$0xf] }
 0x17d   :  { %3571 = vmatpush.bf16.msrb.mxu3 %v12002_v16  ;;  %3560 = vmatpush.bf16.msrb.mxu2 %v11682_v17  ;;  %v16389_v35 = vld [vmem:[#allocation6 + $0x6ac] sm:$0xf0]  ;;  %v16217_v16 = vld [vmem:[#allocation6 + $0x154] sm:$0xf] }
 0x17e   :  { %v11617_v36 = vld [vmem:[#allocation6 + $0x410] sm:$0xf]  ;;  %3534 = vmatpush.bf16.msrb.mxu0 %v11170_v24  ;;  %v11938_v48 = vor.u32 %v16389_v35, %v11937_v33  ;;  %v11267_v17 = vld [vmem:[#allocation6 + $0x170] sm:$0xf0]  ;;  %v3305_v35 = vadd.f32 %v3304_v15, %v1282_v20 }
 0x17f   :  { %v16309_v37 = vld [vmem:[#allocation6 + $0x42c] sm:$0xf0]  ;;  %v11270_v27 = vor.u32 %v16217_v16, %v11267_v17  ;;  %v11555_v31 = vld [vmem:[#allocation6 + $0x3b0] sm:$0xf0] }
 0x180   :  { %3546 = vmatpush.bf16.msrb.mxu1 %v11458_v26  ;;  %v11105_v45 = vld [vmem:[#allocation6 + $0x10] sm:$0xf]  ;;  %v11618_v51 = vor.u32 %v16309_v37, %v11617_v36  ;;  %v11590_v26 = vor.u32 %v16297_v52, %v11587_v55  ;;  %v16209_v32 = vld [vmem:[#allocation6 + $0x114] sm:$0xf] }
 0x181   :  { %v16181_v46 = vld [vmem:[#allocation6 + $0x2c] sm:$0xf0]  ;;  %3572 = vmatpush.bf16.msrb.mxu3 %v11970_v25  ;;  %3561 = vmatpush.bf16.msrb.mxu2 %v11650_v30  ;;  %v16289_v30 = vld [vmem:[#allocation6 + $0x394] sm:$0xf] }
 0x182   :  { %v12353_v47 = vld [vmem:[#allocation6 + $0x9d0] sm:$0xf]  ;;  %3535 = vmatpush.bf16.msrb.mxu0 %v11138_v40  ;;  %v11106_v60 = vor.u32 %v16181_v46, %v11105_v45  ;;  %v11235_v33 = vld [vmem:[#allocation6 + $0x130] sm:$0xf0]  ;;  %v3317_v40 = vpop.f32.mrf.mxu3  ;;  %v11558_v43 = vor.u32 %v16289_v30, %v11555_v31 }
 0x183   :  { %v16493_v53 = vld [vmem:[#allocation6 + $0x9ec] sm:$0xf0]  ;;  %v11459_v20 = vld [vmem:[#allocation6 + $0x2f0] sm:$0xf0] }
 0x184   :  { %v11393_v54 = vld [vmem:[#allocation6 + $0x250] sm:$0xf]  ;;  %3547 = vmatpush.bf16.msrb.mxu1 %v11426_v44  ;;  %v12354_v2 = vor.u32 %v16493_v53, %v12353_v47  ;;  %v3278_v42 = vpop.f32.mrf.mxu0  ;;  %v11238_v44 = vor.u32 %v16209_v32, %v11235_v33  ;;  %v16281_v47 = vld [vmem:[#allocation6 + $0x354] sm:$0xf]  ;;  %v3306_v53 = vpop.f32.mrf.mxu2 }
 0x185   :  { %v16253_v56 = vld [vmem:[#allocation6 + $0x26c] sm:$0xf0]  ;;  %3573 = vmatpush.bf16.msrb.mxu3 %v11938_v48  ;;  %3562 = vmatpush.bf16.msrb.mxu2 %v11618_v51  ;;  %v17796_v48 = vadd.f32 %v3317_v40, %v3305_v35  ;;  %v3279_v51 = vadd.f32 %v3278_v42, %v17791_v38  ;;  %v11491_v38 = vld [vmem:[#allocation6 + $0x330] sm:$0xf0] }
 0x186   :  { %v11905_v58 = vld [vmem:[#allocation6 + $0x650] sm:$0xf]  ;;  %v11394_v3 = vor.u32 %v16253_v56, %v11393_v54  ;;  %3536 = vmatpush.bf16.msrb.mxu0 %v11106_v60  ;;  %v11523_v54 = vld [vmem:[#allocation6 + $0x370] sm:$0xf0] }
 0x187   :  { %v16381_v59 = vld [vmem:[#allocation6 + $0x66c] sm:$0xf0]  ;;  %v16201_v56 = vld [vmem:[#allocation6 + $0xd4] sm:$0xf]  ;;  %v11526_v0 = vor.u32 %v16281_v47, %v11523_v54 }
 0x188   :  { %v12321_v4 = vld [vmem:[#allocation6 + $0x990] sm:$0xf]  ;;  %v11906_v7 = vor.u32 %v16381_v59, %v11905_v58  ;;  %3548 = vmatpush.bf16.msrb.mxu1 %v11394_v3  ;;  %3563 = vmatmul.bf16.vlgmr.msrb.gmra.mxu2 %v17753_v50  ;;  %v16257_v32 = vld [vmem:[#allocation6 + $0x294] sm:$0xf] }
 0x189   :  { %v16485_v5 = vld [vmem:[#allocation6 + $0x9ac] sm:$0xf0]  ;;  %3607 = vmatpush.bf16.msra.mxu2 %v11334_v57  ;;  %3537 = vmatmul.bf16.vlgmr.msrb.gmra.mxu0 %v17745_v41  ;;  %v11203_v57 = vld [vmem:[#allocation6 + $0xf0] sm:$0xf0] }
 0x18a   :  { %v11361_v6 = vld [vmem:[#allocation6 + $0x210] sm:$0xf]  ;;  %3581 = vmatpush.bf16.msra.mxu0 %v12354_v2  ;;  %v12322_v18 = vor.u32 %v16485_v5, %v12321_v4  ;;  %3574 = vmatpush.bf16.msrb.mxu3 %v11906_v7  ;;  %v11206_v2 = vor.u32 %v16201_v56, %v11203_v57  ;;  %v16273_v5 = vld [vmem:[#allocation6 + $0x314] sm:$0xf] }
 0x18b   :  { %v16245_v8 = vld [vmem:[#allocation6 + $0x22c] sm:$0xf0]  ;;  %v11171_v7 = vld [vmem:[#allocation6 + $0xb0] sm:$0xf0]  ;;  %v11494_v15 = vor.u32 %v16273_v5, %v11491_v38 }
 0x18c   :  { %v11873_v62 = vld [vmem:[#allocation6 + $0x610] sm:$0xf]  ;;  %v11362_v19 = vor.u32 %v16245_v8, %v11361_v6  ;;  %v16193_v6 = vld [vmem:[#allocation6 + $0x94] sm:$0xf]  ;;  %v3280_v52 = vpop.f32.mrf.mxu0 }
 0x18d   :  { %v16373_v9 = vld [vmem:[#allocation6 + $0x62c] sm:$0xf0]  ;;  %3608 = vmatpush.bf16.msra.mxu2 %v11302_v12  ;;  %v11174_v55 = vor.u32 %v16193_v6, %v11171_v7  ;;  %v11427_v33 = vld [vmem:[#allocation6 + $0x2b0] sm:$0xf0] }
 0x18e   :  { %v12609_v13 = vld [vmem:[#allocation6 + $0xbd0] sm:$0xf]  ;;  %v11874_v21 = vor.u32 %v16373_v9, %v11873_v62  ;;  %3582 = vmatpush.bf16.msra.mxu0 %v12322_v18  ;;  %3549 = vmatpush.bf16.msrb.mxu1 %v11362_v19  ;;  %v3291_v62 = vpop.f32.mrf.mxu1  ;;  %v16265_v18 = vld [vmem:[#allocation6 + $0x2d4] sm:$0xf]  ;;  %v17803_v19 = vpop.f32.mrf.mxu2  ;;  %v11430_v47 = vor.u32 %v16257_v32, %v11427_v33 }
 0x18f   :  { %v16557_v14 = vld [vmem:[#allocation6 + $0xbec] sm:$0xf0]  ;;  %v11107_v35 = vld [vmem:[#allocation6 + $0x30] sm:$0xf0] }
 0x190   :  { %v12610_v22 = vor.u32 %v16557_v14, %v12609_v13  ;;  %v12289_v23 = vld [vmem:[#allocation6 + $0x950] sm:$0xf]  ;;  %3575 = vmatpush.bf16.msrb.mxu3 %v11874_v21  ;;  %v17801_v13 = vadd.f32 %v3291_v62, %v3279_v51  ;;  %v3319_v14 = vpop.f32.mrf.mxu3  ;;  %v16185_v21 = vld [vmem:[#allocation6 + $0x54] sm:$0xf] }
 0x191   :  { %v16477_v24 = vld [vmem:[#allocation6 + $0x96c] sm:$0xf0]  ;;  %3609 = vmatpush.bf16.msra.mxu2 %v11270_v27  ;;  %3550 = vmatmul.bf16.vlgmr.msrb.gmra.mxu1 %v17748_v63  ;;  %v11843_v53 = vld [vmem:[#allocation6 + $0x5f0] sm:$0xf0] }
 0x192   :  { %v12577_v29 = vld [vmem:[#allocation6 + $0xb90] sm:$0xf]  ;;  %v12290_v34 = vor.u32 %v16477_v24, %v12289_v23  ;;  %3594 = vmatpush.bf16.msra.mxu1 %v12610_v22  ;;  %v11139_v22 = vld [vmem:[#allocation6 + $0x70] sm:$0xf0] }
 0x193   :  { %v16549_v25 = vld [vmem:[#allocation6 + $0xbac] sm:$0xf0]  ;;  %3576 = vmatmul.bf16.vlgmr.msrb.gmra.mxu3 %v17756_v11  ;;  %v16353_v6 = vld [vmem:[#allocation6 + $0x594] sm:$0xf] }
 0x194   :  { %v12578_v36 = vor.u32 %v16549_v25, %v12577_v29  ;;  %v12257_v37 = vld [vmem:[#allocation6 + $0x910] sm:$0xf]  ;;  %3620 = vmatpush.bf16.msra.mxu3 %v11590_v26  ;;  %3583 = vmatpush.bf16.msra.mxu0 %v12290_v34  ;;  %v11462_v29 = vor.u32 %v16265_v18, %v11459_v20  ;;  %v11142_v25 = vor.u32 %v16185_v21, %v11139_v22  ;;  %v16177_v34 = vld [vmem:[#allocation6 + $0x14] sm:$0xf]  ;;  %v3330_v57 = vpop.f32.mrf.mxu0 }
 0x195   :  { %v16469_v39 = vld [vmem:[#allocation6 + $0x92c] sm:$0xf0]  ;;  %3610 = vmatpush.bf16.msra.mxu2 %v11238_v44  ;;  %v11110_v51 = vor.u32 %v16177_v34, %v11107_v35  ;;  %v11811_v7 = vld [vmem:[#allocation6 + $0x5b0] sm:$0xf0] }
 0x196   :  { %v12545_v45 = vld [vmem:[#allocation6 + $0xb50] sm:$0xf]  ;;  %v12258_v58 = vor.u32 %v16469_v39, %v12257_v37  ;;  %3595 = vmatpush.bf16.msra.mxu1 %v12578_v36  ;;  %v16489_v37 = vld [vmem:[#allocation6 + $0x9d4] sm:$0xf]  ;;  %v3293_v40 = vpop.f32.mrf.mxu1  ;;  %v11814_v20 = vor.u32 %v16353_v6, %v11811_v7 }
 0x197   :  { %v16541_v46 = vld [vmem:[#allocation6 + $0xb6c] sm:$0xf0]  ;;  %v12355_v39 = vld [vmem:[#allocation6 + $0x9f0] sm:$0xf0] }
 0x198   :  { %v12546_v59 = vor.u32 %v16541_v46, %v12545_v45  ;;  %v12225_v60 = vld [vmem:[#allocation6 + $0x8d0] sm:$0xf]  ;;  %3621 = vmatpush.bf16.msra.mxu3 %v11558_v43  ;;  %3584 = vmatpush.bf16.msra.mxu0 %v12258_v58  ;;  %v16361_v45 = vld [vmem:[#allocation6 + $0x5d4] sm:$0xf]  ;;  %v17805_v46 = vpop.f32.mrf.mxu3  ;;  %v3358_v58 = vpop.f32.mrf.mxu2 }
 0x199   :  { %v16461_v61 = vld [vmem:[#allocation6 + $0x8ec] sm:$0xf0]  ;;  %3611 = vmatpush.bf16.msra.mxu2 %v11206_v2  ;;  %v11846_v5 = vor.u32 %v16361_v45, %v11843_v53  ;;  %v16425_v52 = vld [vmem:[#allocation6 + $0x7d4] sm:$0xf] }
 0x19a   :  { %v12513_v3 = vld [vmem:[#allocation6 + $0xb10] sm:$0xf]  ;;  %v12226_v8 = vor.u32 %v16461_v61, %v12225_v60  ;;  %3596 = vmatpush.bf16.msra.mxu1 %v12546_v59  ;;  %v12358_v59 = vor.u32 %v16489_v37, %v12355_v39  ;;  %v16249_v60 = vld [vmem:[#allocation6 + $0x254] sm:$0xf] }
 0x19b   :  { %v16533_v4 = vld [vmem:[#allocation6 + $0xb2c] sm:$0xf0]  ;;  %v11395_v61 = vld [vmem:[#allocation6 + $0x270] sm:$0xf0] }
 0x19c   :  { %v12514_v9 = vor.u32 %v16533_v4, %v12513_v3  ;;  %v12193_v10 = vld [vmem:[#allocation6 + $0x890] sm:$0xf]  ;;  %3622 = vmatpush.bf16.msra.mxu3 %v11526_v0  ;;  %3585 = vmatpush.bf16.msra.mxu0 %v12226_v8  ;;  %v3331_v0 = vadd.f32 %v3330_v57, %v17796_v48  ;;  %v16481_v3 = vld [vmem:[#allocation6 + $0x994] sm:$0xf]  ;;  %v11398_v62 = vor.u32 %v16249_v60, %v11395_v61 }
 0x19d   :  { %v16453_v12 = vld [vmem:[#allocation6 + $0x8ac] sm:$0xf0]  ;;  %3612 = vmatpush.bf16.msra.mxu2 %v11174_v55  ;;  %v12323_v4 = vld [vmem:[#allocation6 + $0x9b0] sm:$0xf0] }
 0x19e   :  { %v12481_v16 = vld [vmem:[#allocation6 + $0xad0] sm:$0xf]  ;;  %v12194_v23 = vor.u32 %v16453_v12, %v12193_v10  ;;  %3597 = vmatpush.bf16.msra.mxu1 %v12514_v9  ;;  %v16241_v10 = vld [vmem:[#allocation6 + $0x214] sm:$0xf]  ;;  %v12326_v14 = vor.u32 %v16481_v3, %v12323_v4  ;;  %v3343_v18 = vpop.f32.mrf.mxu1 }
 0x19f   :  { %v16525_v17 = vld [vmem:[#allocation6 + $0xaec] sm:$0xf0]  ;;  %v11363_v12 = vld [vmem:[#allocation6 + $0x230] sm:$0xf0]  ;;  %v3344_v22 = vadd.f32 %v3343_v18, %v3331_v0 }
 0x1a0   :  { %v12482_v24 = vor.u32 %v16525_v17, %v12481_v16  ;;  %v12161_v26 = vld [vmem:[#allocation6 + $0x850] sm:$0xf]  ;;  %3623 = vmatpush.bf16.msra.mxu3 %v11494_v15  ;;  %3586 = vmatpush.bf16.msra.mxu0 %v12194_v23  ;;  %v12099_v15 = vld [vmem:[#allocation6 + $0x7f0] sm:$0xf0]  ;;  %v3371_v23 = vpop.f32.mrf.mxu3 }
 0x1a1   :  { %v16445_v27 = vld [vmem:[#allocation6 + $0x86c] sm:$0xf0]  ;;  %3613 = vmatpush.bf16.msra.mxu2 %v11142_v25  ;;  %v16553_v48 = vld [vmem:[#allocation6 + $0xbd4] sm:$0xf]  ;;  %v3332_v25 = vpop.f32.mrf.mxu0  ;;  %v3357_v35 = vadd.f32 %v17803_v19, %v3344_v22 }
 0x1a2   :  { %v12449_v30 = vld [vmem:[#allocation6 + $0xa90] sm:$0xf]  ;;  %v12162_v36 = vor.u32 %v16445_v27, %v12161_v26  ;;  %3598 = vmatpush.bf16.msra.mxu1 %v12482_v24  ;;  %v12611_v55 = vld [vmem:[#allocation6 + $0xbf0] sm:$0xf0]  ;;  %v11366_v24 = vor.u32 %v16241_v10, %v11363_v12  ;;  %v12102_v26 = vor.u32 %v16425_v52, %v12099_v15 }
 0x1a3   :  { %v16517_v31 = vld [vmem:[#allocation6 + $0xaac] sm:$0xf0]  ;;  %v16473_v16 = vld [vmem:[#allocation6 + $0x954] sm:$0xf] }
 0x1a4   :  { %v12450_v42 = vor.u32 %v16517_v31, %v12449_v30  ;;  %v12129_v43 = vld [vmem:[#allocation6 + $0x810] sm:$0xf]  ;;  %3624 = vmatpush.bf16.msra.mxu3 %v11462_v29  ;;  %3587 = vmatpush.bf16.msra.mxu0 %v12162_v36  ;;  %v12291_v17 = vld [vmem:[#allocation6 + $0x970] sm:$0xf0]  ;;  %v12614_v30 = vor.u32 %v16553_v48, %v12611_v55 }
 0x1a5   :  { %v16437_v44 = vld [vmem:[#allocation6 + $0x82c] sm:$0xf0]  ;;  %3614 = vmatpush.bf16.msra.mxu2 %v11110_v51  ;;  %v16345_v27 = vld [vmem:[#allocation6 + $0x554] sm:$0xf]  ;;  %v12294_v31 = vor.u32 %v16473_v16, %v12291_v17 }
 0x1a6   :  { %v12417_v54 = vld [vmem:[#allocation6 + $0xa50] sm:$0xf]  ;;  %v12130_v2 = vor.u32 %v16437_v44, %v12129_v43  ;;  %3599 = vmatpush.bf16.msra.mxu1 %v12450_v42  ;;  %v11779_v29 = vld [vmem:[#allocation6 + $0x570] sm:$0xf0]  ;;  %v17812_v42 = vadd.f32 %v17805_v46, %v3357_v35  ;;  %v3345_v46 = vpop.f32.mrf.mxu1 }
 0x1a7   :  { %v16509_v56 = vld [vmem:[#allocation6 + $0xa6c] sm:$0xf0]  ;;  %v16417_v32 = vld [vmem:[#allocation6 + $0x794] sm:$0xf]  ;;  %v11782_v40 = vor.u32 %v16345_v27, %v11779_v29 }
 0x1a8   :  { %v12418_v38 = vor.u32 %v16509_v56, %v12417_v54  ;;  %v12385_v8 = vld [vmem:[#allocation6 + $0xa10] sm:$0xf]  ;;  %3625 = vmatpush.bf16.msra.mxu3 %v11430_v47  ;;  %3588 = vmatpush.bf16.msra.mxu0 %v12130_v2  ;;  %v12067_v33 = vld [vmem:[#allocation6 + $0x7b0] sm:$0xf0] }
 0x1a9   :  { %v16501_v9 = vld [vmem:[#allocation6 + $0xa2c] sm:$0xf0]  ;;  %3659 = vmatpush.bf16.msrb.mxu2 %v12358_v59  ;;  %v16545_v34 = vld [vmem:[#allocation6 + $0xb94] sm:$0xf]  ;;  %v12070_v43 = vor.u32 %v16417_v32, %v12067_v33  ;;  %v3382_v2 = vpop.f32.mrf.mxu0 }
 0x1aa   :  { %3600 = vmatpush.bf16.msra.mxu1 %v12418_v38  ;;  %v12386_v21 = vor.u32 %v16501_v9, %v12385_v8  ;;  %3615 = vmatmul.bf16.vlgmr.msra.gmra.mxu2 %v17745_v41  ;;  %v12579_v36 = vld [vmem:[#allocation6 + $0xbb0] sm:$0xf0]  ;;  %v1283_v9 = vperm.slane %v17779_v49, 2 }
 0x1ab   :  { %3589 = vmatmul.bf16.vlgmr.msra.gmra.mxu0 %v17763_v1  ;;  %v16465_v37 = vld [vmem:[#allocation6 + $0x914] sm:$0xf]  ;;  %v12582_v47 = vor.u32 %v16545_v34, %v12579_v36 }
 0x1ac   :  { %3633 = vmatpush.bf16.msrb.mxu0 %v11846_v5  ;;  %3626 = vmatpush.bf16.msra.mxu3 %v11398_v62  ;;  %v12259_v39 = vld [vmem:[#allocation6 + $0x930] sm:$0xf0]  ;;  %v3383_v22 = vadd.f32 %v3382_v2, %v1283_v9  ;;  %v16230_v9 = vld [vmem:[#allocation6 + $0x1b4] sm:$0xf0] }
 0x1ad   :  { %3660 = vmatpush.bf16.msrb.mxu2 %v12326_v14  ;;  %v16337_v44 = vld [vmem:[#allocation6 + $0x514] sm:$0xf]  ;;  %v12262_v51 = vor.u32 %v16465_v37, %v12259_v39  ;;  %v3408_v23 = vpop.f32.mrf.mxu2 }
 0x1ae   :  { %3601 = vmatpush.bf16.msra.mxu1 %v12386_v21  ;;  %v11747_v45 = vld [vmem:[#allocation6 + $0x530] sm:$0xf0] }
 0x1af   :  { %v16409_v53 = vld [vmem:[#allocation6 + $0x754] sm:$0xf]  ;;  %v11750_v59 = vor.u32 %v16337_v44, %v11747_v45  ;;  %v11849_v44 = vld [vmem:[#allocation6 + $0x5d8] sm:$0xf] }
 0x1b0   :  { %3634 = vmatpush.bf16.msrb.mxu0 %v11814_v20  ;;  %3627 = vmatpush.bf16.msra.mxu3 %v11366_v24  ;;  %v12035_v19 = vld [vmem:[#allocation6 + $0x770] sm:$0xf0]  ;;  %v3395_v24 = vpop.f32.mrf.mxu1  ;;  %v16366_v45 = vld [vmem:[#allocation6 + $0x5f4] sm:$0xf0] }
 0x1b1   :  { %3661 = vmatpush.bf16.msrb.mxu2 %v12294_v31  ;;  %v16537_v54 = vld [vmem:[#allocation6 + $0xb54] sm:$0xf]  ;;  %3602 = vmatmul.bf16.vlgmr.msra.gmra.mxu1 %v17767_v28  ;;  %v12038_v60 = vor.u32 %v16409_v53, %v12035_v19  ;;  %v3396_v25 = vadd.f32 %v3395_v24, %v3383_v22  ;;  %v11337_v19 = vld [vmem:[#allocation6 + $0x1d8] sm:$0xf] }
 0x1b2   :  { %3646 = vmatpush.bf16.msrb.mxu1 %v12102_v26  ;;  %v12547_v56 = vld [vmem:[#allocation6 + $0xb70] sm:$0xf0] }
 0x1b3   :  { %v16457_v57 = vld [vmem:[#allocation6 + $0x8d4] sm:$0xf]  ;;  %3628 = vmatmul.bf16.vlgmr.msra.gmra.mxu3 %v17748_v63  ;;  %v12550_v3 = vor.u32 %v16537_v54, %v12547_v56  ;;  %v3421_v54 = vpop.f32.mrf.mxu3 }
 0x1b4   :  { %3672 = vmatpush.bf16.msrb.mxu3 %v12614_v30  ;;  %v12227_v58 = vld [vmem:[#allocation6 + $0x8f0] sm:$0xf0]  ;;  %3635 = vmatpush.bf16.msrb.mxu0 %v11782_v40  ;;  %v3384_v30 = vpop.f32.mrf.mxu0  ;;  %v3409_v40 = vadd.f32 %v3408_v23, %v3396_v25 }
 0x1b5   :  { %v16329_v61 = vld [vmem:[#allocation6 + $0x4d4] sm:$0xf]  ;;  %3662 = vmatpush.bf16.msrb.mxu2 %v12262_v51  ;;  %v12230_v4 = vor.u32 %v16457_v57, %v12227_v58  ;;  %v16238_v58 = vld [vmem:[#allocation6 + $0x1f4] sm:$0xf0] }
 0x1b6   :  { %3647 = vmatpush.bf16.msrb.mxu1 %v12070_v43  ;;  %v11715_v0 = vld [vmem:[#allocation6 + $0x4f0] sm:$0xf0] }
 0x1b7   :  { %v16401_v5 = vld [vmem:[#allocation6 + $0x714] sm:$0xf]  ;;  %v11718_v10 = vor.u32 %v16329_v61, %v11715_v0  ;;  %v11850_v61 = vor.u32 %v16366_v45, %v11849_v44 }
 0x1b8   :  { %3673 = vmatpush.bf16.msrb.mxu3 %v12582_v47  ;;  %v12003_v38 = vld [vmem:[#allocation6 + $0x730] sm:$0xf0]  ;;  %3636 = vmatpush.bf16.msrb.mxu0 %v11750_v59 }
 0x1b9   :  { %v16529_v6 = vld [vmem:[#allocation6 + $0xb14] sm:$0xf]  ;;  %v12006_v12 = vor.u32 %v16401_v5, %v12003_v38  ;;  %3663 = vmatpush.bf16.msrb.mxu2 %v12230_v4  ;;  %v11817_v5 = vld [vmem:[#allocation6 + $0x598] sm:$0xf] }
 0x1ba   :  { %v12515_v7 = vld [vmem:[#allocation6 + $0xb30] sm:$0xf0]  ;;  %3648 = vmatpush.bf16.msrb.mxu1 %v12038_v60  ;;  %v17817_v60 = vadd.f32 %v3421_v54, %v3409_v40  ;;  %v16358_v38 = vld [vmem:[#allocation6 + $0x5b4] sm:$0xf0] }
 0x1bb   :  { %v16449_v8 = vld [vmem:[#allocation6 + $0x894] sm:$0xf]  ;;  %v12518_v15 = vor.u32 %v16529_v6, %v12515_v7  ;;  %v3397_v6 = vpop.f32.mrf.mxu1  ;;  %v11338_v7 = vor.u32 %v16238_v58, %v11337_v19  ;;  %v11241_v40 = vld [vmem:[#allocation6 + $0x118] sm:$0xf] }
 0x1bc   :  { %v12195_v62 = vld [vmem:[#allocation6 + $0x8b0] sm:$0xf0]  ;;  %3674 = vmatpush.bf16.msrb.mxu3 %v12550_v3  ;;  %3637 = vmatpush.bf16.msrb.mxu0 %v11718_v10  ;;  %v3410_v3 = vpop.f32.mrf.mxu2  ;;  %v16414_v19 = vld [vmem:[#allocation6 + $0x774] sm:$0xf0] }
 0x1bd   :  { %v16321_v14 = vld [vmem:[#allocation6 + $0x494] sm:$0xf]  ;;  %v12198_v48 = vor.u32 %v16449_v8, %v12195_v62  ;;  %v11305_v62 = vld [vmem:[#allocation6 + $0x198] sm:$0xf] }
 0x1be   :  { %v11683_v52 = vld [vmem:[#allocation6 + $0x4b0] sm:$0xf0]  ;;  %3649 = vmatpush.bf16.msrb.mxu1 %v12006_v12  ;;  %v11306_v22 = vor.u32 %v16230_v9, %v11305_v62  ;;  %v11721_v54 = vld [vmem:[#allocation6 + $0x4d8] sm:$0xf] }
 0x1bf   :  { %v16393_v55 = vld [vmem:[#allocation6 + $0x6d4] sm:$0xf]  ;;  %v11686_v49 = vor.u32 %v16321_v14, %v11683_v52  ;;  %3664 = vmatpush.bf16.msrb.mxu2 %v12198_v48  ;;  %v11818_v48 = vor.u32 %v16358_v38, %v11817_v5  ;;  %v11497_v3 = vld [vmem:[#allocation6 + $0x318] sm:$0xf] }
 0x1c0   :  { %v11971_v16 = vld [vmem:[#allocation6 + $0x6f0] sm:$0xf0]  ;;  %3675 = vmatpush.bf16.msrb.mxu3 %v12518_v15  ;;  %v12009_v5 = vld [vmem:[#allocation6 + $0x718] sm:$0xf] }
 0x1c1   :  { %v16521_v17 = vld [vmem:[#allocation6 + $0xad4] sm:$0xf]  ;;  %v11974_v26 = vor.u32 %v16393_v55, %v11971_v16  ;;  %3638 = vmatpush.bf16.msrb.mxu0 %v11686_v49  ;;  %v11593_v55 = vld [vmem:[#allocation6 + $0x3d8] sm:$0xf]  ;;  %v3423_v49 = vpop.f32.mrf.mxu3 }
 0x1c2   :  { %v12483_v18 = vld [vmem:[#allocation6 + $0xaf0] sm:$0xf0]  ;;  %v16302_v16 = vld [vmem:[#allocation6 + $0x3f4] sm:$0xf0] }
 0x1c3   :  { %v16441_v20 = vld [vmem:[#allocation6 + $0x854] sm:$0xf]  ;;  %v12486_v31 = vor.u32 %v16521_v17, %v12483_v18  ;;  %3650 = vmatpush.bf16.msrb.mxu1 %v11974_v26  ;;  %v12105_v17 = vld [vmem:[#allocation6 + $0x7d8] sm:$0xf]  ;;  %v11594_v26 = vor.u32 %v16302_v16, %v11593_v55 }
 0x1c4   :  { %v12163_v21 = vld [vmem:[#allocation6 + $0x870] sm:$0xf0]  ;;  %v16430_v18 = vld [vmem:[#allocation6 + $0x7f4] sm:$0xf0] }
 0x1c5   :  { %v16313_v27 = vld [vmem:[#allocation6 + $0x454] sm:$0xf]  ;;  %v12166_v32 = vor.u32 %v16441_v20, %v12163_v21  ;;  %3676 = vmatpush.bf16.msrb.mxu3 %v12486_v31  ;;  %v11785_v20 = vld [vmem:[#allocation6 + $0x558] sm:$0xf]  ;;  %v12106_v25 = vor.u32 %v16430_v18, %v12105_v17 }
 0x1c6   :  { %v11651_v29 = vld [vmem:[#allocation6 + $0x470] sm:$0xf0]  ;;  %v16350_v21 = vld [vmem:[#allocation6 + $0x574] sm:$0xf0] }
 0x1c7   :  { %v16385_v33 = vld [vmem:[#allocation6 + $0x694] sm:$0xf]  ;;  %v11654_v43 = vor.u32 %v16313_v27, %v11651_v29  ;;  %3665 = vmatpush.bf16.msrb.mxu2 %v12166_v32  ;;  %v11273_v27 = vld [vmem:[#allocation6 + $0x158] sm:$0xf]  ;;  %v11786_v30 = vor.u32 %v16350_v21, %v11785_v20 }
 0x1c8   :  { %v11939_v34 = vld [vmem:[#allocation6 + $0x6b0] sm:$0xf0]  ;;  %v16222_v29 = vld [vmem:[#allocation6 + $0x174] sm:$0xf0] }
 0x1c9   :  { %v16513_v35 = vld [vmem:[#allocation6 + $0xa94] sm:$0xf]  ;;  %v11942_v47 = vor.u32 %v16385_v33, %v11939_v34  ;;  %3639 = vmatpush.bf16.msrb.mxu0 %v11654_v43  ;;  %v11561_v31 = vld [vmem:[#allocation6 + $0x398] sm:$0xf] }
 0x1ca   :  { %v12451_v36 = vld [vmem:[#allocation6 + $0xab0] sm:$0xf0]  ;;  %v16294_v32 = vld [vmem:[#allocation6 + $0x3b4] sm:$0xf0] }
 0x1cb   :  { %v16433_v37 = vld [vmem:[#allocation6 + $0x814] sm:$0xf]  ;;  %v12454_v56 = vor.u32 %v16513_v35, %v12451_v36  ;;  %3651 = vmatpush.bf16.msrb.mxu1 %v11942_v47  ;;  %v12073_v33 = vld [vmem:[#allocation6 + $0x798] sm:$0xf]  ;;  %v3460_v20 = vpop.f32.mrf.mxu2 }
 0x1cc   :  { %v12131_v39 = vld [vmem:[#allocation6 + $0x830] sm:$0xf0]  ;;  %v16422_v34 = vld [vmem:[#allocation6 + $0x7b4] sm:$0xf0] }
 0x1cd   :  { %v16305_v51 = vld [vmem:[#allocation6 + $0x414] sm:$0xf]  ;;  %v12134_v57 = vor.u32 %v16433_v37, %v12131_v39  ;;  %3677 = vmatpush.bf16.msrb.mxu3 %v12454_v56  ;;  %v11753_v35 = vld [vmem:[#allocation6 + $0x518] sm:$0xf]  ;;  %v11274_v37 = vor.u32 %v16222_v29, %v11273_v27  ;;  %v11562_v39 = vor.u32 %v16294_v32, %v11561_v31  ;;  %v12074_v44 = vor.u32 %v16422_v34, %v12073_v33 }
 0x1ce   :  { %v11619_v53 = vld [vmem:[#allocation6 + $0x430] sm:$0xf0]  ;;  %v16342_v36 = vld [vmem:[#allocation6 + $0x534] sm:$0xf0] }
 0x1cf   :  { %v16377_v46 = vld [vmem:[#allocation6 + $0x654] sm:$0xf]  ;;  %v11622_v4 = vor.u32 %v16305_v51, %v11619_v53  ;;  %3666 = vmatpush.bf16.msrb.mxu2 %v12134_v57  ;;  %v16214_v43 = vld [vmem:[#allocation6 + $0x134] sm:$0xf0]  ;;  %v11754_v45 = vor.u32 %v16342_v36, %v11753_v35 }
 0x1d0   :  { %v11907_v59 = vld [vmem:[#allocation6 + $0x670] sm:$0xf0]  ;;  %v11529_v47 = vld [vmem:[#allocation6 + $0x358] sm:$0xf]  ;;  %v11242_v57 = vor.u32 %v16214_v43, %v11241_v40  ;;  %v11339_v40 = vld [vmem:[#allocation6 + $0x1f8] sm:$0xf0] }
 0x1d1   :  { %v16505_v0 = vld [vmem:[#allocation6 + $0xa54] sm:$0xf]  ;;  %v11910_v8 = vor.u32 %v16377_v46, %v11907_v59  ;;  %3640 = vmatpush.bf16.msrb.mxu0 %v11622_v4  ;;  %v16286_v51 = vld [vmem:[#allocation6 + $0x374] sm:$0xf0] }
 0x1d2   :  { %v12419_v2 = vld [vmem:[#allocation6 + $0xa70] sm:$0xf0]  ;;  %3667 = vmatmul.bf16.vlgmr.msrb.gmra.mxu2 %v17763_v1  ;;  %v12041_v53 = vld [vmem:[#allocation6 + $0x758] sm:$0xf]  ;;  %v11530_v58 = vor.u32 %v16286_v51, %v11529_v47 }
 0x1d3   :  { %v16369_v10 = vld [vmem:[#allocation6 + $0x614] sm:$0xf]  ;;  %v12422_v12 = vor.u32 %v16505_v0, %v12419_v2  ;;  %3711 = vmatpush.bf16.msra.mxu2 %v11850_v61  ;;  %3652 = vmatpush.bf16.msrb.mxu1 %v11910_v8  ;;  %v16334_v56 = vld [vmem:[#allocation6 + $0x4f4] sm:$0xf0]  ;;  %v3434_v61 = vpop.f32.mrf.mxu0  ;;  %v12042_v0 = vor.u32 %v16414_v19, %v12041_v53  ;;  %v3473_v53 = vpop.f32.mrf.mxu3 }
 0x1d4   :  { %v11875_v14 = vld [vmem:[#allocation6 + $0x630] sm:$0xf0]  ;;  %3641 = vmatmul.bf16.vlgmr.msrb.gmra.mxu0 %v17753_v50  ;;  %v11209_v46 = vld [vmem:[#allocation6 + $0xd8] sm:$0xf]  ;;  %v11722_v2 = vor.u32 %v16334_v56, %v11721_v54  ;;  %v3435_v38 = vadd.f32 %v3434_v61, %v17817_v60  ;;  %v3447_v60 = vpop.f32.mrf.mxu1 }
 0x1d5   :  { %v16497_v52 = vld [vmem:[#allocation6 + $0xa14] sm:$0xf]  ;;  %3685 = vmatpush.bf16.msra.mxu0 %v11338_v7  ;;  %v11878_v23 = vor.u32 %v16369_v10, %v11875_v14  ;;  %3678 = vmatpush.bf16.msrb.mxu3 %v12422_v12  ;;  %v16206_v59 = vld [vmem:[#allocation6 + $0xf4] sm:$0xf0] }
 0x1d6   :  { %v12387_v15 = vld [vmem:[#allocation6 + $0xa30] sm:$0xf0]  ;;  %v16278_v4 = vld [vmem:[#allocation6 + $0x334] sm:$0xf0]  ;;  %v11210_v62 = vor.u32 %v16206_v59, %v11209_v46 }
 0x1d7   :  { %v12390_v24 = vor.u32 %v16497_v52, %v12387_v15  ;;  %3712 = vmatpush.bf16.msra.mxu2 %v11818_v48  ;;  %3653 = vmatpush.bf16.msrb.mxu1 %v11878_v23  ;;  %v16406_v6 = vld [vmem:[#allocation6 + $0x734] sm:$0xf0]  ;;  %v11498_v9 = vor.u32 %v16278_v4, %v11497_v3  ;;  %v17826_v23 = vld [vmem:[#allocation7] sm:$0xff]  ;;  %v3462_v3 = vpop.f32.mrf.mxu2 }
 0x1d8   :  { %v11689_v7 = vld [vmem:[#allocation6 + $0x498] sm:$0xf]  ;;  %v12010_v14 = vor.u32 %v16406_v6, %v12009_v5  ;;  %v1284_v49 = vperm.slane %v17826_v23, 3  ;;  %v16226_v5 = vld [vmem:[#allocation6 + $0x19c] sm:$0xf] }
 0x1d9   :  { %3686 = vmatpush.bf16.msra.mxu0 %v11306_v22  ;;  %3679 = vmatpush.bf16.msrb.mxu3 %v12390_v24  ;;  %v16326_v8 = vld [vmem:[#allocation6 + $0x4b4] sm:$0xf0]  ;;  %v17824_v22 = vadd.f32 %v3447_v60, %v3435_v38  ;;  %v11307_v38 = vld [vmem:[#allocation6 + $0x1b8] sm:$0xf0] }
 0x1da   :  { %3654 = vmatmul.bf16.vlgmr.msrb.gmra.mxu1 %v17756_v11  ;;  %v11177_v10 = vld [vmem:[#allocation6 + $0x98] sm:$0xf]  ;;  %v11690_v52 = vor.u32 %v16326_v8, %v11689_v7  ;;  %v3461_v43 = vadd.f32 %v3460_v20, %v1284_v49  ;;  %v11275_v60 = vld [vmem:[#allocation6 + $0x178] sm:$0xf0] }
 0x1db   :  { %3698 = vmatpush.bf16.msra.mxu1 %v11594_v26  ;;  %3713 = vmatpush.bf16.msra.mxu2 %v11786_v30  ;;  %v16198_v12 = vld [vmem:[#allocation6 + $0xb4] sm:$0xf0]  ;;  %v3436_v29 = vpop.f32.mrf.mxu0  ;;  %v3475_v49 = vpop.f32.mrf.mxu3  ;;  %17437 = vtanh.f32 %v17824_v22 }
 0x1dc   :  { %3680 = vmatmul.bf16.vlgmr.msrb.gmra.mxu3 %v17767_v28  ;;  %v11465_v15 = vld [vmem:[#allocation6 + $0x2d8] sm:$0xf]  ;;  %v11178_v21 = vor.u32 %v16198_v12, %v11177_v10  ;;  %v17829_v46 = vadd.f32 %v3473_v53, %v3461_v43  ;;  %v16282_v53 = vld [vmem:[#allocation6 + $0x35c] sm:$0xf]  ;;  %17439 = vtanh.f32 %v17801_v13 }
 0x1dd   :  { %3724 = vmatpush.bf16.msra.mxu3 %v12106_v25  ;;  %3687 = vmatpush.bf16.msra.mxu0 %v11274_v37  ;;  %v16270_v48 = vld [vmem:[#allocation6 + $0x2f4] sm:$0xf0]  ;;  %17441 = vtanh.f32 %v17812_v42 }
 0x1de   :  { %v11977_v55 = vld [vmem:[#allocation6 + $0x6d8] sm:$0xf]  ;;  %v11466_v24 = vor.u32 %v16270_v48, %v11465_v15  ;;  %v11310_v15 = vor.u32 %v16226_v5, %v11307_v38  ;;  %v16274_v5 = vld [vmem:[#allocation6 + $0x31c] sm:$0xf] }
 0x1df   :  { %3699 = vmatpush.bf16.msra.mxu1 %v11562_v39  ;;  %3714 = vmatpush.bf16.msra.mxu2 %v11754_v45  ;;  %v16398_v16 = vld [vmem:[#allocation6 + $0x6f4] sm:$0xf0]  ;;  %v16234_v39 = vld [vmem:[#allocation6 + $0x1dc] sm:$0xf] }
 0x1e0   :  { %v11657_v17 = vld [vmem:[#allocation6 + $0x458] sm:$0xf]  ;;  %v11978_v25 = vor.u32 %v16398_v16, %v11977_v55  ;;  %v11342_v59 = vor.u32 %v16234_v39, %v11339_v40  ;;  %v16298_v16 = vld [vmem:[#allocation6 + $0x3dc] sm:$0xf] }
 0x1e1   :  { %3725 = vmatpush.bf16.msra.mxu3 %v12074_v44  ;;  %3688 = vmatpush.bf16.msra.mxu0 %v11242_v57  ;;  %v16318_v18 = vld [vmem:[#allocation6 + $0x474] sm:$0xf0] }
 0x1e2   :  { %v11145_v26 = vld [vmem:[#allocation6 + $0x58] sm:$0xf]  ;;  %v11658_v30 = vor.u32 %v16318_v18, %v11657_v17  ;;  %v11595_v17 = vld [vmem:[#allocation6 + $0x3f8] sm:$0xf0] }
 0x1e3   :  { %3700 = vmatpush.bf16.msra.mxu1 %v11530_v58  ;;  %3715 = vmatpush.bf16.msra.mxu2 %v11722_v2  ;;  %v16190_v27 = vld [vmem:[#allocation6 + $0x74] sm:$0xf0]  ;;  %v3449_v2 = vpop.f32.mrf.mxu1  ;;  %v16218_v18 = vld [vmem:[#allocation6 + $0x15c] sm:$0xf] }
 0x1e4   :  { %v11433_v31 = vld [vmem:[#allocation6 + $0x298] sm:$0xf]  ;;  %v11146_v37 = vor.u32 %v16190_v27, %v11145_v26 }
 0x1e5   :  { %3726 = vmatpush.bf16.msra.mxu3 %v12042_v0  ;;  %3689 = vmatpush.bf16.msra.mxu0 %v11210_v62  ;;  %v16262_v32 = vld [vmem:[#allocation6 + $0x2b4] sm:$0xf0] }
 0x1e6   :  { %v11945_v33 = vld [vmem:[#allocation6 + $0x698] sm:$0xf]  ;;  %v11434_v44 = vor.u32 %v16262_v32, %v11433_v31 }
 0x1e7   :  { %3701 = vmatpush.bf16.msra.mxu1 %v11498_v9  ;;  %3716 = vmatpush.bf16.msra.mxu2 %v11690_v52  ;;  %v16390_v34 = vld [vmem:[#allocation6 + $0x6b4] sm:$0xf0] }
 0x1e8   :  { %v11625_v35 = vld [vmem:[#allocation6 + $0x418] sm:$0xf]  ;;  %v11946_v19 = vor.u32 %v16390_v34, %v11945_v33  ;;  %v16290_v33 = vld [vmem:[#allocation6 + $0x39c] sm:$0xf]  ;;  %v3486_v38 = vpop.f32.mrf.mxu0 }
 0x1e9   :  { %3727 = vmatpush.bf16.msra.mxu3 %v12010_v14  ;;  %v16310_v36 = vld [vmem:[#allocation6 + $0x434] sm:$0xf0]  ;;  %3690 = vmatpush.bf16.msra.mxu0 %v11178_v21  ;;  %v11563_v34 = vld [vmem:[#allocation6 + $0x3b8] sm:$0xf0] }
 0x1ea   :  { %v11113_v45 = vld [vmem:[#allocation6 + $0x18] sm:$0xf]  ;;  %v11626_v54 = vor.u32 %v16310_v36, %v11625_v35  ;;  %v16210_v35 = vld [vmem:[#allocation6 + $0x11c] sm:$0xf] }
 0x1eb   :  { %3702 = vmatpush.bf16.msra.mxu1 %v11466_v24  ;;  %v16182_v47 = vld [vmem:[#allocation6 + $0x34] sm:$0xf0]  ;;  %3717 = vmatpush.bf16.msra.mxu2 %v11658_v30  ;;  %v11278_v30 = vor.u32 %v16218_v18, %v11275_v60  ;;  %v11243_v36 = vld [vmem:[#allocation6 + $0x138] sm:$0xf0] }
 0x1ec   :  { %v12361_v51 = vld [vmem:[#allocation6 + $0x9d8] sm:$0xf]  ;;  %v11114_v4 = vor.u32 %v16182_v47, %v11113_v45  ;;  %v11246_v45 = vor.u32 %v16210_v35, %v11243_v36  ;;  %v16186_v18 = vld [vmem:[#allocation6 + $0x5c] sm:$0xf] }
 0x1ed   :  { %3728 = vmatpush.bf16.msra.mxu3 %v11978_v25  ;;  %v16494_v56 = vld [vmem:[#allocation6 + $0x9f4] sm:$0xf0]  ;;  %3691 = vmatpush.bf16.msra.mxu0 %v11146_v37  ;;  %v11598_v25 = vor.u32 %v16298_v16, %v11595_v17  ;;  %v16266_v16 = vld [vmem:[#allocation6 + $0x2dc] sm:$0xf] }
 0x1ee   :  { %v11401_v57 = vld [vmem:[#allocation6 + $0x258] sm:$0xf]  ;;  %v12362_v6 = vor.u32 %v16494_v56, %v12361_v51  ;;  %v11211_v56 = vld [vmem:[#allocation6 + $0xf8] sm:$0xf0] }
 0x1ef   :  { %v16254_v58 = vld [vmem:[#allocation6 + $0x274] sm:$0xf0]  ;;  %3703 = vmatpush.bf16.msra.mxu1 %v11434_v44  ;;  %3718 = vmatpush.bf16.msra.mxu2 %v11626_v54  ;;  %v11566_v44 = vor.u32 %v16290_v33, %v11563_v34  ;;  %v16202_v54 = vld [vmem:[#allocation6 + $0xdc] sm:$0xf] }
 0x1f0   :  { %v11913_v61 = vld [vmem:[#allocation6 + $0x658] sm:$0xf]  ;;  %v11402_v7 = vor.u32 %v16254_v58, %v11401_v57  ;;  %v11214_v2 = vor.u32 %v16202_v54, %v11211_v56  ;;  %v11467_v17 = vld [vmem:[#allocation6 + $0x2f8] sm:$0xf0]  ;;  %v3488_v34 = vpop.f32.mrf.mxu0 }
 0x1f1   :  { %v16382_v0 = vld [vmem:[#allocation6 + $0x674] sm:$0xf0]  ;;  %3729 = vmatpush.bf16.msra.mxu3 %v11946_v19  ;;  %3692 = vmatpush.bf16.msra.mxu0 %v11114_v4  ;;  %v11531_v19 = vld [vmem:[#allocation6 + $0x378] sm:$0xf0] }
 0x1f2   :  { %v12329_v8 = vld [vmem:[#allocation6 + $0x998] sm:$0xf]  ;;  %v11914_v10 = vor.u32 %v16382_v0, %v11913_v61  ;;  %3719 = vmatmul.bf16.vlgmr.msra.gmra.mxu2 %v17753_v50  ;;  %v11534_v0 = vor.u32 %v16282_v53, %v11531_v19  ;;  %v11147_v60 = vld [vmem:[#allocation6 + $0x78] sm:$0xf0] }
 0x1f3   :  { %v16486_v62 = vld [vmem:[#allocation6 + $0x9b4] sm:$0xf0]  ;;  %3763 = vmatpush.bf16.msrb.mxu2 %v11342_v59  ;;  %3704 = vmatpush.bf16.msra.mxu1 %v11402_v7  ;;  %v16194_v7 = vld [vmem:[#allocation6 + $0x9c] sm:$0xf] }
 0x1f4   :  { %v11369_v9 = vld [vmem:[#allocation6 + $0x218] sm:$0xf]  ;;  %v12330_v20 = vor.u32 %v16486_v62, %v12329_v8  ;;  %3693 = vmatmul.bf16.vlgmr.msra.gmra.mxu0 %v17745_v41  ;;  %v11179_v8 = vld [vmem:[#allocation6 + $0xb8] sm:$0xf0]  ;;  %v3487_v62 = vadd.f32 %v3486_v38, %v17829_v46 }
 0x1f5   :  { %v16246_v12 = vld [vmem:[#allocation6 + $0x234] sm:$0xf0]  ;;  %3737 = vmatpush.bf16.msrb.mxu0 %v12362_v6  ;;  %3730 = vmatpush.bf16.msra.mxu3 %v11914_v10  ;;  %v11499_v6 = vld [vmem:[#allocation6 + $0x338] sm:$0xf0] }
 0x1f6   :  { %v11881_v14 = vld [vmem:[#allocation6 + $0x618] sm:$0xf]  ;;  %v11370_v21 = vor.u32 %v16246_v12, %v11369_v9  ;;  %v11435_v35 = vld [vmem:[#allocation6 + $0x2b8] sm:$0xf0] }
 0x1f7   :  { %v16374_v52 = vld [vmem:[#allocation6 + $0x634] sm:$0xf0]  ;;  %3764 = vmatpush.bf16.msrb.mxu2 %v11310_v15  ;;  %v11182_v15 = vor.u32 %v16194_v7, %v11179_v8  ;;  %v16178_v36 = vld [vmem:[#allocation6 + $0x1c] sm:$0xf] }
 0x1f8   :  { %v12617_v48 = vld [vmem:[#allocation6 + $0xbd8] sm:$0xf]  ;;  %v11882_v24 = vor.u32 %v16374_v52, %v11881_v14  ;;  %3705 = vmatpush.bf16.msra.mxu1 %v11370_v21  ;;  %v11502_v52 = vor.u32 %v16274_v5, %v11499_v6  ;;  %v3512_v21 = vpop.f32.mrf.mxu2  ;;  %v11851_v54 = vld [vmem:[#allocation6 + $0x5f8] sm:$0xf0] }
 0x1f9   :  { %v16558_v55 = vld [vmem:[#allocation6 + $0xbf4] sm:$0xf0]  ;;  %3738 = vmatpush.bf16.msrb.mxu0 %v12330_v20  ;;  %v3499_v20 = vpop.f32.mrf.mxu1  ;;  %v16482_v5 = vld [vmem:[#allocation6 + $0x99c] sm:$0xf] }
 0x1fa   :  { %v12618_v26 = vor.u32 %v16558_v55, %v12617_v48  ;;  %v12297_v27 = vld [vmem:[#allocation6 + $0x958] sm:$0xf]  ;;  %3731 = vmatpush.bf16.msra.mxu3 %v11882_v24  ;;  %v3500_v49 = vadd.f32 %v3499_v20, %v3487_v62  ;;  %v12331_v38 = vld [vmem:[#allocation6 + $0x9b8] sm:$0xf0] }
 0x1fb   :  { %v16478_v29 = vld [vmem:[#allocation6 + $0x974] sm:$0xf0]  ;;  %3765 = vmatpush.bf16.msrb.mxu2 %v11278_v30  ;;  %3706 = vmatmul.bf16.vlgmr.msra.gmra.mxu1 %v17748_v63  ;;  %v16354_v8 = vld [vmem:[#allocation6 + $0x59c] sm:$0xf] }
 0x1fc   :  { %v12585_v31 = vld [vmem:[#allocation6 + $0xb98] sm:$0xf]  ;;  %v12298_v37 = vor.u32 %v16478_v29, %v12297_v27  ;;  %3750 = vmatpush.bf16.msrb.mxu1 %v12618_v26  ;;  %v11470_v29 = vor.u32 %v16266_v16, %v11467_v17  ;;  %v17836_v33 = vadd.f32 %v3512_v21, %v3500_v49  ;;  %v11819_v62 = vld [vmem:[#allocation6 + $0x5b8] sm:$0xf0] }
 0x1fd   :  { %v16550_v32 = vld [vmem:[#allocation6 + $0xbb4] sm:$0xf0]  ;;  %3732 = vmatmul.bf16.vlgmr.msra.gmra.mxu3 %v17756_v11  ;;  %v16554_v16 = vld [vmem:[#allocation6 + $0xbdc] sm:$0xf]  ;;  %v11822_v20 = vor.u32 %v16354_v8, %v11819_v62 }
 0x1fe   :  { %v12586_v39 = vor.u32 %v16550_v32, %v12585_v31  ;;  %v12265_v40 = vld [vmem:[#allocation6 + $0x918] sm:$0xf]  ;;  %3776 = vmatpush.bf16.msrb.mxu3 %v11598_v25  ;;  %3739 = vmatpush.bf16.msrb.mxu0 %v12298_v37  ;;  %v11150_v25 = vor.u32 %v16186_v18, %v11147_v60  ;;  %v16258_v32 = vld [vmem:[#allocation6 + $0x29c] sm:$0xf] }
 0x1ff   :  { %v16470_v43 = vld [vmem:[#allocation6 + $0x934] sm:$0xf0]  ;;  %3766 = vmatpush.bf16.msrb.mxu2 %v11246_v45  ;;  %v11115_v37 = vld [vmem:[#allocation6 + $0x38] sm:$0xf0]  ;;  %v11438_v53 = vor.u32 %v16258_v32, %v11435_v35 }
 0x200   :  { %v12553_v47 = vld [vmem:[#allocation6 + $0xb58] sm:$0xf]  ;;  %v12266_v57 = vor.u32 %v16470_v43, %v12265_v40  ;;  %3751 = vmatpush.bf16.msrb.mxu1 %v12586_v39  ;;  %v16490_v40 = vld [vmem:[#allocation6 + $0x9dc] sm:$0xf]  ;;  %v11118_v19 = vor.u32 %v16178_v36, %v11115_v37 }
 0x201   :  { %v16542_v51 = vld [vmem:[#allocation6 + $0xb74] sm:$0xf0]  ;;  %v12363_v43 = vld [vmem:[#allocation6 + $0x9f8] sm:$0xf0] }
 0x202   :  { %v12554_v58 = vor.u32 %v16542_v51, %v12553_v47  ;;  %v12233_v59 = vld [vmem:[#allocation6 + $0x8d8] sm:$0xf]  ;;  %3777 = vmatpush.bf16.msrb.mxu3 %v11566_v44  ;;  %3740 = vmatpush.bf16.msrb.mxu0 %v12266_v57  ;;  %v16362_v51 = vld [vmem:[#allocation6 + $0x5dc] sm:$0xf] }
 0x203   :  { %v16462_v61 = vld [vmem:[#allocation6 + $0x8f4] sm:$0xf0]  ;;  %3767 = vmatpush.bf16.msrb.mxu2 %v11214_v2  ;;  %v3501_v2 = vpop.f32.mrf.mxu1  ;;  %v11854_v6 = vor.u32 %v16362_v51, %v11851_v54  ;;  %v12619_v17 = vld [vmem:[#allocation6 + $0xbf8] sm:$0xf0] }
 0x204   :  { %v12521_v3 = vld [vmem:[#allocation6 + $0xb18] sm:$0xf]  ;;  %v12234_v9 = vor.u32 %v16462_v61, %v12233_v59  ;;  %3752 = vmatpush.bf16.msrb.mxu1 %v12554_v58  ;;  %v17838_v58 = vpop.f32.mrf.mxu3  ;;  %v12366_v59 = vor.u32 %v16490_v40, %v12363_v43  ;;  %v16250_v61 = vld [vmem:[#allocation6 + $0x25c] sm:$0xf] }
 0x205   :  { %v16534_v4 = vld [vmem:[#allocation6 + $0xb34] sm:$0xf0]  ;;  %v16474_v18 = vld [vmem:[#allocation6 + $0x95c] sm:$0xf] }
 0x206   :  { %v12522_v10 = vor.u32 %v16534_v4, %v12521_v3  ;;  %v12201_v12 = vld [vmem:[#allocation6 + $0x898] sm:$0xf]  ;;  %3778 = vmatpush.bf16.msrb.mxu3 %v11534_v0  ;;  %3741 = vmatpush.bf16.msrb.mxu0 %v12234_v9  ;;  %v11403_v0 = vld [vmem:[#allocation6 + $0x278] sm:$0xf0]  ;;  %v3514_v3 = vpop.f32.mrf.mxu2 }
 0x207   :  { %v16454_v14 = vld [vmem:[#allocation6 + $0x8b4] sm:$0xf0]  ;;  %3768 = vmatpush.bf16.msrb.mxu2 %v11182_v15  ;;  %v12334_v15 = vor.u32 %v16482_v5, %v12331_v38  ;;  %v12299_v60 = vld [vmem:[#allocation6 + $0x978] sm:$0xf0]  ;;  %v17844_v38 = vpop.f32.mrf.mxu0 }
 0x208   :  { %v12489_v48 = vld [vmem:[#allocation6 + $0xad8] sm:$0xf]  ;;  %v12202_v46 = vor.u32 %v16454_v14, %v12201_v12  ;;  %3753 = vmatpush.bf16.msrb.mxu1 %v12522_v10  ;;  %v11406_v10 = vor.u32 %v16250_v61, %v11403_v0  ;;  %v16242_v14 = vld [vmem:[#allocation6 + $0x21c] sm:$0xf] }
 0x209   :  { %v16526_v55 = vld [vmem:[#allocation6 + $0xaf4] sm:$0xf0]  ;;  %v16546_v32 = vld [vmem:[#allocation6 + $0xb9c] sm:$0xf] }
 0x20a   :  { %v12490_v24 = vor.u32 %v16526_v55, %v12489_v48  ;;  %v12169_v26 = vld [vmem:[#allocation6 + $0x858] sm:$0xf]  ;;  %3779 = vmatpush.bf16.msrb.mxu3 %v11502_v52  ;;  %3742 = vmatpush.bf16.msrb.mxu0 %v12202_v46  ;;  %v11371_v52 = vld [vmem:[#allocation6 + $0x238] sm:$0xf0] }
 0x20b   :  { %v16446_v27 = vld [vmem:[#allocation6 + $0x874] sm:$0xf0]  ;;  %3769 = vmatpush.bf16.msrb.mxu2 %v11150_v25  ;;  %v16426_v48 = vld [vmem:[#allocation6 + $0x7dc] sm:$0xf]  ;;  %v11374_v46 = vor.u32 %v16242_v14, %v11371_v52  ;;  %v12302_v25 = vor.u32 %v16474_v18, %v12299_v60 }
 0x20c   :  { %v12457_v30 = vld [vmem:[#allocation6 + $0xa98] sm:$0xf]  ;;  %v12170_v39 = vor.u32 %v16446_v27, %v12169_v26  ;;  %3754 = vmatpush.bf16.msrb.mxu1 %v12490_v24  ;;  %v12107_v55 = vld [vmem:[#allocation6 + $0x7f8] sm:$0xf0]  ;;  %v3527_v27 = vpop.f32.mrf.mxu3 }
 0x20d   :  { %v16518_v31 = vld [vmem:[#allocation6 + $0xab4] sm:$0xf0]  ;;  %v12110_v49 = vor.u32 %v16426_v48, %v12107_v55  ;;  %v16346_v24 = vld [vmem:[#allocation6 + $0x55c] sm:$0xf] }
 0x20e   :  { %v12458_v44 = vor.u32 %v16518_v31, %v12457_v30  ;;  %v12137_v45 = vld [vmem:[#allocation6 + $0x818] sm:$0xf]  ;;  %3780 = vmatpush.bf16.msrb.mxu3 %v11470_v29  ;;  %3743 = vmatpush.bf16.msrb.mxu0 %v12170_v39  ;;  %v11787_v26 = vld [vmem:[#allocation6 + $0x578] sm:$0xf0]  ;;  %v12622_v29 = vor.u32 %v16554_v16, %v12619_v17  ;;  %v17846_v18 = vpop.f32.mrf.mxu1  ;;  %v17848_v60 = vpop.f32.mrf.mxu2 }
 0x20f   :  { %v16438_v47 = vld [vmem:[#allocation6 + $0x834] sm:$0xf0]  ;;  %3770 = vmatpush.bf16.msrb.mxu2 %v11118_v19  ;;  %v16418_v30 = vld [vmem:[#allocation6 + $0x79c] sm:$0xf]  ;;  %v11790_v37 = vor.u32 %v16346_v24, %v11787_v26 }
 0x210   :  { %v12425_v56 = vld [vmem:[#allocation6 + $0xa58] sm:$0xf]  ;;  %v12138_v4 = vor.u32 %v16438_v47, %v12137_v45  ;;  %3755 = vmatpush.bf16.msrb.mxu1 %v12458_v44  ;;  %v12075_v31 = vld [vmem:[#allocation6 + $0x7b8] sm:$0xf0] }
 0x211   :  { %v16510_v57 = vld [vmem:[#allocation6 + $0xa74] sm:$0xf0]  ;;  %v12587_v34 = vld [vmem:[#allocation6 + $0xbb8] sm:$0xf0] }
 0x212   :  { %v12426_v7 = vor.u32 %v16510_v57, %v12425_v56  ;;  %v12393_v9 = vld [vmem:[#allocation6 + $0xa18] sm:$0xf]  ;;  %3781 = vmatpush.bf16.msrb.mxu3 %v11438_v53  ;;  %3744 = vmatpush.bf16.msrb.mxu0 %v12138_v4  ;;  %v16466_v35 = vld [vmem:[#allocation6 + $0x91c] sm:$0xf]  ;;  %v12590_v43 = vor.u32 %v16546_v32, %v12587_v34 }
 0x213   :  { %v16502_v12 = vld [vmem:[#allocation6 + $0xa34] sm:$0xf0]  ;;  %3815 = vmatpush.bf16.msra.mxu2 %v12366_v59  ;;  %v12267_v36 = vld [vmem:[#allocation6 + $0x938] sm:$0xf0] }
 0x214   :  { %3756 = vmatpush.bf16.msrb.mxu1 %v12426_v7  ;;  %v12394_v21 = vor.u32 %v16502_v12, %v12393_v9  ;;  %3771 = vmatmul.bf16.vlgmr.msrb.gmra.mxu2 %v17745_v41  ;;  %v12078_v41 = vor.u32 %v16418_v30, %v12075_v31  ;;  %v16338_v39 = vld [vmem:[#allocation6 + $0x51c] sm:$0xf]  ;;  %v12270_v44 = vor.u32 %v16466_v35, %v12267_v36  ;;  %v3540_v30 = vpop.f32.mrf.mxu0  ;;  %v13729_v36 = vld [vmem:[#allocation9 + $0x8a0] sm:$0xf]  ;;  %v16865_v13 = vld [vmem:[#allocation9 + $0x98c] sm:$0xf0] }
 0x215   :  { %3745 = vmatmul.bf16.vlgmr.msrb.gmra.mxu0 %v17763_v1  ;;  %v11755_v40 = vld [vmem:[#allocation6 + $0x538] sm:$0xf0]  ;;  %v16733_v30 = vld [vmem:[#allocation9 + $0x56c] sm:$0xf0] }
 0x216   :  { %3789 = vmatpush.bf16.msra.mxu0 %v11854_v6  ;;  %3782 = vmatpush.bf16.msrb.mxu3 %v11406_v10  ;;  %v16410_v45 = vld [vmem:[#allocation6 + $0x75c] sm:$0xf]  ;;  %v11758_v56 = vor.u32 %v16338_v39, %v11755_v40 }
 0x217   :  { %3816 = vmatpush.bf16.msra.mxu2 %v12334_v15  ;;  %v12043_v47 = vld [vmem:[#allocation6 + $0x778] sm:$0xf0] }
 0x218   :  { %3757 = vmatpush.bf16.msrb.mxu1 %v12394_v21  ;;  %v16538_v51 = vld [vmem:[#allocation6 + $0xb5c] sm:$0xf]  ;;  %v12046_v57 = vor.u32 %v16410_v45, %v12043_v47  ;;  %v16649_v47 = vld [vmem:[#allocation9 + $0x2cc] sm:$0xf0] }
 0x219   :  { %v12555_v53 = vld [vmem:[#allocation6 + $0xb78] sm:$0xf0] }
 0x21a   :  { %3790 = vmatpush.bf16.msra.mxu0 %v11822_v20  ;;  %3783 = vmatpush.bf16.msrb.mxu3 %v11374_v46  ;;  %v16458_v19 = vld [vmem:[#allocation6 + $0x8dc] sm:$0xf]  ;;  %v12558_v0 = vor.u32 %v16538_v51, %v12555_v53 }
 0x21b   :  { %3817 = vmatpush.bf16.msra.mxu2 %v12302_v25  ;;  %3758 = vmatmul.bf16.vlgmr.msrb.gmra.mxu1 %v17767_v28  ;;  %v12235_v54 = vld [vmem:[#allocation6 + $0x8f8] sm:$0xf0] }
 0x21c   :  { %3802 = vmatpush.bf16.msra.mxu1 %v12110_v49  ;;  %v16330_v59 = vld [vmem:[#allocation6 + $0x4dc] sm:$0xf]  ;;  %v12238_v2 = vor.u32 %v16458_v19, %v12235_v54  ;;  %v17850_v19 = vpop.f32.mrf.mxu3 }
 0x21d   :  { %3784 = vmatmul.bf16.vlgmr.msrb.gmra.mxu3 %v17748_v63  ;;  %v11723_v61 = vld [vmem:[#allocation6 + $0x4f8] sm:$0xf0] }
 0x21e   :  { %3828 = vmatpush.bf16.msra.mxu3 %v12622_v29  ;;  %3791 = vmatpush.bf16.msra.mxu0 %v11790_v37  ;;  %v16402_v3 = vld [vmem:[#allocation6 + $0x71c] sm:$0xf]  ;;  %v11726_v63 = vor.u32 %v16330_v59, %v11723_v61  ;;  %v16841_v37 = vld [vmem:[#allocation9 + $0x8cc] sm:$0xf0]  ;;  %v3553_v59 = vpop.f32.mrf.mxu1  ;;  %v3566_v61 = vpop.f32.mrf.mxu2 }
 0x21f   :  { %3818 = vmatpush.bf16.msra.mxu2 %v12270_v44  ;;  %v12011_v4 = vld [vmem:[#allocation6 + $0x738] sm:$0xf0]  ;;  %v13730_v54 = vor.u32 %v16841_v37, %v13729_v36  ;;  %v12817_v37 = vld [vmem:[#allocation9 + $0x180] sm:$0xf] }
 0x220   :  { %3803 = vmatpush.bf16.msra.mxu1 %v12078_v41  ;;  %v16530_v5 = vld [vmem:[#allocation6 + $0xb1c] sm:$0xf]  ;;  %v12014_v62 = vor.u32 %v16402_v3, %v12011_v4  ;;  %v16829_v3 = vld [vmem:[#allocation9 + $0x86c] sm:$0xf0] }
 0x221   :  { %v12523_v6 = vld [vmem:[#allocation6 + $0xb38] sm:$0xf0] }
 0x222   :  { %3829 = vmatpush.bf16.msra.mxu3 %v12590_v43  ;;  %v16450_v7 = vld [vmem:[#allocation6 + $0x89c] sm:$0xf]  ;;  %3792 = vmatpush.bf16.msra.mxu0 %v11758_v56  ;;  %v12526_v12 = vor.u32 %v16530_v5, %v12523_v6  ;;  %v12961_v43 = vld [vmem:[#allocation9 + $0x2a0] sm:$0xf] }
 0x223   :  { %v12203_v8 = vld [vmem:[#allocation6 + $0x8b8] sm:$0xf0]  ;;  %3819 = vmatpush.bf16.msra.mxu2 %v12238_v2  ;;  %v13681_v2 = vld [vmem:[#allocation9 + $0x840] sm:$0xf]  ;;  %v12962_v4 = vor.u32 %v16649_v47, %v12961_v43  ;;  %v16721_v43 = vld [vmem:[#allocation9 + $0x50c] sm:$0xf0] }
 0x224   :  { %3804 = vmatpush.bf16.msra.mxu1 %v12046_v57  ;;  %v16322_v9 = vld [vmem:[#allocation6 + $0x49c] sm:$0xf]  ;;  %v12206_v14 = vor.u32 %v16450_v7, %v12203_v8  ;;  %v12913_v6 = vld [vmem:[#allocation9 + $0x240] sm:$0xf]  ;;  %v16637_v7 = vld [vmem:[#allocation9 + $0x26c] sm:$0xf0] }
 0x225   :  { %v11691_v10 = vld [vmem:[#allocation6 + $0x4b8] sm:$0xf0]  ;;  %v13537_v47 = vld [vmem:[#allocation9 + $0x720] sm:$0xf] }
 0x226   :  { %3830 = vmatpush.bf16.msra.mxu3 %v12558_v0  ;;  %v16394_v52 = vld [vmem:[#allocation6 + $0x6dc] sm:$0xf]  ;;  %3793 = vmatpush.bf16.msra.mxu0 %v11726_v63  ;;  %v11694_v20 = vor.u32 %v16322_v9, %v11691_v10 }
 0x227   :  { %v11979_v15 = vld [vmem:[#allocation6 + $0x6f8] sm:$0xf0]  ;;  %3820 = vmatpush.bf16.msra.mxu2 %v12206_v14  ;;  %v13345_v14 = vld [vmem:[#allocation9 + $0x5a0] sm:$0xf] }
 0x228   :  { %v16522_v48 = vld [vmem:[#allocation6 + $0xadc] sm:$0xf]  ;;  %3805 = vmatpush.bf16.msra.mxu1 %v12014_v62  ;;  %v11982_v21 = vor.u32 %v16394_v52, %v11979_v15  ;;  %v16745_v52 = vld [vmem:[#allocation9 + $0x5cc] sm:$0xf0]  ;;  %v14113_v15 = vld [vmem:[#allocation9 + $0xba0] sm:$0xf] }
 0x229   :  { %v12491_v55 = vld [vmem:[#allocation6 + $0xaf8] sm:$0xf0] }
 0x22a   :  { %v16442_v16 = vld [vmem:[#allocation6 + $0x85c] sm:$0xf]  ;;  %3831 = vmatpush.bf16.msra.mxu3 %v12526_v12  ;;  %v12494_v24 = vor.u32 %v16522_v48, %v12491_v55  ;;  %3794 = vmatpush.bf16.msra.mxu0 %v11694_v20  ;;  %v13682_v12 = vor.u32 %v16829_v3, %v13681_v2  ;;  %v16937_v48 = vld [vmem:[#allocation9 + $0xbcc] sm:$0xf0]  ;;  %v13633_v55 = vld [vmem:[#allocation9 + $0x7e0] sm:$0xf] }
 0x22b   :  { %v12171_v17 = vld [vmem:[#allocation6 + $0x878] sm:$0xf0]  ;;  %v16709_v2 = vld [vmem:[#allocation9 + $0x4ac] sm:$0xf0]  ;;  %v13969_v3 = vld [vmem:[#allocation9 + $0xa80] sm:$0xf] }
 0x22c   :  { %v16314_v46 = vld [vmem:[#allocation6 + $0x45c] sm:$0xf]  ;;  %v12174_v26 = vor.u32 %v16442_v16, %v12171_v17  ;;  %3806 = vmatpush.bf16.msra.mxu1 %v11982_v21  ;;  %v16817_v16 = vld [vmem:[#allocation9 + $0x80c] sm:$0xf0]  ;;  %v12914_v17 = vor.u32 %v16637_v7, %v12913_v6 }
 0x22d   :  { %v11659_v49 = vld [vmem:[#allocation6 + $0x478] sm:$0xf0]  ;;  %v16781_v6 = vld [vmem:[#allocation9 + $0x6ec] sm:$0xf0] }
 0x22e   :  { %v16386_v27 = vld [vmem:[#allocation6 + $0x69c] sm:$0xf]  ;;  %v11662_v35 = vor.u32 %v16314_v46, %v11659_v49  ;;  %3832 = vmatpush.bf16.msra.mxu3 %v12494_v24  ;;  %3821 = vmatpush.bf16.msra.mxu2 %v12174_v26  ;;  %v13346_v46 = vor.u32 %v16745_v52, %v13345_v14  ;;  %v12865_v49 = vld [vmem:[#allocation9 + $0x1e0] sm:$0xf]  ;;  %v16625_v24 = vld [vmem:[#allocation9 + $0x20c] sm:$0xf0]  ;;  %v3579_v26 = vpop.f32.mrf.mxu3 }
 0x22f   :  { %v11947_v29 = vld [vmem:[#allocation6 + $0x6b8] sm:$0xf0]  ;;  %v12866_v36 = vor.u32 %v16625_v24, %v12865_v49  ;;  %v13921_v14 = vld [vmem:[#allocation9 + $0xa20] sm:$0xf]  ;;  %v16889_v52 = vld [vmem:[#allocation9 + $0xa4c] sm:$0xf0] }
 0x230   :  { %v16514_v25 = vld [vmem:[#allocation6 + $0xa9c] sm:$0xf]  ;;  %v11950_v41 = vor.u32 %v16386_v27, %v11947_v29  ;;  %3795 = vmatpush.bf16.msra.mxu0 %v11662_v35  ;;  %v14114_v27 = vor.u32 %v16937_v48, %v14113_v15  ;;  %v13634_v29 = vor.u32 %v16817_v16, %v13633_v55  ;;  %v16805_v35 = vld [vmem:[#allocation9 + $0x7ac] sm:$0xf0]  ;;  %v13441_v15 = vld [vmem:[#allocation9 + $0x660] sm:$0xf]  ;;  %v17858_v55 = vpop.f32.mrf.mxu1  ;;  %v17860_v16 = vpop.f32.mrf.mxu2  ;;  %v13922_v49 = vor.u32 %v16889_v52, %v13921_v14 }
 0x231   :  { %v12459_v31 = vld [vmem:[#allocation6 + $0xab8] sm:$0xf0]  ;;  %v16769_v48 = vld [vmem:[#allocation9 + $0x68c] sm:$0xf0]  ;;  %v13105_v26 = vld [vmem:[#allocation9 + $0x3c0] sm:$0xf] }
 0x232   :  { %v16434_v32 = vld [vmem:[#allocation6 + $0x81c] sm:$0xf]  ;;  %v12462_v44 = vor.u32 %v16514_v25, %v12459_v31  ;;  %3807 = vmatpush.bf16.msra.mxu1 %v11950_v41  ;;  %v13297_v25 = vld [vmem:[#allocation9 + $0x540] sm:$0xf]  ;;  %v16613_v41 = vld [vmem:[#allocation9 + $0x1ac] sm:$0xf0]  ;;  %v13442_v24 = vor.u32 %v16769_v48, %v13441_v15 }
 0x233   :  { %v12139_v34 = vld [vmem:[#allocation6 + $0x838] sm:$0xf0]  ;;  %v14065_v31 = vld [vmem:[#allocation9 + $0xb40] sm:$0xf] }
 0x234   :  { %v16306_v39 = vld [vmem:[#allocation6 + $0x41c] sm:$0xf]  ;;  %v12142_v45 = vor.u32 %v16434_v32, %v12139_v34  ;;  %3833 = vmatpush.bf16.msra.mxu3 %v12462_v44  ;;  %v16925_v32 = vld [vmem:[#allocation9 + $0xb6c] sm:$0xf0]  ;;  %v13585_v34 = vld [vmem:[#allocation9 + $0x780] sm:$0xf] }
 0x235   :  { %v11627_v40 = vld [vmem:[#allocation6 + $0x438] sm:$0xf0]  ;;  %v14017_v44 = vld [vmem:[#allocation9 + $0xae0] sm:$0xf] }
 0x236   :  { %v16378_v51 = vld [vmem:[#allocation6 + $0x65c] sm:$0xf]  ;;  %v11630_v0 = vor.u32 %v16306_v39, %v11627_v40  ;;  %3822 = vmatpush.bf16.msra.mxu2 %v12142_v45  ;;  %v13586_v39 = vor.u32 %v16805_v35, %v13585_v34  ;;  %v13249_v40 = vld [vmem:[#allocation9 + $0x4e0] sm:$0xf]  ;;  %v16913_v45 = vld [vmem:[#allocation9 + $0xb0c] sm:$0xf0] }
 0x237   :  { %v11915_v53 = vld [vmem:[#allocation6 + $0x678] sm:$0xf0]  ;;  %v14018_v59 = vor.u32 %v16913_v45, %v14017_v44  ;;  %v12625_v35 = vld [vmem:[#allocation9] sm:$0xf]  ;;  %v17866_v45 = vpop.f32.mrf.mxu3 }
 0x238   :  { %v16506_v56 = vld [vmem:[#allocation6 + $0xa5c] sm:$0xf]  ;;  %v11918_v5 = vor.u32 %v16378_v51, %v11915_v53  ;;  %3796 = vmatpush.bf16.msra.mxu0 %v11630_v0  ;;  %v16793_v51 = vld [vmem:[#allocation9 + $0x74c] sm:$0xf0]  ;;  %v12818_v53 = vor.u32 %v16613_v41, %v12817_v37  ;;  %v13201_v0 = vld [vmem:[#allocation9 + $0x480] sm:$0xf] }
 0x239   :  { %v12427_v57 = vld [vmem:[#allocation6 + $0xa78] sm:$0xf0]  ;;  %3823 = vmatmul.bf16.vlgmr.msra.gmra.mxu2 %v17763_v1  ;;  %v13298_v1 = vor.u32 %v16733_v30, %v13297_v25  ;;  %v13538_v61 = vor.u32 %v16793_v51, %v13537_v47  ;;  %v13202_v7 = vor.u32 %v16709_v2, %v13201_v0  ;;  %v16877_v30 = vld [vmem:[#allocation9 + $0x9ec] sm:$0xf0]  ;;  %v14497_v37 = vld [vmem:[#allocation9 + $0xea0] sm:$0xf] }
 0x23a   :  { %v16370_v8 = vld [vmem:[#allocation6 + $0x61c] sm:$0xf]  ;;  %v12430_v63 = vor.u32 %v16506_v56, %v12427_v57  ;;  %8519 = vmatpush.bf16.msrb.mxu2 %v13730_v54  ;;  %3808 = vmatpush.bf16.msra.mxu1 %v11918_v5  ;;  %v13250_v54 = vor.u32 %v16721_v43, %v13249_v40  ;;  %v12769_v56 = vld [vmem:[#allocation9 + $0x120] sm:$0xf]  ;;  %v16601_v57 = vld [vmem:[#allocation9 + $0x14c] sm:$0xf0] }
 0x23b   :  { %v11883_v62 = vld [vmem:[#allocation6 + $0x638] sm:$0xf0]  ;;  %3797 = vmatmul.bf16.vlgmr.msra.gmra.mxu0 %v17753_v50  ;;  %v14066_v50 = vor.u32 %v16925_v32, %v14065_v31  ;;  %v13489_v5 = vld [vmem:[#allocation9 + $0x6c0] sm:$0xf]  ;;  %v16757_v32 = vld [vmem:[#allocation9 + $0x62c] sm:$0xf0] }
 0x23c   :  { %v16498_v9 = vld [vmem:[#allocation6 + $0xa1c] sm:$0xf]  ;;  %8493 = vmatpush.bf16.msrb.mxu0 %v12962_v4  ;;  %v11886_v20 = vor.u32 %v16370_v8, %v11883_v62  ;;  %3834 = vmatpush.bf16.msra.mxu3 %v12430_v63  ;;  %v17856_v4 = vpop.f32.mrf.mxu0  ;;  %v12721_v8 = vld [vmem:[#allocation9 + $0xc0] sm:$0xf]  ;;  %v16589_v63 = vld [vmem:[#allocation9 + $0xec] sm:$0xf0] }
 0x23d   :  { %v12395_v10 = vld [vmem:[#allocation6 + $0xa38] sm:$0xf0]  ;;  %v13393_v31 = vld [vmem:[#allocation9 + $0x600] sm:$0xf]  ;;  %v17033_v41 = vld [vmem:[#allocation9 + $0xecc] sm:$0xf0] }
 0x23e   :  { %v12398_v21 = vor.u32 %v16498_v9, %v12395_v10  ;;  %8520 = vmatpush.bf16.msrb.mxu2 %v13682_v12  ;;  %3809 = vmatpush.bf16.msra.mxu1 %v11886_v20  ;;  %v13490_v9 = vor.u32 %v16781_v6, %v13489_v5  ;;  %v13153_v10 = vld [vmem:[#allocation9 + $0x420] sm:$0xf]  ;;  %v16697_v12 = vld [vmem:[#allocation9 + $0x44c] sm:$0xf0] }
 0x23f   :  { %v13154_v20 = vor.u32 %v16697_v12, %v13153_v10  ;;  %v13057_v40 = vld [vmem:[#allocation9 + $0x360] sm:$0xf]  ;;  %v16673_v43 = vld [vmem:[#allocation9 + $0x38c] sm:$0xf0]  ;;  %v1285_v12 = vperm.slane %v17826_v23, 4 }
 0x240   :  { %8494 = vmatpush.bf16.msrb.mxu0 %v12914_v17  ;;  %3835 = vmatpush.bf16.msra.mxu3 %v12398_v21  ;;  %v12722_v17 = vor.u32 %v16589_v63, %v12721_v8  ;;  %v12673_v21 = vld [vmem:[#allocation9 + $0x60] sm:$0xf]  ;;  %v17225_v51 = vld [vmem:[#allocation9 + $0x14cc] sm:$0xf0] }
 0x241   :  { %3810 = vmatmul.bf16.vlgmr.msra.gmra.mxu1 %v17756_v11  ;;  %v16901_v11 = vld [vmem:[#allocation9 + $0xaac] sm:$0xf0]  ;;  %v13825_v44 = vld [vmem:[#allocation9 + $0x960] sm:$0xf] }
 0x242   :  { %8506 = vmatpush.bf16.msrb.mxu1 %v13346_v46  ;;  %8521 = vmatpush.bf16.msrb.mxu2 %v13634_v29  ;;  %v13970_v62 = vor.u32 %v16901_v11, %v13969_v3  ;;  %v16577_v46 = vld [vmem:[#allocation9 + $0x8c] sm:$0xf0]  ;;  %v13873_v29 = vld [vmem:[#allocation9 + $0x9c0] sm:$0xf]  ;;  %v13826_v5 = vor.u32 %v16865_v13, %v13825_v44 }
 0x243   :  { %3836 = vmatmul.bf16.vlgmr.msra.gmra.mxu3 %v17767_v28  ;;  %v12770_v28 = vor.u32 %v16601_v57, %v12769_v56  ;;  %v12674_v34 = vor.u32 %v16577_v46, %v12673_v21  ;;  %v13874_v22 = vor.u32 %v16877_v30, %v13873_v29  ;;  %v15265_v47 = vld [vmem:[#allocation9 + $0x14a0] sm:$0xf]  ;;  %v17021_v0 = vld [vmem:[#allocation9 + $0xe6c] sm:$0xf0] }
 0x244   :  { %8532 = vmatpush.bf16.msrb.mxu3 %v14114_v27  ;;  %8495 = vmatpush.bf16.msrb.mxu0 %v12866_v36  ;;  %v16685_v27 = vld [vmem:[#allocation9 + $0x3ec] sm:$0xf0]  ;;  %v3592_v25 = vpop.f32.mrf.mxu0  ;;  %v14449_v57 = vld [vmem:[#allocation9 + $0xe40] sm:$0xf] }
 0x245   :  { %v13106_v36 = vor.u32 %v16685_v27, %v13105_v26  ;;  %v13009_v2 = vld [vmem:[#allocation9 + $0x300] sm:$0xf]  ;;  %v16661_v3 = vld [vmem:[#allocation9 + $0x32c] sm:$0xf0]  ;;  %v14450_v14 = vor.u32 %v17021_v0, %v14449_v57  ;;  %v3539_v25 = vadd.f32 %v17844_v38, %v1285_v12 }
 0x246   :  { %8507 = vmatpush.bf16.msrb.mxu1 %v13298_v1  ;;  %8522 = vmatpush.bf16.msrb.mxu2 %v13586_v39  ;;  %v16565_v1 = vld [vmem:[#allocation9 + $0x2c] sm:$0xf0]  ;;  %v13394_v39 = vor.u32 %v16757_v32, %v13393_v31  ;;  %v13777_v6 = vld [vmem:[#allocation9 + $0x900] sm:$0xf]  ;;  %v13010_v52 = vor.u32 %v16661_v3, %v13009_v2 }
 0x247   :  { %v12626_v56 = vor.u32 %v16565_v1, %v12625_v35  ;;  %v17129_v8 = vld [vmem:[#allocation9 + $0x11cc] sm:$0xf0]  ;;  %v15217_v63 = vld [vmem:[#allocation9 + $0x1440] sm:$0xf] }
 0x248   :  { %8533 = vmatpush.bf16.msrb.mxu3 %v14066_v50  ;;  %8496 = vmatpush.bf16.msrb.mxu0 %v12818_v53  ;;  %v3526_v50 = vadd.f32 %v17838_v58, %v17836_v33  ;;  %v3605_v53 = vpop.f32.mrf.mxu1  ;;  %v14498_v33 = vor.u32 %v17033_v41, %v14497_v37  ;;  %v13058_v58 = vor.u32 %v16673_v43, %v13057_v40  ;;  %v14833_v21 = vld [vmem:[#allocation9 + $0x1140] sm:$0xf]  ;;  %v17201_v23 = vld [vmem:[#allocation9 + $0x140c] sm:$0xf0] }
 0x249   :  { %v15169_v26 = vld [vmem:[#allocation9 + $0x13e0] sm:$0xf]  ;;  %v16997_v35 = vld [vmem:[#allocation9 + $0xdac] sm:$0xf0]  ;;  %v3552_v37 = vadd.f32 %v17846_v18, %v3539_v25 }
 0x24a   :  { %8508 = vmatpush.bf16.msrb.mxu1 %v13250_v54  ;;  %8523 = vmatpush.bf16.msrb.mxu2 %v13538_v61  ;;  %v3618_v54 = vpop.f32.mrf.mxu2  ;;  %v17438_v61 = vpop.eup %17437  ;;  %17443 = vtanh.f32 %v3526_v50  ;;  %v15170_v29 = vor.u32 %v17201_v23, %v15169_v26  ;;  %v17105_v41 = vld [vmem:[#allocation9 + $0x110c] sm:$0xf0]  ;;  %v15121_v50 = vld [vmem:[#allocation9 + $0x1380] sm:$0xf]  ;;  %v16643_v26 = vld [vmem:[#allocation9 + $0x2a4] sm:$0xf] }
 0x24b   :  { %v17440_v11 = vpop.eup %17439  ;;  %v14305_v13 = vld [vmem:[#allocation9 + $0xd20] sm:$0xf]  ;;  %v17093_v53 = vld [vmem:[#allocation9 + $0x10ac] sm:$0xf0]  ;;  %v12963_v23 = vld [vmem:[#allocation9 + $0x2d0] sm:$0xf0] }
 0x24c   :  { %8534 = vmatpush.bf16.msrb.mxu3 %v14018_v59  ;;  %8497 = vmatpush.bf16.msrb.mxu0 %v12770_v28  ;;  %v15266_v59 = vor.u32 %v17225_v51, %v15265_v47  ;;  %v16853_v28 = vld [vmem:[#allocation9 + $0x92c] sm:$0xf0]  ;;  %v17871_v10 = vpack.c.bf16 %v17440_v11, %v17440_v11  ;;  %v17442_v46 = vpop.eup %17441  ;;  %v14737_v18 = vld [vmem:[#allocation9 + $0x1080] sm:$0xf]  ;;  %v3565_v51 = vadd.f32 %v17848_v60, %v3552_v37  ;;  %v13731_v37 = vld [vmem:[#allocation9 + $0x8d0] sm:$0xf0] }
 0x24d   :  { %v13778_v15 = vor.u32 %v16853_v28, %v13777_v6  ;;  %v17877_v31 = vpack.c.bf16 %v17442_v46, %v17442_v46  ;;  %v16985_v47 = vld [vmem:[#allocation9 + $0xd4c] sm:$0xf0]  ;;  %v15073_v54 = vld [vmem:[#allocation9 + $0x1320] sm:$0xf]  ;;  %v14738_v0 = vor.u32 %v17093_v53, %v14737_v18 }
 0x24e   :  { %8509 = vmatpush.bf16.msrb.mxu1 %v13202_v7  ;;  %8524 = vmatpush.bf16.msrb.mxu2 %v13490_v9  ;;  %v14881_v7 = vld [vmem:[#allocation9 + $0x11a0] sm:$0xf]  ;;  %v17869_v9 = vpack.c.bf16 %v17438_v61, %v17438_v61  ;;  %v3578_v61 = vadd.f32 %v17850_v19, %v3565_v51  ;;  %v16973_v3 = vld [vmem:[#allocation9 + $0xcec] sm:$0xf0] }
 0x24f   :  { %v14882_v48 = vor.u32 %v17129_v8, %v14881_v7  ;;  %v14257_v2 = vld [vmem:[#allocation9 + $0xcc0] sm:$0xf]  ;;  %v17081_v6 = vld [vmem:[#allocation9 + $0x104c] sm:$0xf0] }
 0x250   :  { %8535 = vmatpush.bf16.msrb.mxu3 %v13970_v62  ;;  %8498 = vmatpush.bf16.msrb.mxu0 %v12722_v17  ;;  %v17213_v62 = vld [vmem:[#allocation9 + $0x146c] sm:$0xf0]  ;;  %v14401_v17 = vld [vmem:[#allocation9 + $0xde0] sm:$0xf]  ;;  %v17444_v27 = vpop.eup %17443 }
 0x251   :  { %v15218_v42 = vor.u32 %v17213_v62, %v15217_v63  ;;  %v17879_v1 = vpack.c.bf16 %v17444_v27, %v17444_v27  ;;  %v3642_v57 = vpop.f32.mrf.mxu0  ;;  %v14689_v11 = vld [vmem:[#allocation9 + $0x1020] sm:$0xf]  ;;  %v17165_v7 = vld [vmem:[#allocation9 + $0x12ec] sm:$0xf0] }
 0x252   :  { %8510 = vmatpush.bf16.msrb.mxu1 %v13154_v20  ;;  %8525 = vmatpush.bf16.msrb.mxu2 %v13442_v24  ;;  %v17009_v20 = vld [vmem:[#allocation9 + $0xe0c] sm:$0xf0]  ;;  %v15025_v28 = vld [vmem:[#allocation9 + $0x12c0] sm:$0xf]  ;;  %v14690_v12 = vor.u32 %v17081_v6, %v14689_v11  ;;  %v16727_v6 = vld [vmem:[#allocation9 + $0x544] sm:$0xf] }
 0x253   :  { %v17117_v24 = vld [vmem:[#allocation9 + $0x116c] sm:$0xf0]  ;;  %v14402_v30 = vor.u32 %v17009_v20, %v14401_v17  ;;  %v15026_v8 = vor.u32 %v17165_v7, %v15025_v28  ;;  %v14161_v46 = vld [vmem:[#allocation9 + $0xc00] sm:$0xf] }
 0x254   :  { %8536 = vmatpush.bf16.msrb.mxu3 %v13922_v49  ;;  %8499 = vmatpush.bf16.msrb.mxu0 %v12674_v34  ;;  %v3631_v49 = vpop.f32.mrf.mxu3  ;;  %v14834_v32 = vor.u32 %v17117_v24, %v14833_v21  ;;  %v14353_v34 = vld [vmem:[#allocation9 + $0xd80] sm:$0xf]  ;;  %v17153_v17 = vld [vmem:[#allocation9 + $0x128c] sm:$0xf0] }
 0x255   :  { %v14354_v43 = vor.u32 %v16997_v35, %v14353_v34  ;;  %v3668_v62 = vpop.f32.mrf.mxu2  ;;  %v16949_v49 = vld [vmem:[#allocation9 + $0xc2c] sm:$0xf0]  ;;  %v14593_v27 = vld [vmem:[#allocation9 + $0xf60] sm:$0xf] }
 0x256   :  { %8511 = vmatpush.bf16.msrb.mxu1 %v13106_v36  ;;  %8526 = vmatpush.bf16.msrb.mxu2 %v13394_v39  ;;  %v14785_v36 = vld [vmem:[#allocation9 + $0x10e0] sm:$0xf]  ;;  %v17883_v39 = vld [vmem:[#allocation7] sm:$0xff]  ;;  %v17057_v25 = vld [vmem:[#allocation9 + $0xf8c] sm:$0xf0] }
 0x257   :  { %v1286_v40 = vperm.slane %v17883_v39, 5  ;;  %v14786_v44 = vor.u32 %v17105_v41, %v14785_v36  ;;  %v16835_v36 = vld [vmem:[#allocation9 + $0x8a4] sm:$0xf]  ;;  %v14545_v51 = vld [vmem:[#allocation9 + $0xf00] sm:$0xf] }
 0x258   :  { %8537 = vmatpush.bf16.msrb.mxu3 %v13874_v22  ;;  %8500 = vmatpush.bf16.msrb.mxu0 %v12626_v56  ;;  %v17189_v22 = vld [vmem:[#allocation9 + $0x13ac] sm:$0xf0] }
 0x259   :  { %8527 = vmatmul.bf16.vlgmr.msrb.gmra.mxu2 %v17869_v9  ;;  %v15122_v38 = vor.u32 %v17189_v22, %v15121_v50  ;;  %v17177_v56 = vld [vmem:[#allocation9 + $0x134c] sm:$0xf0]  ;;  %v3644_v20 = vpop.f32.mrf.mxu0 }
 0x25a   :  { %8571 = vmatpush.bf16.msra.mxu2 %v15266_v59  ;;  %8512 = vmatpush.bf16.msrb.mxu1 %v13058_v58  ;;  %v15074_v59 = vor.u32 %v17177_v56, %v15073_v54  ;;  %v14306_v58 = vor.u32 %v16985_v47, %v14305_v13  ;;  %v16631_v13 = vld [vmem:[#allocation9 + $0x244] sm:$0xf]  ;;  %v12915_v47 = vld [vmem:[#allocation9 + $0x270] sm:$0xf0]  ;;  %v17045_v53 = vld [vmem:[#allocation9 + $0xf2c] sm:$0xf0] }
 0x25b   :  { %8501 = vmatmul.bf16.vlgmr.msrb.gmra.mxu0 %v17871_v10  ;;  %v16739_v54 = vld [vmem:[#allocation9 + $0x5a4] sm:$0xf]  ;;  %v13347_v56 = vld [vmem:[#allocation9 + $0x5d0] sm:$0xf0] }
 0x25c   :  { %8545 = vmatpush.bf16.msra.mxu0 %v14498_v33  ;;  %8538 = vmatpush.bf16.msrb.mxu3 %v13826_v5  ;;  %v3617_v33 = vadd.f32 %v17860_v16, %v1286_v40  ;;  %v3591_v5 = vadd.f32 %v17856_v4, %v3578_v61  ;;  %v3655_v16 = vpop.f32.mrf.mxu1  ;;  %v13734_v40 = vor.u32 %v16835_v36, %v13731_v37  ;;  %v13251_v20 = vld [vmem:[#allocation9 + $0x510] sm:$0xf0] }
 0x25d   :  { %v3670_v22 = vpop.f32.mrf.mxu2  ;;  %v13350_v11 = vor.u32 %v16739_v54, %v13347_v56 }
 0x25e   :  { %8572 = vmatpush.bf16.msra.mxu2 %v15218_v42  ;;  %8513 = vmatpush.bf16.msrb.mxu1 %v13010_v52  ;;  %v3630_v60 = vadd.f32 %v17866_v45, %v3617_v33  ;;  %v3604_v19 = vadd.f32 %v17858_v55, %v3591_v5  ;;  %v14258_v42 = vor.u32 %v16973_v3, %v14257_v2  ;;  %v16961_v52 = vld [vmem:[#allocation9 + $0xc8c] sm:$0xf0]  ;;  %v14977_v45 = vld [vmem:[#allocation9 + $0x1260] sm:$0xf]  ;;  %v16619_v5 = vld [vmem:[#allocation9 + $0x1e4] sm:$0xf] }
 0x25f   :  { %v14978_v21 = vor.u32 %v17153_v17, %v14977_v45  ;;  %v3681_v34 = vpop.f32.mrf.mxu3  ;;  %v15649_v2 = vld [vmem:[#allocation9 + $0x17a0] sm:$0xf]  ;;  %v17321_v3 = vld [vmem:[#allocation9 + $0x17cc] sm:$0xf0]  ;;  %v16715_v45 = vld [vmem:[#allocation9 + $0x4e4] sm:$0xf] }
 0x260   :  { %8546 = vmatpush.bf16.msra.mxu0 %v14450_v14  ;;  %8539 = vmatpush.bf16.msrb.mxu3 %v13778_v15  ;;  %v3643_v63 = vadd.f32 %v3642_v57, %v3630_v60  ;;  %v14209_v14 = vld [vmem:[#allocation9 + $0xc60] sm:$0xf]  ;;  %17445 = vtanh.f32 %v3604_v19  ;;  %v16823_v57 = vld [vmem:[#allocation9 + $0x844] sm:$0xf]  ;;  %v12867_v60 = vld [vmem:[#allocation9 + $0x210] sm:$0xf0]  ;;  %v15650_v28 = vor.u32 %v17321_v3, %v15649_v2 }
 0x261   :  { %8514 = vmatmul.bf16.vlgmr.msrb.gmra.mxu1 %v17877_v31  ;;  %v14641_v15 = vld [vmem:[#allocation9 + $0xfc0] sm:$0xf]  ;;  %v14210_v55 = vor.u32 %v16961_v52, %v14209_v14  ;;  %v16811_v19 = vld [vmem:[#allocation9 + $0x7e4] sm:$0xf]  ;;  %v17309_v14 = vld [vmem:[#allocation9 + $0x176c] sm:$0xf0] }
 0x262   :  { %8558 = vmatpush.bf16.msra.mxu1 %v14882_v48  ;;  %8573 = vmatpush.bf16.msra.mxu2 %v15170_v29  ;;  %v3656_v4 = vadd.f32 %v3655_v16, %v3643_v63  ;;  %v17069_v48 = vld [vmem:[#allocation9 + $0xfec] sm:$0xf0]  ;;  %v13635_v63 = vld [vmem:[#allocation9 + $0x810] sm:$0xf0]  ;;  %v16679_v3 = vld [vmem:[#allocation9 + $0x3c4] sm:$0xf] }
 0x263   :  { %8540 = vmatmul.bf16.vlgmr.msrb.gmra.mxu3 %v17879_v1  ;;  %v14642_v24 = vor.u32 %v17069_v48, %v14641_v15  ;;  %v12819_v48 = vld [vmem:[#allocation9 + $0x1b0] sm:$0xf0]  ;;  %v17285_v22 = vld [vmem:[#allocation9 + $0x16ac] sm:$0xf0] }
 0x264   :  { %8547 = vmatpush.bf16.msra.mxu0 %v14402_v30  ;;  %v3669_v29 = vadd.f32 %v3668_v62, %v3656_v4  ;;  %v14929_v30 = vld [vmem:[#allocation9 + $0x1200] sm:$0xf]  ;;  %v3657_v50 = vpop.f32.mrf.mxu1  ;;  %8584 = vmatpush.bf16.msra.mxu3 %v15650_v28  ;;  %v13638_v62 = vor.u32 %v16811_v19, %v13635_v63  ;;  %v16607_v4 = vld [vmem:[#allocation9 + $0x184] sm:$0xf]  ;;  %v12675_v2 = vld [vmem:[#allocation9 + $0x90] sm:$0xf0] }
 0x265   :  { %v15505_v50 = vld [vmem:[#allocation9 + $0x1680] sm:$0xf]  ;;  %v12627_v63 = vld [vmem:[#allocation9 + $0x30] sm:$0xf0] }
 0x266   :  { %8559 = vmatpush.bf16.msra.mxu1 %v14834_v32  ;;  %8574 = vmatpush.bf16.msra.mxu2 %v15122_v38  ;;  %v17141_v32 = vld [vmem:[#allocation9 + $0x122c] sm:$0xf0]  ;;  %v3682_v41 = vadd.f32 %v3681_v34, %v3669_v29  ;;  %v14162_v38 = vor.u32 %v16949_v49, %v14161_v46  ;;  %v17446_v18 = vpop.eup %17445  ;;  %v12822_v49 = vor.u32 %v16607_v4, %v12819_v48  ;;  %v12771_v29 = vld [vmem:[#allocation9 + $0x150] sm:$0xf0]  ;;  %v16787_v34 = vld [vmem:[#allocation9 + $0x724] sm:$0xf] }
 0x267   :  { %v14930_v35 = vor.u32 %v17141_v32, %v14929_v30  ;;  %v17893_v33 = vpack.c.bf16 %v17446_v18, %v17446_v18  ;;  %v3683_v7 = vpop.f32.mrf.mxu3  ;;  %v13203_v32 = vld [vmem:[#allocation9 + $0x4b0] sm:$0xf0]  ;;  %v16775_v18 = vld [vmem:[#allocation9 + $0x6c4] sm:$0xf] }
 0x268   :  { %8548 = vmatpush.bf16.msra.mxu0 %v14354_v43  ;;  %v12966_v43 = vor.u32 %v16643_v26, %v12963_v23  ;;  %17447 = vtanh.f32 %v3682_v41  ;;  %v17297_v26 = vld [vmem:[#allocation9 + $0x170c] sm:$0xf0]  ;;  %v13254_v23 = vor.u32 %v16715_v45, %v13251_v20  ;;  %v16559_v7 = vld [vmem:[#allocation9 + $0x4] sm:$0xf]  ;;  %v13059_v48 = vld [vmem:[#allocation9 + $0x390] sm:$0xf0] }
 0x269   :  { %v16751_v45 = vld [vmem:[#allocation9 + $0x604] sm:$0xf] }
 0x26a   :  { %8560 = vmatpush.bf16.msra.mxu1 %v14786_v44  ;;  %8575 = vmatpush.bf16.msra.mxu2 %v15074_v59  ;;  %v14594_v44 = vor.u32 %v17057_v25, %v14593_v27  ;;  %v13683_v59 = vld [vmem:[#allocation9 + $0x870] sm:$0xf0]  ;;  %v16595_v27 = vld [vmem:[#allocation9 + $0x124] sm:$0xf] }
 0x26b   :  { %v13686_v61 = vor.u32 %v16823_v57, %v13683_v59  ;;  %v16703_v25 = vld [vmem:[#allocation9 + $0x484] sm:$0xf]  ;;  %v12774_v41 = vor.u32 %v16595_v27, %v12771_v29  ;;  %v15457_v59 = vld [vmem:[#allocation9 + $0x1620] sm:$0xf]  ;;  %v17249_v29 = vld [vmem:[#allocation9 + $0x158c] sm:$0xf0] }
 0x26c   :  { %8549 = vmatpush.bf16.msra.mxu0 %v14306_v58  ;;  %v12918_v58 = vor.u32 %v16631_v13, %v12915_v47  ;;  %v15506_v13 = vor.u32 %v17285_v22, %v15505_v50  ;;  %v13155_v47 = vld [vmem:[#allocation9 + $0x450] sm:$0xf0]  ;;  %v17015_v27 = vld [vmem:[#allocation9 + $0xe44] sm:$0xf]  ;;  %v17237_v50 = vld [vmem:[#allocation9 + $0x152c] sm:$0xf0] }
 0x26d   :  { %v1287_v22 = vperm.slane %v17883_v39, 6 }
 0x26e   :  { %8561 = vmatpush.bf16.msra.mxu1 %v14738_v0  ;;  %8576 = vmatpush.bf16.msra.mxu2 %v15026_v8  ;;  %v14546_v0 = vor.u32 %v17045_v53, %v14545_v51  ;;  %v13299_v8 = vld [vmem:[#allocation9 + $0x570] sm:$0xf0]  ;;  %v17448_v16 = vpop.eup %17447 }
 0x26f   :  { %v17896_v52 = vpack.c.bf16 %v17448_v16, %v17448_v16  ;;  %v13302_v15 = vor.u32 %v16727_v6, %v13299_v8  ;;  %v13491_v51 = vld [vmem:[#allocation9 + $0x6f0] sm:$0xf0]  ;;  %v15409_v16 = vld [vmem:[#allocation9 + $0x15c0] sm:$0xf] }
 0x270   :  { %8550 = vmatpush.bf16.msra.mxu0 %v14258_v42  ;;  %v12870_v42 = vor.u32 %v16619_v5, %v12867_v60  ;;  %v13494_v53 = vor.u32 %v16775_v18, %v13491_v51  ;;  %v13107_v5 = vld [vmem:[#allocation9 + $0x3f0] sm:$0xf0]  ;;  %v16763_v60 = vld [vmem:[#allocation9 + $0x664] sm:$0xf] }
 0x271   :  { %v17899_v36 = vpop.f32.mrf.mxu0  ;;  %v13443_v6 = vld [vmem:[#allocation9 + $0x690] sm:$0xf0] }
 0x272   :  { %8562 = vmatpush.bf16.msra.mxu1 %v14690_v12  ;;  %8577 = vmatpush.bf16.msra.mxu2 %v14978_v21  ;;  %v15601_v12 = vld [vmem:[#allocation9 + $0x1740] sm:$0xf]  ;;  %v16799_v21 = vld [vmem:[#allocation9 + $0x784] sm:$0xf]  ;;  %v13446_v8 = vor.u32 %v16763_v60, %v13443_v6  ;;  %v14403_v18 = vld [vmem:[#allocation9 + $0xe10] sm:$0xf0] }
 0x273   :  { %v15602_v17 = vor.u32 %v17309_v14, %v15601_v12  ;;  %v17027_v12 = vld [vmem:[#allocation9 + $0xea4] sm:$0xf]  ;;  %v14499_v14 = vld [vmem:[#allocation9 + $0xed0] sm:$0xf0] }
 0x274   :  { %8551 = vmatpush.bf16.msra.mxu0 %v14210_v55  ;;  %v13587_v55 = vld [vmem:[#allocation9 + $0x7b0] sm:$0xf0]  ;;  %v17099_v6 = vld [vmem:[#allocation9 + $0x10e4] sm:$0xf] }
 0x275   :  { %8585 = vmatpush.bf16.msra.mxu3 %v15602_v17  ;;  %v13590_v46 = vor.u32 %v16799_v21, %v13587_v55  ;;  %v17903_v56 = vpop.f32.mrf.mxu2  ;;  %v13395_v17 = vld [vmem:[#allocation9 + $0x630] sm:$0xf0] }
 0x276   :  { %8563 = vmatpush.bf16.msra.mxu1 %v14642_v24  ;;  %8578 = vmatpush.bf16.msra.mxu2 %v14930_v35  ;;  %v15553_v24 = vld [vmem:[#allocation9 + $0x16e0] sm:$0xf]  ;;  %v13539_v35 = vld [vmem:[#allocation9 + $0x750] sm:$0xf0]  ;;  %v13398_v21 = vor.u32 %v16751_v45, %v13395_v17 }
 0x277   :  { %v15554_v30 = vor.u32 %v17297_v26, %v15553_v24  ;;  %v13542_v37 = vor.u32 %v16787_v34, %v13539_v35  ;;  %v15361_v24 = vld [vmem:[#allocation9 + $0x1560] sm:$0xf]  ;;  %v14502_v26 = vor.u32 %v17027_v12, %v14499_v14  ;;  %v17123_v35 = vld [vmem:[#allocation9 + $0x11a4] sm:$0xf]  ;;  %v14115_v51 = vld [vmem:[#allocation9 + $0xbd0] sm:$0xf0] }
 0x278   :  { %8552 = vmatpush.bf16.msra.mxu0 %v14162_v38  ;;  %v13206_v38 = vor.u32 %v16703_v25, %v13203_v32  ;;  %v17901_v54 = vpop.f32.mrf.mxu1  ;;  %v14451_v25 = vld [vmem:[#allocation9 + $0xe70] sm:$0xf0]  ;;  %v15362_v34 = vor.u32 %v17249_v29, %v15361_v24  ;;  %v17087_v12 = vld [vmem:[#allocation9 + $0x1084] sm:$0xf] }
 0x279   :  { %8586 = vmatpush.bf16.msra.mxu3 %v15554_v30  ;;  %v3696_v28 = vpop.f32.mrf.mxu0  ;;  %v16655_v30 = vld [vmem:[#allocation9 + $0x304] sm:$0xf]  ;;  %v13011_v32 = vld [vmem:[#allocation9 + $0x330] sm:$0xf0] }
 0x27a   :  { %8623 = vmatpush.bf16.msrb.mxu2 %v13734_v40  ;;  %8564 = vmatpush.bf16.msra.mxu1 %v14594_v44  ;;  %v16583_v40 = vld [vmem:[#allocation9 + $0xc4] sm:$0xf]  ;;  %v14067_v60 = vld [vmem:[#allocation9 + $0xb70] sm:$0xf0] }
 0x27b   :  { %8553 = vmatmul.bf16.vlgmr.msra.gmra.mxu0 %v17893_v33  ;;  %v16691_v44 = vld [vmem:[#allocation9 + $0x424] sm:$0xf]  ;;  %v14787_v28 = vld [vmem:[#allocation9 + $0x1110] sm:$0xf0] }
 0x27c   :  { %8597 = vmatpush.bf16.msrb.mxu0 %v12966_v43  ;;  %v12723_v43 = vld [vmem:[#allocation9 + $0xf0] sm:$0xf0]  ;;  %v17075_v24 = vld [vmem:[#allocation9 + $0x1024] sm:$0xf] }
 0x27d   :  { %8587 = vmatpush.bf16.msra.mxu3 %v15506_v13  ;;  %v12726_v57 = vor.u32 %v16583_v40, %v12723_v43  ;;  %v13014_v40 = vor.u32 %v16655_v30, %v13011_v32  ;;  %v14739_v14 = vld [vmem:[#allocation9 + $0x10b0] sm:$0xf0]  ;;  %v16955_v30 = vld [vmem:[#allocation9 + $0xc64] sm:$0xf] }
 0x27e   :  { %8624 = vmatpush.bf16.msrb.mxu2 %v13686_v61  ;;  %8565 = vmatpush.bf16.msra.mxu1 %v14546_v0  ;;  %v17273_v61 = vld [vmem:[#allocation9 + $0x164c] sm:$0xf0]  ;;  %v16571_v0 = vld [vmem:[#allocation9 + $0x64] sm:$0xf] }
 0x27f   :  { %v12678_v19 = vor.u32 %v16571_v0, %v12675_v2  ;;  %v16991_v0 = vld [vmem:[#allocation9 + $0xd84] sm:$0xf]  ;;  %v3695_v2 = vadd.f32 %v17899_v36, %v1287_v22 }
 0x280   :  { %8598 = vmatpush.bf16.msrb.mxu0 %v12918_v58  ;;  %v13158_v58 = vor.u32 %v16691_v44, %v13155_v47  ;;  %v17905_v20 = vpop.f32.mrf.mxu3  ;;  %v3709_v55 = vpop.f32.mrf.mxu1  ;;  %v16931_v44 = vld [vmem:[#allocation9 + $0xba4] sm:$0xf] }
 0x281   :  { %8566 = vmatmul.bf16.vlgmr.msra.gmra.mxu1 %v17896_v52  ;;  %v17003_v47 = vld [vmem:[#allocation9 + $0xde4] sm:$0xf]  ;;  %v14259_v55 = vld [vmem:[#allocation9 + $0xcf0] sm:$0xf0] }
 0x282   :  { %8610 = vmatpush.bf16.msrb.mxu1 %v13350_v11  ;;  %8625 = vmatpush.bf16.msrb.mxu2 %v13638_v62  ;;  %v15458_v11 = vor.u32 %v17273_v61, %v15457_v59  ;;  %v17261_v62 = vld [vmem:[#allocation9 + $0x15ec] sm:$0xf0]  ;;  %v14835_v59 = vld [vmem:[#allocation9 + $0x1170] sm:$0xf0]  ;;  %v14118_v61 = vor.u32 %v16931_v44, %v14115_v51  ;;  %v16907_v36 = vld [vmem:[#allocation9 + $0xae4] sm:$0xf] }
 0x283   :  { %v15410_v4 = vor.u32 %v17261_v62, %v15409_v16  ;;  %v14790_v16 = vor.u32 %v17099_v6, %v14787_v28  ;;  %v14307_v62 = vld [vmem:[#allocation9 + $0xd50] sm:$0xf0] }
 0x284   :  { %8599 = vmatpush.bf16.msrb.mxu0 %v12870_v42  ;;  %8588 = vmatpush.bf16.msra.mxu3 %v15458_v11  ;;  %v13110_v42 = vor.u32 %v16679_v3, %v13107_v5  ;;  %v14355_v11 = vld [vmem:[#allocation9 + $0xdb0] sm:$0xf0]  ;;  %v16919_v5 = vld [vmem:[#allocation9 + $0xb44] sm:$0xf] }
 0x285   :  { %v14163_v44 = vld [vmem:[#allocation9 + $0xc30] sm:$0xf0] }
 0x286   :  { %8611 = vmatpush.bf16.msrb.mxu1 %v13302_v15  ;;  %8626 = vmatpush.bf16.msrb.mxu2 %v13590_v46  ;;  %v16667_v15 = vld [vmem:[#allocation9 + $0x364] sm:$0xf]  ;;  %v3722_v46 = vpop.f32.mrf.mxu2  ;;  %v13875_v51 = vld [vmem:[#allocation9 + $0x9f0] sm:$0xf0] }
 0x287   :  { %v16895_v46 = vld [vmem:[#allocation9 + $0xa84] sm:$0xf] }
 0x288   :  { %8600 = vmatpush.bf16.msrb.mxu0 %v12822_v49  ;;  %8589 = vmatpush.bf16.msra.mxu3 %v15410_v4  ;;  %v12630_v49 = vor.u32 %v16559_v7, %v12627_v63  ;;  %v14070_v7 = vor.u32 %v16919_v5, %v14067_v60  ;;  %v16979_v63 = vld [vmem:[#allocation9 + $0xd24] sm:$0xf] }
 0x289   :  { %v14310_v45 = vor.u32 %v16979_v63, %v14307_v62  ;;  %v12921_v62 = vld [vmem:[#allocation9 + $0x248] sm:$0xf] }
 0x28a   :  { %8612 = vmatpush.bf16.msrb.mxu1 %v13254_v23  ;;  %8627 = vmatpush.bf16.msrb.mxu2 %v13542_v37  ;;  %v13062_v23 = vor.u32 %v16667_v15, %v13059_v48  ;;  %v14883_v37 = vld [vmem:[#allocation9 + $0x11d0] sm:$0xf0] }
 0x28b   :  { %v14886_v13 = vor.u32 %v17123_v35, %v14883_v37  ;;  %v16883_v35 = vld [vmem:[#allocation9 + $0xa24] sm:$0xf]  ;;  %v13923_v37 = vld [vmem:[#allocation9 + $0xa50] sm:$0xf0] }
 0x28c   :  { %8601 = vmatpush.bf16.msrb.mxu0 %v12774_v41  ;;  %8590 = vmatpush.bf16.msra.mxu3 %v15362_v34  ;;  %v15313_v41 = vld [vmem:[#allocation9 + $0x1500] sm:$0xf]  ;;  %v13926_v22 = vor.u32 %v16883_v35, %v13923_v37  ;;  %v15123_v35 = vld [vmem:[#allocation9 + $0x13b0] sm:$0xf0] }
 0x28d   :  { %v15314_v43 = vor.u32 %v17237_v50, %v15313_v41  ;;  %v17063_v41 = vld [vmem:[#allocation9 + $0xfc4] sm:$0xf]  ;;  %v14643_v50 = vld [vmem:[#allocation9 + $0xff0] sm:$0xf0] }
 0x28e   :  { %8613 = vmatpush.bf16.msrb.mxu1 %v13206_v38  ;;  %8628 = vmatpush.bf16.msrb.mxu2 %v13494_v53  ;;  %v14454_v38 = vor.u32 %v17015_v27, %v14451_v25  ;;  %v3735_v53 = vpop.f32.mrf.mxu3 }
 0x28f   :  { %v15267_v53 = vld [vmem:[#allocation9 + $0x14d0] sm:$0xf0] }
 0x290   :  { %8602 = vmatpush.bf16.msrb.mxu0 %v12726_v57  ;;  %v17111_v57 = vld [vmem:[#allocation9 + $0x1144] sm:$0xf]  ;;  %8591 = vmatpush.bf16.msra.mxu3 %v15314_v43 }
 0x291   :  { %v14838_v3 = vor.u32 %v17111_v57, %v14835_v59  ;;  %v16943_v43 = vld [vmem:[#allocation9 + $0xc04] sm:$0xf]  ;;  %v12969_v57 = vld [vmem:[#allocation9 + $0x2a8] sm:$0xf]  ;;  %v16650_v59 = vld [vmem:[#allocation9 + $0x2d4] sm:$0xf0] }
 0x292   :  { %8614 = vmatpush.bf16.msrb.mxu1 %v13158_v58  ;;  %8629 = vmatpush.bf16.msrb.mxu2 %v13446_v8  ;;  %v14406_v58 = vor.u32 %v17003_v47, %v14403_v18  ;;  %v3708_v8 = vadd.f32 %v17901_v54, %v3695_v2  ;;  %v3746_v48 = vpop.f32.mrf.mxu0  ;;  %v16967_v54 = vld [vmem:[#allocation9 + $0xcc4] sm:$0xf]  ;;  %v14595_v2 = vld [vmem:[#allocation9 + $0xf90] sm:$0xf0]  ;;  %v14166_v5 = vor.u32 %v16943_v43, %v14163_v44 }
 0x293   :  { %v17219_v47 = vld [vmem:[#allocation9 + $0x14a4] sm:$0xf]  ;;  %v12970_v28 = vor.u32 %v16650_v59, %v12969_v57  ;;  %v13209_v59 = vld [vmem:[#allocation9 + $0x488] sm:$0xf] }
 0x294   :  { %8603 = vmatpush.bf16.msrb.mxu0 %v12678_v19  ;;  %8636 = vmatpush.bf16.msrb.mxu3 %v14118_v61  ;;  %v14358_v19 = vor.u32 %v16991_v0, %v14355_v11  ;;  %v3721_v4 = vadd.f32 %v17903_v56, %v3708_v8  ;;  %v14262_v56 = vor.u32 %v16967_v54, %v14259_v55  ;;  %v16871_v18 = vld [vmem:[#allocation9 + $0x9c4] sm:$0xf]  ;;  %v15219_v8 = vld [vmem:[#allocation9 + $0x1470] sm:$0xf0] }
 0x295   :  { %v13878_v61 = vor.u32 %v16871_v18, %v13875_v51  ;;  %v17051_v0 = vld [vmem:[#allocation9 + $0xf64] sm:$0xf]  ;;  %v15270_v6 = vor.u32 %v17219_v47, %v15267_v53  ;;  %v15075_v47 = vld [vmem:[#allocation9 + $0x1350] sm:$0xf0]  ;;  %v12777_v51 = vld [vmem:[#allocation9 + $0x128] sm:$0xf] }
 0x296   :  { %8615 = vmatpush.bf16.msrb.mxu1 %v13110_v42  ;;  %8630 = vmatpush.bf16.msrb.mxu2 %v13398_v21  ;;  %v14019_v42 = vld [vmem:[#allocation9 + $0xb10] sm:$0xf0]  ;;  %v3734_v17 = vadd.f32 %v17905_v20, %v3721_v4  ;;  %v14742_v21 = vor.u32 %v17087_v12, %v14739_v14  ;;  %v17039_v12 = vld [vmem:[#allocation9 + $0xf04] sm:$0xf]  ;;  %v13353_v4 = vld [vmem:[#allocation9 + $0x5a8] sm:$0xf] }
 0x297   :  { %v14022_v15 = vor.u32 %v16907_v36, %v14019_v42  ;;  %v17914_v25 = vpop.f32.mrf.mxu2  ;;  %v14211_v20 = vld [vmem:[#allocation9 + $0xc90] sm:$0xf0]  ;;  %v16638_v36 = vld [vmem:[#allocation9 + $0x274] sm:$0xf0] }
 0x298   :  { %8604 = vmatpush.bf16.msrb.mxu0 %v12630_v49  ;;  %8637 = vmatpush.bf16.msrb.mxu3 %v14070_v7  ;;  %v13971_v49 = vld [vmem:[#allocation9 + $0xab0] sm:$0xf0]  ;;  %v3747_v27 = vadd.f32 %v3746_v48, %v3734_v17  ;;  %v3759_v29 = vpop.f32.mrf.mxu1  ;;  %v17207_v7 = vld [vmem:[#allocation9 + $0x1444] sm:$0xf]  ;;  %v16746_v48 = vld [vmem:[#allocation9 + $0x5d4] sm:$0xf0]  ;;  %v12922_v54 = vor.u32 %v16638_v36, %v12921_v62 }
 0x299   :  { %v13827_v42 = vld [vmem:[#allocation9 + $0x990] sm:$0xf0]  ;;  %v16847_v17 = vld [vmem:[#allocation9 + $0x904] sm:$0xf]  ;;  %v16602_v53 = vld [vmem:[#allocation9 + $0x154] sm:$0xf0] }
 0x29a   :  { %8616 = vmatpush.bf16.msrb.mxu1 %v13062_v23  ;;  %v13974_v23 = vor.u32 %v16895_v46, %v13971_v49  ;;  %v3760_v32 = vadd.f32 %v3759_v29, %v3747_v27  ;;  %v14547_v14 = vld [vmem:[#allocation9 + $0xf30] sm:$0xf0]  ;;  %v17195_v46 = vld [vmem:[#allocation9 + $0x13e4] sm:$0xf]  ;;  %v12873_v27 = vld [vmem:[#allocation9 + $0x1e8] sm:$0xf] }
 0x29b   :  { %8605 = vmatmul.bf16.vlgmr.msrb.gmra.mxu0 %v17871_v10  ;;  %v14550_v55 = vor.u32 %v17039_v12, %v14547_v14  ;;  %v15171_v49 = vld [vmem:[#allocation9 + $0x1410] sm:$0xf0]  ;;  %v16626_v29 = vld [vmem:[#allocation9 + $0x214] sm:$0xf0] }
 0x29c   :  { %8649 = vmatpush.bf16.msra.mxu0 %v14502_v26  ;;  %8638 = vmatpush.bf16.msrb.mxu3 %v14022_v15  ;;  %v14691_v26 = vld [vmem:[#allocation9 + $0x1050] sm:$0xf0]  ;;  %17449 = vtanh.f32 %v3760_v32  ;;  %v15174_v32 = vor.u32 %v17195_v46, %v15171_v49  ;;  %v12633_v49 = vld [vmem:[#allocation9 + $0x8] sm:$0xf] }
 0x29d   :  { %v14694_v34 = vor.u32 %v17075_v24, %v14691_v26  ;;  %v14979_v12 = vld [vmem:[#allocation9 + $0x1290] sm:$0xf0] }
 0x29e   :  { %8617 = vmatpush.bf16.msrb.mxu1 %v13014_v40  ;;  %v14214_v40 = vor.u32 %v16955_v30, %v14211_v20  ;;  %v16734_v30 = vld [vmem:[#allocation9 + $0x574] sm:$0xf0]  ;;  %v17183_v20 = vld [vmem:[#allocation9 + $0x1384] sm:$0xf]  ;;  %v14931_v46 = vld [vmem:[#allocation9 + $0x1230] sm:$0xf0] }
 0x29f   :  { %v3774_v11 = vpop.f32.mrf.mxu2  ;;  %v15126_v43 = vor.u32 %v17183_v20, %v15123_v35  ;;  %v16674_v20 = vld [vmem:[#allocation9 + $0x394] sm:$0xf0] }
 0x2a0   :  { %8650 = vmatpush.bf16.msra.mxu0 %v14454_v38  ;;  %8639 = vmatpush.bf16.msrb.mxu3 %v13974_v23  ;;  %v3748_v38 = vpop.f32.mrf.mxu0  ;;  %v13354_v23 = vor.u32 %v16746_v48, %v13353_v4  ;;  %v15027_v11 = vld [vmem:[#allocation9 + $0x12f0] sm:$0xf0]  ;;  %v16578_v4 = vld [vmem:[#allocation9 + $0x94] sm:$0xf0] }
 0x2a1   :  { %8618 = vmatmul.bf16.vlgmr.msrb.gmra.mxu1 %v17877_v31  ;;  %v16722_v38 = vld [vmem:[#allocation9 + $0x514] sm:$0xf0] }
 0x2a2   :  { %8662 = vmatpush.bf16.msra.mxu1 %v14886_v13  ;;  %v14646_v13 = vor.u32 %v17063_v41, %v14643_v50  ;;  %v17450_v60 = vpop.eup %17449  ;;  %v12825_v41 = vld [vmem:[#allocation9 + $0x188] sm:$0xf]  ;;  %v16614_v50 = vld [vmem:[#allocation9 + $0x1b4] sm:$0xf0] }
 0x2a3   :  { %v17918_v63 = vpack.c.bf16 %v17450_v60, %v17450_v60  ;;  %v12826_v44 = vor.u32 %v16614_v50, %v12825_v41 }
 0x2a4   :  { %8651 = vmatpush.bf16.msra.mxu0 %v14406_v58  ;;  %8640 = vmatpush.bf16.msrb.mxu3 %v13926_v22  ;;  %v17916_v58 = vpop.f32.mrf.mxu3  ;;  %v13257_v22 = vld [vmem:[#allocation9 + $0x4e8] sm:$0xf] }
 0x2a5   :  { %8579 = vmatmul.bf16.vlgmr.msra.gmra.mxu2 %v17918_v63  ;;  %v13258_v18 = vor.u32 %v16722_v38, %v13257_v22 }
 0x2a6   :  { %8663 = vmatpush.bf16.msra.mxu1 %v14838_v3  ;;  %v3761_v3 = vpop.f32.mrf.mxu1  ;;  %8675 = vmatpush.bf16.msra.mxu2 %v15270_v6  ;;  %v12729_v6 = vld [vmem:[#allocation9 + $0xc8] sm:$0xf] }
 0x2a7   :  { %v17159_v3 = vld [vmem:[#allocation9 + $0x12c4] sm:$0xf] }
 0x2a8   :  { %8652 = vmatpush.bf16.msra.mxu0 %v14358_v19  ;;  %8641 = vmatpush.bf16.msrb.mxu3 %v13878_v61  ;;  %v16859_v19 = vld [vmem:[#allocation9 + $0x964] sm:$0xf]  ;;  %v16710_v61 = vld [vmem:[#allocation9 + $0x4b4] sm:$0xf0]  ;;  %v15030_v62 = vor.u32 %v17159_v3, %v15027_v11  ;;  %v13641_v11 = vld [vmem:[#allocation9 + $0x7e8] sm:$0xf] }
 0x2a9   :  { %v13830_v15 = vor.u32 %v16859_v19, %v13827_v42  ;;  %v13210_v60 = vor.u32 %v16710_v61, %v13209_v59  ;;  %v17147_v42 = vld [vmem:[#allocation9 + $0x1264] sm:$0xf]  ;;  %v17130_v59 = vld [vmem:[#allocation9 + $0x11d4] sm:$0xf0] }
 0x2aa   :  { %8664 = vmatpush.bf16.msra.mxu1 %v14790_v16  ;;  %v14598_v16 = vor.u32 %v17051_v0, %v14595_v2 }
 0x2ac   :  { %8653 = vmatpush.bf16.msra.mxu0 %v14310_v45  ;;  %v15222_v45 = vor.u32 %v17207_v7, %v15219_v8  ;;  %8642 = vmatpush.bf16.msrb.mxu3 %v13830_v15  ;;  %v3787_v26 = vpop.f32.mrf.mxu3  ;;  %v13161_v7 = vld [vmem:[#allocation9 + $0x428] sm:$0xf]  ;;  %v16698_v8 = vld [vmem:[#allocation9 + $0x454] sm:$0xf0] }
 0x2ad   :  { %v12681_v15 = vld [vmem:[#allocation9 + $0x68] sm:$0xf] }
 0x2ae   :  { %8665 = vmatpush.bf16.msra.mxu1 %v14742_v21  ;;  %v13779_v21 = vld [vmem:[#allocation9 + $0x930] sm:$0xf0]  ;;  %8676 = vmatpush.bf16.msra.mxu2 %v15222_v45  ;;  %v13113_v45 = vld [vmem:[#allocation9 + $0x3c8] sm:$0xf] }
 0x2af   :  { %v13782_v24 = vor.u32 %v16847_v17, %v13779_v21  ;;  %v14982_v17 = vor.u32 %v17147_v42, %v14979_v12  ;;  %v17135_v21 = vld [vmem:[#allocation9 + $0x1204] sm:$0xf]  ;;  %v15603_v12 = vld [vmem:[#allocation9 + $0x1770] sm:$0xf0] }
 0x2b0   :  { %8654 = vmatpush.bf16.msra.mxu0 %v14262_v56  ;;  %v13305_v56 = vld [vmem:[#allocation9 + $0x548] sm:$0xf]  ;;  %v14934_v50 = vor.u32 %v17135_v21, %v14931_v46  ;;  %v17303_v42 = vld [vmem:[#allocation9 + $0x1744] sm:$0xf]  ;;  %v17106_v21 = vld [vmem:[#allocation9 + $0x1114] sm:$0xf0] }
 0x2b1   :  { %8643 = vmatpush.bf16.msrb.mxu3 %v13782_v24  ;;  %v13306_v37 = vor.u32 %v16734_v30, %v13305_v56  ;;  %v16566_v24 = vld [vmem:[#allocation9 + $0x34] sm:$0xf0]  ;;  %v14505_v56 = vld [vmem:[#allocation9 + $0xea8] sm:$0xf] }
 0x2b2   :  { %8666 = vmatpush.bf16.msra.mxu1 %v14694_v34  ;;  %v12874_v34 = vor.u32 %v16626_v29, %v12873_v27  ;;  %8677 = vmatpush.bf16.msra.mxu2 %v15174_v32  ;;  %v13737_v27 = vld [vmem:[#allocation9 + $0x8a8] sm:$0xf]  ;;  %v16842_v29 = vld [vmem:[#allocation9 + $0x8d4] sm:$0xf0]  ;;  %v12634_v22 = vor.u32 %v16566_v24, %v12633_v49  ;;  %v17291_v49 = vld [vmem:[#allocation9 + $0x16e4] sm:$0xf] }
 0x2b3   :  { %v17034_v32 = vld [vmem:[#allocation9 + $0xed4] sm:$0xf0]  ;;  %v13738_v38 = vor.u32 %v16842_v29, %v13737_v27  ;;  %v15555_v24 = vld [vmem:[#allocation9 + $0x1710] sm:$0xf0] }
 0x2b4   :  { %8655 = vmatpush.bf16.msra.mxu0 %v14214_v40  ;;  %v1288_v40 = vperm.slane %v17883_v39, 7  ;;  %v12778_v39 = vor.u32 %v16602_v53, %v12777_v51  ;;  %v13017_v51 = vld [vmem:[#allocation9 + $0x308] sm:$0xf]  ;;  %v16662_v53 = vld [vmem:[#allocation9 + $0x334] sm:$0xf0] }
 0x2b5   :  { %8631 = vmatmul.bf16.vlgmr.msrb.gmra.mxu2 %v17869_v9  ;;  %v13018_v3 = vor.u32 %v16662_v53, %v13017_v51  ;;  %v16794_v27 = vld [vmem:[#allocation9 + $0x754] sm:$0xf0]  ;;  %v14697_v53 = vld [vmem:[#allocation9 + $0x1028] sm:$0xf] }
 0x2b6   :  { %8667 = vmatpush.bf16.msra.mxu1 %v14646_v13  ;;  %v17171_v13 = vld [vmem:[#allocation9 + $0x1324] sm:$0xf]  ;;  %v3773_v0 = vadd.f32 %v17914_v25, %v1288_v40  ;;  %8678 = vmatpush.bf16.msra.mxu2 %v15126_v43  ;;  %v14506_v40 = vor.u32 %v17034_v32, %v14505_v56  ;;  %v14313_v56 = vld [vmem:[#allocation9 + $0xd28] sm:$0xf] }
 0x2b7   :  { %v15078_v2 = vor.u32 %v17171_v13, %v15075_v47  ;;  %v16830_v13 = vld [vmem:[#allocation9 + $0x874] sm:$0xf0]  ;;  %v14457_v47 = vld [vmem:[#allocation9 + $0xe48] sm:$0xf] }
 0x2b8   :  { %8656 = vmatpush.bf16.msra.mxu0 %v14166_v5  ;;  %v3798_v57 = vpop.f32.mrf.mxu0  ;;  %v3786_v5 = vadd.f32 %v17916_v58, %v3773_v0  ;;  %v13162_v58 = vor.u32 %v16698_v8, %v13161_v7  ;;  %v17315_v0 = vld [vmem:[#allocation9 + $0x17a4] sm:$0xf]  ;;  %v17010_v7 = vld [vmem:[#allocation9 + $0xe14] sm:$0xf0] }
 0x2ba   :  { %8668 = vmatpush.bf16.msra.mxu1 %v14598_v16  ;;  %v3799_v19 = vadd.f32 %v3798_v57, %v3786_v5  ;;  %8679 = vmatpush.bf16.msra.mxu2 %v15078_v2  ;;  %v14889_v57 = vld [vmem:[#allocation9 + $0x11a8] sm:$0xf]  ;;  %v15651_v2 = vld [vmem:[#allocation9 + $0x17d0] sm:$0xf0]  ;;  %v16818_v5 = vld [vmem:[#allocation9 + $0x814] sm:$0xf0] }
 0x2bb   :  { %8657 = vmatmul.bf16.vlgmr.msra.gmra.mxu0 %v17893_v33 }
 0x2bc   :  { %8701 = vmatpush.bf16.msrb.mxu0 %v12970_v28  ;;  %v16590_v28 = vld [vmem:[#allocation9 + $0xf4] sm:$0xf0]  ;;  %v3824_v25 = vpop.f32.mrf.mxu2 }
 0x2bd   :  { %v12730_v36 = vor.u32 %v16590_v28, %v12729_v6  ;;  %v14890_v6 = vor.u32 %v17130_v59, %v14889_v57  ;;  %v14409_v28 = vld [vmem:[#allocation9 + $0xde8] sm:$0xf]  ;;  %v17082_v57 = vld [vmem:[#allocation9 + $0x1054] sm:$0xf0] }
 0x2be   :  { %8669 = vmatpush.bf16.msra.mxu1 %v14550_v55  ;;  %v3811_v16 = vpop.f32.mrf.mxu1  ;;  %8680 = vmatpush.bf16.msra.mxu2 %v15030_v62  ;;  %v12682_v55 = vor.u32 %v16578_v4, %v12681_v15  ;;  %v16806_v15 = vld [vmem:[#allocation9 + $0x7b4] sm:$0xf0] }
 0x2bf   :  { %v3812_v14 = vadd.f32 %v3811_v16, %v3799_v19  ;;  %v15654_v19 = vor.u32 %v17315_v0, %v15651_v2  ;;  %v14841_v16 = vld [vmem:[#allocation9 + $0x1148] sm:$0xf]  ;;  %v17267_v2 = vld [vmem:[#allocation9 + $0x1624] sm:$0xf] }
 0x2c0   :  { %8702 = vmatpush.bf16.msrb.mxu0 %v12922_v54  ;;  %v3800_v48 = vpop.f32.mrf.mxu0  ;;  %v16686_v54 = vld [vmem:[#allocation9 + $0x3f4] sm:$0xf0] }
 0x2c1   :  { %8670 = vmatmul.bf16.vlgmr.msra.gmra.mxu1 %v17896_v52  ;;  %v3825_v26 = vadd.f32 %v3824_v25, %v3812_v14  ;;  %v17118_v25 = vld [vmem:[#allocation9 + $0x1174] sm:$0xf0]  ;;  %v14410_v14 = vor.u32 %v17010_v7, %v14409_v28  ;;  %v14361_v48 = vld [vmem:[#allocation9 + $0xd88] sm:$0xf] }
 0x2c2   :  { %8714 = vmatpush.bf16.msrb.mxu1 %v13354_v23  ;;  %v13114_v23 = vor.u32 %v16686_v54, %v13113_v45  ;;  %8681 = vmatpush.bf16.msra.mxu2 %v14982_v17  ;;  %v14842_v4 = vor.u32 %v17118_v25, %v14841_v16  ;;  %v16998_v45 = vld [vmem:[#allocation9 + $0xdb4] sm:$0xf0]  ;;  %v15606_v54 = vor.u32 %v17303_v42, %v15603_v12  ;;  %v14793_v17 = vld [vmem:[#allocation9 + $0x10e8] sm:$0xf]  ;;  %v17255_v12 = vld [vmem:[#allocation9 + $0x15c4] sm:$0xf] }
 0x2c3   :  { %v14794_v29 = vor.u32 %v17106_v21, %v14793_v17  ;;  %v14217_v28 = vld [vmem:[#allocation9 + $0xc68] sm:$0xf]  ;;  %v16962_v7 = vld [vmem:[#allocation9 + $0xc94] sm:$0xf0] }
 0x2c4   :  { %8703 = vmatpush.bf16.msrb.mxu0 %v12874_v34  ;;  %v13065_v34 = vld [vmem:[#allocation9 + $0x368] sm:$0xf]  ;;  %v3826_v41 = vpop.f32.mrf.mxu2  ;;  %v17226_v21 = vld [vmem:[#allocation9 + $0x14d4] sm:$0xf0] }
 0x2c5   :  { %v13066_v43 = vor.u32 %v16674_v20, %v13065_v34  ;;  %v15558_v20 = vor.u32 %v17291_v49, %v15555_v24  ;;  %v14649_v25 = vld [vmem:[#allocation9 + $0xfc8] sm:$0xf] }
 0x2c6   :  { %8715 = vmatpush.bf16.msrb.mxu1 %v13306_v37  ;;  %v3837_v30 = vpop.f32.mrf.mxu3  ;;  %v3813_v37 = vpop.f32.mrf.mxu1  ;;  %8682 = vmatpush.bf16.msra.mxu2 %v14934_v50  ;;  %v17279_v50 = vld [vmem:[#allocation9 + $0x1684] sm:$0xf]  ;;  %v15273_v17 = vld [vmem:[#allocation9 + $0x14a8] sm:$0xf] }
 0x2c7   :  { %v3838_v35 = vadd.f32 %v3837_v30, %v3825_v26  ;;  %v14362_v26 = vor.u32 %v16998_v45, %v14361_v48  ;;  %v16986_v30 = vld [vmem:[#allocation9 + $0xd54] sm:$0xf0]  ;;  %v14169_v48 = vld [vmem:[#allocation9 + $0xc08] sm:$0xf] }
 0x2c8   :  { %8704 = vmatpush.bf16.msrb.mxu0 %v12826_v44  ;;  %v13689_v44 = vld [vmem:[#allocation9 + $0x848] sm:$0xf]  ;;  %v17094_v37 = vld [vmem:[#allocation9 + $0x10b4] sm:$0xf0] }
 0x2c9   :  { %17451 = vtanh.f32 %v3838_v35  ;;  %v13690_v61 = vor.u32 %v16830_v13, %v13689_v44  ;;  %8683 = vmatmul.bf16.vlgmr.msra.gmra.mxu2 %v17918_v63  ;;  %v14745_v35 = vld [vmem:[#allocation9 + $0x1088] sm:$0xf]  ;;  %v16950_v45 = vld [vmem:[#allocation9 + $0xc34] sm:$0xf0] }
 0x2ca   :  { %8716 = vmatpush.bf16.msrb.mxu1 %v13258_v18  ;;  %v17022_v18 = vld [vmem:[#allocation9 + $0xe74] sm:$0xf0]  ;;  %8727 = vmatpush.bf16.msrb.mxu2 %v13738_v38  ;;  %v14314_v38 = vor.u32 %v16986_v30, %v14313_v56  ;;  %v14746_v44 = vor.u32 %v17094_v37, %v14745_v35  ;;  %v14265_v13 = vld [vmem:[#allocation9 + $0xcc8] sm:$0xf]  ;;  %v14170_v35 = vor.u32 %v16950_v45, %v14169_v48  ;;  %v12827_v48 = vld [vmem:[#allocation9 + $0x1b8] sm:$0xf0] }
 0x2cb   :  { %v15274_v37 = vor.u32 %v17226_v21, %v15273_v17  ;;  %v13259_v17 = vld [vmem:[#allocation9 + $0x518] sm:$0xf0] }
 0x2cc   :  { %8705 = vmatpush.bf16.msrb.mxu0 %v12778_v39  ;;  %v14458_v39 = vor.u32 %v17022_v18, %v14457_v47  ;;  %v16974_v47 = vld [vmem:[#allocation9 + $0xcf4] sm:$0xf0] }
 0x2ce   :  { %8717 = vmatpush.bf16.msrb.mxu1 %v13210_v60  ;;  %v3839_v60 = vpop.f32.mrf.mxu3  ;;  %8728 = vmatpush.bf16.msrb.mxu2 %v13690_v61 }
 0x2cf   :  { %v17452_v8 = vpop.eup %17451  ;;  %v16770_v60 = vld [vmem:[#allocation9 + $0x694] sm:$0xf0] }
 0x2d0   :  { %8706 = vmatpush.bf16.msrb.mxu0 %v12730_v36  ;;  %v17929_v62 = vpack.c.bf16 %v17452_v8, %v17452_v8  ;;  %v13642_v36 = vor.u32 %v16818_v5, %v13641_v11  ;;  %v14266_v11 = vor.u32 %v16974_v47, %v14265_v13  ;;  %v13449_v5 = vld [vmem:[#allocation9 + $0x668] sm:$0xf]  ;;  %v17231_v13 = vld [vmem:[#allocation9 + $0x1504] sm:$0xf] }
 0x2d1   :  { %v13450_v42 = vor.u32 %v16770_v60, %v13449_v5  ;;  %v14553_v47 = vld [vmem:[#allocation9 + $0xf08] sm:$0xf] }
 0x2d2   :  { %8718 = vmatpush.bf16.msrb.mxu1 %v13162_v58  ;;  %v13593_v58 = vld [vmem:[#allocation9 + $0x788] sm:$0xf]  ;;  %8592 = vmatmul.bf16.vlgmr.msra.gmra.mxu3 %v17929_v62 }
 0x2d3   :  { %8688 = vmatpush.bf16.msra.mxu3 %v15654_v19  ;;  %8729 = vmatpush.bf16.msrb.mxu2 %v13642_v36  ;;  %v13594_v46 = vor.u32 %v16806_v15, %v13593_v58  ;;  %v17070_v36 = vld [vmem:[#allocation9 + $0xff4] sm:$0xf0]  ;;  %v13401_v58 = vld [vmem:[#allocation9 + $0x608] sm:$0xf]  ;;  %v14218_v15 = vor.u32 %v16962_v7, %v14217_v28  ;;  %v16620_v28 = vld [vmem:[#allocation9 + $0x1ec] sm:$0xf] }
 0x2d4   :  { %8707 = vmatpush.bf16.msrb.mxu0 %v12682_v55  ;;  %v17933_v55 = vld [vmem:[#allocation10] sm:$0xff]  ;;  %v12875_v7 = vld [vmem:[#allocation9 + $0x218] sm:$0xf0] }
 0x2d5   :  { %v4629_v32 = vperm.slane %v17933_v55, 0 }
 0x2d6   :  { %8719 = vmatpush.bf16.msrb.mxu1 %v13114_v23  ;;  %v13545_v23 = vld [vmem:[#allocation9 + $0x728] sm:$0xf] }
 0x2d7   :  { %8689 = vmatpush.bf16.msra.mxu3 %v15606_v54  ;;  %8730 = vmatpush.bf16.msrb.mxu2 %v13594_v46  ;;  %v13546_v41 = vor.u32 %v16794_v27, %v13545_v23  ;;  %v14650_v54 = vor.u32 %v17070_v36, %v14649_v25  ;;  %v16644_v46 = vld [vmem:[#allocation9 + $0x2ac] sm:$0xf]  ;;  %v14601_v23 = vld [vmem:[#allocation9 + $0xf68] sm:$0xf]  ;;  %v17058_v27 = vld [vmem:[#allocation9 + $0xf94] sm:$0xf0] }
 0x2d8   :  { %8708 = vmatpush.bf16.msrb.mxu0 %v12634_v22  ;;  %v8502_v34 = vpop.f32.mrf.mxu0  ;;  %v15507_v22 = vld [vmem:[#allocation9 + $0x16b0] sm:$0xf0]  ;;  %v14073_v36 = vld [vmem:[#allocation9 + $0xb48] sm:$0xf] }
 0x2d9   :  { %v8503_v18 = vadd.f32 %v8502_v34, %v4629_v32  ;;  %v15510_v51 = vor.u32 %v17279_v50, %v15507_v22  ;;  %v17243_v34 = vld [vmem:[#allocation9 + $0x1564] sm:$0xf]  ;;  %v14602_v22 = vor.u32 %v17058_v27, %v14601_v23  ;;  %v17178_v23 = vld [vmem:[#allocation9 + $0x1354] sm:$0xf0] }
 0x2da   :  { %8720 = vmatpush.bf16.msrb.mxu1 %v13066_v43  ;;  %v16782_v43 = vld [vmem:[#allocation9 + $0x6f4] sm:$0xf0] }
 0x2db   :  { %8709 = vmatmul.bf16.vlgmr.msrb.gmra.mxu0 %v17871_v10  ;;  %8690 = vmatpush.bf16.msra.mxu3 %v15558_v20  ;;  %v15363_v20 = vld [vmem:[#allocation9 + $0x1590] sm:$0xf0] }
 0x2dc   :  { %8753 = vmatpush.bf16.msra.mxu0 %v14506_v40  ;;  %v13497_v40 = vld [vmem:[#allocation9 + $0x6c8] sm:$0xf]  ;;  %8731 = vmatpush.bf16.msrb.mxu2 %v13546_v41  ;;  %v8528_v61 = vpop.f32.mrf.mxu2 }
 0x2dd   :  { %v13498_v0 = vor.u32 %v16782_v43, %v13497_v40  ;;  %v15225_v41 = vld [vmem:[#allocation9 + $0x1448] sm:$0xf]  ;;  %v16632_v40 = vld [vmem:[#allocation9 + $0x24c] sm:$0xf]  ;;  %v12923_v43 = vld [vmem:[#allocation9 + $0x278] sm:$0xf0] }
 0x2de   :  { %8721 = vmatpush.bf16.msrb.mxu1 %v13018_v3  ;;  %v8515_v59 = vpop.f32.mrf.mxu1 }
 0x2df   :  { %v8516_v3 = vadd.f32 %v8515_v59, %v8503_v18  ;;  %8691 = vmatpush.bf16.msra.mxu3 %v15510_v51  ;;  %v17046_v18 = vld [vmem:[#allocation9 + $0xf34] sm:$0xf0]  ;;  %v15315_v51 = vld [vmem:[#allocation9 + $0x1530] sm:$0xf0] }
 0x2e0   :  { %8754 = vmatpush.bf16.msra.mxu0 %v14458_v39  ;;  %v15459_v39 = vld [vmem:[#allocation9 + $0x1650] sm:$0xf0]  ;;  %v8504_v19 = vpop.f32.mrf.mxu0  ;;  %8732 = vmatpush.bf16.msrb.mxu2 %v13498_v0  ;;  %v16938_v0 = vld [vmem:[#allocation9 + $0xbd4] sm:$0xf0]  ;;  %v15318_v60 = vor.u32 %v17231_v13, %v15315_v51  ;;  %v16584_v13 = vld [vmem:[#allocation9 + $0xcc] sm:$0xf] }
 0x2e1   :  { %8722 = vmatmul.bf16.vlgmr.msrb.gmra.mxu1 %v17877_v31  ;;  %v8529_v8 = vadd.f32 %v8528_v61, %v8516_v3  ;;  %v15462_v16 = vor.u32 %v17267_v2, %v15459_v39  ;;  %v14121_v61 = vld [vmem:[#allocation9 + $0xba8] sm:$0xf]  ;;  %v12926_v2 = vor.u32 %v16632_v40, %v12923_v43  ;;  %v14554_v39 = vor.u32 %v17046_v18, %v14553_v47  ;;  %v16728_v19 = vld [vmem:[#allocation9 + $0x54c] sm:$0xf]  ;;  %v17166_v43 = vld [vmem:[#allocation9 + $0x12f4] sm:$0xf0] }
 0x2e2   :  { %8766 = vmatpush.bf16.msra.mxu1 %v14890_v6  ;;  %v14698_v6 = vor.u32 %v17082_v57, %v14697_v53  ;;  %8644 = vmatmul.bf16.vlgmr.msrb.gmra.mxu3 %v17879_v1  ;;  %v16740_v53 = vld [vmem:[#allocation9 + $0x5ac] sm:$0xf]  ;;  %v13355_v57 = vld [vmem:[#allocation9 + $0x5d8] sm:$0xf0]  ;;  %v15177_v3 = vld [vmem:[#allocation9 + $0x13e8] sm:$0xf] }
 0x2e3   :  { %8692 = vmatpush.bf16.msra.mxu3 %v15462_v16  ;;  %v13307_v16 = vld [vmem:[#allocation9 + $0x578] sm:$0xf0]  ;;  %v15033_v40 = vld [vmem:[#allocation9 + $0x12c8] sm:$0xf]  ;;  %v16692_v51 = vld [vmem:[#allocation9 + $0x42c] sm:$0xf] }
 0x2e4   :  { %8755 = vmatpush.bf16.msra.mxu0 %v14410_v14  ;;  %v15411_v14 = vld [vmem:[#allocation9 + $0x15f0] sm:$0xf0]  ;;  %8733 = vmatpush.bf16.msrb.mxu2 %v13450_v42  ;;  %v8530_v30 = vpop.f32.mrf.mxu2  ;;  %v16926_v42 = vld [vmem:[#allocation9 + $0xb74] sm:$0xf0]  ;;  %v12731_v47 = vld [vmem:[#allocation9 + $0xf8] sm:$0xf0] }
 0x2e5   :  { %v15414_v24 = vor.u32 %v17255_v12, %v15411_v14  ;;  %v12878_v12 = vor.u32 %v16620_v28, %v12875_v7  ;;  %v15129_v14 = vld [vmem:[#allocation9 + $0x1388] sm:$0xf]  ;;  %v14074_v45 = vor.u32 %v16926_v42, %v14073_v36  ;;  %v12779_v30 = vld [vmem:[#allocation9 + $0x158] sm:$0xf0]  ;;  %v16680_v7 = vld [vmem:[#allocation9 + $0x3cc] sm:$0xf] }
 0x2e6   :  { %8767 = vmatpush.bf16.msra.mxu1 %v14842_v4  ;;  %v16758_v4 = vld [vmem:[#allocation9 + $0x634] sm:$0xf0]  ;;  %v8541_v49 = vpop.f32.mrf.mxu3  ;;  %v8517_v56 = vpop.f32.mrf.mxu1  ;;  %v14937_v36 = vld [vmem:[#allocation9 + $0x1208] sm:$0xf] }
 0x2e7   :  { %v13402_v32 = vor.u32 %v16758_v4, %v13401_v58  ;;  %8693 = vmatpush.bf16.msra.mxu3 %v15414_v24  ;;  %v17190_v58 = vld [vmem:[#allocation9 + $0x13b4] sm:$0xf0]  ;;  %v16608_v4 = vld [vmem:[#allocation9 + $0x18c] sm:$0xf] }
 0x2e8   :  { %8756 = vmatpush.bf16.msra.mxu0 %v14362_v26  ;;  %v12971_v26 = vld [vmem:[#allocation9 + $0x2d8] sm:$0xf0]  ;;  %v15130_v21 = vor.u32 %v17190_v58, %v15129_v14  ;;  %v12830_v24 = vor.u32 %v16608_v4, %v12827_v48  ;;  %v16596_v56 = vld [vmem:[#allocation9 + $0x12c] sm:$0xf] }
 0x2e9   :  { %v12974_v50 = vor.u32 %v16644_v46, %v12971_v26  ;;  %8734 = vmatpush.bf16.msrb.mxu2 %v13402_v32  ;;  %v14025_v46 = vld [vmem:[#allocation9 + $0xae8] sm:$0xf]  ;;  %v16560_v14 = vld [vmem:[#allocation9 + $0xc] sm:$0xf]  ;;  %v12635_v58 = vld [vmem:[#allocation9 + $0x38] sm:$0xf0] }
 0x2ea   :  { %8768 = vmatpush.bf16.msra.mxu1 %v14794_v29  ;;  %v17937_v29 = vadd.f32 %v8541_v49, %v8529_v8  ;;  %v14122_v8 = vor.u32 %v16938_v0, %v14121_v61  ;;  %v16914_v49 = vld [vmem:[#allocation9 + $0xb14] sm:$0xf0]  ;;  %v15081_v26 = vld [vmem:[#allocation9 + $0x1328] sm:$0xf]  ;;  %v16836_v4 = vld [vmem:[#allocation9 + $0x8ac] sm:$0xf] }
 0x2eb   :  { %v16890_v61 = vld [vmem:[#allocation9 + $0xa54] sm:$0xf0]  ;;  %v13739_v48 = vld [vmem:[#allocation9 + $0x8d8] sm:$0xf0] }
 0x2ec   :  { %8757 = vmatpush.bf16.msra.mxu0 %v14314_v38  ;;  %v17214_v38 = vld [vmem:[#allocation9 + $0x1474] sm:$0xf0]  ;;  %8735 = vmatmul.bf16.vlgmr.msrb.gmra.mxu2 %v17869_v9 }
 0x2ed   :  { %8779 = vmatpush.bf16.msra.mxu2 %v15274_v37  ;;  %v15226_v59 = vor.u32 %v17214_v38, %v15225_v41  ;;  %v15082_v41 = vor.u32 %v17178_v23, %v15081_v26  ;;  %v12782_v38 = vor.u32 %v16596_v56, %v12779_v30  ;;  %v13833_v26 = vld [vmem:[#allocation9 + $0x968] sm:$0xf]  ;;  %v16866_v23 = vld [vmem:[#allocation9 + $0x994] sm:$0xf0]  ;;  %v13742_v56 = vor.u32 %v16836_v4, %v13739_v48  ;;  %v16824_v30 = vld [vmem:[#allocation9 + $0x84c] sm:$0xf] }
 0x2ee   :  { %8769 = vmatpush.bf16.msra.mxu1 %v14746_v44  ;;  %v15366_v44 = vor.u32 %v17243_v34, %v15363_v20  ;;  %v8543_v5 = vpop.f32.mrf.mxu3  ;;  %v14026_v34 = vor.u32 %v16914_v49, %v14025_v46  ;;  %v16704_v20 = vld [vmem:[#allocation9 + $0x48c] sm:$0xf]  ;;  %v13067_v46 = vld [vmem:[#allocation9 + $0x398] sm:$0xf0]  ;;  %v17298_v4 = vld [vmem:[#allocation9 + $0x1714] sm:$0xf0] }
 0x2ef   :  { %v16572_v5 = vld [vmem:[#allocation9 + $0x6c] sm:$0xf] }
 0x2f0   :  { %8758 = vmatpush.bf16.msra.mxu0 %v14266_v11  ;;  %v17202_v11 = vld [vmem:[#allocation9 + $0x1414] sm:$0xf0]  ;;  %8694 = vmatpush.bf16.msra.mxu3 %v15366_v44 }
 0x2f1   :  { %8780 = vmatpush.bf16.msra.mxu2 %v15226_v59  ;;  %v15178_v25 = vor.u32 %v17202_v11, %v15177_v3  ;;  %v15034_v59 = vor.u32 %v17166_v43, %v15033_v40  ;;  %v17154_v3 = vld [vmem:[#allocation9 + $0x1294] sm:$0xf0]  ;;  %v17124_v43 = vld [vmem:[#allocation9 + $0x11ac] sm:$0xf] }
 0x2f2   :  { %8770 = vmatpush.bf16.msra.mxu1 %v14698_v6  ;;  %v13358_v6 = vor.u32 %v16740_v53, %v13355_v57  ;;  %v13163_v53 = vld [vmem:[#allocation9 + $0x458] sm:$0xf0]  ;;  %v16854_v40 = vld [vmem:[#allocation9 + $0x934] sm:$0xf0] }
 0x2f3   :  { %v13166_v11 = vor.u32 %v16692_v51, %v13163_v53 }
 0x2f4   :  { %8759 = vmatpush.bf16.msra.mxu0 %v14218_v15  ;;  %8695 = vmatpush.bf16.msra.mxu3 %v15318_v60  ;;  %v13310_v15 = vor.u32 %v16728_v19, %v13307_v16  ;;  %v12683_v60 = vld [vmem:[#allocation9 + $0x98] sm:$0xf0]  ;;  %v13881_v16 = vld [vmem:[#allocation9 + $0x9c8] sm:$0xf] }
 0x2f5   :  { %8781 = vmatpush.bf16.msra.mxu2 %v15178_v25  ;;  %v16878_v25 = vld [vmem:[#allocation9 + $0x9f4] sm:$0xf0]  ;;  %v12686_v42 = vor.u32 %v16572_v5, %v12683_v60  ;;  %v14843_v5 = vld [vmem:[#allocation9 + $0x1178] sm:$0xf0] }
 0x2f6   :  { %8771 = vmatpush.bf16.msra.mxu1 %v14650_v54  ;;  %v16716_v54 = vld [vmem:[#allocation9 + $0x4ec] sm:$0xf] }
 0x2f7   :  { %8696 = vmatmul.bf16.vlgmr.msra.gmra.mxu3 %v17929_v62  ;;  %v13262_v27 = vor.u32 %v16716_v54, %v13259_v17  ;;  %v13882_v54 = vor.u32 %v16878_v25, %v13881_v16  ;;  %v14507_v17 = vld [vmem:[#allocation9 + $0xed8] sm:$0xf0]  ;;  %v16992_v25 = vld [vmem:[#allocation9 + $0xd8c] sm:$0xf] }
 0x2f8   :  { %8760 = vmatpush.bf16.msra.mxu0 %v14170_v35  ;;  %8740 = vmatpush.bf16.msrb.mxu3 %v14122_v8  ;;  %v8554_v32 = vpop.f32.mrf.mxu0  ;;  %v13211_v35 = vld [vmem:[#allocation9 + $0x4b8] sm:$0xf0] }
 0x2f9   :  { %v8555_v37 = vadd.f32 %v8554_v32, %v17937_v29  ;;  %8782 = vmatpush.bf16.msra.mxu2 %v15130_v21  ;;  %v13214_v44 = vor.u32 %v16704_v20, %v13211_v35  ;;  %v13929_v29 = vld [vmem:[#allocation9 + $0xa28] sm:$0xf]  ;;  %v13115_v8 = vld [vmem:[#allocation9 + $0x3f8] sm:$0xf0]  ;;  %v16668_v21 = vld [vmem:[#allocation9 + $0x36c] sm:$0xf] }
 0x2fa   :  { %8772 = vmatpush.bf16.msra.mxu1 %v14602_v22  ;;  %v16902_v22 = vld [vmem:[#allocation9 + $0xab4] sm:$0xf0]  ;;  %v13930_v28 = vor.u32 %v16890_v61, %v13929_v29  ;;  %v13691_v20 = vld [vmem:[#allocation9 + $0x878] sm:$0xf0]  ;;  %v17016_v35 = vld [vmem:[#allocation9 + $0xe4c] sm:$0xf] }
 0x2fb   :  { %8761 = vmatmul.bf16.vlgmr.msra.gmra.mxu0 %v17893_v33 }
 0x2fc   :  { %8805 = vmatpush.bf16.msrb.mxu0 %v12974_v50  ;;  %8741 = vmatpush.bf16.msrb.mxu3 %v14074_v45  ;;  %v13977_v50 = vld [vmem:[#allocation9 + $0xa88] sm:$0xf]  ;;  %v17028_v45 = vld [vmem:[#allocation9 + $0xeac] sm:$0xf] }
 0x2fd   :  { %v13978_v18 = vor.u32 %v16902_v22, %v13977_v50  ;;  %8783 = vmatpush.bf16.msra.mxu2 %v15082_v41  ;;  %v14510_v32 = vor.u32 %v17028_v45, %v14507_v17  ;;  %v13834_v41 = vor.u32 %v16866_v23, %v13833_v26  ;;  %v13785_v50 = vld [vmem:[#allocation9 + $0x908] sm:$0xf]  ;;  %v16656_v22 = vld [vmem:[#allocation9 + $0x30c] sm:$0xf] }
 0x2fe   :  { %8773 = vmatpush.bf16.msra.mxu1 %v14554_v39  ;;  %v8567_v57 = vpop.f32.mrf.mxu1  ;;  %v14985_v39 = vld [vmem:[#allocation9 + $0x1268] sm:$0xf]  ;;  %v13786_v29 = vor.u32 %v16854_v40, %v13785_v50  ;;  %v16788_v45 = vld [vmem:[#allocation9 + $0x72c] sm:$0xf]  ;;  %v14267_v50 = vld [vmem:[#allocation9 + $0xcf8] sm:$0xf0] }
 0x2ff   :  { %v17944_v0 = vadd.f32 %v8567_v57, %v8555_v37  ;;  %v14986_v19 = vor.u32 %v17154_v3, %v14985_v39  ;;  %v14459_v37 = vld [vmem:[#allocation9 + $0xe78] sm:$0xf0]  ;;  %v16812_v57 = vld [vmem:[#allocation9 + $0x7ec] sm:$0xf] }
 0x300   :  { %8806 = vmatpush.bf16.msrb.mxu0 %v12926_v2  ;;  %8742 = vmatpush.bf16.msrb.mxu3 %v14026_v34  ;;  %v12734_v2 = vor.u32 %v16584_v13, %v12731_v47  ;;  %v13070_v34 = vor.u32 %v16668_v21, %v13067_v46  ;;  %v13694_v13 = vor.u32 %v16824_v30, %v13691_v20  ;;  %v15657_v47 = vld [vmem:[#allocation9 + $0x17a8] sm:$0xf]  ;;  %v14411_v39 = vld [vmem:[#allocation9 + $0xe18] sm:$0xf0]  ;;  %v16980_v21 = vld [vmem:[#allocation9 + $0xd2c] sm:$0xf] }
 0x301   :  { %8774 = vmatmul.bf16.vlgmr.msra.gmra.mxu1 %v17896_v52  ;;  %8784 = vmatpush.bf16.msra.mxu2 %v15034_v59  ;;  %v14462_v51 = vor.u32 %v17016_v35, %v14459_v37  ;;  %v13643_v59 = vld [vmem:[#allocation9 + $0x818] sm:$0xf0]  ;;  %v17088_v23 = vld [vmem:[#allocation9 + $0x108c] sm:$0xf]  ;;  %v15513_v30 = vld [vmem:[#allocation9 + $0x1688] sm:$0xf] }
 0x302   :  { %8818 = vmatpush.bf16.msrb.mxu1 %v13358_v6  ;;  %v8556_v6 = vpop.f32.mrf.mxu0  ;;  %v13646_v60 = vor.u32 %v16812_v57, %v13643_v59  ;;  %v14315_v46 = vld [vmem:[#allocation9 + $0xd58] sm:$0xf0]  ;;  %v16776_v20 = vld [vmem:[#allocation9 + $0x6cc] sm:$0xf] }
 0x303   :  { %v15609_v6 = vld [vmem:[#allocation9 + $0x1748] sm:$0xf]  ;;  %v13499_v35 = vld [vmem:[#allocation9 + $0x6f8] sm:$0xf0] }
 0x304   :  { %8807 = vmatpush.bf16.msrb.mxu0 %v12878_v12  ;;  %8743 = vmatpush.bf16.msrb.mxu3 %v13978_v18  ;;  %v17142_v12 = vld [vmem:[#allocation9 + $0x1234] sm:$0xf0]  ;;  %v14699_v40 = vld [vmem:[#allocation9 + $0x1058] sm:$0xf0] }
 0x305   :  { %8785 = vmatpush.bf16.msra.mxu2 %v14986_v19  ;;  %v17322_v18 = vld [vmem:[#allocation9 + $0x17d4] sm:$0xf0]  ;;  %v13595_v19 = vld [vmem:[#allocation9 + $0x7b8] sm:$0xf0] }
 0x306   :  { %8819 = vmatpush.bf16.msrb.mxu1 %v13310_v15  ;;  %v13118_v15 = vor.u32 %v16680_v7, %v13115_v8  ;;  %v8569_v49 = vpop.f32.mrf.mxu1  ;;  %v15658_v3 = vor.u32 %v17322_v18, %v15657_v47  ;;  %v16800_v8 = vld [vmem:[#allocation9 + $0x78c] sm:$0xf]  ;;  %v17274_v47 = vld [vmem:[#allocation9 + $0x1654] sm:$0xf0]  ;;  %v13451_v57 = vld [vmem:[#allocation9 + $0x698] sm:$0xf0] }
 0x307   :  { %v4630_v49 = vperm.slane %v17933_v55, 1  ;;  %v17076_v55 = vld [vmem:[#allocation9 + $0x102c] sm:$0xf] }
 0x308   :  { %8808 = vmatpush.bf16.msrb.mxu0 %v12830_v24  ;;  %8744 = vmatpush.bf16.msrb.mxu3 %v13930_v28  ;;  %v14938_v24 = vor.u32 %v17142_v12, %v14937_v36  ;;  %v17310_v28 = vld [vmem:[#allocation9 + $0x1774] sm:$0xf0]  ;;  %v14363_v36 = vld [vmem:[#allocation9 + $0xdb8] sm:$0xf0]  ;;  %v17100_v12 = vld [vmem:[#allocation9 + $0x10ec] sm:$0xf]  ;;  %v14702_v59 = vor.u32 %v17076_v55, %v14699_v40 }
 0x309   :  { %v14366_v48 = vor.u32 %v16992_v25, %v14363_v36  ;;  %v17220_v36 = vld [vmem:[#allocation9 + $0x14ac] sm:$0xf] }
 0x30a   :  { %8820 = vmatpush.bf16.msrb.mxu1 %v13262_v27  ;;  %v12638_v27 = vor.u32 %v16560_v14, %v12635_v58  ;;  %8786 = vmatpush.bf16.msra.mxu2 %v14938_v24  ;;  %v14795_v14 = vld [vmem:[#allocation9 + $0x1118] sm:$0xf0]  ;;  %v13598_v58 = vor.u32 %v16800_v8, %v13595_v19  ;;  %v16944_v19 = vld [vmem:[#allocation9 + $0xc0c] sm:$0xf] }
 0x30b   :  { %v14798_v17 = vor.u32 %v17100_v12, %v14795_v14  ;;  %v13403_v8 = vld [vmem:[#allocation9 + $0x638] sm:$0xf0]  ;;  %v12977_v12 = vld [vmem:[#allocation9 + $0x2b0] sm:$0xf] }
 0x30c   :  { %8809 = vmatpush.bf16.msrb.mxu0 %v12782_v38  ;;  %8745 = vmatpush.bf16.msrb.mxu3 %v13882_v54  ;;  %v13019_v38 = vld [vmem:[#allocation9 + $0x338] sm:$0xf0] }
 0x30d   :  { %v13022_v53 = vor.u32 %v16656_v22, %v13019_v38  ;;  %8787 = vmatmul.bf16.vlgmr.msra.gmra.mxu2 %v17918_v63  ;;  %v13547_v54 = vld [vmem:[#allocation9 + $0x758] sm:$0xf0] }
 0x30e   :  { %8821 = vmatpush.bf16.msrb.mxu1 %v13214_v44  ;;  %v14891_v44 = vld [vmem:[#allocation9 + $0x11d8] sm:$0xf0]  ;;  %8831 = vmatpush.bf16.msrb.mxu2 %v13742_v56  ;;  %v13550_v56 = vor.u32 %v16788_v45, %v13547_v54  ;;  %v15369_v54 = vld [vmem:[#allocation9 + $0x1568] sm:$0xf] }
 0x30f   :  { %v14894_v61 = vor.u32 %v17124_v43, %v14891_v44  ;;  %v13502_v44 = vor.u32 %v16776_v20, %v13499_v35  ;;  %v14555_v20 = vld [vmem:[#allocation9 + $0xf38] sm:$0xf0]  ;;  %v17238_v35 = vld [vmem:[#allocation9 + $0x1534] sm:$0xf0] }
 0x310   :  { %8810 = vmatpush.bf16.msrb.mxu0 %v12734_v2  ;;  %8746 = vmatpush.bf16.msrb.mxu3 %v13834_v41  ;;  %v17004_v2 = vld [vmem:[#allocation9 + $0xdec] sm:$0xf] }
 0x311   :  { %v14414_v7 = vor.u32 %v17004_v2, %v14411_v39  ;;  %v16968_v41 = vld [vmem:[#allocation9 + $0xccc] sm:$0xf] }
 0x312   :  { %8822 = vmatpush.bf16.msrb.mxu1 %v13166_v11  ;;  %v17112_v11 = vld [vmem:[#allocation9 + $0x114c] sm:$0xf]  ;;  %8832 = vmatpush.bf16.msrb.mxu2 %v13694_v13  ;;  %v15465_v13 = vld [vmem:[#allocation9 + $0x1628] sm:$0xf] }
 0x313   :  { %v14846_v16 = vor.u32 %v17112_v11, %v14843_v5  ;;  %v15466_v39 = vor.u32 %v17274_v47, %v15465_v13  ;;  %v14651_v11 = vld [vmem:[#allocation9 + $0xff8] sm:$0xf0] }
 0x314   :  { %8811 = vmatpush.bf16.msrb.mxu0 %v12686_v42  ;;  %8747 = vmatpush.bf16.msrb.mxu3 %v13786_v29  ;;  %v15610_v42 = vor.u32 %v17310_v28, %v15609_v6  ;;  %v16956_v29 = vld [vmem:[#allocation9 + $0xc6c] sm:$0xf]  ;;  %v17262_v6 = vld [vmem:[#allocation9 + $0x15f4] sm:$0xf0] }
 0x315   :  { %v16752_v28 = vld [vmem:[#allocation9 + $0x60c] sm:$0xf] }
 0x316   :  { %8823 = vmatpush.bf16.msrb.mxu1 %v13118_v15  ;;  %8833 = vmatpush.bf16.msrb.mxu2 %v13646_v60  ;;  %v15561_v15 = vld [vmem:[#allocation9 + $0x16e8] sm:$0xf]  ;;  %v13406_v45 = vor.u32 %v16752_v28, %v13403_v8  ;;  %v16615_v28 = vld [vmem:[#allocation9 + $0x1bc] sm:$0xf0]  ;;  %v13265_v8 = vld [vmem:[#allocation9 + $0x4f0] sm:$0xf] }
 0x317   :  { %8748 = vmatmul.bf16.vlgmr.msrb.gmra.mxu3 %v17879_v1  ;;  %v15562_v26 = vor.u32 %v17298_v4, %v15561_v15  ;;  %v15417_v60 = vld [vmem:[#allocation9 + $0x15c8] sm:$0xf]  ;;  %v17052_v15 = vld [vmem:[#allocation9 + $0xf6c] sm:$0xf]  ;;  %v14603_v4 = vld [vmem:[#allocation9 + $0xf98] sm:$0xf0] }
 0x318   :  { %8812 = vmatpush.bf16.msrb.mxu0 %v12638_v27  ;;  %8792 = vmatpush.bf16.msra.mxu3 %v15658_v3  ;;  %v8606_v24 = vpop.f32.mrf.mxu0  ;;  %v14747_v27 = vld [vmem:[#allocation9 + $0x10b8] sm:$0xf0]  ;;  %v17064_v3 = vld [vmem:[#allocation9 + $0xfcc] sm:$0xf]  ;;  %v15418_v14 = vor.u32 %v17262_v6, %v15417_v60  ;;  %v12833_v6 = vld [vmem:[#allocation9 + $0x190] sm:$0xf] }
 0x319   :  { %v14750_v37 = vor.u32 %v17088_v23, %v14747_v27  ;;  %v8607_v22 = vadd.f32 %v8606_v24, %v4630_v49  ;;  %v14654_v25 = vor.u32 %v17064_v3, %v14651_v11  ;;  %v17208_v49 = vld [vmem:[#allocation9 + $0x144c] sm:$0xf]  ;;  %v15227_v23 = vld [vmem:[#allocation9 + $0x1478] sm:$0xf0]  ;;  %v12929_v27 = vld [vmem:[#allocation9 + $0x250] sm:$0xf] }
 0x31a   :  { %8824 = vmatpush.bf16.msrb.mxu1 %v13070_v34  ;;  %8834 = vmatpush.bf16.msrb.mxu2 %v13598_v58  ;;  %v14318_v34 = vor.u32 %v16980_v21, %v14315_v46  ;;  %v16651_v58 = vld [vmem:[#allocation9 + $0x2dc] sm:$0xf0]  ;;  %v17184_v11 = vld [vmem:[#allocation9 + $0x138c] sm:$0xf] }
 0x31b   :  { %8813 = vmatmul.bf16.vlgmr.msrb.gmra.mxu0 %v17871_v10  ;;  %v12978_v24 = vor.u32 %v16651_v58, %v12977_v12  ;;  %v17172_v12 = vld [vmem:[#allocation9 + $0x132c] sm:$0xf] }
 0x31c   :  { %8857 = vmatpush.bf16.msra.mxu0 %v14510_v32  ;;  %8793 = vmatpush.bf16.msra.mxu3 %v15610_v42  ;;  %v17286_v32 = vld [vmem:[#allocation9 + $0x16b4] sm:$0xf0]  ;;  %v15275_v42 = vld [vmem:[#allocation9 + $0x14d8] sm:$0xf0] }
 0x31d   :  { %v15514_v38 = vor.u32 %v17286_v32, %v15513_v30  ;;  %v15278_v46 = vor.u32 %v17220_v36, %v15275_v42  ;;  %v15321_v32 = vld [vmem:[#allocation9 + $0x1508] sm:$0xf]  ;;  %v14027_v36 = vld [vmem:[#allocation9 + $0xb18] sm:$0xf0]  ;;  %v12834_v42 = vor.u32 %v16615_v28, %v12833_v6  ;;  %v13745_v28 = vld [vmem:[#allocation9 + $0x8b0] sm:$0xf] }
 0x31e   :  { %8825 = vmatpush.bf16.msrb.mxu1 %v13022_v53  ;;  %8835 = vmatpush.bf16.msrb.mxu2 %v13550_v56  ;;  %v8619_v43 = vpop.f32.mrf.mxu1  ;;  %v16764_v53 = vld [vmem:[#allocation9 + $0x66c] sm:$0xf]  ;;  %v16639_v56 = vld [vmem:[#allocation9 + $0x27c] sm:$0xf0]  ;;  %v15322_v13 = vor.u32 %v17238_v35, %v15321_v32  ;;  %v13169_v35 = vld [vmem:[#allocation9 + $0x430] sm:$0xf] }
 0x31f   :  { %v17951_v18 = vadd.f32 %v8619_v43, %v8607_v22  ;;  %v13454_v5 = vor.u32 %v16764_v53, %v13451_v57  ;;  %v16932_v22 = vld [vmem:[#allocation9 + $0xbac] sm:$0xf]  ;;  %v12930_v55 = vor.u32 %v16639_v56, %v12929_v27  ;;  %v16627_v53 = vld [vmem:[#allocation9 + $0x21c] sm:$0xf0] }
 0x320   :  { %8858 = vmatpush.bf16.msra.mxu0 %v14462_v51  ;;  %8794 = vmatpush.bf16.msra.mxu3 %v15562_v26  ;;  %v14270_v51 = vor.u32 %v16968_v41, %v14267_v50  ;;  %v8608_v2 = vpop.f32.mrf.mxu0  ;;  %v14606_v26 = vor.u32 %v17052_v15, %v14603_v4  ;;  %v16747_v41 = vld [vmem:[#allocation9 + $0x5dc] sm:$0xf0]  ;;  %v15230_v50 = vor.u32 %v17208_v49, %v15227_v23  ;;  %v17196_v43 = vld [vmem:[#allocation9 + $0x13ec] sm:$0xf]  ;;  %v12785_v15 = vld [vmem:[#allocation9 + $0x130] sm:$0xf] }
 0x321   :  { %8826 = vmatmul.bf16.vlgmr.msrb.gmra.mxu1 %v17877_v31  ;;  %v16920_v2 = vld [vmem:[#allocation9 + $0xb4c] sm:$0xf]  ;;  %v16603_v4 = vld [vmem:[#allocation9 + $0x15c] sm:$0xf0]  ;;  %v13979_v49 = vld [vmem:[#allocation9 + $0xab8] sm:$0xf0] }
 0x322   :  { %8870 = vmatpush.bf16.msra.mxu1 %v14894_v61  ;;  %v14219_v61 = vld [vmem:[#allocation9 + $0xc98] sm:$0xf0]  ;;  %8836 = vmatpush.bf16.msrb.mxu2 %v13502_v44  ;;  %v16591_v32 = vld [vmem:[#allocation9 + $0xfc] sm:$0xf0] }
 0x323   :  { %v15179_v44 = vld [vmem:[#allocation9 + $0x1418] sm:$0xf0] }
 0x324   :  { %8859 = vmatpush.bf16.msra.mxu0 %v14414_v7  ;;  %8795 = vmatpush.bf16.msra.mxu3 %v15514_v38  ;;  %v14222_v7 = vor.u32 %v16956_v29, %v14219_v61  ;;  %v14123_v38 = vld [vmem:[#allocation9 + $0xbd8] sm:$0xf0]  ;;  %v16735_v29 = vld [vmem:[#allocation9 + $0x57c] sm:$0xf0]  ;;  %v15182_v61 = vor.u32 %v17196_v43, %v15179_v44 }
 0x325   :  { %v14126_v57 = vor.u32 %v16932_v22, %v14123_v38  ;;  %v15035_v23 = vld [vmem:[#allocation9 + $0x12f8] sm:$0xf0] }
 0x326   :  { %8871 = vmatpush.bf16.msra.mxu1 %v14846_v16  ;;  %v14171_v16 = vld [vmem:[#allocation9 + $0xc38] sm:$0xf0]  ;;  %8837 = vmatpush.bf16.msrb.mxu2 %v13454_v5 }
 0x327   :  { %v14174_v21 = vor.u32 %v16944_v19, %v14171_v16  ;;  %v15131_v5 = vld [vmem:[#allocation9 + $0x13b8] sm:$0xf0]  ;;  %v16723_v19 = vld [vmem:[#allocation9 + $0x51c] sm:$0xf0] }
 0x328   :  { %8860 = vmatpush.bf16.msra.mxu0 %v14366_v48  ;;  %8796 = vmatpush.bf16.msra.mxu3 %v15466_v39  ;;  %v8621_v48 = vpop.f32.mrf.mxu1  ;;  %v14075_v39 = vld [vmem:[#allocation9 + $0xb78] sm:$0xf0]  ;;  %v15134_v16 = vor.u32 %v17184_v11, %v15131_v5  ;;  %v13266_v58 = vor.u32 %v16723_v19, %v13265_v8  ;;  %v8580_v27 = vpop.f32.mrf.mxu2  ;;  %v12641_v11 = vld [vmem:[#allocation9 + $0x10] sm:$0xf]  ;;  %v16567_v5 = vld [vmem:[#allocation9 + $0x3c] sm:$0xf0] }
 0x329   :  { %v13931_v22 = vld [vmem:[#allocation9 + $0xa58] sm:$0xf0]  ;;  %v14513_v8 = vld [vmem:[#allocation9 + $0xeb0] sm:$0xf] }
 0x32a   :  { %8872 = vmatpush.bf16.msra.mxu1 %v14798_v17  ;;  %v17250_v17 = vld [vmem:[#allocation9 + $0x1594] sm:$0xf0]  ;;  %8838 = vmatpush.bf16.msrb.mxu2 %v13406_v45  ;;  %v14987_v43 = vld [vmem:[#allocation9 + $0x1298] sm:$0xf0] }
 0x32b   :  { %v15370_v30 = vor.u32 %v17250_v17, %v15369_v54  ;;  %v13217_v54 = vld [vmem:[#allocation9 + $0x490] sm:$0xf]  ;;  %v16711_v17 = vld [vmem:[#allocation9 + $0x4bc] sm:$0xf0] }
 0x32c   :  { %8861 = vmatpush.bf16.msra.mxu0 %v14318_v34  ;;  %8797 = vmatpush.bf16.msra.mxu3 %v15418_v14  ;;  %v17040_v34 = vld [vmem:[#allocation9 + $0xf0c] sm:$0xf]  ;;  %v15083_v14 = vld [vmem:[#allocation9 + $0x1358] sm:$0xf0]  ;;  %v13218_v56 = vor.u32 %v16711_v17, %v13217_v54 }
 0x32d   :  { %v14558_v40 = vor.u32 %v17040_v34, %v14555_v20  ;;  %8839 = vmatmul.bf16.vlgmr.msrb.gmra.mxu2 %v17869_v9  ;;  %v17960_v34 = vadd.f32 %v8580_v27, %v17944_v0  ;;  %v16663_v27 = vld [vmem:[#allocation9 + $0x33c] sm:$0xf0] }
 0x32e   :  { %8873 = vmatpush.bf16.msra.mxu1 %v14750_v37  ;;  %v13361_v37 = vld [vmem:[#allocation9 + $0x5b0] sm:$0xf]  ;;  %8883 = vmatpush.bf16.msra.mxu2 %v15278_v46  ;;  %v16896_v46 = vld [vmem:[#allocation9 + $0xa8c] sm:$0xf] }
 0x32f   :  { %v13362_v47 = vor.u32 %v16747_v41, %v13361_v37  ;;  %v13982_v20 = vor.u32 %v16896_v46, %v13979_v49  ;;  %v16699_v37 = vld [vmem:[#allocation9 + $0x45c] sm:$0xf0]  ;;  %v14465_v46 = vld [vmem:[#allocation9 + $0xe50] sm:$0xf] }
 0x330   :  { %8862 = vmatpush.bf16.msra.mxu0 %v14270_v51  ;;  %8798 = vmatpush.bf16.msra.mxu3 %v15370_v30  ;;  %v12881_v51 = vld [vmem:[#allocation9 + $0x1f0] sm:$0xf]  ;;  %v13170_v44 = vor.u32 %v16699_v37, %v13169_v35  ;;  %v17023_v49 = vld [vmem:[#allocation9 + $0xe7c] sm:$0xf0]  ;;  %v17316_v35 = vld [vmem:[#allocation9 + $0x17ac] sm:$0xf] }
 0x331   :  { %v12882_v3 = vor.u32 %v16627_v53, %v12881_v51  ;;  %v12737_v30 = vld [vmem:[#allocation9 + $0xd0] sm:$0xf]  ;;  %v15659_v37 = vld [vmem:[#allocation9 + $0x17d8] sm:$0xf0] }
 0x332   :  { %8874 = vmatpush.bf16.msra.mxu1 %v14702_v59  ;;  %v13313_v59 = vld [vmem:[#allocation9 + $0x550] sm:$0xf]  ;;  %8884 = vmatpush.bf16.msra.mxu2 %v15230_v50  ;;  %v16884_v50 = vld [vmem:[#allocation9 + $0xa2c] sm:$0xf] }
 0x333   :  { %v13314_v60 = vor.u32 %v16735_v29, %v13313_v59  ;;  %v13934_v51 = vor.u32 %v16884_v50, %v13931_v22  ;;  %v13121_v53 = vld [vmem:[#allocation9 + $0x3d0] sm:$0xf]  ;;  %v16872_v29 = vld [vmem:[#allocation9 + $0x9cc] sm:$0xf]  ;;  %v14466_v50 = vor.u32 %v17023_v49, %v14465_v46 }
 0x334   :  { %8863 = vmatpush.bf16.msra.mxu0 %v14222_v7  ;;  %8799 = vmatpush.bf16.msra.mxu3 %v15322_v13  ;;  %v14078_v7 = vor.u32 %v16920_v2, %v14075_v39  ;;  %v12689_v13 = vld [vmem:[#allocation9 + $0x70] sm:$0xf]  ;;  %v17136_v2 = vld [vmem:[#allocation9 + $0x120c] sm:$0xf] }
 0x335   :  { %v17280_v49 = vld [vmem:[#allocation9 + $0x168c] sm:$0xf] }
 0x336   :  { %8875 = vmatpush.bf16.msra.mxu1 %v14654_v25  ;;  %8885 = vmatpush.bf16.msra.mxu2 %v15182_v61  ;;  %v16908_v25 = vld [vmem:[#allocation9 + $0xaec] sm:$0xf]  ;;  %v13883_v61 = vld [vmem:[#allocation9 + $0x9f8] sm:$0xf0] }
 0x337   :  { %8800 = vmatmul.bf16.vlgmr.msra.gmra.mxu3 %v17929_v62  ;;  %v14030_v45 = vor.u32 %v16908_v25, %v14027_v36  ;;  %v13886_v19 = vor.u32 %v16872_v29, %v13883_v61  ;;  %v13073_v25 = vld [vmem:[#allocation9 + $0x370] sm:$0xf]  ;;  %v16675_v36 = vld [vmem:[#allocation9 + $0x39c] sm:$0xf0]  ;;  %v17304_v29 = vld [vmem:[#allocation9 + $0x174c] sm:$0xf] }
 0x338   :  { %8864 = vmatpush.bf16.msra.mxu0 %v14174_v21  ;;  %8844 = vmatpush.bf16.msrb.mxu3 %v14126_v57  ;;  %v17957_v48 = vpop.f32.mrf.mxu0  ;;  %v15086_v21 = vor.u32 %v17172_v12, %v15083_v14  ;;  %v16687_v57 = vld [vmem:[#allocation9 + $0x3fc] sm:$0xf0]  ;;  %v16860_v12 = vld [vmem:[#allocation9 + $0x96c] sm:$0xf]  ;;  %v13835_v14 = vld [vmem:[#allocation9 + $0x998] sm:$0xf0]  ;;  %v13074_v17 = vor.u32 %v16675_v36, %v13073_v25 }
 0x339   :  { %v13122_v6 = vor.u32 %v16687_v57, %v13121_v53  ;;  %v14849_v53 = vld [vmem:[#allocation9 + $0x1150] sm:$0xf]  ;;  %v17119_v57 = vld [vmem:[#allocation9 + $0x117c] sm:$0xf0]  ;;  %v15611_v61 = vld [vmem:[#allocation9 + $0x1778] sm:$0xf0] }
 0x33a   :  { %8876 = vmatpush.bf16.msra.mxu1 %v14606_v26  ;;  %8886 = vmatpush.bf16.msra.mxu2 %v15134_v16  ;;  %v17160_v26 = vld [vmem:[#allocation9 + $0x12cc] sm:$0xf]  ;;  %v17035_v16 = vld [vmem:[#allocation9 + $0xedc] sm:$0xf0]  ;;  %v13553_v36 = vld [vmem:[#allocation9 + $0x730] sm:$0xf] }
 0x33b   :  { %8865 = vmatmul.bf16.vlgmr.msra.gmra.mxu0 %v17893_v33  ;;  %v15038_v41 = vor.u32 %v17160_v26, %v15035_v23  ;;  %v14514_v54 = vor.u32 %v17035_v16, %v14513_v8  ;;  %v16848_v26 = vld [vmem:[#allocation9 + $0x90c] sm:$0xf]  ;;  %v13025_v23 = vld [vmem:[#allocation9 + $0x310] sm:$0xf] }
 0x33c   :  { %8909 = vmatpush.bf16.msrb.mxu0 %v12978_v24  ;;  %8845 = vmatpush.bf16.msrb.mxu3 %v14078_v7  ;;  %v12786_v24 = vor.u32 %v16603_v4, %v12785_v15  ;;  %v16843_v7 = vld [vmem:[#allocation9 + $0x8dc] sm:$0xf0]  ;;  %v12642_v15 = vor.u32 %v16567_v5, %v12641_v11  ;;  %v13026_v22 = vor.u32 %v16663_v27, %v13025_v23  ;;  %v14369_v11 = vld [vmem:[#allocation9 + $0xd90] sm:$0xf]  ;;  %v17292_v8 = vld [vmem:[#allocation9 + $0x16ec] sm:$0xf] }
 0x33d   :  { %v13746_v4 = vor.u32 %v16843_v7, %v13745_v28  ;;  %v16999_v5 = vld [vmem:[#allocation9 + $0xdbc] sm:$0xf0]  ;;  %v13505_v23 = vld [vmem:[#allocation9 + $0x6d0] sm:$0xf] }
 0x33e   :  { %8877 = vmatpush.bf16.msra.mxu1 %v14558_v40  ;;  %8887 = vmatpush.bf16.msra.mxu2 %v15086_v21  ;;  %v17962_v38 = vpop.f32.mrf.mxu1  ;;  %v17148_v40 = vld [vmem:[#allocation9 + $0x126c] sm:$0xf]  ;;  %v16831_v21 = vld [vmem:[#allocation9 + $0x87c] sm:$0xf0]  ;;  %v14370_v25 = vor.u32 %v16999_v5, %v14369_v11  ;;  %v15419_v11 = vld [vmem:[#allocation9 + $0x15f8] sm:$0xf0] }
 0x33f   :  { %v14990_v59 = vor.u32 %v17148_v40, %v14987_v43  ;;  %v16819_v40 = vld [vmem:[#allocation9 + $0x81c] sm:$0xf0]  ;;  %v13409_v5 = vld [vmem:[#allocation9 + $0x610] sm:$0xf] }
 0x340   :  { %8910 = vmatpush.bf16.msrb.mxu0 %v12930_v55  ;;  %8846 = vmatpush.bf16.msrb.mxu3 %v14030_v45  ;;  %v12738_v55 = vor.u32 %v16591_v32, %v12737_v30  ;;  %v8660_v0 = vpop.f32.mrf.mxu0  ;;  %v13697_v45 = vld [vmem:[#allocation9 + $0x850] sm:$0xf]  ;;  %v17131_v32 = vld [vmem:[#allocation9 + $0x11dc] sm:$0xf0] }
 0x341   :  { %8878 = vmatmul.bf16.vlgmr.msra.gmra.mxu1 %v17896_v52  ;;  %v14897_v30 = vld [vmem:[#allocation9 + $0x11b0] sm:$0xf]  ;;  %v17011_v0 = vld [vmem:[#allocation9 + $0xe1c] sm:$0xf0] }
 0x342   :  { %8922 = vmatpush.bf16.msrb.mxu1 %v13362_v47  ;;  %v16579_v47 = vld [vmem:[#allocation9 + $0x9c] sm:$0xf0]  ;;  %8888 = vmatpush.bf16.msra.mxu2 %v15038_v41 }
 0x343   :  { %v12690_v39 = vor.u32 %v16579_v47, %v12689_v13  ;;  %v14898_v13 = vor.u32 %v17131_v32, %v14897_v30  ;;  %v14417_v47 = vld [vmem:[#allocation9 + $0xdf0] sm:$0xf]  ;;  %v17107_v28 = vld [vmem:[#allocation9 + $0x111c] sm:$0xf0] }
 0x344   :  { %8911 = vmatpush.bf16.msrb.mxu0 %v12882_v3  ;;  %8847 = vmatpush.bf16.msrb.mxu3 %v13982_v20  ;;  %v14939_v3 = vld [vmem:[#allocation9 + $0x1238] sm:$0xf0]  ;;  %v13698_v20 = vor.u32 %v16831_v21, %v13697_v45  ;;  %v17095_v45 = vld [vmem:[#allocation9 + $0x10bc] sm:$0xf0]  ;;  %v14273_v30 = vld [vmem:[#allocation9 + $0xcd0] sm:$0xf] }
 0x345   :  { %v16783_v27 = vld [vmem:[#allocation9 + $0x6fc] sm:$0xf0] }
 0x346   :  { %8923 = vmatpush.bf16.msrb.mxu1 %v13314_v60  ;;  %v8582_v60 = vpop.f32.mrf.mxu2  ;;  %8889 = vmatpush.bf16.msra.mxu2 %v14990_v59  ;;  %v16975_v32 = vld [vmem:[#allocation9 + $0xcfc] sm:$0xf0] }
 0x347   :  { %v15614_v60 = vor.u32 %v17304_v29, %v15611_v61  ;;  %v14657_v61 = vld [vmem:[#allocation9 + $0xfd0] sm:$0xf] }
 0x348   :  { %8912 = vmatpush.bf16.msrb.mxu0 %v12834_v42  ;;  %8848 = vmatpush.bf16.msrb.mxu3 %v13934_v51  ;;  %v14942_v42 = vor.u32 %v17136_v2, %v14939_v3  ;;  %v15662_v51 = vor.u32 %v17316_v35, %v15659_v37  ;;  %v14418_v2 = vor.u32 %v17011_v0, %v14417_v47  ;;  %v14705_v35 = vld [vmem:[#allocation9 + $0x1030] sm:$0xf]  ;;  %v17083_v37 = vld [vmem:[#allocation9 + $0x105c] sm:$0xf0] }
 0x349   :  { %v14850_v3 = vor.u32 %v17119_v57, %v14849_v53  ;;  %v13457_v47 = vld [vmem:[#allocation9 + $0x670] sm:$0xf]  ;;  %v16771_v0 = vld [vmem:[#allocation9 + $0x69c] sm:$0xf0]  ;;  %v14706_v53 = vor.u32 %v17083_v37, %v14705_v35 }
 0x34a   :  { %8924 = vmatpush.bf16.msrb.mxu1 %v13266_v58  ;;  %v8673_v58 = vpop.f32.mrf.mxu1  ;;  %8890 = vmatpush.bf16.msra.mxu2 %v14942_v42  ;;  %v16795_v42 = vld [vmem:[#allocation9 + $0x75c] sm:$0xf0]  ;;  %v14225_v57 = vld [vmem:[#allocation9 + $0xc70] sm:$0xf] }
 0x34b   :  { %v16987_v58 = vld [vmem:[#allocation9 + $0xd5c] sm:$0xf0]  ;;  %v13554_v46 = vor.u32 %v16795_v42, %v13553_v36  ;;  %v16645_v42 = vld [vmem:[#allocation9 + $0x2b4] sm:$0xf]  ;;  %v14561_v35 = vld [vmem:[#allocation9 + $0xf10] sm:$0xf] }
 0x34c   :  { %8913 = vmatpush.bf16.msrb.mxu0 %v12786_v24  ;;  %8849 = vmatpush.bf16.msrb.mxu3 %v13886_v19  ;;  %v13838_v24 = vor.u32 %v16860_v12, %v13835_v14  ;;  %v15563_v19 = vld [vmem:[#allocation9 + $0x1718] sm:$0xf0]  ;;  %v14321_v14 = vld [vmem:[#allocation9 + $0xd30] sm:$0xf]  ;;  %v17227_v36 = vld [vmem:[#allocation9 + $0x14dc] sm:$0xf0] }
 0x34d   :  { %8891 = vmatmul.bf16.vlgmr.msra.gmra.mxu2 %v17918_v63  ;;  %v17047_v37 = vld [vmem:[#allocation9 + $0xf3c] sm:$0xf0] }
 0x34e   :  { %8925 = vmatpush.bf16.msrb.mxu1 %v13218_v56  ;;  %v13787_v56 = vld [vmem:[#allocation9 + $0x938] sm:$0xf0]  ;;  %8935 = vmatpush.bf16.msrb.mxu2 %v13746_v4  ;;  %v8632_v41 = vpop.f32.mrf.mxu2  ;;  %v14753_v4 = vld [vmem:[#allocation9 + $0x1090] sm:$0xf] }
 0x34f   :  { %v17965_v43 = vadd.f32 %v8632_v41, %v17951_v18  ;;  %v13601_v18 = vld [vmem:[#allocation9 + $0x790] sm:$0xf] }
 0x350   :  { %8914 = vmatpush.bf16.msrb.mxu0 %v12738_v55  ;;  %v13649_v55 = vld [vmem:[#allocation9 + $0x7f0] sm:$0xf]  ;;  %8850 = vmatpush.bf16.msrb.mxu3 %v13838_v24  ;;  %v15515_v24 = vld [vmem:[#allocation9 + $0x16b8] sm:$0xf0] }
 0x351   :  { %v13650_v59 = vor.u32 %v16819_v40, %v13649_v55  ;;  %v15467_v55 = vld [vmem:[#allocation9 + $0x1658] sm:$0xf0] }
 0x352   :  { %8926 = vmatpush.bf16.msrb.mxu1 %v13170_v44  ;;  %v13790_v44 = vor.u32 %v16848_v26, %v13787_v56  ;;  %8936 = vmatpush.bf16.msrb.mxu2 %v13698_v20  ;;  %v14322_v26 = vor.u32 %v16987_v58, %v14321_v14  ;;  %v14754_v56 = vor.u32 %v17095_v45, %v14753_v4  ;;  %v12979_v14 = vld [vmem:[#allocation9 + $0x2e0] sm:$0xf0]  ;;  %v14609_v58 = vld [vmem:[#allocation9 + $0xf70] sm:$0xf]  ;;  %v17244_v45 = vld [vmem:[#allocation9 + $0x156c] sm:$0xf] }
 0x353   :  { %v15518_v20 = vor.u32 %v17280_v49, %v15515_v24  ;;  %v15233_v24 = vld [vmem:[#allocation9 + $0x1450] sm:$0xf] }
 0x354   :  { %8915 = vmatpush.bf16.msrb.mxu0 %v12690_v39  ;;  %v16807_v39 = vld [vmem:[#allocation9 + $0x7bc] sm:$0xf0]  ;;  %8851 = vmatpush.bf16.msrb.mxu3 %v13790_v44 }
 0x355   :  { %v13602_v7 = vor.u32 %v16807_v39, %v13601_v18  ;;  %v13458_v39 = vor.u32 %v16771_v0, %v13457_v47  ;;  %v16939_v47 = vld [vmem:[#allocation9 + $0xbdc] sm:$0xf0] }
 0x356   :  { %8927 = vmatpush.bf16.msrb.mxu1 %v13122_v6  ;;  %v14801_v6 = vld [vmem:[#allocation9 + $0x10f0] sm:$0xf]  ;;  %8937 = vmatpush.bf16.msrb.mxu2 %v13650_v59  ;;  %v8634_v16 = vpop.f32.mrf.mxu2  ;;  %v16963_v59 = vld [vmem:[#allocation9 + $0xc9c] sm:$0xf0] }
 0x357   :  { %8852 = vmatmul.bf16.vlgmr.msrb.gmra.mxu3 %v17879_v1  ;;  %v14802_v12 = vor.u32 %v17107_v28, %v14801_v6  ;;  %v14226_v6 = vor.u32 %v16963_v59, %v14225_v57  ;;  %v16759_v28 = vld [vmem:[#allocation9 + $0x63c] sm:$0xf0]  ;;  %v15185_v57 = vld [vmem:[#allocation9 + $0x13f0] sm:$0xf] }
 0x358   :  { %8916 = vmatpush.bf16.msrb.mxu0 %v12642_v15  ;;  %8896 = vmatpush.bf16.msra.mxu3 %v15662_v51  ;;  %v15566_v15 = vor.u32 %v17292_v8, %v15563_v19  ;;  %v8710_v21 = vpop.f32.mrf.mxu0  ;;  %v16951_v8 = vld [vmem:[#allocation9 + $0xc3c] sm:$0xf0]  ;;  %v13410_v4 = vor.u32 %v16759_v28, %v13409_v5 }
 0x359   :  { %v17203_v59 = vld [vmem:[#allocation9 + $0x141c] sm:$0xf0] }
 0x35a   :  { %8928 = vmatpush.bf16.msrb.mxu1 %v13074_v17  ;;  %8938 = vmatpush.bf16.msrb.mxu2 %v13602_v7  ;;  %v14177_v7 = vld [vmem:[#allocation9 + $0xc10] sm:$0xf]  ;;  %v15186_v5 = vor.u32 %v17203_v59, %v15185_v57 }
 0x35b   :  { %8917 = vmatmul.bf16.vlgmr.msrb.gmra.mxu0 %v17871_v10  ;;  %v14178_v49 = vor.u32 %v16951_v8, %v14177_v7  ;;  %v15137_v7 = vld [vmem:[#allocation9 + $0x1390] sm:$0xf]  ;;  %v17191_v8 = vld [vmem:[#allocation9 + $0x13bc] sm:$0xf0] }
 0x35c   :  { %8961 = vmatpush.bf16.msra.mxu0 %v14514_v54  ;;  %8897 = vmatpush.bf16.msra.mxu3 %v15614_v60  ;;  %v17971_v54 = vld [vmem:[#allocation10] sm:$0xff]  ;;  %v8593_v60 = vpop.f32.mrf.mxu3 }
 0x35d   :  { %v4631_v17 = vperm.slane %v17971_v54, 2  ;;  %v17979_v19 = vadd.f32 %v8593_v60, %v17960_v34  ;;  %v14081_v60 = vld [vmem:[#allocation9 + $0xb50] sm:$0xf] }
 0x35e   :  { %8929 = vmatpush.bf16.msrb.mxu1 %v13026_v22  ;;  %8939 = vmatpush.bf16.msrb.mxu2 %v13554_v46  ;;  %v17268_v22 = vld [vmem:[#allocation9 + $0x162c] sm:$0xf]  ;;  %v8723_v40 = vpop.f32.mrf.mxu1  ;;  %v17974_v44 = vpop.f32.mrf.mxu2 }
 0x35f   :  { %v8711_v41 = vadd.f32 %v8710_v21, %v4631_v17  ;;  %v15470_v29 = vor.u32 %v17268_v22, %v15467_v55  ;;  %v15371_v17 = vld [vmem:[#allocation9 + $0x1598] sm:$0xf0]  ;;  %v13363_v22 = vld [vmem:[#allocation9 + $0x5e0] sm:$0xf0] }
 0x360   :  { %8962 = vmatpush.bf16.msra.mxu0 %v14466_v50  ;;  %8898 = vmatpush.bf16.msra.mxu3 %v15566_v15  ;;  %v13506_v50 = vor.u32 %v16783_v27, %v13505_v23  ;;  %v8712_v18 = vpop.f32.mrf.mxu0  ;;  %v17059_v15 = vld [vmem:[#allocation9 + $0xf9c] sm:$0xf0] }
 0x361   :  { %8930 = vmatmul.bf16.vlgmr.msrb.gmra.mxu1 %v17877_v31  ;;  %v17976_v51 = vadd.f32 %v8723_v40, %v8711_v41  ;;  %v14610_v23 = vor.u32 %v17059_v15, %v14609_v58  ;;  %v17215_v27 = vld [vmem:[#allocation9 + $0x147c] sm:$0xf0]  ;;  %v15323_v41 = vld [vmem:[#allocation9 + $0x1538] sm:$0xf0]  ;;  %v12883_v18 = vld [vmem:[#allocation9 + $0x220] sm:$0xf0]  ;;  %v15138_v15 = vor.u32 %v17191_v8, %v15137_v7 }
 0x362   :  { %8974 = vmatpush.bf16.msra.mxu1 %v14898_v13  ;;  %v14274_v13 = vor.u32 %v16975_v32, %v14273_v30  ;;  %8940 = vmatpush.bf16.msrb.mxu2 %v13506_v50  ;;  %v12931_v30 = vld [vmem:[#allocation9 + $0x280] sm:$0xf0]  ;;  %v15374_v32 = vor.u32 %v17244_v45, %v15371_v17  ;;  %v16741_v50 = vld [vmem:[#allocation9 + $0x5b4] sm:$0xf]  ;;  %v15234_v40 = vor.u32 %v17215_v27, %v15233_v24  ;;  %v16915_v45 = vld [vmem:[#allocation9 + $0xb1c] sm:$0xf0] }
 0x363   :  { %v16597_v24 = vld [vmem:[#allocation9 + $0x134] sm:$0xf]  ;;  %v13123_v7 = vld [vmem:[#allocation9 + $0x400] sm:$0xf0] }
 0x364   :  { %8963 = vmatpush.bf16.msra.mxu0 %v14418_v2  ;;  %8899 = vmatpush.bf16.msra.mxu3 %v15518_v20  ;;  %v17071_v2 = vld [vmem:[#allocation9 + $0xffc] sm:$0xf0]  ;;  %v17232_v20 = vld [vmem:[#allocation9 + $0x150c] sm:$0xf]  ;;  %v8595_v55 = vpop.f32.mrf.mxu3 }
 0x365   :  { %v14658_v16 = vor.u32 %v17071_v2, %v14657_v61  ;;  %v13366_v61 = vor.u32 %v16741_v50, %v13363_v22  ;;  %v16621_v2 = vld [vmem:[#allocation9 + $0x1f4] sm:$0xf]  ;;  %v17167_v50 = vld [vmem:[#allocation9 + $0x12fc] sm:$0xf0] }
 0x366   :  { %8975 = vmatpush.bf16.msra.mxu1 %v14850_v3  ;;  %v17256_v3 = vld [vmem:[#allocation9 + $0x15cc] sm:$0xf]  ;;  %8941 = vmatpush.bf16.msrb.mxu2 %v13458_v39  ;;  %v8725_v21 = vpop.f32.mrf.mxu1  ;;  %v8686_v46 = vpop.f32.mrf.mxu2  ;;  %v12886_v28 = vor.u32 %v16621_v2, %v12883_v18 }
 0x367   :  { %v15089_v46 = vld [vmem:[#allocation9 + $0x1330] sm:$0xf] }
 0x368   :  { %8964 = vmatpush.bf16.msra.mxu0 %v14370_v25  ;;  %v15281_v25 = vld [vmem:[#allocation9 + $0x14b0] sm:$0xf]  ;;  %8900 = vmatpush.bf16.msra.mxu3 %v15470_v29  ;;  %v15326_v29 = vor.u32 %v17232_v20, %v15323_v41 }
 0x369   :  { %v15282_v34 = vor.u32 %v17227_v36, %v15281_v25  ;;  %v16609_v25 = vld [vmem:[#allocation9 + $0x194] sm:$0xf]  ;;  %v12835_v36 = vld [vmem:[#allocation9 + $0x1c0] sm:$0xf0]  ;;  %v13985_v20 = vld [vmem:[#allocation9 + $0xa90] sm:$0xf] }
 0x36a   :  { %8976 = vmatpush.bf16.msra.mxu1 %v14802_v12  ;;  %v15422_v12 = vor.u32 %v17256_v3, %v15419_v11  ;;  %8942 = vmatpush.bf16.msrb.mxu2 %v13410_v4  ;;  %v16729_v3 = vld [vmem:[#allocation9 + $0x554] sm:$0xf]  ;;  %v13315_v11 = vld [vmem:[#allocation9 + $0x580] sm:$0xf0]  ;;  %v14033_v4 = vld [vmem:[#allocation9 + $0xaf0] sm:$0xf]  ;;  %v12838_v21 = vor.u32 %v16609_v25, %v12835_v36 }
 0x36b   :  { %v14034_v27 = vor.u32 %v16915_v45, %v14033_v4  ;;  %v15041_v41 = vld [vmem:[#allocation9 + $0x12d0] sm:$0xf]  ;;  %v16879_v36 = vld [vmem:[#allocation9 + $0x9fc] sm:$0xf0]  ;;  %v16837_v4 = vld [vmem:[#allocation9 + $0x8b4] sm:$0xf] }
 0x36c   :  { %8965 = vmatpush.bf16.msra.mxu0 %v14322_v26  ;;  %v12982_v26 = vor.u32 %v16645_v42, %v12979_v14  ;;  %8901 = vmatpush.bf16.msra.mxu3 %v15422_v12  ;;  %v16717_v12 = vld [vmem:[#allocation9 + $0x4f4] sm:$0xf]  ;;  %v13267_v14 = vld [vmem:[#allocation9 + $0x520] sm:$0xf0]  ;;  %v8645_v58 = vpop.f32.mrf.mxu3  ;;  %v15042_v59 = vor.u32 %v17167_v50, %v15041_v41  ;;  %v13889_v25 = vld [vmem:[#allocation9 + $0x9d0] sm:$0xf] }
 0x36d   :  { %8943 = vmatmul.bf16.vlgmr.msrb.gmra.mxu2 %v17869_v9  ;;  %v8646_v17 = vadd.f32 %v8645_v58, %v17965_v43  ;;  %v16561_v58 = vld [vmem:[#allocation9 + $0x14] sm:$0xf]  ;;  %v13747_v45 = vld [vmem:[#allocation9 + $0x8e0] sm:$0xf0] }
 0x36e   :  { %8977 = vmatpush.bf16.msra.mxu1 %v14754_v56  ;;  %v16633_v56 = vld [vmem:[#allocation9 + $0x254] sm:$0xf]  ;;  %8987 = vmatpush.bf16.msra.mxu2 %v15282_v34  ;;  %v13270_v34 = vor.u32 %v16717_v12, %v13267_v14  ;;  %v17143_v14 = vld [vmem:[#allocation9 + $0x123c] sm:$0xf0] }
 0x36f   :  { %v12934_v0 = vor.u32 %v16633_v56, %v12931_v30  ;;  %v16705_v56 = vld [vmem:[#allocation9 + $0x494] sm:$0xf]  ;;  %v13219_v30 = vld [vmem:[#allocation9 + $0x4c0] sm:$0xf0]  ;;  %v8736_v2 = vpop.f32.mrf.mxu2 }
 0x370   :  { %8966 = vmatpush.bf16.msra.mxu0 %v14274_v13  ;;  %v14129_v13 = vld [vmem:[#allocation9 + $0xbb0] sm:$0xf]  ;;  %8902 = vmatpush.bf16.msra.mxu3 %v15374_v32  ;;  %v13222_v55 = vor.u32 %v16705_v56, %v13219_v30 }
 0x371   :  { %v14130_v39 = vor.u32 %v16939_v47, %v14129_v13  ;;  %v16693_v47 = vld [vmem:[#allocation9 + $0x434] sm:$0xf] }
 0x372   :  { %8978 = vmatpush.bf16.msra.mxu1 %v14706_v53  ;;  %v14562_v53 = vor.u32 %v17047_v37, %v14561_v35  ;;  %8988 = vmatpush.bf16.msra.mxu2 %v15234_v40  ;;  %v16903_v35 = vld [vmem:[#allocation9 + $0xabc] sm:$0xf0]  ;;  %v16585_v40 = vld [vmem:[#allocation9 + $0xd4] sm:$0xf] }
 0x373   :  { %v13986_v13 = vor.u32 %v16903_v35, %v13985_v20  ;;  %v13750_v35 = vor.u32 %v16837_v4, %v13747_v45  ;;  %v16993_v4 = vld [vmem:[#allocation9 + $0xd94] sm:$0xf]  ;;  %v14371_v45 = vld [vmem:[#allocation9 + $0xdc0] sm:$0xf0] }
 0x374   :  { %8967 = vmatpush.bf16.msra.mxu0 %v14226_v6  ;;  %v16927_v6 = vld [vmem:[#allocation9 + $0xb7c] sm:$0xf0]  ;;  %8903 = vmatpush.bf16.msra.mxu3 %v15326_v29  ;;  %v8647_v57 = vpop.f32.mrf.mxu3  ;;  %v13937_v29 = vld [vmem:[#allocation9 + $0xa30] sm:$0xf] }
 0x375   :  { %v14082_v42 = vor.u32 %v16927_v6, %v14081_v60  ;;  %v16573_v60 = vld [vmem:[#allocation9 + $0x74] sm:$0xf]  ;;  %v12691_v6 = vld [vmem:[#allocation9 + $0xa0] sm:$0xf0] }
 0x376   :  { %8979 = vmatpush.bf16.msra.mxu1 %v14658_v16  ;;  %v13318_v16 = vor.u32 %v16729_v3, %v13315_v11  ;;  %8989 = vmatpush.bf16.msra.mxu2 %v15186_v5  ;;  %v17155_v3 = vld [vmem:[#allocation9 + $0x129c] sm:$0xf0]  ;;  %v17994_v11 = vadd.f32 %v8736_v2, %v17976_v51  ;;  %v12694_v12 = vor.u32 %v16573_v60, %v12691_v6  ;;  %v12643_v51 = vld [vmem:[#allocation9 + $0x40] sm:$0xf0]  ;;  %v17125_v57 = vld [vmem:[#allocation9 + $0x11b4] sm:$0xf] }
 0x377   :  { %8904 = vmatmul.bf16.vlgmr.msra.gmra.mxu3 %v17929_v62  ;;  %v8738_v30 = vpop.f32.mrf.mxu2  ;;  %v12646_v20 = vor.u32 %v16561_v58, %v12643_v51  ;;  %v17323_v2 = vld [vmem:[#allocation9 + $0x17dc] sm:$0xf0]  ;;  %v16801_v58 = vld [vmem:[#allocation9 + $0x794] sm:$0xf]  ;;  %v13603_v51 = vld [vmem:[#allocation9 + $0x7c0] sm:$0xf0] }
 0x378   :  { %8968 = vmatpush.bf16.msra.mxu0 %v14178_v49  ;;  %8948 = vmatpush.bf16.msrb.mxu3 %v14130_v39  ;;  %v17179_v49 = vld [vmem:[#allocation9 + $0x135c] sm:$0xf0]  ;;  %v17987_v32 = vpop.f32.mrf.mxu0  ;;  %v14993_v39 = vld [vmem:[#allocation9 + $0x1270] sm:$0xf] }
 0x379   :  { %v15090_v43 = vor.u32 %v17179_v49, %v15089_v46  ;;  %v14515_v46 = vld [vmem:[#allocation9 + $0xee0] sm:$0xf0]  ;;  %v16669_v49 = vld [vmem:[#allocation9 + $0x374] sm:$0xf] }
 0x37a   :  { %8980 = vmatpush.bf16.msra.mxu1 %v14610_v23  ;;  %v8659_v23 = vadd.f32 %v17957_v48, %v8646_v17  ;;  %8990 = vmatpush.bf16.msra.mxu2 %v15138_v15  ;;  %v12739_v48 = vld [vmem:[#allocation9 + $0x100] sm:$0xf0]  ;;  %v17029_v17 = vld [vmem:[#allocation9 + $0xeb4] sm:$0xf] }
 0x37b   :  { %8969 = vmatmul.bf16.vlgmr.msra.gmra.mxu0 %v17893_v33  ;;  %v14518_v41 = vor.u32 %v17029_v17, %v14515_v46  ;;  %v14803_v46 = vld [vmem:[#allocation9 + $0x1120] sm:$0xf0] }
 0x37c   :  { %9013 = vmatpush.bf16.msrb.mxu0 %v12982_v26  ;;  %v12787_v26 = vld [vmem:[#allocation9 + $0x160] sm:$0xf0]  ;;  %8949 = vmatpush.bf16.msrb.mxu3 %v14082_v42  ;;  %v8672_v22 = vadd.f32 %v17962_v38, %v8659_v23  ;;  %v12742_v38 = vor.u32 %v16585_v40, %v12739_v48  ;;  %v14945_v42 = vld [vmem:[#allocation9 + $0x1210] sm:$0xf] }
 0x37d   :  { %v12790_v37 = vor.u32 %v16597_v24, %v12787_v26  ;;  %v8697_v24 = vpop.f32.mrf.mxu3  ;;  %v14946_v26 = vor.u32 %v17143_v14, %v14945_v42  ;;  %v13841_v23 = vld [vmem:[#allocation9 + $0x970] sm:$0xf]  ;;  %v14467_v40 = vld [vmem:[#allocation9 + $0xe80] sm:$0xf0] }
 0x37e   :  { %8981 = vmatpush.bf16.msra.mxu1 %v14562_v53  ;;  %v8685_v53 = vadd.f32 %v17974_v44, %v8672_v22  ;;  %8991 = vmatpush.bf16.msra.mxu2 %v15090_v43  ;;  %v17991_v18 = vpop.f32.mrf.mxu1  ;;  %v13699_v22 = vld [vmem:[#allocation9 + $0x880] sm:$0xf0]  ;;  %v15617_v42 = vld [vmem:[#allocation9 + $0x1750] sm:$0xf] }
 0x380   :  { %9014 = vmatpush.bf16.msrb.mxu0 %v12934_v0  ;;  %8950 = vmatpush.bf16.msrb.mxu3 %v14034_v27  ;;  %v13171_v0 = vld [vmem:[#allocation9 + $0x460] sm:$0xf0]  ;;  %v8764_v8 = vpop.f32.mrf.mxu0  ;;  %v16867_v27 = vld [vmem:[#allocation9 + $0x99c] sm:$0xf0]  ;;  %v17996_v56 = vadd.f32 %v8697_v24, %v8685_v53 }
 0x381   :  { %8982 = vmatmul.bf16.vlgmr.msra.gmra.mxu1 %v17896_v52  ;;  %v13174_v5 = vor.u32 %v16693_v47, %v13171_v0  ;;  %v13842_v48 = vor.u32 %v16867_v27, %v13841_v23  ;;  %v16657_v47 = vld [vmem:[#allocation9 + $0x314] sm:$0xf]  ;;  %v13027_v0 = vld [vmem:[#allocation9 + $0x340] sm:$0xf0]  ;;  %v16855_v53 = vld [vmem:[#allocation9 + $0x93c] sm:$0xf0] }
 0x382   :  { %9026 = vmatpush.bf16.msrb.mxu1 %v13366_v61  ;;  %v16891_v61 = vld [vmem:[#allocation9 + $0xa5c] sm:$0xf0]  ;;  %8992 = vmatpush.bf16.msra.mxu2 %v15042_v59  ;;  %v14899_v59 = vld [vmem:[#allocation9 + $0x11e0] sm:$0xf0]  ;;  %v16789_v23 = vld [vmem:[#allocation9 + $0x734] sm:$0xf] }
 0x383   :  { %v13938_v44 = vor.u32 %v16891_v61, %v13937_v29  ;;  %v15665_v61 = vld [vmem:[#allocation9 + $0x17b0] sm:$0xf]  ;;  %v14902_v6 = vor.u32 %v17125_v57, %v14899_v59  ;;  %v17299_v24 = vld [vmem:[#allocation9 + $0x171c] sm:$0xf0]  ;;  %v13555_v27 = vld [vmem:[#allocation9 + $0x760] sm:$0xf0] }
 0x384   :  { %9015 = vmatpush.bf16.msrb.mxu0 %v12886_v28  ;;  %8951 = vmatpush.bf16.msrb.mxu3 %v13986_v13  ;;  %v16681_v28 = vld [vmem:[#allocation9 + $0x3d4] sm:$0xf]  ;;  %v13793_v13 = vld [vmem:[#allocation9 + $0x910] sm:$0xf]  ;;  %v15666_v8 = vor.u32 %v17323_v2, %v15665_v61  ;;  %v14275_v59 = vld [vmem:[#allocation9 + $0xd00] sm:$0xf0] }
 0x385   :  { %v13126_v15 = vor.u32 %v16681_v28, %v13123_v7  ;;  %v13794_v60 = vor.u32 %v16855_v53, %v13793_v13  ;;  %v14419_v28 = vld [vmem:[#allocation9 + $0xe20] sm:$0xf0]  ;;  %v8699_v7 = vpop.f32.mrf.mxu3  ;;  %v16969_v57 = vld [vmem:[#allocation9 + $0xcd4] sm:$0xf] }
 0x386   :  { %9027 = vmatpush.bf16.msrb.mxu1 %v13318_v16  ;;  %v14994_v16 = vor.u32 %v17155_v3, %v14993_v39  ;;  %v8777_v43 = vpop.f32.mrf.mxu1  ;;  %v13030_v39 = vor.u32 %v16657_v47, %v13027_v0  ;;  %v16813_v3 = vld [vmem:[#allocation9 + $0x7f4] sm:$0xf]  ;;  %v13507_v0 = vld [vmem:[#allocation9 + $0x700] sm:$0xf0] }
 0x387   :  { %v16981_v43 = vld [vmem:[#allocation9 + $0xd34] sm:$0xf]  ;;  %v14707_v2 = vld [vmem:[#allocation9 + $0x1060] sm:$0xf0] }
 0x388   :  { %9016 = vmatpush.bf16.msrb.mxu0 %v12838_v21  ;;  %8952 = vmatpush.bf16.msrb.mxu3 %v13938_v44  ;;  %v13890_v21 = vor.u32 %v16879_v36, %v13889_v25  ;;  %v17005_v44 = vld [vmem:[#allocation9 + $0xdf4] sm:$0xf]  ;;  %v14851_v25 = vld [vmem:[#allocation9 + $0x1180] sm:$0xf0] }
 0x389   :  { %8993 = vmatpush.bf16.msra.mxu2 %v14994_v16  ;;  %v17113_v16 = vld [vmem:[#allocation9 + $0x1154] sm:$0xf]  ;;  %v14422_v14 = vor.u32 %v17005_v44, %v14419_v28  ;;  %v13459_v28 = vld [vmem:[#allocation9 + $0x6a0] sm:$0xf0] }
 0x38a   :  { %9028 = vmatpush.bf16.msrb.mxu1 %v13270_v34  ;;  %v13075_v34 = vld [vmem:[#allocation9 + $0x3a0] sm:$0xf0]  ;;  %v16777_v47 = vld [vmem:[#allocation9 + $0x6d4] sm:$0xf] }
 0x38b   :  { %v13078_v50 = vor.u32 %v16669_v49, %v13075_v34  ;;  %v13606_v49 = vor.u32 %v16801_v58, %v13603_v51  ;;  %v15569_v34 = vld [vmem:[#allocation9 + $0x16f0] sm:$0xf]  ;;  %v17077_v61 = vld [vmem:[#allocation9 + $0x1034] sm:$0xf] }
 0x38c   :  { %9017 = vmatpush.bf16.msrb.mxu0 %v12790_v37  ;;  %v16825_v37 = vld [vmem:[#allocation9 + $0x854] sm:$0xf]  ;;  %8953 = vmatpush.bf16.msrb.mxu3 %v13890_v21  ;;  %v15425_v51 = vld [vmem:[#allocation9 + $0x15d0] sm:$0xf] }
 0x38d   :  { %8994 = vmatpush.bf16.msra.mxu2 %v14946_v26  ;;  %v13702_v29 = vor.u32 %v16825_v37, %v13699_v22  ;;  %v17101_v21 = vld [vmem:[#allocation9 + $0x10f4] sm:$0xf]  ;;  %v14374_v26 = vor.u32 %v16993_v4, %v14371_v45 }
 0x38e   :  { %9029 = vmatpush.bf16.msrb.mxu1 %v13222_v55  ;;  %v17017_v55 = vld [vmem:[#allocation9 + $0xe54] sm:$0xf]  ;;  %v14806_v30 = vor.u32 %v17101_v21, %v14803_v46  ;;  %v14179_v46 = vld [vmem:[#allocation9 + $0xc40] sm:$0xf0] }
 0x38f   :  { %v17089_v37 = vld [vmem:[#allocation9 + $0x1094] sm:$0xf] }
 0x390   :  { %9018 = vmatpush.bf16.msrb.mxu0 %v12742_v38  ;;  %v14470_v38 = vor.u32 %v17017_v55, %v14467_v40  ;;  %8954 = vmatpush.bf16.msrb.mxu3 %v13842_v48  ;;  %v13558_v55 = vor.u32 %v16789_v23, %v13555_v27  ;;  %v15521_v40 = vld [vmem:[#allocation9 + $0x1690] sm:$0xf]  ;;  %v17287_v48 = vld [vmem:[#allocation9 + $0x16bc] sm:$0xf0]  ;;  %v16765_v44 = vld [vmem:[#allocation9 + $0x674] sm:$0xf] }
 0x391   :  { %9039 = vmatpush.bf16.msrb.mxu2 %v13750_v35  ;;  %v15570_v35 = vor.u32 %v17299_v24, %v15569_v34  ;;  %v13462_v58 = vor.u32 %v16765_v44, %v13459_v28  ;;  %v16753_v4 = vld [vmem:[#allocation9 + $0x614] sm:$0xf]  ;;  %v15283_v24 = vld [vmem:[#allocation9 + $0x14e0] sm:$0xf0]  ;;  %v16652_v27 = vld [vmem:[#allocation9 + $0x2e4] sm:$0xf0] }
 0x392   :  { %9030 = vmatpush.bf16.msrb.mxu1 %v13174_v5  ;;  %v13651_v5 = vld [vmem:[#allocation9 + $0x820] sm:$0xf0]  ;;  %8995 = vmatmul.bf16.vlgmr.msra.gmra.mxu2 %v17918_v63  ;;  %v16945_v21 = vld [vmem:[#allocation9 + $0xc14] sm:$0xf] }
 0x393   :  { %v13654_v36 = vor.u32 %v16813_v3, %v13651_v5  ;;  %v17275_v3 = vld [vmem:[#allocation9 + $0x165c] sm:$0xf0]  ;;  %v18003_v5 = vpop.f32.mrf.mxu2  ;;  %v17221_v34 = vld [vmem:[#allocation9 + $0x14b4] sm:$0xf]  ;;  %v14131_v44 = vld [vmem:[#allocation9 + $0xbe0] sm:$0xf0] }
 0x394   :  { %9019 = vmatpush.bf16.msrb.mxu0 %v12694_v12  ;;  %v17311_v12 = vld [vmem:[#allocation9 + $0x177c] sm:$0xf0]  ;;  %8955 = vmatpush.bf16.msrb.mxu3 %v13794_v60 }
 0x395   :  { %9040 = vmatpush.bf16.msrb.mxu2 %v13702_v29  ;;  %v15618_v17 = vor.u32 %v17311_v12, %v15617_v42  ;;  %v15522_v29 = vor.u32 %v17287_v48, %v15521_v40  ;;  %v17065_v42 = vld [vmem:[#allocation9 + $0xfd4] sm:$0xf]  ;;  %v14659_v12 = vld [vmem:[#allocation9 + $0x1000] sm:$0xf0]  ;;  %v14182_v40 = vor.u32 %v16945_v21, %v14179_v46  ;;  %v15286_v48 = vor.u32 %v17221_v34, %v15283_v24 }
 0x396   :  { %9031 = vmatpush.bf16.msrb.mxu1 %v13126_v15  ;;  %v14854_v15 = vor.u32 %v17113_v16, %v14851_v25  ;;  %v16957_v16 = vld [vmem:[#allocation9 + $0xc74] sm:$0xf]  ;;  %v14227_v25 = vld [vmem:[#allocation9 + $0xca0] sm:$0xf0] }
 0x397   :  { %8956 = vmatmul.bf16.vlgmr.msrb.gmra.mxu3 %v17879_v1  ;;  %v14230_v45 = vor.u32 %v16957_v16, %v14227_v25  ;;  %v17197_v16 = vld [vmem:[#allocation9 + $0x13f4] sm:$0xf]  ;;  %v15187_v25 = vld [vmem:[#allocation9 + $0x1420] sm:$0xf0] }
 0x398   :  { %9020 = vmatpush.bf16.msrb.mxu0 %v12646_v20  ;;  %9000 = vmatpush.bf16.msra.mxu3 %v15666_v8  ;;  %v14323_v20 = vld [vmem:[#allocation9 + $0xd60] sm:$0xf0]  ;;  %v8814_v22 = vpop.f32.mrf.mxu0  ;;  %v14710_v8 = vor.u32 %v17077_v61, %v14707_v2  ;;  %v15329_v2 = vld [vmem:[#allocation9 + $0x1510] sm:$0xf] }
 0x399   :  { %9041 = vmatpush.bf16.msrb.mxu2 %v13654_v36  ;;  %v14326_v13 = vor.u32 %v16981_v43, %v14323_v20  ;;  %v14611_v43 = vld [vmem:[#allocation9 + $0xfa0] sm:$0xf0] }
 0x39a   :  { %9032 = vmatpush.bf16.msrb.mxu1 %v13078_v50  ;;  %v4632_v50 = vperm.slane %v17971_v54, 3  ;;  %v13510_v54 = vor.u32 %v16777_v47, %v13507_v0  ;;  %v8749_v20 = vpop.f32.mrf.mxu3  ;;  %v14083_v21 = vld [vmem:[#allocation9 + $0xb80] sm:$0xf0] }
 0x39b   :  { %9021 = vmatmul.bf16.vlgmr.msrb.gmra.mxu0 %v17871_v10  ;;  %v15139_v34 = vld [vmem:[#allocation9 + $0x13c0] sm:$0xf0] }
 0x39c   :  { %9065 = vmatpush.bf16.msra.mxu0 %v14518_v41  ;;  %9001 = vmatpush.bf16.msra.mxu3 %v15618_v17  ;;  %v14755_v41 = vld [vmem:[#allocation9 + $0x10c0] sm:$0xf0] }
 0x39d   :  { %9042 = vmatpush.bf16.msrb.mxu2 %v13606_v49  ;;  %v14758_v53 = vor.u32 %v17089_v37, %v14755_v41  ;;  %v13411_v17 = vld [vmem:[#allocation9 + $0x640] sm:$0xf0]  ;;  %v14662_v49 = vor.u32 %v17065_v42, %v14659_v12  ;;  %v15377_v37 = vld [vmem:[#allocation9 + $0x1570] sm:$0xf]  ;;  %v17251_v41 = vld [vmem:[#allocation9 + $0x159c] sm:$0xf0] }
 0x39e   :  { %9033 = vmatpush.bf16.msrb.mxu1 %v13030_v39  ;;  %v15473_v39 = vld [vmem:[#allocation9 + $0x1630] sm:$0xf]  ;;  %v8827_v60 = vpop.f32.mrf.mxu1  ;;  %v15378_v61 = vor.u32 %v17251_v41, %v15377_v37  ;;  %v12889_v12 = vld [vmem:[#allocation9 + $0x1f8] sm:$0xf]  ;;  %v17173_v41 = vld [vmem:[#allocation9 + $0x1334] sm:$0xf] }
 0x39f   :  { %v15474_v36 = vor.u32 %v17275_v3, %v15473_v39  ;;  %v13369_v39 = vld [vmem:[#allocation9 + $0x5b8] sm:$0xf]  ;;  %v16748_v3 = vld [vmem:[#allocation9 + $0x5e4] sm:$0xf0] }
 0x3a0   :  { %9066 = vmatpush.bf16.msra.mxu0 %v14470_v38  ;;  %9002 = vmatpush.bf16.msra.mxu3 %v15570_v35  ;;  %v8815_v38 = vadd.f32 %v8814_v22, %v4632_v50  ;;  %v13414_v35 = vor.u32 %v16753_v4, %v13411_v17  ;;  %v8750_v50 = vadd.f32 %v8749_v20, %v17994_v11  ;;  %v8790_v22 = vpop.f32.mrf.mxu2  ;;  %v17239_v11 = vld [vmem:[#allocation9 + $0x153c] sm:$0xf0]  ;;  %v16736_v4 = vld [vmem:[#allocation9 + $0x584] sm:$0xf0]  ;;  %v16921_v17 = vld [vmem:[#allocation9 + $0xb54] sm:$0xf] }
 0x3a1   :  { %9034 = vmatmul.bf16.vlgmr.msrb.gmra.mxu1 %v17877_v31  ;;  %9043 = vmatpush.bf16.msrb.mxu2 %v13558_v55  ;;  %v13370_v42 = vor.u32 %v16748_v3, %v13369_v39  ;;  %v16909_v20 = vld [vmem:[#allocation9 + $0xaf4] sm:$0xf]  ;;  %v13177_v3 = vld [vmem:[#allocation9 + $0x438] sm:$0xf] }
 0x3a2   :  { %9078 = vmatpush.bf16.msra.mxu1 %v14902_v6  ;;  %v14278_v6 = vor.u32 %v16969_v57, %v14275_v59  ;;  %v18005_v7 = vadd.f32 %v8827_v60, %v8815_v38  ;;  %v12937_v57 = vld [vmem:[#allocation9 + $0x258] sm:$0xf]  ;;  %v16640_v59 = vld [vmem:[#allocation9 + $0x284] sm:$0xf0]  ;;  %v17041_v38 = vld [vmem:[#allocation9 + $0xf14] sm:$0xf] }
 0x3a4   :  { %9067 = vmatpush.bf16.msra.mxu0 %v14422_v14  ;;  %9003 = vmatpush.bf16.msra.mxu3 %v15522_v29  ;;  %v8816_v14 = vpop.f32.mrf.mxu0  ;;  %v8763_v29 = vadd.f32 %v17987_v32, %v8750_v50  ;;  %v15091_v50 = vld [vmem:[#allocation9 + $0x1360] sm:$0xf0] }
 0x3a5   :  { %9044 = vmatpush.bf16.msrb.mxu2 %v13510_v54  ;;  %v14563_v54 = vld [vmem:[#allocation9 + $0xf40] sm:$0xf0]  ;;  %v16628_v14 = vld [vmem:[#allocation9 + $0x224] sm:$0xf0] }
 0x3a6   :  { %9079 = vmatpush.bf16.msra.mxu1 %v14854_v15  ;;  %v17263_v15 = vld [vmem:[#allocation9 + $0x15fc] sm:$0xf0]  ;;  %v8829_v55 = vpop.f32.mrf.mxu1  ;;  %v8776_v28 = vadd.f32 %v17991_v18, %v8763_v29  ;;  %v14566_v32 = vor.u32 %v17041_v38, %v14563_v54  ;;  %v12890_v46 = vor.u32 %v16628_v14, %v12889_v12  ;;  %v12745_v54 = vld [vmem:[#allocation9 + $0xd8] sm:$0xf] }
 0x3a7   :  { %v15426_v23 = vor.u32 %v17263_v15, %v15425_v51  ;;  %v8751_v51 = vpop.f32.mrf.mxu3  ;;  %v13321_v15 = vld [vmem:[#allocation9 + $0x558] sm:$0xf] }
 0x3a8   :  { %9068 = vmatpush.bf16.msra.mxu0 %v14374_v26  ;;  %v12985_v26 = vld [vmem:[#allocation9 + $0x2b8] sm:$0xf]  ;;  %9004 = vmatpush.bf16.msra.mxu3 %v15474_v36  ;;  %v15330_v36 = vor.u32 %v17239_v11, %v15329_v2  ;;  %v13322_v24 = vor.u32 %v16736_v4, %v13321_v15  ;;  %v15043_v2 = vld [vmem:[#allocation9 + $0x1300] sm:$0xf0]  ;;  %v16592_v11 = vld [vmem:[#allocation9 + $0x104] sm:$0xf0] }
 0x3a9   :  { %9045 = vmatpush.bf16.msrb.mxu2 %v13462_v58  ;;  %v12986_v47 = vor.u32 %v16652_v27, %v12985_v26  ;;  %v18012_v58 = vadd.f32 %v18003_v5, %v8776_v28  ;;  %v12841_v5 = vld [vmem:[#allocation9 + $0x198] sm:$0xf]  ;;  %v16616_v26 = vld [vmem:[#allocation9 + $0x1c4] sm:$0xf0]  ;;  %v13939_v28 = vld [vmem:[#allocation9 + $0xa60] sm:$0xf0] }
 0x3aa   :  { %9080 = vmatpush.bf16.msra.mxu1 %v14806_v30  ;;  %v17053_v30 = vld [vmem:[#allocation9 + $0xf74] sm:$0xf]  ;;  %v13273_v27 = vld [vmem:[#allocation9 + $0x4f8] sm:$0xf]  ;;  %v12842_v37 = vor.u32 %v16616_v26, %v12841_v5  ;;  %v16580_v51 = vld [vmem:[#allocation9 + $0xa4] sm:$0xf0] }
 0x3ab   :  { %v14614_v0 = vor.u32 %v17053_v30, %v14611_v43  ;;  %v16724_v30 = vld [vmem:[#allocation9 + $0x524] sm:$0xf0]  ;;  %v12793_v55 = vld [vmem:[#allocation9 + $0x138] sm:$0xf] }
 0x3ac   :  { %9069 = vmatpush.bf16.msra.mxu0 %v14326_v13  ;;  %v17209_v13 = vld [vmem:[#allocation9 + $0x1454] sm:$0xf]  ;;  %9005 = vmatpush.bf16.msra.mxu3 %v15426_v23  ;;  %v14086_v23 = vor.u32 %v16921_v17, %v14083_v21  ;;  %v13274_v22 = vor.u32 %v16724_v30, %v13273_v27  ;;  %v12697_v14 = vld [vmem:[#allocation9 + $0x78] sm:$0xf]  ;;  %v16688_v4 = vld [vmem:[#allocation9 + $0x404] sm:$0xf0] }
 0x3ad   :  { %9046 = vmatpush.bf16.msrb.mxu2 %v13414_v35  ;;  %v14035_v35 = vld [vmem:[#allocation9 + $0xb20] sm:$0xf0]  ;;  %v13129_v15 = vld [vmem:[#allocation9 + $0x3d8] sm:$0xf]  ;;  %v16873_v21 = vld [vmem:[#allocation9 + $0x9d4] sm:$0xf] }
 0x3ae   :  { %9081 = vmatpush.bf16.msra.mxu1 %v14758_v53  ;;  %v15235_v53 = vld [vmem:[#allocation9 + $0x1480] sm:$0xf0]  ;;  %v12649_v5 = vld [vmem:[#allocation9 + $0x18] sm:$0xf]  ;;  %v13130_v26 = vor.u32 %v16688_v4, %v13129_v15  ;;  %v16844_v27 = vld [vmem:[#allocation9 + $0x8e4] sm:$0xf0] }
 0x3af   :  { %v15238_v60 = vor.u32 %v17209_v13, %v15235_v53  ;;  %v13225_v13 = vld [vmem:[#allocation9 + $0x498] sm:$0xf]  ;;  %v15094_v53 = vor.u32 %v17173_v41, %v15091_v50  ;;  %v17012_v15 = vld [vmem:[#allocation9 + $0xe24] sm:$0xf0] }
 0x3b0   :  { %9070 = vmatpush.bf16.msra.mxu0 %v14278_v6  ;;  %v16933_v6 = vld [vmem:[#allocation9 + $0xbb4] sm:$0xf]  ;;  %9006 = vmatpush.bf16.msra.mxu3 %v15378_v61  ;;  %v14521_v30 = vld [vmem:[#allocation9 + $0xeb8] sm:$0xf] }
 0x3b1   :  { %9091 = vmatpush.bf16.msra.mxu2 %v15286_v48  ;;  %v14134_v18 = vor.u32 %v16933_v6, %v14131_v44  ;;  %v14038_v48 = vor.u32 %v16909_v20, %v14035_v35  ;;  %v17161_v61 = vld [vmem:[#allocation9 + $0x12d4] sm:$0xf]  ;;  %v17036_v20 = vld [vmem:[#allocation9 + $0xee4] sm:$0xf0]  ;;  %v13081_v35 = vld [vmem:[#allocation9 + $0x378] sm:$0xf] }
 0x3b2   :  { %9082 = vmatpush.bf16.msra.mxu1 %v14710_v8  ;;  %v12938_v8 = vor.u32 %v16640_v59, %v12937_v57  ;;  %9047 = vmatmul.bf16.vlgmr.msrb.gmra.mxu2 %v17869_v9  ;;  %v16897_v57 = vld [vmem:[#allocation9 + $0xa94] sm:$0xf]  ;;  %v13987_v59 = vld [vmem:[#allocation9 + $0xac0] sm:$0xf0]  ;;  %v15046_v6 = vor.u32 %v17161_v61, %v15043_v2  ;;  %v16832_v61 = vld [vmem:[#allocation9 + $0x884] sm:$0xf0] }
 0x3b3   :  { %v13990_v39 = vor.u32 %v16897_v57, %v13987_v59  ;;  %v16885_v44 = vld [vmem:[#allocation9 + $0xa34] sm:$0xf]  ;;  %v13705_v57 = vld [vmem:[#allocation9 + $0x858] sm:$0xf]  ;;  %v14522_v59 = vor.u32 %v17036_v20, %v14521_v30  ;;  %v17108_v20 = vld [vmem:[#allocation9 + $0x1124] sm:$0xf0] }
 0x3b4   :  { %9071 = vmatpush.bf16.msra.mxu0 %v14230_v45  ;;  %v15190_v45 = vor.u32 %v17197_v16, %v15187_v25  ;;  %9007 = vmatpush.bf16.msra.mxu3 %v15330_v36  ;;  %v12746_v16 = vor.u32 %v16592_v11, %v12745_v54  ;;  %v17149_v25 = vld [vmem:[#allocation9 + $0x1274] sm:$0xf]  ;;  %v14995_v36 = vld [vmem:[#allocation9 + $0x12a0] sm:$0xf0]  ;;  %v14473_v2 = vld [vmem:[#allocation9 + $0xe58] sm:$0xf] }
 0x3b5   :  { %9092 = vmatpush.bf16.msra.mxu2 %v15238_v60  ;;  %v16700_v60 = vld [vmem:[#allocation9 + $0x464] sm:$0xf0]  ;;  %v14998_v17 = vor.u32 %v17149_v25, %v14995_v36  ;;  %v16849_v11 = vld [vmem:[#allocation9 + $0x914] sm:$0xf]  ;;  %v13657_v36 = vld [vmem:[#allocation9 + $0x7f8] sm:$0xf] }
 0x3b6   :  { %9083 = vmatpush.bf16.msra.mxu1 %v14662_v49  ;;  %v17185_v49 = vld [vmem:[#allocation9 + $0x1394] sm:$0xf]  ;;  %v13178_v12 = vor.u32 %v16700_v60, %v13177_v3  ;;  %v16664_v3 = vld [vmem:[#allocation9 + $0x344] sm:$0xf0]  ;;  %v14905_v60 = vld [vmem:[#allocation9 + $0x11b8] sm:$0xf] }
 0x3b7   :  { %v15142_v43 = vor.u32 %v17185_v49, %v15139_v34  ;;  %9008 = vmatmul.bf16.vlgmr.msra.gmra.mxu3 %v17929_v62  ;;  %v17137_v49 = vld [vmem:[#allocation9 + $0x1214] sm:$0xf]  ;;  %v12698_v34 = vor.u32 %v16580_v51, %v12697_v14 }
 0x3b8   :  { %9072 = vmatpush.bf16.msra.mxu0 %v14182_v40  ;;  %9052 = vmatpush.bf16.msrb.mxu3 %v14134_v18  ;;  %v16604_v40 = vld [vmem:[#allocation9 + $0x164] sm:$0xf0]  ;;  %v13942_v18 = vor.u32 %v16885_v44, %v13939_v28  ;;  %v13706_v44 = vor.u32 %v16832_v61, %v13705_v57  ;;  %v17317_v28 = vld [vmem:[#allocation9 + $0x17b4] sm:$0xf]  ;;  %v14761_v57 = vld [vmem:[#allocation9 + $0x1098] sm:$0xf] }
 0x3b9   :  { %9093 = vmatpush.bf16.msra.mxu2 %v15190_v45  ;;  %v12794_v29 = vor.u32 %v16604_v40, %v12793_v55  ;;  %v13843_v55 = vld [vmem:[#allocation9 + $0x9a0] sm:$0xf0] }
 0x3ba   :  { %9084 = vmatpush.bf16.msra.mxu1 %v14614_v0  ;;  %v18017_v0 = vpop.f32.mrf.mxu0  ;;  %v8801_v41 = vpop.f32.mrf.mxu3 }
 0x3bb   :  { %9073 = vmatmul.bf16.vlgmr.msra.gmra.mxu0 %v17893_v33  ;;  %v18025_v40 = vadd.f32 %v8801_v41, %v18012_v58  ;;  %v13795_v58 = vld [vmem:[#allocation9 + $0x940] sm:$0xf0] }
 0x3bc   :  { %9117 = vmatpush.bf16.msrb.mxu0 %v12986_v47  ;;  %9053 = vmatpush.bf16.msrb.mxu3 %v14086_v23  ;;  %v16712_v47 = vld [vmem:[#allocation9 + $0x4c4] sm:$0xf0]  ;;  %v13753_v23 = vld [vmem:[#allocation9 + $0x8b8] sm:$0xf]  ;;  %v13798_v14 = vor.u32 %v16849_v11, %v13795_v58  ;;  %v15571_v41 = vld [vmem:[#allocation9 + $0x1720] sm:$0xf0] }
 0x3bd   :  { %9094 = vmatpush.bf16.msra.mxu2 %v15142_v43  ;;  %v13226_v38 = vor.u32 %v16712_v47, %v13225_v13  ;;  %v15523_v11 = vld [vmem:[#allocation9 + $0x16c0] sm:$0xf0]  ;;  %v16784_v58 = vld [vmem:[#allocation9 + $0x704] sm:$0xf0] }
 0x3be   :  { %9085 = vmatpush.bf16.msra.mxu1 %v14566_v32  ;;  %v18019_v32 = vpop.f32.mrf.mxu1 }
 0x3c0   :  { %9118 = vmatpush.bf16.msrb.mxu0 %v12938_v8  ;;  %9054 = vmatpush.bf16.msrb.mxu3 %v14038_v48  ;;  %v8840_v8 = vpop.f32.mrf.mxu2 }
 0x3c1   :  { %9086 = vmatmul.bf16.vlgmr.msra.gmra.mxu1 %v17896_v52  ;;  %9095 = vmatpush.bf16.msra.mxu2 %v15094_v53  ;;  %v13754_v53 = vor.u32 %v16844_v27, %v13753_v23  ;;  %v14377_v23 = vld [vmem:[#allocation9 + $0xd98] sm:$0xf]  ;;  %v17000_v27 = vld [vmem:[#allocation9 + $0xdc4] sm:$0xf0] }
 0x3c2   :  { %9130 = vmatpush.bf16.msrb.mxu1 %v13370_v42  ;;  %v18022_v42 = vadd.f32 %v8840_v8, %v18005_v7  ;;  %v8868_v45 = vpop.f32.mrf.mxu0  ;;  %v16568_v7 = vld [vmem:[#allocation9 + $0x44] sm:$0xf0]  ;;  %v15667_v8 = vld [vmem:[#allocation9 + $0x17e0] sm:$0xf0]  ;;  %v8803_v4 = vpop.f32.mrf.mxu3 }
 0x3c3   :  { %v12650_v47 = vor.u32 %v16568_v7, %v12649_v5  ;;  %v15670_v45 = vor.u32 %v17317_v28, %v15667_v8  ;;  %v13609_v5 = vld [vmem:[#allocation9 + $0x798] sm:$0xf]  ;;  %v16808_v7 = vld [vmem:[#allocation9 + $0x7c4] sm:$0xf0] }
 0x3c4   :  { %9119 = vmatpush.bf16.msrb.mxu0 %v12890_v46  ;;  %9055 = vmatpush.bf16.msrb.mxu3 %v13990_v39  ;;  %v13891_v46 = vld [vmem:[#allocation9 + $0xa00] sm:$0xf0]  ;;  %v13033_v39 = vld [vmem:[#allocation9 + $0x318] sm:$0xf] }
 0x3c5   :  { %9096 = vmatpush.bf16.msra.mxu2 %v15046_v6  ;;  %v13894_v43 = vor.u32 %v16873_v21, %v13891_v46  ;;  %v17132_v6 = vld [vmem:[#allocation9 + $0x11e4] sm:$0xf0]  ;;  %v13034_v25 = vor.u32 %v16664_v3, %v13033_v39  ;;  %v13513_v3 = vld [vmem:[#allocation9 + $0x6d8] sm:$0xf] }
 0x3c6   :  { %9131 = vmatpush.bf16.msrb.mxu1 %v13322_v24  ;;  %v14947_v24 = vld [vmem:[#allocation9 + $0x1240] sm:$0xf0]  ;;  %v8881_v13 = vpop.f32.mrf.mxu1  ;;  %v14906_v51 = vor.u32 %v17132_v6, %v14905_v60  ;;  %v17120_v21 = vld [vmem:[#allocation9 + $0x1184] sm:$0xf0]  ;;  %v14281_v6 = vld [vmem:[#allocation9 + $0xcd8] sm:$0xf] }
 0x3c7   :  { %v14950_v50 = vor.u32 %v17137_v49, %v14947_v24  ;;  %v17305_v49 = vld [vmem:[#allocation9 + $0x1754] sm:$0xf]  ;;  %v14329_v13 = vld [vmem:[#allocation9 + $0xd38] sm:$0xf] }
 0x3c8   :  { %9120 = vmatpush.bf16.msrb.mxu0 %v12842_v37  ;;  %9056 = vmatpush.bf16.msrb.mxu3 %v13942_v18  ;;  %v16676_v37 = vld [vmem:[#allocation9 + $0x3a4] sm:$0xf0]  ;;  %v8842_v48 = vpop.f32.mrf.mxu2  ;;  %v14425_v18 = vld [vmem:[#allocation9 + $0xdf8] sm:$0xf] }
 0x3c9   :  { %9097 = vmatpush.bf16.msra.mxu2 %v14998_v17  ;;  %v14857_v17 = vld [vmem:[#allocation9 + $0x1158] sm:$0xf]  ;;  %v14426_v24 = vor.u32 %v17012_v15, %v14425_v18 }
 0x3ca   :  { %9132 = vmatpush.bf16.msrb.mxu1 %v13274_v22  ;;  %v16861_v22 = vld [vmem:[#allocation9 + $0x974] sm:$0xf]  ;;  %v14713_v8 = vld [vmem:[#allocation9 + $0x1038] sm:$0xf] }
 0x3cb   :  { %v13846_v54 = vor.u32 %v16861_v22, %v13843_v55  ;;  %v13561_v22 = vld [vmem:[#allocation9 + $0x738] sm:$0xf]  ;;  %v16796_v55 = vld [vmem:[#allocation9 + $0x764] sm:$0xf0] }
 0x3cc   :  { %9121 = vmatpush.bf16.msrb.mxu0 %v12794_v29  ;;  %v13082_v29 = vor.u32 %v16676_v37, %v13081_v35  ;;  %9057 = vmatpush.bf16.msrb.mxu3 %v13894_v43  ;;  %v14809_v43 = vld [vmem:[#allocation9 + $0x10f8] sm:$0xf]  ;;  %v13610_v35 = vor.u32 %v16808_v7, %v13609_v5  ;;  %v17293_v37 = vld [vmem:[#allocation9 + $0x16f4] sm:$0xf]  ;;  %v17072_v5 = vld [vmem:[#allocation9 + $0x1004] sm:$0xf0] }
 0x3cd   :  { %9098 = vmatpush.bf16.msra.mxu2 %v14950_v50  ;;  %v14378_v50 = vor.u32 %v17000_v27, %v14377_v23  ;;  %v14810_v48 = vor.u32 %v17108_v20, %v14809_v43  ;;  %v13465_v4 = vld [vmem:[#allocation9 + $0x678] sm:$0xf]  ;;  %v17257_v23 = vld [vmem:[#allocation9 + $0x15d4] sm:$0xf]  ;;  %v15427_v27 = vld [vmem:[#allocation9 + $0x1600] sm:$0xf0] }
 0x3ce   :  { %9133 = vmatpush.bf16.msrb.mxu1 %v13226_v38  ;;  %v17024_v38 = vld [vmem:[#allocation9 + $0xe84] sm:$0xf0] }
 0x3cf   :  { %v16760_v20 = vld [vmem:[#allocation9 + $0x644] sm:$0xf0] }
 0x3d0   :  { %9122 = vmatpush.bf16.msrb.mxu0 %v12746_v16  ;;  %v14474_v16 = vor.u32 %v17024_v38, %v14473_v2  ;;  %9058 = vmatpush.bf16.msrb.mxu3 %v13846_v54  ;;  %v13562_v38 = vor.u32 %v16796_v55, %v13561_v22  ;;  %v17281_v54 = vld [vmem:[#allocation9 + $0x1694] sm:$0xf]  ;;  %v17228_v22 = vld [vmem:[#allocation9 + $0x14e4] sm:$0xf0]  ;;  %v16646_v55 = vld [vmem:[#allocation9 + $0x2bc] sm:$0xf] }
 0x3d1   :  { %9143 = vmatpush.bf16.msrb.mxu2 %v13754_v53  ;;  %v15574_v53 = vor.u32 %v17293_v37, %v15571_v41  ;;  %v15526_v28 = vor.u32 %v17281_v54, %v15523_v11  ;;  %v16952_v37 = vld [vmem:[#allocation9 + $0xc44] sm:$0xf0] }
 0x3d2   :  { %9134 = vmatpush.bf16.msrb.mxu1 %v13178_v12  ;;  %v16820_v12 = vld [vmem:[#allocation9 + $0x824] sm:$0xf0]  ;;  %9099 = vmatmul.bf16.vlgmr.msra.gmra.mxu2 %v17918_v63 }
 0x3d3   :  { %v13658_v46 = vor.u32 %v16820_v12, %v13657_v36  ;;  %v13514_v36 = vor.u32 %v16784_v58, %v13513_v3  ;;  %v17269_v12 = vld [vmem:[#allocation9 + $0x1634] sm:$0xf]  ;;  %v15241_v58 = vld [vmem:[#allocation9 + $0x1458] sm:$0xf] }
 0x3d4   :  { %9123 = vmatpush.bf16.msrb.mxu0 %v12698_v34  ;;  %v15619_v34 = vld [vmem:[#allocation9 + $0x1780] sm:$0xf0]  ;;  %9059 = vmatpush.bf16.msrb.mxu3 %v13798_v14 }
 0x3d5   :  { %9144 = vmatpush.bf16.msrb.mxu2 %v13706_v44  ;;  %v15622_v30 = vor.u32 %v17305_v49, %v15619_v34  ;;  %v16976_v44 = vld [vmem:[#allocation9 + $0xd04] sm:$0xf0]  ;;  %v15475_v14 = vld [vmem:[#allocation9 + $0x1660] sm:$0xf0] }
 0x3d6   :  { %9135 = vmatpush.bf16.msrb.mxu1 %v13130_v26  ;;  %v14858_v26 = vor.u32 %v17120_v21, %v14857_v17  ;;  %v14282_v15 = vor.u32 %v16976_v44, %v14281_v6  ;;  %v16964_v49 = vld [vmem:[#allocation9 + $0xca4] sm:$0xf0]  ;;  %v15478_v34 = vor.u32 %v17269_v12, %v15475_v14  ;;  %v14569_v12 = vld [vmem:[#allocation9 + $0xf18] sm:$0xf] }
 0x3d7   :  { %9060 = vmatmul.bf16.vlgmr.msrb.gmra.mxu3 %v17879_v1  ;;  %v17216_v44 = vld [vmem:[#allocation9 + $0x1484] sm:$0xf0] }
 0x3d8   :  { %9124 = vmatpush.bf16.msrb.mxu0 %v12650_v47  ;;  %9104 = vmatpush.bf16.msra.mxu3 %v15670_v45  ;;  %v16988_v47 = vld [vmem:[#allocation9 + $0xd64] sm:$0xf0]  ;;  %v8918_v2 = vpop.f32.mrf.mxu0 }
 0x3d9   :  { %9145 = vmatpush.bf16.msrb.mxu2 %v13658_v46  ;;  %v14330_v39 = vor.u32 %v16988_v47, %v14329_v13  ;;  %v16772_v45 = vld [vmem:[#allocation9 + $0x6a4] sm:$0xf0]  ;;  %v14233_v46 = vld [vmem:[#allocation9 + $0xc78] sm:$0xf]  ;;  %v12987_v13 = vld [vmem:[#allocation9 + $0x2e8] sm:$0xf0] }
 0x3da   :  { %9136 = vmatpush.bf16.msrb.mxu1 %v13082_v29  ;;  %v18031_v29 = vld [vmem:[#allocation10] sm:$0xff]  ;;  %v14234_v43 = vor.u32 %v16964_v49, %v14233_v46  ;;  %v14617_v47 = vld [vmem:[#allocation9 + $0xf78] sm:$0xf]  ;;  %v17048_v14 = vld [vmem:[#allocation9 + $0xf44] sm:$0xf0] }
 0x3db   :  { %9125 = vmatmul.bf16.vlgmr.msrb.gmra.mxu0 %v17871_v10  ;;  %v4633_v61 = vperm.slane %v18031_v29, 4 }
 0x3dc   :  { %9169 = vmatpush.bf16.msra.mxu0 %v14522_v59  ;;  %9105 = vmatpush.bf16.msra.mxu3 %v15622_v30  ;;  %v17096_v59 = vld [vmem:[#allocation9 + $0x10c4] sm:$0xf0]  ;;  %v13417_v30 = vld [vmem:[#allocation9 + $0x618] sm:$0xf] }
 0x3dd   :  { %9146 = vmatpush.bf16.msrb.mxu2 %v13610_v35  ;;  %v14762_v60 = vor.u32 %v17096_v59, %v14761_v57  ;;  %v14185_v35 = vld [vmem:[#allocation9 + $0xc18] sm:$0xf]  ;;  %v8853_v57 = vpop.f32.mrf.mxu3  ;;  %v13418_v59 = vor.u32 %v16760_v20, %v13417_v30  ;;  %v13323_v20 = vld [vmem:[#allocation9 + $0x588] sm:$0xf0] }
 0x3de   :  { %9137 = vmatpush.bf16.msrb.mxu1 %v13034_v25  ;;  %v8919_v25 = vadd.f32 %v8918_v2, %v4633_v61  ;;  %v8931_v18 = vpop.f32.mrf.mxu1  ;;  %v17245_v61 = vld [vmem:[#allocation9 + $0x1574] sm:$0xf]  ;;  %v15379_v2 = vld [vmem:[#allocation9 + $0x15a0] sm:$0xf0] }
 0x3e0   :  { %9170 = vmatpush.bf16.msra.mxu0 %v14474_v16  ;;  %9106 = vmatpush.bf16.msra.mxu3 %v15574_v53  ;;  %v17084_v16 = vld [vmem:[#allocation9 + $0x1064] sm:$0xf0]  ;;  %v18036_v17 = vadd.f32 %v8931_v18, %v8919_v25  ;;  %v8920_v7 = vpop.f32.mrf.mxu0  ;;  %v15382_v25 = vor.u32 %v17245_v61, %v15379_v2  ;;  %v16742_v18 = vld [vmem:[#allocation9 + $0x5bc] sm:$0xf]  ;;  %v14041_v61 = vld [vmem:[#allocation9 + $0xaf8] sm:$0xf] }
 0x3e1   :  { %9138 = vmatmul.bf16.vlgmr.msrb.gmra.mxu1 %v17877_v31  ;;  %9147 = vmatpush.bf16.msrb.mxu2 %v13562_v38  ;;  %v14714_v21 = vor.u32 %v17084_v16, %v14713_v8  ;;  %v17060_v53 = vld [vmem:[#allocation9 + $0xfa4] sm:$0xf0]  ;;  %v8854_v38 = vadd.f32 %v8853_v57, %v18022_v42  ;;  %v12939_v8 = vld [vmem:[#allocation9 + $0x288] sm:$0xf0]  ;;  %v15331_v42 = vld [vmem:[#allocation9 + $0x1540] sm:$0xf0] }
 0x3e2   :  { %9182 = vmatpush.bf16.msra.mxu1 %v14906_v51  ;;  %v18034_v51 = vpop.f32.mrf.mxu2  ;;  %v14618_v6 = vor.u32 %v17060_v53, %v14617_v47  ;;  %v16718_v53 = vld [vmem:[#allocation9 + $0x4fc] sm:$0xf]  ;;  %v13275_v57 = vld [vmem:[#allocation9 + $0x528] sm:$0xf0]  ;;  %v16916_v2 = vld [vmem:[#allocation9 + $0xb24] sm:$0xf0] }
 0x3e3   :  { %v8867_v16 = vadd.f32 %v18017_v0, %v8854_v38  ;;  %v14570_v0 = vor.u32 %v17048_v14, %v14569_v12  ;;  %v15049_v12 = vld [vmem:[#allocation9 + $0x12d8] sm:$0xf]  ;;  %v17168_v14 = vld [vmem:[#allocation9 + $0x1304] sm:$0xf0] }
 0x3e4   :  { %9171 = vmatpush.bf16.msra.mxu0 %v14426_v24  ;;  %9107 = vmatpush.bf16.msra.mxu3 %v15526_v28  ;;  %v14665_v24 = vld [vmem:[#allocation9 + $0xfd8] sm:$0xf]  ;;  %v16634_v28 = vld [vmem:[#allocation9 + $0x25c] sm:$0xf] }
 0x3e5   :  { %9148 = vmatpush.bf16.msrb.mxu2 %v13514_v36  ;;  %v14666_v41 = vor.u32 %v17072_v5, %v14665_v24  ;;  %v17233_v36 = vld [vmem:[#allocation9 + $0x1514] sm:$0xf]  ;;  %v8880_v46 = vadd.f32 %v18019_v32, %v8867_v16  ;;  %v12942_v49 = vor.u32 %v16634_v28, %v12939_v8  ;;  %v17204_v24 = vld [vmem:[#allocation9 + $0x1424] sm:$0xf0]  ;;  %v8855_v30 = vpop.f32.mrf.mxu3  ;;  %v13993_v16 = vld [vmem:[#allocation9 + $0xa98] sm:$0xf] }
 0x3e6   :  { %9183 = vmatpush.bf16.msra.mxu1 %v14858_v26  ;;  %v13466_v26 = vor.u32 %v16772_v45, %v13465_v4  ;;  %v8933_v11 = vpop.f32.mrf.mxu1  ;;  %v15242_v4 = vor.u32 %v17216_v44, %v15241_v58  ;;  %v14137_v45 = vld [vmem:[#allocation9 + $0xbb8] sm:$0xf]  ;;  %v15334_v5 = vor.u32 %v17233_v36, %v15331_v42  ;;  %v12795_v58 = vld [vmem:[#allocation9 + $0x168] sm:$0xf0] }
 0x3e7   :  { %v17180_v11 = vld [vmem:[#allocation9 + $0x1364] sm:$0xf0]  ;;  %v13227_v44 = vld [vmem:[#allocation9 + $0x4c8] sm:$0xf0] }
 0x3e8   :  { %9172 = vmatpush.bf16.msra.mxu0 %v14378_v50  ;;  %v15289_v50 = vld [vmem:[#allocation9 + $0x14b8] sm:$0xf]  ;;  %9108 = vmatpush.bf16.msra.mxu3 %v15478_v34 }
 0x3e9   :  { %9149 = vmatpush.bf16.msrb.mxu2 %v13466_v26  ;;  %v15290_v3 = vor.u32 %v17228_v22, %v15289_v50  ;;  %v15193_v34 = vld [vmem:[#allocation9 + $0x13f8] sm:$0xf]  ;;  %v16622_v26 = vld [vmem:[#allocation9 + $0x1fc] sm:$0xf] }
 0x3ea   :  { %9184 = vmatpush.bf16.msra.mxu1 %v14810_v48  ;;  %v15430_v48 = vor.u32 %v17257_v23, %v15427_v27  ;;  %v8894_v54 = vpop.f32.mrf.mxu2  ;;  %v12891_v23 = vld [vmem:[#allocation9 + $0x228] sm:$0xf0]  ;;  %v18043_v27 = vadd.f32 %v18034_v51, %v8880_v46  ;;  %v15145_v22 = vld [vmem:[#allocation9 + $0x1398] sm:$0xf]  ;;  %v16610_v51 = vld [vmem:[#allocation9 + $0x19c] sm:$0xf]  ;;  %v15050_v46 = vor.u32 %v17168_v14, %v15049_v12 }
 0x3eb   :  { %v12894_v50 = vor.u32 %v16622_v26, %v12891_v23  ;;  %v15097_v54 = vld [vmem:[#allocation9 + $0x1338] sm:$0xf]  ;;  %v17156_v26 = vld [vmem:[#allocation9 + $0x12a4] sm:$0xf0] }
 0x3ec   :  { %9173 = vmatpush.bf16.msra.mxu0 %v14330_v39  ;;  %v14186_v39 = vor.u32 %v16952_v37, %v14185_v35  ;;  %9109 = vmatpush.bf16.msra.mxu3 %v15430_v48  ;;  %v15194_v35 = vor.u32 %v17204_v24, %v15193_v34  ;;  %v14089_v37 = vld [vmem:[#allocation9 + $0xb58] sm:$0xf]  ;;  %v15098_v8 = vor.u32 %v17180_v11, %v15097_v54  ;;  %v16670_v54 = vld [vmem:[#allocation9 + $0x37c] sm:$0xf]  ;;  %v13083_v11 = vld [vmem:[#allocation9 + $0x3a8] sm:$0xf0] }
 0x3ed   :  { %9150 = vmatpush.bf16.msrb.mxu2 %v13418_v59  ;;  %v13086_v14 = vor.u32 %v16670_v54, %v13083_v11  ;;  %v17102_v54 = vld [vmem:[#allocation9 + $0x10fc] sm:$0xf]  ;;  %v14811_v11 = vld [vmem:[#allocation9 + $0x1128] sm:$0xf0] }
 0x3ee   :  { %9185 = vmatpush.bf16.msra.mxu1 %v14762_v60  ;;  %v12990_v60 = vor.u32 %v16646_v55, %v12987_v13  ;;  %v17192_v55 = vld [vmem:[#allocation9 + $0x13c4] sm:$0xf0]  ;;  %v12843_v13 = vld [vmem:[#allocation9 + $0x1c8] sm:$0xf0] }
 0x3ef   :  { %v15146_v59 = vor.u32 %v17192_v55, %v15145_v22  ;;  %v12846_v38 = vor.u32 %v16610_v51, %v12843_v13  ;;  %v13897_v22 = vld [vmem:[#allocation9 + $0x9d8] sm:$0xf]  ;;  %v16880_v55 = vld [vmem:[#allocation9 + $0xa04] sm:$0xf0] }
 0x3f0   :  { %9174 = vmatpush.bf16.msra.mxu0 %v14282_v15  ;;  %v13371_v15 = vld [vmem:[#allocation9 + $0x5e8] sm:$0xf0]  ;;  %9110 = vmatpush.bf16.msra.mxu3 %v15382_v25  ;;  %v16904_v25 = vld [vmem:[#allocation9 + $0xac4] sm:$0xf0] }
 0x3f1   :  { %9195 = vmatpush.bf16.msra.mxu2 %v15290_v3  ;;  %v13374_v7 = vor.u32 %v16742_v18, %v13371_v15  ;;  %v16598_v3 = vld [vmem:[#allocation9 + $0x13c] sm:$0xf]  ;;  %v12747_v15 = vld [vmem:[#allocation9 + $0x108] sm:$0xf0]  ;;  %v17144_v13 = vld [vmem:[#allocation9 + $0x1244] sm:$0xf0] }
 0x3f2   :  { %9186 = vmatpush.bf16.msra.mxu1 %v14714_v21  ;;  %v16940_v21 = vld [vmem:[#allocation9 + $0xbe4] sm:$0xf0]  ;;  %9151 = vmatmul.bf16.vlgmr.msrb.gmra.mxu2 %v17869_v9  ;;  %v12798_v36 = vor.u32 %v16598_v3, %v12795_v58  ;;  %v16586_v18 = vld [vmem:[#allocation9 + $0xdc] sm:$0xf]  ;;  %v8944_v34 = vpop.f32.mrf.mxu2  ;;  %v13849_v58 = vld [vmem:[#allocation9 + $0x978] sm:$0xf] }
 0x3f3   :  { %v14138_v32 = vor.u32 %v16940_v21, %v14137_v45  ;;  %v16694_v45 = vld [vmem:[#allocation9 + $0x43c] sm:$0xf]  ;;  %v13179_v21 = vld [vmem:[#allocation9 + $0x468] sm:$0xf0]  ;;  %v18053_v23 = vadd.f32 %v8944_v34, %v18036_v17 }
 0x3f4   :  { %9175 = vmatpush.bf16.msra.mxu0 %v14234_v43  ;;  %v16730_v43 = vld [vmem:[#allocation9 + $0x55c] sm:$0xf]  ;;  %9111 = vmatpush.bf16.msra.mxu3 %v15334_v5  ;;  %v12750_v5 = vor.u32 %v16586_v18, %v12747_v15  ;;  %v13182_v30 = vor.u32 %v16694_v45, %v13179_v21  ;;  %v12651_v17 = vld [vmem:[#allocation9 + $0x48] sm:$0xf0]  ;;  %v13801_v45 = vld [vmem:[#allocation9 + $0x918] sm:$0xf] }
 0x3f5   :  { %9196 = vmatpush.bf16.msra.mxu2 %v15242_v4  ;;  %v13326_v48 = vor.u32 %v16730_v43, %v13323_v20  ;;  %v13994_v4 = vor.u32 %v16904_v25, %v13993_v16  ;;  %v12699_v43 = vld [vmem:[#allocation9 + $0xa8] sm:$0xf0]  ;;  %v17018_v18 = vld [vmem:[#allocation9 + $0xe5c] sm:$0xf] }
 0x3f6   :  { %9187 = vmatpush.bf16.msra.mxu1 %v14666_v41  ;;  %v16928_v41 = vld [vmem:[#allocation9 + $0xb84] sm:$0xf0]  ;;  %v14475_v15 = vld [vmem:[#allocation9 + $0xe88] sm:$0xf0]  ;;  %v16658_v21 = vld [vmem:[#allocation9 + $0x31c] sm:$0xf] }
 0x3f7   :  { %v14090_v47 = vor.u32 %v16928_v41, %v14089_v37  ;;  %9112 = vmatmul.bf16.vlgmr.msra.gmra.mxu3 %v17929_v62  ;;  %v13131_v37 = vld [vmem:[#allocation9 + $0x408] sm:$0xf0] }
 0x3f8   :  { %9176 = vmatpush.bf16.msra.mxu0 %v14186_v39  ;;  %9156 = vmatpush.bf16.msrb.mxu3 %v14138_v32  ;;  %v13278_v39 = vor.u32 %v16718_v53, %v13275_v57  ;;  %v18048_v28 = vpop.f32.mrf.mxu0  ;;  %v16574_v32 = vld [vmem:[#allocation9 + $0x7c] sm:$0xf] }
 0x3f9   :  { %9197 = vmatpush.bf16.msra.mxu2 %v15194_v35  ;;  %v16682_v35 = vld [vmem:[#allocation9 + $0x3dc] sm:$0xf]  ;;  %v12702_v51 = vor.u32 %v16574_v32, %v12699_v43  ;;  %v13659_v43 = vld [vmem:[#allocation9 + $0x828] sm:$0xf0] }
 0x3fa   :  { %9188 = vmatpush.bf16.msra.mxu1 %v14618_v6  ;;  %v16706_v6 = vld [vmem:[#allocation9 + $0x49c] sm:$0xf]  ;;  %v13134_v53 = vor.u32 %v16682_v35, %v13131_v37 }
 0x3fb   :  { %9177 = vmatmul.bf16.vlgmr.msra.gmra.mxu0 %v17893_v33  ;;  %v13230_v42 = vor.u32 %v16706_v6, %v13227_v44  ;;  %v16838_v57 = vld [vmem:[#allocation9 + $0x8bc] sm:$0xf]  ;;  %v8946_v44 = vpop.f32.mrf.mxu2 }
 0x3fc   :  { %9221 = vmatpush.bf16.msrb.mxu0 %v12990_v60  ;;  %9157 = vmatpush.bf16.msrb.mxu3 %v14090_v47  ;;  %v14042_v60 = vor.u32 %v16916_v2, %v14041_v61  ;;  %v16562_v47 = vld [vmem:[#allocation9 + $0x1c] sm:$0xf]  ;;  %v13898_v2 = vor.u32 %v16880_v55, %v13897_v22 }
 0x3fd   :  { %9198 = vmatpush.bf16.msra.mxu2 %v15146_v59  ;;  %v13755_v59 = vld [vmem:[#allocation9 + $0x8e8] sm:$0xf0]  ;;  %v17030_v61 = vld [vmem:[#allocation9 + $0xebc] sm:$0xf]  ;;  %v12654_v16 = vor.u32 %v16562_v47, %v12651_v17  ;;  %v17312_v47 = vld [vmem:[#allocation9 + $0x1784] sm:$0xf0] }
 0x3fe   :  { %9189 = vmatpush.bf16.msra.mxu1 %v14570_v0  ;;  %v16892_v0 = vld [vmem:[#allocation9 + $0xa64] sm:$0xf0]  ;;  %v18050_v24 = vpop.f32.mrf.mxu1  ;;  %v13758_v25 = vor.u32 %v16838_v57, %v13755_v59  ;;  %v16814_v32 = vld [vmem:[#allocation9 + $0x7fc] sm:$0xf]  ;;  %v13611_v57 = vld [vmem:[#allocation9 + $0x7c8] sm:$0xf0] }
 0x3ff   :  { %v17006_v37 = vld [vmem:[#allocation9 + $0xdfc] sm:$0xf] }
 0x400   :  { %9222 = vmatpush.bf16.msrb.mxu0 %v12942_v49  ;;  %9158 = vmatpush.bf16.msrb.mxu3 %v14042_v60  ;;  %v13945_v49 = vld [vmem:[#allocation9 + $0xa38] sm:$0xf]  ;;  %v8972_v41 = vpop.f32.mrf.mxu0  ;;  %v16868_v60 = vld [vmem:[#allocation9 + $0x9a4] sm:$0xf0]  ;;  %v17114_v55 = vld [vmem:[#allocation9 + $0x115c] sm:$0xf] }
 0x401   :  { %9190 = vmatmul.bf16.vlgmr.msra.gmra.mxu1 %v17896_v52  ;;  %9199 = vmatpush.bf16.msra.mxu2 %v15098_v8  ;;  %v13946_v20 = vor.u32 %v16892_v0, %v13945_v49  ;;  %v17126_v49 = vld [vmem:[#allocation9 + $0x11bc] sm:$0xf]  ;;  %v14907_v0 = vld [vmem:[#allocation9 + $0x11e8] sm:$0xf0] }
 0x402   :  { %9234 = vmatpush.bf16.msrb.mxu1 %v13374_v7  ;;  %v15001_v7 = vld [vmem:[#allocation9 + $0x1278] sm:$0xf]  ;;  %v14910_v35 = vor.u32 %v17126_v49, %v14907_v0  ;;  %v14427_v41 = vld [vmem:[#allocation9 + $0xe28] sm:$0xf0]  ;;  %v16790_v44 = vld [vmem:[#allocation9 + $0x73c] sm:$0xf] }
 0x403   :  { %v14430_v17 = vor.u32 %v17006_v37, %v14427_v41  ;;  %v13515_v49 = vld [vmem:[#allocation9 + $0x708] sm:$0xf0] }
 0x404   :  { %9223 = vmatpush.bf16.msrb.mxu0 %v12894_v50  ;;  %9159 = vmatpush.bf16.msrb.mxu3 %v13994_v4  ;;  %v15002_v50 = vor.u32 %v17156_v26, %v15001_v7  ;;  %v13850_v4 = vor.u32 %v16868_v60, %v13849_v58  ;;  %v17324_v7 = vld [vmem:[#allocation9 + $0x17e4] sm:$0xf0]  ;;  %v14478_v26 = vor.u32 %v17018_v18, %v14475_v15  ;;  %v4634_v18 = vperm.slane %v18031_v29, 5 }
 0x405   :  { %9200 = vmatpush.bf16.msra.mxu2 %v15050_v46  ;;  %v13035_v46 = vld [vmem:[#allocation9 + $0x348] sm:$0xf0]  ;;  %v17300_v58 = vld [vmem:[#allocation9 + $0x1724] sm:$0xf0] }
 0x406   :  { %9235 = vmatpush.bf16.msrb.mxu1 %v13326_v48  ;;  %v14953_v48 = vld [vmem:[#allocation9 + $0x1218] sm:$0xf]  ;;  %v8985_v8 = vpop.f32.mrf.mxu1 }
 0x407   :  { %v14954_v3 = vor.u32 %v17144_v13, %v14953_v48  ;;  %v14859_v48 = vld [vmem:[#allocation9 + $0x1188] sm:$0xf0]  ;;  %v15625_v13 = vld [vmem:[#allocation9 + $0x1758] sm:$0xf] }
 0x408   :  { %9224 = vmatpush.bf16.msrb.mxu0 %v12846_v38  ;;  %9160 = vmatpush.bf16.msrb.mxu3 %v13946_v20  ;;  %v14523_v38 = vld [vmem:[#allocation9 + $0xee8] sm:$0xf0]  ;;  %v14862_v59 = vor.u32 %v17114_v55, %v14859_v48 }
 0x409   :  { %9201 = vmatpush.bf16.msra.mxu2 %v15002_v50  ;;  %v14526_v12 = vor.u32 %v17030_v61, %v14523_v38  ;;  %v16994_v61 = vld [vmem:[#allocation9 + $0xd9c] sm:$0xf]  ;;  %v15626_v38 = vor.u32 %v17312_v47, %v15625_v13  ;;  %v13563_v8 = vld [vmem:[#allocation9 + $0x768] sm:$0xf0] }
 0x40a   :  { %9236 = vmatpush.bf16.msrb.mxu1 %v13278_v39  ;;  %v8905_v39 = vpop.f32.mrf.mxu3  ;;  %v14235_v13 = vld [vmem:[#allocation9 + $0xca8] sm:$0xf0] }
 0x40b   :  { %v18056_v6 = vadd.f32 %v8905_v39, %v18043_v27  ;;  %v16856_v27 = vld [vmem:[#allocation9 + $0x944] sm:$0xf0] }
 0x40c   :  { %9225 = vmatpush.bf16.msrb.mxu0 %v12798_v36  ;;  %v16826_v36 = vld [vmem:[#allocation9 + $0x85c] sm:$0xf]  ;;  %9161 = vmatpush.bf16.msrb.mxu3 %v13898_v2  ;;  %v13802_v20 = vor.u32 %v16856_v27, %v13801_v45  ;;  %v14379_v2 = vld [vmem:[#allocation9 + $0xdc8] sm:$0xf0]  ;;  %v15529_v45 = vld [vmem:[#allocation9 + $0x1698] sm:$0xf] }
 0x40d   :  { %9202 = vmatpush.bf16.msra.mxu2 %v14954_v3  ;;  %v15577_v3 = vld [vmem:[#allocation9 + $0x16f8] sm:$0xf]  ;;  %v14382_v60 = vor.u32 %v16994_v61, %v14379_v2  ;;  %v16778_v27 = vld [vmem:[#allocation9 + $0x6dc] sm:$0xf]  ;;  %v17264_v2 = vld [vmem:[#allocation9 + $0x1604] sm:$0xf0] }
 0x40e   :  { %9237 = vmatpush.bf16.msrb.mxu1 %v13230_v42  ;;  %v13707_v42 = vld [vmem:[#allocation9 + $0x888] sm:$0xf0]  ;;  %v13518_v29 = vor.u32 %v16778_v27, %v13515_v49  ;;  %v15433_v61 = vld [vmem:[#allocation9 + $0x15d8] sm:$0xf]  ;;  %v17210_v49 = vld [vmem:[#allocation9 + $0x145c] sm:$0xf] }
 0x40f   :  { %v13710_v34 = vor.u32 %v16826_v36, %v13707_v42  ;;  %v14331_v36 = vld [vmem:[#allocation9 + $0xd68] sm:$0xf0] }
 0x410   :  { %9226 = vmatpush.bf16.msrb.mxu0 %v12750_v5  ;;  %v15673_v5 = vld [vmem:[#allocation9 + $0x17b8] sm:$0xf]  ;;  %9162 = vmatpush.bf16.msrb.mxu3 %v13850_v4  ;;  %v14763_v42 = vld [vmem:[#allocation9 + $0x10c8] sm:$0xf0]  ;;  %v13566_v4 = vor.u32 %v16790_v44, %v13563_v8  ;;  %v12993_v8 = vld [vmem:[#allocation9 + $0x2c0] sm:$0xf] }
 0x411   :  { %9247 = vmatpush.bf16.msrb.mxu2 %v13758_v25  ;;  %v15674_v22 = vor.u32 %v17324_v7, %v15673_v5  ;;  %v16982_v25 = vld [vmem:[#allocation9 + $0xd3c] sm:$0xf]  ;;  %v14283_v5 = vld [vmem:[#allocation9 + $0xd08] sm:$0xf0] }
 0x412   :  { %9238 = vmatpush.bf16.msrb.mxu1 %v13182_v30  ;;  %v13038_v30 = vor.u32 %v16658_v21, %v13035_v46  ;;  %9203 = vmatmul.bf16.vlgmr.msra.gmra.mxu2 %v17918_v63  ;;  %v8907_v50 = vpop.f32.mrf.mxu3  ;;  %v17288_v21 = vld [vmem:[#allocation9 + $0x16c4] sm:$0xf0]  ;;  %v14334_v46 = vor.u32 %v16982_v25, %v14331_v36  ;;  %v15291_v44 = vld [vmem:[#allocation9 + $0x14e8] sm:$0xf0]  ;;  %v16653_v25 = vld [vmem:[#allocation9 + $0x2ec] sm:$0xf0] }
 0x413   :  { %v15530_v7 = vor.u32 %v17288_v21, %v15529_v45  ;;  %v16766_v50 = vld [vmem:[#allocation9 + $0x67c] sm:$0xf] }
 0x414   :  { %9227 = vmatpush.bf16.msrb.mxu0 %v12702_v51  ;;  %v13662_v51 = vor.u32 %v16814_v32, %v13659_v43  ;;  %9163 = vmatpush.bf16.msrb.mxu3 %v13802_v20  ;;  %v15481_v43 = vld [vmem:[#allocation9 + $0x1638] sm:$0xf]  ;;  %v17276_v20 = vld [vmem:[#allocation9 + $0x1664] sm:$0xf0]  ;;  %v17054_v36 = vld [vmem:[#allocation9 + $0xf7c] sm:$0xf] }
 0x415   :  { %9248 = vmatpush.bf16.msrb.mxu2 %v13710_v34  ;;  %v16970_v34 = vld [vmem:[#allocation9 + $0xcdc] sm:$0xf]  ;;  %v15482_v47 = vor.u32 %v17276_v20, %v15481_v43  ;;  %v14571_v20 = vld [vmem:[#allocation9 + $0xf48] sm:$0xf0] }
 0x416   :  { %9239 = vmatpush.bf16.msrb.mxu1 %v13134_v53  ;;  %v16802_v53 = vld [vmem:[#allocation9 + $0x79c] sm:$0xf]  ;;  %v14286_v41 = vor.u32 %v16970_v34, %v14283_v5  ;;  %v15243_v5 = vld [vmem:[#allocation9 + $0x1488] sm:$0xf0] }
 0x417   :  { %v13614_v39 = vor.u32 %v16802_v53, %v13611_v57  ;;  %9164 = vmatmul.bf16.vlgmr.msrb.gmra.mxu3 %v17879_v1  ;;  %v14667_v53 = vld [vmem:[#allocation9 + $0x1008] sm:$0xf0]  ;;  %v17042_v43 = vld [vmem:[#allocation9 + $0xf1c] sm:$0xf] }
 0x418   :  { %9228 = vmatpush.bf16.msrb.mxu0 %v12654_v16  ;;  %9208 = vmatpush.bf16.msra.mxu3 %v15674_v22  ;;  %v14814_v16 = vor.u32 %v17102_v54, %v14811_v11  ;;  %v9022_v15 = vpop.f32.mrf.mxu0  ;;  %v13467_v22 = vld [vmem:[#allocation9 + $0x6a8] sm:$0xf0] }
 0x419   :  { %9249 = vmatpush.bf16.msrb.mxu2 %v13662_v51  ;;  %v9023_v32 = vadd.f32 %v9022_v15, %v4634_v18  ;;  %v16958_v51 = vld [vmem:[#allocation9 + $0xc7c] sm:$0xf]  ;;  %v13419_v11 = vld [vmem:[#allocation9 + $0x648] sm:$0xf0]  ;;  %v15385_v18 = vld [vmem:[#allocation9 + $0x1578] sm:$0xf] }
 0x41a   :  { %9240 = vmatpush.bf16.msrb.mxu1 %v13086_v14  ;;  %v17090_v14 = vld [vmem:[#allocation9 + $0x109c] sm:$0xf]  ;;  %v14238_v54 = vor.u32 %v16958_v51, %v14235_v13  ;;  %v17252_v15 = vld [vmem:[#allocation9 + $0x15a4] sm:$0xf0] }
 0x41b   :  { %9229 = vmatmul.bf16.vlgmr.msrb.gmra.mxu0 %v17871_v10  ;;  %v14766_v0 = vor.u32 %v17090_v14, %v14763_v42  ;;  %v8957_v14 = vpop.f32.mrf.mxu3 }
 0x41c   :  { %9273 = vmatpush.bf16.msra.mxu0 %v14526_v12  ;;  %9209 = vmatpush.bf16.msra.mxu3 %v15626_v38  ;;  %v15578_v12 = vor.u32 %v17300_v58, %v15577_v3  ;;  %v16754_v38 = vld [vmem:[#allocation9 + $0x61c] sm:$0xf]  ;;  %v14187_v3 = vld [vmem:[#allocation9 + $0xc48] sm:$0xf0] }
 0x41d   :  { %9250 = vmatpush.bf16.msrb.mxu2 %v13614_v39  ;;  %v16946_v39 = vld [vmem:[#allocation9 + $0xc1c] sm:$0xf]  ;;  %v13422_v42 = vor.u32 %v16754_v38, %v13419_v11  ;;  %v16737_v11 = vld [vmem:[#allocation9 + $0x58c] sm:$0xf0] }
 0x41e   :  { %9241 = vmatpush.bf16.msrb.mxu1 %v13038_v30  ;;  %v14715_v30 = vld [vmem:[#allocation9 + $0x1068] sm:$0xf0]  ;;  %v9035_v37 = vpop.f32.mrf.mxu1 }
 0x41f   :  { %v18065_v55 = vadd.f32 %v9035_v37, %v9023_v32  ;;  %v15386_v32 = vor.u32 %v17252_v15, %v15385_v18  ;;  %v13377_v37 = vld [vmem:[#allocation9 + $0x5c0] sm:$0xf]  ;;  %v16910_v18 = vld [vmem:[#allocation9 + $0xafc] sm:$0xf]  ;;  %v14043_v15 = vld [vmem:[#allocation9 + $0xb28] sm:$0xf0] }
 0x420   :  { %9274 = vmatpush.bf16.msra.mxu0 %v14478_v26  ;;  %9210 = vmatpush.bf16.msra.mxu3 %v15578_v12  ;;  %v17078_v26 = vld [vmem:[#allocation9 + $0x103c] sm:$0xf]  ;;  %v9024_v57 = vpop.f32.mrf.mxu0  ;;  %v14619_v12 = vld [vmem:[#allocation9 + $0xfa8] sm:$0xf0] }
 0x421   :  { %9242 = vmatmul.bf16.vlgmr.msrb.gmra.mxu1 %v17877_v31  ;;  %9251 = vmatpush.bf16.msrb.mxu2 %v13566_v4  ;;  %v14718_v48 = vor.u32 %v17078_v26, %v14715_v30  ;;  %v8958_v4 = vadd.f32 %v8957_v14, %v18053_v23  ;;  %v14622_v34 = vor.u32 %v17054_v36, %v14619_v12  ;;  %v16641_v26 = vld [vmem:[#allocation9 + $0x28c] sm:$0xf0]  ;;  %v17240_v23 = vld [vmem:[#allocation9 + $0x1544] sm:$0xf0]  ;;  %v13281_v12 = vld [vmem:[#allocation9 + $0x500] sm:$0xf] }
 0x422   :  { %9286 = vmatpush.bf16.msra.mxu1 %v14910_v35  ;;  %v18063_v35 = vpop.f32.mrf.mxu2  ;;  %v16725_v14 = vld [vmem:[#allocation9 + $0x52c] sm:$0xf0] }
 0x423   :  { %v8971_v30 = vadd.f32 %v18048_v28, %v8958_v4  ;;  %v14574_v28 = vor.u32 %v17042_v43, %v14571_v20  ;;  %v8959_v38 = vpop.f32.mrf.mxu3  ;;  %v17162_v43 = vld [vmem:[#allocation9 + $0x12dc] sm:$0xf]  ;;  %v15051_v20 = vld [vmem:[#allocation9 + $0x1308] sm:$0xf0] }
 0x424   :  { %9275 = vmatpush.bf16.msra.mxu0 %v14430_v17  ;;  %9211 = vmatpush.bf16.msra.mxu3 %v15530_v7  ;;  %v17066_v17 = vld [vmem:[#allocation9 + $0xfdc] sm:$0xf]  ;;  %v12945_v7 = vld [vmem:[#allocation9 + $0x260] sm:$0xf] }
 0x425   :  { %9252 = vmatpush.bf16.msrb.mxu2 %v13518_v29  ;;  %v14670_v58 = vor.u32 %v17066_v17, %v14667_v53  ;;  %v15337_v29 = vld [vmem:[#allocation9 + $0x1518] sm:$0xf]  ;;  %v8984_v51 = vadd.f32 %v18050_v24, %v8971_v30  ;;  %v12946_v13 = vor.u32 %v16641_v26, %v12945_v7  ;;  %v15195_v17 = vld [vmem:[#allocation9 + $0x1428] sm:$0xf0]  ;;  %v16898_v30 = vld [vmem:[#allocation9 + $0xa9c] sm:$0xf] }
 0x426   :  { %9287 = vmatpush.bf16.msra.mxu1 %v14862_v59  ;;  %v13470_v59 = vor.u32 %v16766_v50, %v13467_v22  ;;  %v9037_v21 = vpop.f32.mrf.mxu1  ;;  %v15246_v50 = vor.u32 %v17210_v49, %v15243_v5  ;;  %v16934_v22 = vld [vmem:[#allocation9 + $0xbbc] sm:$0xf]  ;;  %v15338_v53 = vor.u32 %v17240_v23, %v15337_v29  ;;  %v16605_v49 = vld [vmem:[#allocation9 + $0x16c] sm:$0xf0] }
 0x427   :  { %v15099_v21 = vld [vmem:[#allocation9 + $0x1368] sm:$0xf0]  ;;  %v16713_v5 = vld [vmem:[#allocation9 + $0x4cc] sm:$0xf0] }
 0x428   :  { %9276 = vmatpush.bf16.msra.mxu0 %v14382_v60  ;;  %v17222_v60 = vld [vmem:[#allocation9 + $0x14bc] sm:$0xf]  ;;  %9212 = vmatpush.bf16.msra.mxu3 %v15482_v47 }
 0x429   :  { %9253 = vmatpush.bf16.msrb.mxu2 %v13470_v59  ;;  %v15294_v27 = vor.u32 %v17222_v60, %v15291_v44  ;;  %v17198_v47 = vld [vmem:[#allocation9 + $0x13fc] sm:$0xf]  ;;  %v12897_v59 = vld [vmem:[#allocation9 + $0x200] sm:$0xf] }
 0x42a   :  { %9288 = vmatpush.bf16.msra.mxu1 %v14814_v16  ;;  %v15434_v16 = vor.u32 %v17264_v2, %v15433_v61  ;;  %v8998_v45 = vpop.f32.mrf.mxu2  ;;  %v16629_v61 = vld [vmem:[#allocation9 + $0x22c] sm:$0xf0]  ;;  %v18072_v2 = vadd.f32 %v18063_v35, %v8984_v51  ;;  %v17186_v44 = vld [vmem:[#allocation9 + $0x139c] sm:$0xf]  ;;  %v12849_v35 = vld [vmem:[#allocation9 + $0x1a0] sm:$0xf]  ;;  %v15054_v51 = vor.u32 %v17162_v43, %v15051_v20 }
 0x42b   :  { %v12898_v60 = vor.u32 %v16629_v61, %v12897_v59  ;;  %v17174_v45 = vld [vmem:[#allocation9 + $0x133c] sm:$0xf]  ;;  %v15003_v59 = vld [vmem:[#allocation9 + $0x12a8] sm:$0xf0] }
 0x42c   :  { %9277 = vmatpush.bf16.msra.mxu0 %v14334_v46  ;;  %v14190_v46 = vor.u32 %v16946_v39, %v14187_v3  ;;  %9213 = vmatpush.bf16.msra.mxu3 %v15434_v16  ;;  %v15198_v39 = vor.u32 %v17198_v47, %v15195_v17  ;;  %v16922_v3 = vld [vmem:[#allocation9 + $0xb5c] sm:$0xf]  ;;  %v15102_v26 = vor.u32 %v17174_v45, %v15099_v21  ;;  %v13089_v45 = vld [vmem:[#allocation9 + $0x380] sm:$0xf]  ;;  %v16677_v21 = vld [vmem:[#allocation9 + $0x3ac] sm:$0xf0] }
 0x42d   :  { %9254 = vmatpush.bf16.msrb.mxu2 %v13422_v42  ;;  %v13090_v20 = vor.u32 %v16677_v21, %v13089_v45  ;;  %v14817_v45 = vld [vmem:[#allocation9 + $0x1100] sm:$0xf]  ;;  %v17109_v21 = vld [vmem:[#allocation9 + $0x112c] sm:$0xf0] }
 0x42e   :  { %9289 = vmatpush.bf16.msra.mxu1 %v14766_v0  ;;  %v12994_v0 = vor.u32 %v16653_v25, %v12993_v8  ;;  %v15147_v8 = vld [vmem:[#allocation9 + $0x13c8] sm:$0xf0]  ;;  %v16617_v25 = vld [vmem:[#allocation9 + $0x1cc] sm:$0xf0] }
 0x42f   :  { %v15150_v42 = vor.u32 %v17186_v44, %v15147_v8  ;;  %v12850_v4 = vor.u32 %v16617_v25, %v12849_v35  ;;  %v16874_v44 = vld [vmem:[#allocation9 + $0x9dc] sm:$0xf]  ;;  %v13899_v8 = vld [vmem:[#allocation9 + $0xa08] sm:$0xf0] }
 0x430   :  { %9278 = vmatpush.bf16.msra.mxu0 %v14286_v41  ;;  %v16749_v41 = vld [vmem:[#allocation9 + $0x5ec] sm:$0xf0]  ;;  %9214 = vmatpush.bf16.msra.mxu3 %v15386_v32  ;;  %v13995_v32 = vld [vmem:[#allocation9 + $0xac8] sm:$0xf0] }
 0x431   :  { %9299 = vmatpush.bf16.msra.mxu2 %v15294_v27  ;;  %v13378_v57 = vor.u32 %v16749_v41, %v13377_v37  ;;  %v12801_v27 = vld [vmem:[#allocation9 + $0x140] sm:$0xf]  ;;  %v16593_v41 = vld [vmem:[#allocation9 + $0x10c] sm:$0xf0]  ;;  %v14955_v25 = vld [vmem:[#allocation9 + $0x1248] sm:$0xf0] }
 0x432   :  { %9290 = vmatpush.bf16.msra.mxu1 %v14718_v48  ;;  %v14139_v48 = vld [vmem:[#allocation9 + $0xbe8] sm:$0xf0]  ;;  %9255 = vmatmul.bf16.vlgmr.msrb.gmra.mxu2 %v17869_v9  ;;  %v12802_v29 = vor.u32 %v16605_v49, %v12801_v27  ;;  %v12753_v37 = vld [vmem:[#allocation9 + $0xe0] sm:$0xf]  ;;  %v16862_v49 = vld [vmem:[#allocation9 + $0x97c] sm:$0xf] }
 0x433   :  { %v14142_v24 = vor.u32 %v16934_v22, %v14139_v48  ;;  %v13185_v22 = vld [vmem:[#allocation9 + $0x440] sm:$0xf]  ;;  %v16701_v48 = vld [vmem:[#allocation9 + $0x46c] sm:$0xf0] }
 0x434   :  { %9279 = vmatpush.bf16.msra.mxu0 %v14238_v54  ;;  %v13329_v54 = vld [vmem:[#allocation9 + $0x560] sm:$0xf]  ;;  %9215 = vmatpush.bf16.msra.mxu3 %v15338_v53  ;;  %v12754_v53 = vor.u32 %v16593_v41, %v12753_v37  ;;  %v13186_v38 = vor.u32 %v16701_v48, %v13185_v22  ;;  %v17025_v41 = vld [vmem:[#allocation9 + $0xe8c] sm:$0xf0]  ;;  %v16850_v22 = vld [vmem:[#allocation9 + $0x91c] sm:$0xf] }
 0x435   :  { %9300 = vmatpush.bf16.msra.mxu2 %v15246_v50  ;;  %v13330_v16 = vor.u32 %v16737_v11, %v13329_v54  ;;  %v13998_v50 = vor.u32 %v16898_v30, %v13995_v32  ;;  %v9048_v47 = vpop.f32.mrf.mxu2  ;;  %v16581_v54 = vld [vmem:[#allocation9 + $0xac] sm:$0xf0]  ;;  %v14481_v37 = vld [vmem:[#allocation9 + $0xe60] sm:$0xf] }
 0x436   :  { %9291 = vmatpush.bf16.msra.mxu1 %v14670_v58  ;;  %v14091_v58 = vld [vmem:[#allocation9 + $0xb88] sm:$0xf0]  ;;  %v18082_v61 = vadd.f32 %v9048_v47, %v18065_v55  ;;  %v16569_v55 = vld [vmem:[#allocation9 + $0x4c] sm:$0xf0]  ;;  %v13041_v48 = vld [vmem:[#allocation9 + $0x320] sm:$0xf] }
 0x437   :  { %v14094_v36 = vor.u32 %v16922_v3, %v14091_v58  ;;  %9216 = vmatmul.bf16.vlgmr.msra.gmra.mxu3 %v17929_v62  ;;  %v16689_v3 = vld [vmem:[#allocation9 + $0x40c] sm:$0xf0] }
 0x438   :  { %9280 = vmatpush.bf16.msra.mxu0 %v14190_v46  ;;  %9260 = vmatpush.bf16.msrb.mxu3 %v14142_v24  ;;  %v13282_v46 = vor.u32 %v16725_v14, %v13281_v12  ;;  %v18077_v7 = vpop.f32.mrf.mxu0  ;;  %v12705_v24 = vld [vmem:[#allocation9 + $0x80] sm:$0xf] }
 0x439   :  { %9301 = vmatpush.bf16.msra.mxu2 %v15198_v39  ;;  %v13137_v39 = vld [vmem:[#allocation9 + $0x3e0] sm:$0xf]  ;;  %v12706_v35 = vor.u32 %v16581_v54, %v12705_v24  ;;  %v16821_v54 = vld [vmem:[#allocation9 + $0x82c] sm:$0xf0] }
 0x43a   :  { %9292 = vmatpush.bf16.msra.mxu1 %v14622_v34  ;;  %v13233_v34 = vld [vmem:[#allocation9 + $0x4a0] sm:$0xf]  ;;  %v13138_v12 = vor.u32 %v16689_v3, %v13137_v39 }
 0x43b   :  { %9281 = vmatmul.bf16.vlgmr.msra.gmra.mxu0 %v17893_v33  ;;  %v13234_v23 = vor.u32 %v16713_v5, %v13233_v34  ;;  %v13761_v14 = vld [vmem:[#allocation9 + $0x8c0] sm:$0xf] }
 0x43c   :  { %9325 = vmatpush.bf16.msrb.mxu0 %v12994_v0  ;;  %9261 = vmatpush.bf16.msrb.mxu3 %v14094_v36  ;;  %v14046_v0 = vor.u32 %v16910_v18, %v14043_v15  ;;  %v12657_v36 = vld [vmem:[#allocation9 + $0x20] sm:$0xf]  ;;  %v13902_v15 = vor.u32 %v16874_v44, %v13899_v8 }
 0x43d   :  { %9302 = vmatpush.bf16.msra.mxu2 %v15150_v42  ;;  %v16845_v42 = vld [vmem:[#allocation9 + $0x8ec] sm:$0xf0]  ;;  %v14529_v18 = vld [vmem:[#allocation9 + $0xec0] sm:$0xf]  ;;  %v9050_v5 = vpop.f32.mrf.mxu2  ;;  %v12658_v30 = vor.u32 %v16569_v55, %v12657_v36  ;;  %v15627_v36 = vld [vmem:[#allocation9 + $0x1788] sm:$0xf0] }
 0x43e   :  { %9293 = vmatpush.bf16.msra.mxu1 %v14574_v28  ;;  %v13947_v28 = vld [vmem:[#allocation9 + $0xa68] sm:$0xf0]  ;;  %v18079_v17 = vpop.f32.mrf.mxu1  ;;  %v13762_v32 = vor.u32 %v16845_v42, %v13761_v14  ;;  %v13665_v24 = vld [vmem:[#allocation9 + $0x800] sm:$0xf]  ;;  %v16809_v14 = vld [vmem:[#allocation9 + $0x7cc] sm:$0xf0] }
 0x43f   :  { %v14433_v3 = vld [vmem:[#allocation9 + $0xe00] sm:$0xf] }
 0x440   :  { %9326 = vmatpush.bf16.msrb.mxu0 %v12946_v13  ;;  %9262 = vmatpush.bf16.msrb.mxu3 %v14046_v0  ;;  %v16886_v13 = vld [vmem:[#allocation9 + $0xa3c] sm:$0xf]  ;;  %v9076_v58 = vpop.f32.mrf.mxu0  ;;  %v13851_v0 = vld [vmem:[#allocation9 + $0x9a8] sm:$0xf0]  ;;  %v14865_v8 = vld [vmem:[#allocation9 + $0x1160] sm:$0xf] }
 0x441   :  { %9294 = vmatmul.bf16.vlgmr.msra.gmra.mxu1 %v17896_v52  ;;  %9303 = vmatpush.bf16.msra.mxu2 %v15102_v26  ;;  %v13950_v11 = vor.u32 %v16886_v13, %v13947_v28  ;;  %v14913_v13 = vld [vmem:[#allocation9 + $0x11c0] sm:$0xf]  ;;  %v17133_v28 = vld [vmem:[#allocation9 + $0x11ec] sm:$0xf0] }
 0x442   :  { %9338 = vmatpush.bf16.msrb.mxu1 %v13378_v57  ;;  %v17150_v57 = vld [vmem:[#allocation9 + $0x127c] sm:$0xf]  ;;  %v14914_v39 = vor.u32 %v17133_v28, %v14913_v13  ;;  %v17013_v58 = vld [vmem:[#allocation9 + $0xe2c] sm:$0xf0]  ;;  %v13569_v5 = vld [vmem:[#allocation9 + $0x740] sm:$0xf] }
 0x443   :  { %v14434_v55 = vor.u32 %v17013_v58, %v14433_v3  ;;  %v13521_v13 = vld [vmem:[#allocation9 + $0x6e0] sm:$0xf]  ;;  %v16785_v28 = vld [vmem:[#allocation9 + $0x70c] sm:$0xf0]  ;;  %v15483_v3 = vld [vmem:[#allocation9 + $0x1668] sm:$0xf0] }
 0x444   :  { %9327 = vmatpush.bf16.msrb.mxu0 %v12898_v60  ;;  %9263 = vmatpush.bf16.msrb.mxu3 %v13998_v50  ;;  %v15006_v60 = vor.u32 %v17150_v57, %v15003_v59  ;;  %v13854_v50 = vor.u32 %v16862_v49, %v13851_v0  ;;  %v15675_v57 = vld [vmem:[#allocation9 + $0x17e8] sm:$0xf0]  ;;  %v14482_v59 = vor.u32 %v17025_v41, %v14481_v37  ;;  %v18091_v37 = vld [vmem:[#allocation10] sm:$0xff] }
 0x445   :  { %9304 = vmatpush.bf16.msra.mxu2 %v15054_v51  ;;  %v16665_v51 = vld [vmem:[#allocation9 + $0x34c] sm:$0xf0]  ;;  %v15579_v49 = vld [vmem:[#allocation9 + $0x1728] sm:$0xf0]  ;;  %v4635_v41 = vperm.slane %v18091_v37, 6 }
 0x446   :  { %9339 = vmatpush.bf16.msrb.mxu1 %v13330_v16  ;;  %v17138_v16 = vld [vmem:[#allocation9 + $0x121c] sm:$0xf]  ;;  %v9089_v26 = vpop.f32.mrf.mxu1 }
 0x447   :  { %v14958_v27 = vor.u32 %v17138_v16, %v14955_v25  ;;  %v17121_v16 = vld [vmem:[#allocation9 + $0x118c] sm:$0xf0]  ;;  %v17306_v25 = vld [vmem:[#allocation9 + $0x175c] sm:$0xf] }
 0x448   :  { %9328 = vmatpush.bf16.msrb.mxu0 %v12850_v4  ;;  %9264 = vmatpush.bf16.msrb.mxu3 %v13950_v11  ;;  %v17037_v4 = vld [vmem:[#allocation9 + $0xeec] sm:$0xf0]  ;;  %v14866_v42 = vor.u32 %v17121_v16, %v14865_v8  ;;  %v13473_v8 = vld [vmem:[#allocation9 + $0x680] sm:$0xf] }
 0x449   :  { %9305 = vmatpush.bf16.msra.mxu2 %v15006_v60  ;;  %v14530_v43 = vor.u32 %v17037_v4, %v14529_v18  ;;  %v14385_v18 = vld [vmem:[#allocation9 + $0xda0] sm:$0xf]  ;;  %v15630_v4 = vor.u32 %v17306_v25, %v15627_v36  ;;  %v16797_v26 = vld [vmem:[#allocation9 + $0x76c] sm:$0xf0] }
 0x44a   :  { %9340 = vmatpush.bf16.msrb.mxu1 %v13282_v46  ;;  %v9009_v46 = vpop.f32.mrf.mxu3  ;;  %v16773_v16 = vld [vmem:[#allocation9 + $0x6ac] sm:$0xf0]  ;;  %v14241_v36 = vld [vmem:[#allocation9 + $0xc80] sm:$0xf] }
 0x44b   :  { %v18085_v34 = vadd.f32 %v9009_v46, %v18072_v2  ;;  %v13803_v2 = vld [vmem:[#allocation9 + $0x948] sm:$0xf0] }
 0x44c   :  { %9329 = vmatpush.bf16.msrb.mxu0 %v12802_v29  ;;  %v13713_v29 = vld [vmem:[#allocation9 + $0x860] sm:$0xf]  ;;  %9265 = vmatpush.bf16.msrb.mxu3 %v13902_v15  ;;  %v13806_v11 = vor.u32 %v16850_v22, %v13803_v2  ;;  %v17001_v15 = vld [vmem:[#allocation9 + $0xdcc] sm:$0xf0]  ;;  %v13570_v22 = vor.u32 %v16797_v26, %v13569_v5 }
 0x44d   :  { %9306 = vmatpush.bf16.msra.mxu2 %v14958_v27  ;;  %v17294_v27 = vld [vmem:[#allocation9 + $0x16fc] sm:$0xf]  ;;  %v14386_v0 = vor.u32 %v17001_v15, %v14385_v18  ;;  %v13474_v15 = vor.u32 %v16773_v16, %v13473_v8  ;;  %v15297_v26 = vld [vmem:[#allocation9 + $0x14c0] sm:$0xf]  ;;  %v16743_v8 = vld [vmem:[#allocation9 + $0x5c4] sm:$0xf] }
 0x44e   :  { %9341 = vmatpush.bf16.msrb.mxu1 %v13234_v23  ;;  %v16833_v23 = vld [vmem:[#allocation9 + $0x88c] sm:$0xf0]  ;;  %v13379_v16 = vld [vmem:[#allocation9 + $0x5f0] sm:$0xf0] }
 0x44f   :  { %v13714_v47 = vor.u32 %v16833_v23, %v13713_v29  ;;  %v16989_v29 = vld [vmem:[#allocation9 + $0xd6c] sm:$0xf0] }
 0x450   :  { %9330 = vmatpush.bf16.msrb.mxu0 %v12754_v53  ;;  %v17318_v53 = vld [vmem:[#allocation9 + $0x17bc] sm:$0xf]  ;;  %9266 = vmatpush.bf16.msrb.mxu3 %v13854_v50  ;;  %v17097_v23 = vld [vmem:[#allocation9 + $0x10cc] sm:$0xf0] }
 0x451   :  { %9351 = vmatpush.bf16.msrb.mxu2 %v13762_v32  ;;  %v15678_v44 = vor.u32 %v17318_v53, %v15675_v57  ;;  %v14337_v32 = vld [vmem:[#allocation9 + $0xd40] sm:$0xf]  ;;  %v16977_v57 = vld [vmem:[#allocation9 + $0xd0c] sm:$0xf0] }
 0x452   :  { %9342 = vmatpush.bf16.msrb.mxu1 %v13186_v38  ;;  %v13042_v38 = vor.u32 %v16665_v51, %v13041_v48  ;;  %9307 = vmatmul.bf16.vlgmr.msra.gmra.mxu2 %v17918_v63  ;;  %v9011_v60 = vpop.f32.mrf.mxu3  ;;  %v17282_v48 = vld [vmem:[#allocation9 + $0x169c] sm:$0xf]  ;;  %v15531_v51 = vld [vmem:[#allocation9 + $0x16c8] sm:$0xf0]  ;;  %v14338_v2 = vor.u32 %v16989_v29, %v14337_v32  ;;  %v14289_v53 = vld [vmem:[#allocation9 + $0xce0] sm:$0xf] }
 0x453   :  { %v16647_v32 = vld [vmem:[#allocation9 + $0x2c4] sm:$0xf] }
 0x454   :  { %9331 = vmatpush.bf16.msrb.mxu0 %v12706_v35  ;;  %v13666_v35 = vor.u32 %v16821_v54, %v13665_v24  ;;  %9267 = vmatpush.bf16.msrb.mxu3 %v13806_v11  ;;  %v17085_v24 = vld [vmem:[#allocation9 + $0x106c] sm:$0xf0]  ;;  %v13522_v11 = vor.u32 %v16785_v28, %v13521_v13 }
 0x455   :  { %9352 = vmatpush.bf16.msrb.mxu2 %v13714_v47  ;;  %v18094_v58 = vpop.f32.mrf.mxu2 }
 0x456   :  { %9343 = vmatpush.bf16.msrb.mxu1 %v13138_v12  ;;  %v13617_v12 = vld [vmem:[#allocation9 + $0x7a0] sm:$0xf] }
 0x457   :  { %v13618_v46 = vor.u32 %v16809_v14, %v13617_v12  ;;  %9268 = vmatmul.bf16.vlgmr.msrb.gmra.mxu3 %v17879_v1  ;;  %v14673_v14 = vld [vmem:[#allocation9 + $0xfe0] sm:$0xf] }
 0x458   :  { %9332 = vmatpush.bf16.msrb.mxu0 %v12658_v30  ;;  %9312 = vmatpush.bf16.msra.mxu3 %v15678_v44  ;;  %v14818_v30 = vor.u32 %v17109_v21, %v14817_v45  ;;  %v9126_v50 = vpop.f32.mrf.mxu0  ;;  %v14290_v44 = vor.u32 %v16977_v57, %v14289_v53  ;;  %v15435_v45 = vld [vmem:[#allocation9 + $0x1608] sm:$0xf0]  ;;  %v13425_v21 = vld [vmem:[#allocation9 + $0x620] sm:$0xf] }
 0x459   :  { %9353 = vmatpush.bf16.msrb.mxu2 %v13666_v35  ;;  %v9127_v54 = vadd.f32 %v9126_v50, %v4635_v41  ;;  %v15249_v53 = vld [vmem:[#allocation9 + $0x1460] sm:$0xf] }
 0x45a   :  { %9344 = vmatpush.bf16.msrb.mxu1 %v13090_v20  ;;  %v14769_v20 = vld [vmem:[#allocation9 + $0x10a0] sm:$0xf]  ;;  %v9061_v41 = vpop.f32.mrf.mxu3 }
 0x45b   :  { %9333 = vmatmul.bf16.vlgmr.msrb.gmra.mxu0 %v17871_v10  ;;  %v14770_v47 = vor.u32 %v17097_v23, %v14769_v20  ;;  %v14625_v20 = vld [vmem:[#allocation9 + $0xf80] sm:$0xf]  ;;  %v17061_v23 = vld [vmem:[#allocation9 + $0xfac] sm:$0xf0] }
 0x45c   :  { %9377 = vmatpush.bf16.msra.mxu0 %v14530_v43  ;;  %9313 = vmatpush.bf16.msra.mxu3 %v15630_v4  ;;  %v15582_v43 = vor.u32 %v17294_v27, %v15579_v49  ;;  %v17258_v4 = vld [vmem:[#allocation9 + $0x15dc] sm:$0xf]  ;;  %v16761_v27 = vld [vmem:[#allocation9 + $0x64c] sm:$0xf0]  ;;  %v14193_v49 = vld [vmem:[#allocation9 + $0xc20] sm:$0xf] }
 0x45d   :  { %9354 = vmatpush.bf16.msrb.mxu2 %v13618_v46  ;;  %v15438_v29 = vor.u32 %v17258_v4, %v15435_v45  ;;  %v13426_v50 = vor.u32 %v16761_v27, %v13425_v21  ;;  %v13382_v4 = vor.u32 %v16743_v8, %v13379_v16  ;;  %v16623_v45 = vld [vmem:[#allocation9 + $0x204] sm:$0xf]  ;;  %v12899_v21 = vld [vmem:[#allocation9 + $0x230] sm:$0xf0]  ;;  %v17169_v8 = vld [vmem:[#allocation9 + $0x130c] sm:$0xf0] }
 0x45e   :  { %9345 = vmatpush.bf16.msrb.mxu1 %v13042_v38  ;;  %v14721_v38 = vld [vmem:[#allocation9 + $0x1040] sm:$0xf]  ;;  %v9139_v60 = vpop.f32.mrf.mxu1 }
 0x45f   :  { %v18096_v35 = vadd.f32 %v9139_v60, %v9127_v54  ;;  %v14722_v25 = vor.u32 %v17085_v24, %v14721_v38  ;;  %v17217_v38 = vld [vmem:[#allocation9 + $0x148c] sm:$0xf0]  ;;  %v16635_v24 = vld [vmem:[#allocation9 + $0x264] sm:$0xf]  ;;  %v12947_v54 = vld [vmem:[#allocation9 + $0x290] sm:$0xf0] }
 0x460   :  { %9378 = vmatpush.bf16.msra.mxu0 %v14482_v59  ;;  %9314 = vmatpush.bf16.msra.mxu3 %v15582_v43  ;;  %v15534_v59 = vor.u32 %v17282_v48, %v15531_v51  ;;  %v9128_v18 = vpop.f32.mrf.mxu0  ;;  %v12995_v43 = vld [vmem:[#allocation9 + $0x2f0] sm:$0xf0]  ;;  %v15387_v48 = vld [vmem:[#allocation9 + $0x15a8] sm:$0xf0]  ;;  %v9062_v51 = vadd.f32 %v9061_v41, %v18082_v61  ;;  %v14577_v60 = vld [vmem:[#allocation9 + $0xf20] sm:$0xf] }
 0x461   :  { %9346 = vmatmul.bf16.vlgmr.msrb.gmra.mxu1 %v17877_v31  ;;  %9355 = vmatpush.bf16.msrb.mxu2 %v13570_v22  ;;  %v17246_v22 = vld [vmem:[#allocation9 + $0x157c] sm:$0xf]  ;;  %v12998_v57 = vor.u32 %v16647_v32, %v12995_v43  ;;  %v15339_v61 = vld [vmem:[#allocation9 + $0x1548] sm:$0xf0]  ;;  %v17205_v18 = vld [vmem:[#allocation9 + $0x142c] sm:$0xf0]  ;;  %v12902_v32 = vor.u32 %v16623_v45, %v12899_v21 }
 0x462   :  { %9390 = vmatpush.bf16.msra.mxu1 %v14914_v39  ;;  %v17270_v39 = vld [vmem:[#allocation9 + $0x163c] sm:$0xf]  ;;  %v9063_v27 = vpop.f32.mrf.mxu3  ;;  %v17193_v43 = vld [vmem:[#allocation9 + $0x13cc] sm:$0xf0]  ;;  %v15009_v21 = vld [vmem:[#allocation9 + $0x1280] sm:$0xf] }
 0x463   :  { %v15486_v12 = vor.u32 %v17270_v39, %v15483_v3  ;;  %v15390_v39 = vor.u32 %v17246_v22, %v15387_v48  ;;  %v17234_v3 = vld [vmem:[#allocation9 + $0x151c] sm:$0xf]  ;;  %v13283_v22 = vld [vmem:[#allocation9 + $0x530] sm:$0xf0]  ;;  %v17157_v27 = vld [vmem:[#allocation9 + $0x12ac] sm:$0xf0] }
 0x464   :  { %9379 = vmatpush.bf16.msra.mxu0 %v14434_v55  ;;  %v16965_v55 = vld [vmem:[#allocation9 + $0xcac] sm:$0xf0]  ;;  %9315 = vmatpush.bf16.msra.mxu3 %v15534_v59  ;;  %v14626_v59 = vor.u32 %v17061_v23, %v14625_v20  ;;  %v12851_v23 = vld [vmem:[#allocation9 + $0x1d0] sm:$0xf0] }
 0x465   :  { %9356 = vmatpush.bf16.msrb.mxu2 %v13522_v11  ;;  %v14242_v46 = vor.u32 %v16965_v55, %v14241_v36  ;;  %v9075_v11 = vadd.f32 %v18077_v7, %v9062_v51  ;;  %v14145_v36 = vld [vmem:[#allocation9 + $0xbc0] sm:$0xf]  ;;  %v16941_v55 = vld [vmem:[#allocation9 + $0xbec] sm:$0xf0] }
 0x466   :  { %9391 = vmatpush.bf16.msra.mxu1 %v14866_v42  ;;  %v17073_v42 = vld [vmem:[#allocation9 + $0x100c] sm:$0xf0]  ;;  %v9141_v13 = vpop.f32.mrf.mxu1  ;;  %v14049_v51 = vld [vmem:[#allocation9 + $0xb00] sm:$0xf] }
 0x467   :  { %v14674_v5 = vor.u32 %v17073_v42, %v14673_v14  ;;  %v12950_v14 = vor.u32 %v16635_v24, %v12947_v54  ;;  %v15201_v42 = vld [vmem:[#allocation9 + $0x1400] sm:$0xf]  ;;  %v16707_v24 = vld [vmem:[#allocation9 + $0x4a4] sm:$0xf]  ;;  %v13235_v54 = vld [vmem:[#allocation9 + $0x4d0] sm:$0xf0] }
 0x468   :  { %9380 = vmatpush.bf16.msra.mxu0 %v14386_v0  ;;  %v16953_v0 = vld [vmem:[#allocation9 + $0xc4c] sm:$0xf0]  ;;  %9316 = vmatpush.bf16.msra.mxu3 %v15486_v12  ;;  %v9088_v12 = vadd.f32 %v18079_v17, %v9075_v11  ;;  %v14146_v17 = vor.u32 %v16941_v55, %v14145_v36  ;;  %v13238_v16 = vor.u32 %v16707_v24, %v13235_v54  ;;  %v12755_v36 = vld [vmem:[#allocation9 + $0x110] sm:$0xf0]  ;;  %v13857_v24 = vld [vmem:[#allocation9 + $0x980] sm:$0xf] }
 0x469   :  { %9357 = vmatpush.bf16.msrb.mxu2 %v13474_v15  ;;  %v14194_v28 = vor.u32 %v16953_v0, %v14193_v49  ;;  %v15342_v15 = vor.u32 %v17234_v3, %v15339_v61  ;;  %v16731_v49 = vld [vmem:[#allocation9 + $0x564] sm:$0xf]  ;;  %v13331_v0 = vld [vmem:[#allocation9 + $0x590] sm:$0xf0]  ;;  %v14001_v3 = vld [vmem:[#allocation9 + $0xaa0] sm:$0xf] }
 0x46a   :  { %9392 = vmatpush.bf16.msra.mxu1 %v14818_v30  ;;  %v17229_v30 = vld [vmem:[#allocation9 + $0x14ec] sm:$0xf0]  ;;  %v13334_v20 = vor.u32 %v16731_v49, %v13331_v0  ;;  %v15057_v61 = vld [vmem:[#allocation9 + $0x12e0] sm:$0xf]  ;;  %v16575_v0 = vld [vmem:[#allocation9 + $0x84] sm:$0xf] }
 0x46b   :  { %v16869_v54 = vld [vmem:[#allocation9 + $0x9ac] sm:$0xf0] }
 0x46c   :  { %9381 = vmatpush.bf16.msra.mxu0 %v14338_v2  ;;  %v9102_v2 = vpop.f32.mrf.mxu2  ;;  %9317 = vmatpush.bf16.msra.mxu3 %v15438_v29  ;;  %v15153_v29 = vld [vmem:[#allocation9 + $0x13a0] sm:$0xf] }
 0x46d   :  { %9358 = vmatpush.bf16.msrb.mxu2 %v13426_v50  ;;  %v16719_v50 = vld [vmem:[#allocation9 + $0x504] sm:$0xf]  ;;  %v15154_v48 = vor.u32 %v17193_v43, %v15153_v29  ;;  %v16917_v2 = vld [vmem:[#allocation9 + $0xb2c] sm:$0xf0]  ;;  %v15010_v43 = vor.u32 %v17157_v27, %v15009_v21  ;;  %v15681_v27 = vld [vmem:[#allocation9 + $0x17c0] sm:$0xf] }
 0x46e   :  { %9393 = vmatpush.bf16.msra.mxu1 %v14770_v47  ;;  %v15298_v47 = vor.u32 %v17229_v30, %v15297_v26  ;;  %v14097_v26 = vld [vmem:[#allocation9 + $0xb60] sm:$0xf]  ;;  %v16929_v30 = vld [vmem:[#allocation9 + $0xb8c] sm:$0xf0] }
 0x46f   :  { %v14098_v41 = vor.u32 %v16929_v30, %v14097_v26  ;;  %v16683_v30 = vld [vmem:[#allocation9 + $0x3e4] sm:$0xf] }
 0x470   :  { %9382 = vmatpush.bf16.msra.mxu0 %v14290_v44  ;;  %v17049_v44 = vld [vmem:[#allocation9 + $0xf4c] sm:$0xf0]  ;;  %9318 = vmatpush.bf16.msra.mxu3 %v15390_v39 }
 0x471   :  { %9403 = vmatpush.bf16.msra.mxu2 %v15298_v47  ;;  %v14578_v7 = vor.u32 %v17049_v44, %v14577_v60  ;;  %v17181_v47 = vld [vmem:[#allocation9 + $0x136c] sm:$0xf0] }
 0x472   :  { %9394 = vmatpush.bf16.msra.mxu1 %v14722_v25  ;;  %v15250_v25 = vor.u32 %v17217_v38, %v15249_v53  ;;  %9359 = vmatmul.bf16.vlgmr.msrb.gmra.mxu2 %v17869_v9  ;;  %v13286_v53 = vor.u32 %v16719_v50, %v13283_v22  ;;  %v14050_v38 = vor.u32 %v16917_v2, %v14049_v51  ;;  %v16905_v60 = vld [vmem:[#allocation9 + $0xacc] sm:$0xf0]  ;;  %v16563_v22 = vld [vmem:[#allocation9 + $0x24] sm:$0xf]  ;;  %v13763_v2 = vld [vmem:[#allocation9 + $0x8f0] sm:$0xf0] }
 0x473   :  { %v14002_v55 = vor.u32 %v16905_v60, %v14001_v3  ;;  %v17145_v50 = vld [vmem:[#allocation9 + $0x124c] sm:$0xf0]  ;;  %v16839_v51 = vld [vmem:[#allocation9 + $0x8c4] sm:$0xf] }
 0x474   :  { %9383 = vmatpush.bf16.msra.mxu0 %v14242_v46  ;;  %v18103_v46 = vadd.f32 %v18094_v58, %v9088_v12  ;;  %9319 = vmatpush.bf16.msra.mxu3 %v15342_v15  ;;  %v16611_v58 = vld [vmem:[#allocation9 + $0x1a4] sm:$0xf] }
 0x475   :  { %9404 = vmatpush.bf16.msra.mxu2 %v15250_v25  ;;  %v12854_v13 = vor.u32 %v16611_v58, %v12851_v23  ;;  %v16587_v25 = vld [vmem:[#allocation9 + $0xe4] sm:$0xf]  ;;  %v9152_v15 = vpop.f32.mrf.mxu2  ;;  %v16881_v58 = vld [vmem:[#allocation9 + $0xa0c] sm:$0xf0]  ;;  %v14961_v23 = vld [vmem:[#allocation9 + $0x1220] sm:$0xf] }
 0x476   :  { %9395 = vmatpush.bf16.msra.mxu1 %v14674_v5  ;;  %v15202_v5 = vor.u32 %v17205_v18, %v15201_v42  ;;  %v16695_v12 = vld [vmem:[#allocation9 + $0x444] sm:$0xf]  ;;  %v13953_v42 = vld [vmem:[#allocation9 + $0xa40] sm:$0xf]  ;;  %v16893_v18 = vld [vmem:[#allocation9 + $0xa6c] sm:$0xf0]  ;;  %v12758_v45 = vor.u32 %v16587_v25, %v12755_v36 }
 0x477   :  { %9320 = vmatmul.bf16.vlgmr.msra.gmra.mxu3 %v17929_v62  ;;  %v13954_v26 = vor.u32 %v16893_v18, %v13953_v42  ;;  %v13715_v36 = vld [vmem:[#allocation9 + $0x890] sm:$0xf0]  ;;  %v16659_v42 = vld [vmem:[#allocation9 + $0x324] sm:$0xf] }
 0x478   :  { %9384 = vmatpush.bf16.msra.mxu0 %v14194_v28  ;;  %9364 = vmatpush.bf16.msrb.mxu3 %v14146_v17  ;;  %v15105_v28 = vld [vmem:[#allocation9 + $0x1340] sm:$0xf]  ;;  %v18108_v11 = vpop.f32.mrf.mxu0  ;;  %v18113_v17 = vadd.f32 %v9152_v15, %v18096_v35  ;;  %v12659_v35 = vld [vmem:[#allocation9 + $0x50] sm:$0xf0]  ;;  %v17127_v15 = vld [vmem:[#allocation9 + $0x11c4] sm:$0xf] }
 0x479   :  { %9405 = vmatpush.bf16.msra.mxu2 %v15202_v5  ;;  %v15106_v39 = vor.u32 %v17181_v47, %v15105_v28  ;;  %v12707_v5 = vld [vmem:[#allocation9 + $0xb0] sm:$0xf0] }
 0x47a   :  { %9396 = vmatpush.bf16.msra.mxu1 %v14626_v59  ;;  %v12803_v59 = vld [vmem:[#allocation9 + $0x170] sm:$0xf0] }
 0x47b   :  { %9385 = vmatmul.bf16.vlgmr.msra.gmra.mxu0 %v17893_v33  ;;  %v14531_v47 = vld [vmem:[#allocation9 + $0xef0] sm:$0xf0] }
 0x47c   :  { %9429 = vmatpush.bf16.msrb.mxu0 %v12998_v57  ;;  %v16599_v57 = vld [vmem:[#allocation9 + $0x144] sm:$0xf]  ;;  %9365 = vmatpush.bf16.msrb.mxu3 %v14098_v41  ;;  %v12710_v41 = vor.u32 %v16575_v0, %v12707_v5  ;;  %v13043_v18 = vld [vmem:[#allocation9 + $0x350] sm:$0xf0] }
 0x47d   :  { %9406 = vmatpush.bf16.msra.mxu2 %v15154_v48  ;;  %v12806_v44 = vor.u32 %v16599_v57, %v12803_v59  ;;  %v13091_v57 = vld [vmem:[#allocation9 + $0x3b0] sm:$0xf0]  ;;  %v9113_v59 = vpop.f32.mrf.mxu3  ;;  %v9154_v3 = vpop.f32.mrf.mxu2  ;;  %v13046_v5 = vor.u32 %v16659_v42, %v13043_v18  ;;  %v15537_v18 = vld [vmem:[#allocation9 + $0x16a0] sm:$0xf] }
 0x47e   :  { %9397 = vmatpush.bf16.msra.mxu1 %v14578_v7  ;;  %v15058_v7 = vor.u32 %v17169_v8, %v15057_v61  ;;  %v13766_v61 = vor.u32 %v16839_v51, %v13763_v2  ;;  %v16827_v8 = vld [vmem:[#allocation9 + $0x864] sm:$0xf]  ;;  %v17301_v3 = vld [vmem:[#allocation9 + $0x172c] sm:$0xf0] }
 0x47f   :  { %v13718_v21 = vor.u32 %v16827_v8, %v13715_v36  ;;  %v16803_v2 = vld [vmem:[#allocation9 + $0x7a4] sm:$0xf] }
 0x480   :  { %9430 = vmatpush.bf16.msrb.mxu0 %v12950_v14  ;;  %9366 = vmatpush.bf16.msrb.mxu3 %v14050_v38  ;;  %v13187_v14 = vld [vmem:[#allocation9 + $0x470] sm:$0xf0]  ;;  %v9180_v29 = vpop.f32.mrf.mxu0  ;;  %v14962_v38 = vor.u32 %v17145_v50, %v14961_v23 }
 0x481   :  { %9398 = vmatmul.bf16.vlgmr.msra.gmra.mxu1 %v17896_v52  ;;  %9407 = vmatpush.bf16.msra.mxu2 %v15106_v39  ;;  %v13190_v49 = vor.u32 %v16695_v12, %v13187_v14  ;;  %v18116_v39 = vadd.f32 %v9113_v59, %v18103_v46  ;;  %v14483_v12 = vld [vmem:[#allocation9 + $0xe90] sm:$0xf0]  ;;  %v13858_v14 = vor.u32 %v16869_v54, %v13857_v24  ;;  %v16857_v46 = vld [vmem:[#allocation9 + $0x94c] sm:$0xf0]  ;;  %v17103_v59 = vld [vmem:[#allocation9 + $0x1104] sm:$0xf] }
 0x482   :  { %9442 = vmatpush.bf16.msrb.mxu1 %v13382_v4  ;;  %v18110_v4 = vpop.f32.mrf.mxu1  ;;  %v14867_v50 = vld [vmem:[#allocation9 + $0x1190] sm:$0xf0]  ;;  %v15585_v54 = vld [vmem:[#allocation9 + $0x1700] sm:$0xf] }
 0x483   :  { %v15586_v36 = vor.u32 %v17301_v3, %v15585_v54  ;;  %v13427_v54 = vld [vmem:[#allocation9 + $0x650] sm:$0xf0]  ;;  %v16947_v3 = vld [vmem:[#allocation9 + $0xc24] sm:$0xf] }
 0x484   :  { %9431 = vmatpush.bf16.msrb.mxu0 %v12902_v32  ;;  %9367 = vmatpush.bf16.msrb.mxu3 %v14002_v55  ;;  %v13139_v32 = vld [vmem:[#allocation9 + $0x410] sm:$0xf0]  ;;  %v17019_v55 = vld [vmem:[#allocation9 + $0xe64] sm:$0xf] }
 0x485   :  { %9408 = vmatpush.bf16.msra.mxu2 %v15058_v7  ;;  %v13142_v48 = vor.u32 %v16683_v30, %v13139_v32  ;;  %v13809_v7 = vld [vmem:[#allocation9 + $0x920] sm:$0xf]  ;;  %v14486_v0 = vor.u32 %v17019_v55, %v14483_v12  ;;  %v13667_v30 = vld [vmem:[#allocation9 + $0x830] sm:$0xf0]  ;;  %v17091_v55 = vld [vmem:[#allocation9 + $0x10a4] sm:$0xf] }
 0x486   :  { %9443 = vmatpush.bf16.msrb.mxu1 %v13334_v20  ;;  %v13905_v20 = vld [vmem:[#allocation9 + $0x9e0] sm:$0xf]  ;;  %v13810_v32 = vor.u32 %v16857_v46, %v13809_v7  ;;  %v14771_v12 = vld [vmem:[#allocation9 + $0x10d0] sm:$0xf0]  ;;  %v17289_v46 = vld [vmem:[#allocation9 + $0x16cc] sm:$0xf0] }
 0x487   :  { %v13906_v28 = vor.u32 %v16881_v58, %v13905_v20  ;;  %v14435_v20 = vld [vmem:[#allocation9 + $0xe30] sm:$0xf0]  ;;  %v9115_v58 = vpop.f32.mrf.mxu3 }
 0x488   :  { %9432 = vmatpush.bf16.msrb.mxu0 %v12854_v13  ;;  %v17031_v13 = vld [vmem:[#allocation9 + $0xec4] sm:$0xf]  ;;  %9368 = vmatpush.bf16.msrb.mxu3 %v13954_v26 }
 0x489   :  { %9409 = vmatpush.bf16.msra.mxu2 %v15010_v43  ;;  %v16815_v26 = vld [vmem:[#allocation9 + $0x804] sm:$0xf] }
 0x48a   :  { %9444 = vmatpush.bf16.msrb.mxu1 %v13286_v53  ;;  %v16671_v53 = vld [vmem:[#allocation9 + $0x384] sm:$0xf]  ;;  %v9193_v60 = vpop.f32.mrf.mxu1 }
 0x48b   :  { %v13094_v25 = vor.u32 %v16671_v53, %v13091_v57  ;;  %v17007_v43 = vld [vmem:[#allocation9 + $0xe04] sm:$0xf]  ;;  %v14387_v53 = vld [vmem:[#allocation9 + $0xdd0] sm:$0xf0] }
 0x48c   :  { %9433 = vmatpush.bf16.msrb.mxu0 %v12806_v44  ;;  %v12662_v44 = vor.u32 %v16563_v22, %v12659_v35  ;;  %9369 = vmatpush.bf16.msrb.mxu3 %v13906_v28  ;;  %v13670_v22 = vor.u32 %v16815_v26, %v13667_v30  ;;  %v15633_v35 = vld [vmem:[#allocation9 + $0x1760] sm:$0xf]  ;;  %v14438_v51 = vor.u32 %v17007_v43, %v14435_v20  ;;  %v17079_v26 = vld [vmem:[#allocation9 + $0x1044] sm:$0xf]  ;;  %v14723_v30 = vld [vmem:[#allocation9 + $0x1070] sm:$0xf0] }
 0x48d   :  { %9410 = vmatpush.bf16.msra.mxu2 %v14962_v38  ;;  %v14819_v38 = vld [vmem:[#allocation9 + $0x1130] sm:$0xf0]  ;;  %v17277_v43 = vld [vmem:[#allocation9 + $0x166c] sm:$0xf0] }
 0x48e   :  { %9445 = vmatpush.bf16.msrb.mxu1 %v13238_v16  ;;  %v14534_v16 = vor.u32 %v17031_v13, %v14531_v47  ;;  %v13619_v13 = vld [vmem:[#allocation9 + $0x7d0] sm:$0xf0]  ;;  %v16995_v47 = vld [vmem:[#allocation9 + $0xda4] sm:$0xf]  ;;  %v14822_v8 = vor.u32 %v17103_v59, %v14819_v38  ;;  %v17265_v59 = vld [vmem:[#allocation9 + $0x160c] sm:$0xf0] }
 0x48f   :  { %v13622_v24 = vor.u32 %v16803_v2, %v13619_v13  ;;  %v14390_v60 = vor.u32 %v16995_v47, %v14387_v53  ;;  %v17067_v13 = vld [vmem:[#allocation9 + $0xfe4] sm:$0xf] }
 0x490   :  { %9434 = vmatpush.bf16.msrb.mxu0 %v12758_v45  ;;  %v14915_v45 = vld [vmem:[#allocation9 + $0x11f0] sm:$0xf0]  ;;  %9370 = vmatpush.bf16.msrb.mxu3 %v13858_v14  ;;  %v4636_v14 = vperm.slane %v18091_v37, 7  ;;  %v16755_v38 = vld [vmem:[#allocation9 + $0x624] sm:$0xf] }
 0x491   :  { %9455 = vmatpush.bf16.msrb.mxu2 %v13766_v61  ;;  %v14918_v29 = vor.u32 %v17127_v15, %v14915_v45  ;;  %v13571_v61 = vld [vmem:[#allocation9 + $0x770] sm:$0xf0]  ;;  %v16779_v45 = vld [vmem:[#allocation9 + $0x6e4] sm:$0xf] }
 0x492   :  { %9446 = vmatpush.bf16.msrb.mxu1 %v13190_v49  ;;  %v17325_v49 = vld [vmem:[#allocation9 + $0x17ec] sm:$0xf0]  ;;  %9411 = vmatmul.bf16.vlgmr.msra.gmra.mxu2 %v17918_v63 }
 0x493   :  { %v15682_v23 = vor.u32 %v17325_v49, %v15681_v27  ;;  %v14774_v27 = vor.u32 %v17091_v55, %v14771_v12  ;;  %v16971_v49 = vld [vmem:[#allocation9 + $0xce4] sm:$0xf]  ;;  %v14627_v12 = vld [vmem:[#allocation9 + $0xfb0] sm:$0xf0] }
 0x494   :  { %9435 = vmatpush.bf16.msrb.mxu0 %v12710_v41  ;;  %v17115_v41 = vld [vmem:[#allocation9 + $0x1164] sm:$0xf]  ;;  %9371 = vmatpush.bf16.msrb.mxu3 %v13810_v32 }
 0x495   :  { %9456 = vmatpush.bf16.msrb.mxu2 %v13718_v21  ;;  %v14870_v28 = vor.u32 %v17115_v41, %v14867_v50  ;;  %v13523_v21 = vld [vmem:[#allocation9 + $0x710] sm:$0xf0]  ;;  %v18123_v20 = vpop.f32.mrf.mxu2  ;;  %v16767_v41 = vld [vmem:[#allocation9 + $0x684] sm:$0xf] }
 0x496   :  { %9447 = vmatpush.bf16.msrb.mxu1 %v13142_v48  ;;  %v17313_v48 = vld [vmem:[#allocation9 + $0x178c] sm:$0xf0]  ;;  %v13526_v37 = vor.u32 %v16779_v45, %v13523_v21  ;;  %v13475_v50 = vld [vmem:[#allocation9 + $0x6b0] sm:$0xf0]  ;;  %v17055_v55 = vld [vmem:[#allocation9 + $0xf84] sm:$0xf] }
 0x497   :  { %v15634_v57 = vor.u32 %v17313_v48, %v15633_v35  ;;  %9372 = vmatmul.bf16.vlgmr.msrb.gmra.mxu3 %v17879_v1  ;;  %v14726_v35 = vor.u32 %v17079_v26, %v14723_v30  ;;  %v16959_v48 = vld [vmem:[#allocation9 + $0xc84] sm:$0xf]  ;;  %v13478_v53 = vor.u32 %v16767_v41, %v13475_v50  ;;  %v15251_v26 = vld [vmem:[#allocation9 + $0x1490] sm:$0xf0]  ;;  %v12953_v30 = vld [vmem:[#allocation9 + $0x268] sm:$0xf] }
 0x498   :  { %9436 = vmatpush.bf16.msrb.mxu0 %v12662_v44  ;;  %9416 = vmatpush.bf16.msra.mxu3 %v15682_v23  ;;  %v16791_v44 = vld [vmem:[#allocation9 + $0x744] sm:$0xf]  ;;  %v9230_v7 = vpop.f32.mrf.mxu0  ;;  %v13385_v41 = vld [vmem:[#allocation9 + $0x5c8] sm:$0xf]  ;;  %v16750_v50 = vld [vmem:[#allocation9 + $0x5f4] sm:$0xf0] }
 0x499   :  { %9457 = vmatpush.bf16.msrb.mxu2 %v13670_v22  ;;  %v13574_v42 = vor.u32 %v16791_v44, %v13571_v61  ;;  %v9231_v32 = vadd.f32 %v9230_v7, %v4636_v14  ;;  %v17223_v61 = vld [vmem:[#allocation9 + $0x14c4] sm:$0xf]  ;;  %v13430_v7 = vor.u32 %v16755_v38, %v13427_v54  ;;  %v16630_v38 = vld [vmem:[#allocation9 + $0x234] sm:$0xf0] }
 0x49a   :  { %9448 = vmatpush.bf16.msrb.mxu1 %v13094_v25  ;;  %v14339_v25 = vld [vmem:[#allocation9 + $0xd70] sm:$0xf0]  ;;  %v9165_v14 = vpop.f32.mrf.mxu3 }
 0x49b   :  { %9437 = vmatmul.bf16.vlgmr.msrb.gmra.mxu0 %v17871_v10 }
 0x49c   :  { %9481 = vmatpush.bf16.msra.mxu0 %v14534_v16  ;;  %v16983_v16 = vld [vmem:[#allocation9 + $0xd44] sm:$0xf]  ;;  %9417 = vmatpush.bf16.msra.mxu3 %v15634_v57  ;;  %v15441_v57 = vld [vmem:[#allocation9 + $0x15e0] sm:$0xf] }
 0x49d   :  { %9458 = vmatpush.bf16.msrb.mxu2 %v13622_v24  ;;  %v14342_v15 = vor.u32 %v16983_v16, %v14339_v25  ;;  %v13001_v16 = vld [vmem:[#allocation9 + $0x2c8] sm:$0xf]  ;;  %v15442_v25 = vor.u32 %v17265_v59, %v15441_v57  ;;  %v13386_v57 = vor.u32 %v16750_v50, %v13385_v41  ;;  %v15059_v41 = vld [vmem:[#allocation9 + $0x1310] sm:$0xf0] }
 0x49e   :  { %9449 = vmatpush.bf16.msrb.mxu1 %v13046_v5  ;;  %v15538_v5 = vor.u32 %v17289_v46, %v15537_v18  ;;  %v9243_v58 = vpop.f32.mrf.mxu1  ;;  %v17253_v18 = vld [vmem:[#allocation9 + $0x15ac] sm:$0xf0]  ;;  %v9166_v46 = vadd.f32 %v9165_v14, %v18113_v17  ;;  %v12905_v59 = vld [vmem:[#allocation9 + $0x208] sm:$0xf] }
 0x49f   :  { %v18125_v22 = vadd.f32 %v9243_v58, %v9231_v32  ;;  %v16642_v32 = vld [vmem:[#allocation9 + $0x294] sm:$0xf0]  ;;  %v17043_v58 = vld [vmem:[#allocation9 + $0xf24] sm:$0xf]  ;;  %v17241_v17 = vld [vmem:[#allocation9 + $0x154c] sm:$0xf0] }
 0x4a0   :  { %9482 = vmatpush.bf16.msra.mxu0 %v14486_v0  ;;  %v14291_v0 = vld [vmem:[#allocation9 + $0xd10] sm:$0xf0]  ;;  %9418 = vmatpush.bf16.msra.mxu3 %v15586_v36  ;;  %v9232_v47 = vpop.f32.mrf.mxu0  ;;  %v16654_v36 = vld [vmem:[#allocation9 + $0x2f4] sm:$0xf0] }
 0x4a1   :  { %9450 = vmatmul.bf16.vlgmr.msrb.gmra.mxu1 %v17877_v31  ;;  %9459 = vmatpush.bf16.msrb.mxu2 %v13574_v42  ;;  %v14294_v23 = vor.u32 %v16971_v49, %v14291_v0  ;;  %v15393_v42 = vld [vmem:[#allocation9 + $0x1580] sm:$0xf]  ;;  %v17211_v49 = vld [vmem:[#allocation9 + $0x1464] sm:$0xf]  ;;  %v13002_v0 = vor.u32 %v16654_v36, %v13001_v16  ;;  %v15203_v47 = vld [vmem:[#allocation9 + $0x1430] sm:$0xf0]  ;;  %v12906_v16 = vor.u32 %v16630_v38, %v12905_v59 }
 0x4a2   :  { %9494 = vmatpush.bf16.msra.mxu1 %v14918_v29  ;;  %v15489_v29 = vld [vmem:[#allocation9 + $0x1640] sm:$0xf]  ;;  %v9167_v54 = vpop.f32.mrf.mxu3  ;;  %v15155_v36 = vld [vmem:[#allocation9 + $0x13d0] sm:$0xf0]  ;;  %v17151_v38 = vld [vmem:[#allocation9 + $0x1284] sm:$0xf] }
 0x4a3   :  { %v15490_v2 = vor.u32 %v17277_v43, %v15489_v29  ;;  %v15394_v29 = vor.u32 %v17253_v18, %v15393_v42  ;;  %v15345_v43 = vld [vmem:[#allocation9 + $0x1520] sm:$0xf]  ;;  %v16726_v42 = vld [vmem:[#allocation9 + $0x534] sm:$0xf0]  ;;  %v15011_v54 = vld [vmem:[#allocation9 + $0x12b0] sm:$0xf0] }
 0x4a4   :  { %9483 = vmatpush.bf16.msra.mxu0 %v14438_v51  ;;  %v14243_v51 = vld [vmem:[#allocation9 + $0xcb0] sm:$0xf0]  ;;  %9419 = vmatpush.bf16.msra.mxu3 %v15538_v5  ;;  %v14630_v5 = vor.u32 %v17055_v55, %v14627_v12  ;;  %v16618_v12 = vld [vmem:[#allocation9 + $0x1d4] sm:$0xf0] }
 0x4a5   :  { %9460 = vmatpush.bf16.msrb.mxu2 %v13526_v37  ;;  %v14246_v24 = vor.u32 %v16959_v48, %v14243_v51  ;;  %v9179_v37 = vadd.f32 %v18108_v11, %v9166_v46  ;;  %v16935_v48 = vld [vmem:[#allocation9 + $0xbc4] sm:$0xf]  ;;  %v14147_v51 = vld [vmem:[#allocation9 + $0xbf0] sm:$0xf0] }
 0x4a6   :  { %9495 = vmatpush.bf16.msra.mxu1 %v14870_v28  ;;  %v14675_v28 = vld [vmem:[#allocation9 + $0x1010] sm:$0xf0]  ;;  %v9245_v45 = vpop.f32.mrf.mxu1  ;;  %v16911_v46 = vld [vmem:[#allocation9 + $0xb04] sm:$0xf] }
 0x4a7   :  { %v14678_v44 = vor.u32 %v17067_v13, %v14675_v28  ;;  %v12954_v13 = vor.u32 %v16642_v32, %v12953_v30  ;;  %v17199_v28 = vld [vmem:[#allocation9 + $0x1404] sm:$0xf]  ;;  %v13241_v30 = vld [vmem:[#allocation9 + $0x4a8] sm:$0xf]  ;;  %v16714_v32 = vld [vmem:[#allocation9 + $0x4d4] sm:$0xf0] }
 0x4a8   :  { %9484 = vmatpush.bf16.msra.mxu0 %v14390_v60  ;;  %v14195_v60 = vld [vmem:[#allocation9 + $0xc50] sm:$0xf0]  ;;  %9420 = vmatpush.bf16.msra.mxu3 %v15490_v2  ;;  %v9192_v2 = vadd.f32 %v18110_v4, %v9179_v37  ;;  %v14150_v4 = vor.u32 %v16935_v48, %v14147_v51  ;;  %v13242_v50 = vor.u32 %v16714_v32, %v13241_v30  ;;  %v16594_v48 = vld [vmem:[#allocation9 + $0x114] sm:$0xf0]  ;;  %v16863_v30 = vld [vmem:[#allocation9 + $0x984] sm:$0xf] }
 0x4a9   :  { %9461 = vmatpush.bf16.msrb.mxu2 %v13478_v53  ;;  %v14198_v21 = vor.u32 %v16947_v3, %v14195_v60  ;;  %v15346_v53 = vor.u32 %v17241_v17, %v15345_v43  ;;  %v13337_v3 = vld [vmem:[#allocation9 + $0x568] sm:$0xf]  ;;  %v16738_v60 = vld [vmem:[#allocation9 + $0x594] sm:$0xf0]  ;;  %v16899_v43 = vld [vmem:[#allocation9 + $0xaa4] sm:$0xf] }
 0x4aa   :  { %9496 = vmatpush.bf16.msra.mxu1 %v14822_v8  ;;  %v15299_v8 = vld [vmem:[#allocation9 + $0x14f0] sm:$0xf0]  ;;  %v13338_v55 = vor.u32 %v16738_v60, %v13337_v3  ;;  %v17163_v17 = vld [vmem:[#allocation9 + $0x12e4] sm:$0xf]  ;;  %v12713_v60 = vld [vmem:[#allocation9 + $0x88] sm:$0xf] }
 0x4ab   :  { %v13859_v32 = vld [vmem:[#allocation9 + $0x9b0] sm:$0xf0] }
 0x4ac   :  { %9485 = vmatpush.bf16.msra.mxu0 %v14342_v15  ;;  %v9206_v15 = vpop.f32.mrf.mxu2  ;;  %9421 = vmatpush.bf16.msra.mxu3 %v15442_v25  ;;  %v17187_v25 = vld [vmem:[#allocation9 + $0x13a4] sm:$0xf] }
 0x4ad   :  { %9462 = vmatpush.bf16.msrb.mxu2 %v13430_v7  ;;  %v13289_v7 = vld [vmem:[#allocation9 + $0x508] sm:$0xf]  ;;  %v15158_v18 = vor.u32 %v17187_v25, %v15155_v36  ;;  %v14051_v15 = vld [vmem:[#allocation9 + $0xb30] sm:$0xf0]  ;;  %v15014_v36 = vor.u32 %v17151_v38, %v15011_v54  ;;  %v17319_v54 = vld [vmem:[#allocation9 + $0x17c4] sm:$0xf] }
 0x4ae   :  { %9497 = vmatpush.bf16.msra.mxu1 %v14774_v27  ;;  %v15302_v27 = vor.u32 %v17223_v61, %v15299_v8  ;;  %v16923_v61 = vld [vmem:[#allocation9 + $0xb64] sm:$0xf]  ;;  %v14099_v8 = vld [vmem:[#allocation9 + $0xb90] sm:$0xf0] }
 0x4af   :  { %v14102_v14 = vor.u32 %v16923_v61, %v14099_v8  ;;  %v13145_v8 = vld [vmem:[#allocation9 + $0x3e8] sm:$0xf] }
 0x4b0   :  { %9486 = vmatpush.bf16.msra.mxu0 %v14294_v23  ;;  %v14579_v23 = vld [vmem:[#allocation9 + $0xf50] sm:$0xf0]  ;;  %9422 = vmatpush.bf16.msra.mxu3 %v15394_v29 }
 0x4b1   :  { %9507 = vmatpush.bf16.msra.mxu2 %v15302_v27  ;;  %v14582_v11 = vor.u32 %v17043_v58, %v14579_v23  ;;  %v15107_v27 = vld [vmem:[#allocation9 + $0x1370] sm:$0xf0] }
 0x4b2   :  { %9498 = vmatpush.bf16.msra.mxu1 %v14726_v35  ;;  %v15254_v35 = vor.u32 %v17211_v49, %v15251_v26  ;;  %9463 = vmatmul.bf16.vlgmr.msrb.gmra.mxu2 %v17869_v9  ;;  %v13290_v49 = vor.u32 %v16726_v42, %v13289_v7  ;;  %v14054_v26 = vor.u32 %v16911_v46, %v14051_v15  ;;  %v14003_v58 = vld [vmem:[#allocation9 + $0xad0] sm:$0xf0]  ;;  %v12665_v42 = vld [vmem:[#allocation9 + $0x28] sm:$0xf]  ;;  %v16846_v15 = vld [vmem:[#allocation9 + $0x8f4] sm:$0xf0] }
 0x4b3   :  { %v14006_v51 = vor.u32 %v16899_v43, %v14003_v58  ;;  %v14963_v7 = vld [vmem:[#allocation9 + $0x1250] sm:$0xf0]  ;;  %v13769_v46 = vld [vmem:[#allocation9 + $0x8c8] sm:$0xf] }
 0x4b4   :  { %9487 = vmatpush.bf16.msra.mxu0 %v14246_v24  ;;  %v18132_v24 = vadd.f32 %v18123_v20, %v9192_v2  ;;  %9423 = vmatpush.bf16.msra.mxu3 %v15346_v53  ;;  %v12857_v20 = vld [vmem:[#allocation9 + $0x1a8] sm:$0xf] }
 0x4b5   :  { %9508 = vmatpush.bf16.msra.mxu2 %v15254_v35  ;;  %v12858_v45 = vor.u32 %v16618_v12, %v12857_v20  ;;  %v12761_v35 = vld [vmem:[#allocation9 + $0xe8] sm:$0xf]  ;;  %v9256_v53 = vpop.f32.mrf.mxu2  ;;  %v13907_v20 = vld [vmem:[#allocation9 + $0xa10] sm:$0xf0]  ;;  %v17139_v12 = vld [vmem:[#allocation9 + $0x1224] sm:$0xf] }
 0x4b6   :  { %9499 = vmatpush.bf16.msra.mxu1 %v14678_v44  ;;  %v15206_v44 = vor.u32 %v17199_v28, %v15203_v47  ;;  %v13193_v2 = vld [vmem:[#allocation9 + $0x448] sm:$0xf]  ;;  %v16887_v28 = vld [vmem:[#allocation9 + $0xa44] sm:$0xf]  ;;  %v13955_v47 = vld [vmem:[#allocation9 + $0xa70] sm:$0xf0]  ;;  %v12762_v59 = vor.u32 %v16594_v48, %v12761_v35 }
 0x4b7   :  { %9424 = vmatmul.bf16.vlgmr.msra.gmra.mxu3 %v17929_v62  ;;  %v13958_v61 = vor.u32 %v16887_v28, %v13955_v47  ;;  %v16834_v48 = vld [vmem:[#allocation9 + $0x894] sm:$0xf0]  ;;  %v13049_v28 = vld [vmem:[#allocation9 + $0x328] sm:$0xf] }
 0x4b8   :  { %9488 = vmatpush.bf16.msra.mxu0 %v14198_v21  ;;  %9468 = vmatpush.bf16.msrb.mxu3 %v14150_v4  ;;  %v17175_v21 = vld [vmem:[#allocation9 + $0x1344] sm:$0xf]  ;;  %v18137_v37 = vpop.f32.mrf.mxu0  ;;  %v18142_v4 = vadd.f32 %v9256_v53, %v18125_v22  ;;  %v16570_v22 = vld [vmem:[#allocation9 + $0x54] sm:$0xf0]  ;;  %v14921_v53 = vld [vmem:[#allocation9 + $0x11c8] sm:$0xf] }
 0x4b9   :  { %9509 = vmatpush.bf16.msra.mxu2 %v15206_v44  ;;  %v15110_v29 = vor.u32 %v17175_v21, %v15107_v27  ;;  %v16582_v44 = vld [vmem:[#allocation9 + $0xb4] sm:$0xf0] }
 0x4ba   :  { %9500 = vmatpush.bf16.msra.mxu1 %v14630_v5  ;;  %v16606_v5 = vld [vmem:[#allocation9 + $0x174] sm:$0xf0] }
 0x4bb   :  { %9489 = vmatmul.bf16.vlgmr.msra.gmra.mxu0 %v17893_v33  ;;  %v17038_v27 = vld [vmem:[#allocation9 + $0xef4] sm:$0xf0] }
 0x4bc   :  { %9533 = vmatpush.bf16.msrb.mxu0 %v13002_v0  ;;  %v12809_v0 = vld [vmem:[#allocation9 + $0x148] sm:$0xf]  ;;  %9469 = vmatpush.bf16.msrb.mxu3 %v14102_v14  ;;  %v12714_v14 = vor.u32 %v16582_v44, %v12713_v60  ;;  %v16666_v47 = vld [vmem:[#allocation9 + $0x354] sm:$0xf0] }
 0x4bd   :  { %9510 = vmatpush.bf16.msra.mxu2 %v15158_v18  ;;  %v12810_v23 = vor.u32 %v16606_v5, %v12809_v0  ;;  %v16678_v0 = vld [vmem:[#allocation9 + $0x3b4] sm:$0xf0]  ;;  %v9217_v5 = vpop.f32.mrf.mxu3  ;;  %v9258_v43 = vpop.f32.mrf.mxu2  ;;  %v13050_v44 = vor.u32 %v16666_v47, %v13049_v28 }
 0x4be   :  { %9501 = vmatpush.bf16.msra.mxu1 %v14582_v11  ;;  %v15062_v11 = vor.u32 %v17163_v17, %v15059_v41  ;;  %v13770_v17 = vor.u32 %v16846_v15, %v13769_v46  ;;  %v13721_v41 = vld [vmem:[#allocation9 + $0x868] sm:$0xf]  ;;  %v15587_v43 = vld [vmem:[#allocation9 + $0x1730] sm:$0xf0] }
 0x4bf   :  { %v13722_v38 = vor.u32 %v16834_v48, %v13721_v41  ;;  %v13625_v15 = vld [vmem:[#allocation9 + $0x7a8] sm:$0xf]  ;;  %v16798_v41 = vld [vmem:[#allocation9 + $0x774] sm:$0xf0] }
 0x4c0   :  { %9534 = vmatpush.bf16.msrb.mxu0 %v12954_v13  ;;  %9470 = vmatpush.bf16.msrb.mxu3 %v14054_v26  ;;  %v16702_v13 = vld [vmem:[#allocation9 + $0x474] sm:$0xf0]  ;;  %v9284_v25 = vpop.f32.mrf.mxu0  ;;  %v14966_v26 = vor.u32 %v17139_v12, %v14963_v7 }
 0x4c1   :  { %9502 = vmatmul.bf16.vlgmr.msra.gmra.mxu1 %v17896_v52  ;;  %9511 = vmatpush.bf16.msra.mxu2 %v15110_v29  ;;  %v13194_v3 = vor.u32 %v16702_v13, %v13193_v2  ;;  %v18145_v29 = vadd.f32 %v9217_v5, %v18132_v24  ;;  %v17026_v2 = vld [vmem:[#allocation9 + $0xe94] sm:$0xf0]  ;;  %v13862_v13 = vor.u32 %v16863_v30, %v13859_v32  ;;  %v13811_v24 = vld [vmem:[#allocation9 + $0x950] sm:$0xf0]  ;;  %v14825_v5 = vld [vmem:[#allocation9 + $0x1108] sm:$0xf] }
 0x4c2   :  { %9546 = vmatpush.bf16.msrb.mxu1 %v13386_v57  ;;  %v18139_v57 = vpop.f32.mrf.mxu1  ;;  %v17122_v7 = vld [vmem:[#allocation9 + $0x1194] sm:$0xf0]  ;;  %v17295_v32 = vld [vmem:[#allocation9 + $0x1704] sm:$0xf] }
 0x4c3   :  { %v16990_v48 = vld [vmem:[#allocation9 + $0xd74] sm:$0xf0] }
 0x4c4   :  { %9535 = vmatpush.bf16.msrb.mxu0 %v12906_v16  ;;  %9471 = vmatpush.bf16.msrb.mxu3 %v14006_v51  ;;  %v16690_v16 = vld [vmem:[#allocation9 + $0x414] sm:$0xf0]  ;;  %v14489_v51 = vld [vmem:[#allocation9 + $0xe68] sm:$0xf] }
 0x4c5   :  { %9512 = vmatpush.bf16.msra.mxu2 %v15062_v11  ;;  %v13146_v18 = vor.u32 %v16690_v16, %v13145_v8  ;;  %v16851_v11 = vld [vmem:[#allocation9 + $0x924] sm:$0xf]  ;;  %v14490_v60 = vor.u32 %v17026_v2, %v14489_v51  ;;  %v16822_v8 = vld [vmem:[#allocation9 + $0x834] sm:$0xf0]  ;;  %v15590_v51 = vor.u32 %v17295_v32, %v15587_v43  ;;  %v14777_v2 = vld [vmem:[#allocation9 + $0x10a8] sm:$0xf] }
 0x4c6   :  { %9547 = vmatpush.bf16.msrb.mxu1 %v13338_v55  ;;  %v16875_v55 = vld [vmem:[#allocation9 + $0x9e4] sm:$0xf]  ;;  %v13814_v16 = vor.u32 %v16851_v11, %v13811_v24  ;;  %v13433_v32 = vld [vmem:[#allocation9 + $0x628] sm:$0xf] }
 0x4c7   :  { %v13910_v21 = vor.u32 %v16875_v55, %v13907_v20  ;;  %v17014_v55 = vld [vmem:[#allocation9 + $0xe34] sm:$0xf0]  ;;  %v9219_v20 = vpop.f32.mrf.mxu3  ;;  %v17283_v24 = vld [vmem:[#allocation9 + $0x16a4] sm:$0xf] }
 0x4c8   :  { %9536 = vmatpush.bf16.msrb.mxu0 %v12858_v45  ;;  %v14537_v45 = vld [vmem:[#allocation9 + $0xec8] sm:$0xf]  ;;  %9472 = vmatpush.bf16.msrb.mxu3 %v13958_v61  ;;  %v15491_v20 = vld [vmem:[#allocation9 + $0x1670] sm:$0xf0] }
 0x4c9   :  { %9513 = vmatpush.bf16.msra.mxu2 %v15014_v36  ;;  %v13673_v61 = vld [vmem:[#allocation9 + $0x808] sm:$0xf] }
 0x4ca   :  { %9548 = vmatpush.bf16.msrb.mxu1 %v13290_v49  ;;  %v13097_v49 = vld [vmem:[#allocation9 + $0x388] sm:$0xf]  ;;  %v9297_v58 = vpop.f32.mrf.mxu1 }
 0x4cb   :  { %v13098_v35 = vor.u32 %v16678_v0, %v13097_v49  ;;  %v14441_v36 = vld [vmem:[#allocation9 + $0xe08] sm:$0xf]  ;;  %v17002_v49 = vld [vmem:[#allocation9 + $0xdd4] sm:$0xf0] }
 0x4cc   :  { %9537 = vmatpush.bf16.msrb.mxu0 %v12810_v23  ;;  %v12666_v23 = vor.u32 %v16570_v22, %v12665_v42  ;;  %9473 = vmatpush.bf16.msrb.mxu3 %v13910_v21  ;;  %v13674_v42 = vor.u32 %v16822_v8, %v13673_v61  ;;  %v17307_v22 = vld [vmem:[#allocation9 + $0x1764] sm:$0xf]  ;;  %v14442_v46 = vor.u32 %v17014_v55, %v14441_v36  ;;  %v18151_v58 = vld [vmem:[#allocation10 + $0x8] sm:$0xf] }
 0x4cd   :  { %9514 = vmatpush.bf16.msra.mxu2 %v14966_v26  ;;  %v17110_v26 = vld [vmem:[#allocation9 + $0x1134] sm:$0xf0]  ;;  %v4637_v11 = vperm.slane %v18151_v58, 0  ;;  %v14729_v8 = vld [vmem:[#allocation9 + $0x1048] sm:$0xf] }
 0x4ce   :  { %9549 = vmatpush.bf16.msrb.mxu1 %v13242_v50  ;;  %v14538_v50 = vor.u32 %v17038_v27, %v14537_v45  ;;  %v16810_v45 = vld [vmem:[#allocation9 + $0x7d4] sm:$0xf0]  ;;  %v14393_v27 = vld [vmem:[#allocation9 + $0xda8] sm:$0xf]  ;;  %v17271_v55 = vld [vmem:[#allocation9 + $0x1644] sm:$0xf] }
 0x4cf   :  { %v13626_v30 = vor.u32 %v16810_v45, %v13625_v15  ;;  %v14249_v15 = vld [vmem:[#allocation9 + $0xc88] sm:$0xf]  ;;  %v16966_v45 = vld [vmem:[#allocation9 + $0xcb4] sm:$0xf0] }
 0x4d0   :  { %9538 = vmatpush.bf16.msrb.mxu0 %v12762_v59  ;;  %v17134_v59 = vld [vmem:[#allocation9 + $0x11f4] sm:$0xf0]  ;;  %9474 = vmatpush.bf16.msrb.mxu3 %v13862_v13  ;;  %v14250_v43 = vor.u32 %v16966_v45, %v14249_v15  ;;  %v13387_v15 = vld [vmem:[#allocation9 + $0x5f8] sm:$0xf0] }
 0x4d1   :  { %9559 = vmatpush.bf16.msrb.mxu2 %v13770_v17  ;;  %v14922_v25 = vor.u32 %v17134_v59, %v14921_v53  ;;  %v13577_v17 = vld [vmem:[#allocation9 + $0x748] sm:$0xf]  ;;  %v17098_v13 = vld [vmem:[#allocation9 + $0x10d4] sm:$0xf0]  ;;  %v15539_v53 = vld [vmem:[#allocation9 + $0x16d0] sm:$0xf0] }
 0x4d2   :  { %9550 = vmatpush.bf16.msrb.mxu1 %v13194_v3  ;;  %v15683_v3 = vld [vmem:[#allocation9 + $0x17f0] sm:$0xf0]  ;;  %9515 = vmatmul.bf16.vlgmr.msra.gmra.mxu2 %v17918_v63  ;;  %v13578_v47 = vor.u32 %v16798_v41, %v13577_v17  ;;  %v15542_v61 = vor.u32 %v17283_v24, %v15539_v53  ;;  %v14201_v17 = vld [vmem:[#allocation9 + $0xc28] sm:$0xf]  ;;  %v16954_v41 = vld [vmem:[#allocation9 + $0xc54] sm:$0xf0] }
 0x4d3   :  { %v15686_v12 = vor.u32 %v17319_v54, %v15683_v3  ;;  %v16786_v54 = vld [vmem:[#allocation9 + $0x714] sm:$0xf0]  ;;  %v14778_v3 = vor.u32 %v17098_v13, %v14777_v2  ;;  %v13003_v13 = vld [vmem:[#allocation9 + $0x2f8] sm:$0xf0]  ;;  %v17247_v53 = vld [vmem:[#allocation9 + $0x1584] sm:$0xf] }
 0x4d4   :  { %9539 = vmatpush.bf16.msrb.mxu0 %v12714_v14  ;;  %v14873_v14 = vld [vmem:[#allocation9 + $0x1168] sm:$0xf]  ;;  %9475 = vmatpush.bf16.msrb.mxu3 %v13814_v16  ;;  %v17086_v16 = vld [vmem:[#allocation9 + $0x1074] sm:$0xf0] }
 0x4d5   :  { %9560 = vmatpush.bf16.msrb.mxu2 %v13722_v38  ;;  %v14874_v21 = vor.u32 %v17122_v7, %v14873_v14  ;;  %v13529_v38 = vld [vmem:[#allocation9 + $0x6e8] sm:$0xf] }
 0x4d6   :  { %9551 = vmatpush.bf16.msrb.mxu1 %v13146_v18  ;;  %v15635_v18 = vld [vmem:[#allocation9 + $0x1790] sm:$0xf0]  ;;  %v13530_v36 = vor.u32 %v16786_v54, %v13529_v38 }
 0x4d7   :  { %v15638_v0 = vor.u32 %v17307_v22, %v15635_v18  ;;  %9476 = vmatmul.bf16.vlgmr.msrb.gmra.mxu3 %v17879_v1  ;;  %v16774_v22 = vld [vmem:[#allocation9 + $0x6b4] sm:$0xf0] }
 0x4d8   :  { %9540 = vmatpush.bf16.msrb.mxu0 %v12666_v23  ;;  %9520 = vmatpush.bf16.msra.mxu3 %v15686_v12  ;;  %v14394_v23 = vor.u32 %v17002_v49, %v14393_v27  ;;  %v9334_v28 = vpop.f32.mrf.mxu0  ;;  %v18154_v12 = vpop.f32.mrf.mxu2  ;;  %v14681_v27 = vld [vmem:[#allocation9 + $0xfe8] sm:$0xf]  ;;  %v17074_v49 = vld [vmem:[#allocation9 + $0x1014] sm:$0xf0] }
 0x4d9   :  { %9561 = vmatpush.bf16.msrb.mxu2 %v13674_v42  ;;  %v13481_v42 = vld [vmem:[#allocation9 + $0x688] sm:$0xf] }
 0x4da   :  { %9552 = vmatpush.bf16.msrb.mxu1 %v13098_v35  ;;  %v14345_v35 = vld [vmem:[#allocation9 + $0xd48] sm:$0xf] }
 0x4db   :  { %9541 = vmatmul.bf16.vlgmr.msrb.gmra.mxu0 %v17871_v10  ;;  %v14346_v59 = vor.u32 %v16990_v48, %v14345_v35  ;;  %v15305_v35 = vld [vmem:[#allocation9 + $0x14c8] sm:$0xf]  ;;  %v17230_v48 = vld [vmem:[#allocation9 + $0x14f4] sm:$0xf0] }
 0x4dc   :  { %9585 = vmatpush.bf16.msra.mxu0 %v14538_v50  ;;  %v14826_v50 = vor.u32 %v17110_v26, %v14825_v5  ;;  %9521 = vmatpush.bf16.msra.mxu3 %v15638_v0  ;;  %v13482_v5 = vor.u32 %v16774_v22, %v13481_v42  ;;  %v17259_v26 = vld [vmem:[#allocation9 + $0x15e4] sm:$0xf]  ;;  %v14585_v42 = vld [vmem:[#allocation9 + $0xf28] sm:$0xf]  ;;  %v17050_v22 = vld [vmem:[#allocation9 + $0xf54] sm:$0xf0] }
 0x4dd   :  { %9562 = vmatpush.bf16.msrb.mxu2 %v13626_v30  ;;  %v15443_v30 = vld [vmem:[#allocation9 + $0x1610] sm:$0xf0] }
 0x4de   :  { %9553 = vmatpush.bf16.msrb.mxu1 %v13050_v44  ;;  %v16978_v44 = vld [vmem:[#allocation9 + $0xd14] sm:$0xf0]  ;;  %v9347_v14 = vpop.f32.mrf.mxu1  ;;  %v15446_v2 = vor.u32 %v17259_v26, %v15443_v30 }
 0x4df   :  { %v17206_v26 = vld [vmem:[#allocation9 + $0x1434] sm:$0xf0] }
 0x4e0   :  { %9586 = vmatpush.bf16.msra.mxu0 %v14490_v60  ;;  %v14297_v60 = vld [vmem:[#allocation9 + $0xce8] sm:$0xf]  ;;  %9522 = vmatpush.bf16.msra.mxu3 %v15590_v51  ;;  %v9336_v0 = vpop.f32.mrf.mxu0  ;;  %v16648_v51 = vld [vmem:[#allocation9 + $0x2cc] sm:$0xf]  ;;  %v9310_v54 = vpop.f32.mrf.mxu2 }
 0x4e1   :  { %9554 = vmatmul.bf16.vlgmr.msrb.gmra.mxu1 %v17877_v31  ;;  %9563 = vmatpush.bf16.msrb.mxu2 %v13578_v47  ;;  %v14298_v7 = vor.u32 %v16978_v44, %v14297_v60  ;;  %v9269_v47 = vpop.f32.mrf.mxu3  ;;  %v14202_v60 = vor.u32 %v16954_v41, %v14201_v17  ;;  %v15306_v44 = vor.u32 %v17230_v48, %v15305_v35  ;;  %v13339_v35 = vld [vmem:[#allocation9 + $0x598] sm:$0xf0] }
 0x4e2   :  { %9598 = vmatpush.bf16.msra.mxu1 %v14922_v25  ;;  %v9335_v25 = vadd.f32 %v9334_v28, %v4637_v11  ;;  %v14633_v11 = vld [vmem:[#allocation9 + $0xf88] sm:$0xf]  ;;  %v17062_v28 = vld [vmem:[#allocation9 + $0xfb4] sm:$0xf0]  ;;  %v9270_v38 = vadd.f32 %v9269_v47, %v18142_v4  ;;  %v15347_v4 = vld [vmem:[#allocation9 + $0x1550] sm:$0xf0] }
 0x4e4   :  { %9587 = vmatpush.bf16.msra.mxu0 %v14442_v46  ;;  %v18156_v18 = vadd.f32 %v9347_v14, %v9335_v25  ;;  %v14730_v46 = vor.u32 %v17086_v16, %v14729_v8  ;;  %9523 = vmatpush.bf16.msra.mxu3 %v15542_v61  ;;  %v15257_v61 = vld [vmem:[#allocation9 + $0x1468] sm:$0xf]  ;;  %v13006_v8 = vor.u32 %v16648_v51, %v13003_v13  ;;  %v17218_v25 = vld [vmem:[#allocation9 + $0x1494] sm:$0xf0] }
 0x4e5   :  { %9564 = vmatpush.bf16.msrb.mxu2 %v13530_v36  ;;  %v14634_v16 = vor.u32 %v17062_v28, %v14633_v11  ;;  %v16636_v36 = vld [vmem:[#allocation9 + $0x26c] sm:$0xf]  ;;  %v15258_v45 = vor.u32 %v17218_v25, %v15257_v61  ;;  %v14105_v51 = vld [vmem:[#allocation9 + $0xb68] sm:$0xf]  ;;  %v17194_v28 = vld [vmem:[#allocation9 + $0x13d4] sm:$0xf0] }
 0x4e6   :  { %9599 = vmatpush.bf16.msra.mxu1 %v14874_v21  ;;  %v15494_v21 = vor.u32 %v17271_v55, %v15491_v20  ;;  %v12955_v55 = vld [vmem:[#allocation9 + $0x298] sm:$0xf0]  ;;  %v9283_v20 = vadd.f32 %v18137_v37, %v9270_v38  ;;  %v14586_v37 = vor.u32 %v17050_v22, %v14585_v42  ;;  %v15161_v11 = vld [vmem:[#allocation9 + $0x13a8] sm:$0xf]  ;;  %v16600_v25 = vld [vmem:[#allocation9 + $0x14c] sm:$0xf] }
 0x4e7   :  { %v12958_v0 = vor.u32 %v16636_v36, %v12955_v55  ;;  %v13291_v38 = vld [vmem:[#allocation9 + $0x538] sm:$0xf0]  ;;  %v15162_v54 = vor.u32 %v17194_v28, %v15161_v11  ;;  %v15113_v61 = vld [vmem:[#allocation9 + $0x1348] sm:$0xf]  ;;  %v16684_v11 = vld [vmem:[#allocation9 + $0x3ec] sm:$0xf] }
 0x4e8   :  { %9588 = vmatpush.bf16.msra.mxu0 %v14394_v23  ;;  %v16762_v23 = vld [vmem:[#allocation9 + $0x654] sm:$0xf0]  ;;  %9524 = vmatpush.bf16.msra.mxu3 %v15494_v21  ;;  %v14153_v21 = vld [vmem:[#allocation9 + $0xbc8] sm:$0xf]  ;;  %v12811_v36 = vld [vmem:[#allocation9 + $0x178] sm:$0xf0] }
 0x4e9   :  { %9565 = vmatpush.bf16.msrb.mxu2 %v13482_v5  ;;  %v13434_v24 = vor.u32 %v16762_v23, %v13433_v32  ;;  %v15209_v5 = vld [vmem:[#allocation9 + $0x1408] sm:$0xf]  ;;  %v12907_v23 = vld [vmem:[#allocation9 + $0x238] sm:$0xf0]  ;;  %v9271_v41 = vpop.f32.mrf.mxu3 }
 0x4ea   :  { %9600 = vmatpush.bf16.msra.mxu1 %v14826_v50  ;;  %v14682_v50 = vor.u32 %v17074_v49, %v14681_v27  ;;  %v16942_v27 = vld [vmem:[#allocation9 + $0xbf4] sm:$0xf0]  ;;  %v9296_v49 = vadd.f32 %v18139_v57, %v9283_v20  ;;  %v15210_v48 = vor.u32 %v17206_v26, %v15209_v5  ;;  %v16708_v20 = vld [vmem:[#allocation9 + $0x4ac] sm:$0xf]  ;;  %v14009_v22 = vld [vmem:[#allocation9 + $0xaa8] sm:$0xf] }
 0x4eb   :  { %v14154_v57 = vor.u32 %v16942_v27, %v14153_v21  ;;  %v16588_v27 = vld [vmem:[#allocation9 + $0xec] sm:$0xf]  ;;  %v13195_v5 = vld [vmem:[#allocation9 + $0x478] sm:$0xf0] }
 0x4ec   :  { %9589 = vmatpush.bf16.msra.mxu0 %v14346_v59  ;;  %v15395_v59 = vld [vmem:[#allocation9 + $0x15b0] sm:$0xf0]  ;;  %9525 = vmatpush.bf16.msra.mxu3 %v15446_v2  ;;  %v18163_v17 = vadd.f32 %v18154_v12, %v9296_v49  ;;  %v16930_v2 = vld [vmem:[#allocation9 + $0xb94] sm:$0xf0]  ;;  %v16612_v12 = vld [vmem:[#allocation9 + $0x1ac] sm:$0xf] }
 0x4ed   :  { %v15398_v14 = vor.u32 %v17247_v53, %v15395_v59  ;;  %9566 = vmatpush.bf16.msrb.mxu2 %v13434_v24  ;;  %v12859_v24 = vld [vmem:[#allocation9 + $0x1d8] sm:$0xf0]  ;;  %v14106_v53 = vor.u32 %v16930_v2, %v14105_v51  ;;  %v16720_v59 = vld [vmem:[#allocation9 + $0x50c] sm:$0xf] }
 0x4ee   :  { %9601 = vmatpush.bf16.msra.mxu1 %v14778_v3  ;;  %v9349_v3 = vpop.f32.mrf.mxu1  ;;  %v12763_v49 = vld [vmem:[#allocation9 + $0x118] sm:$0xf0]  ;;  %v16576_v51 = vld [vmem:[#allocation9 + $0x8c] sm:$0xf] }
 0x4ef   :  { %v14057_v3 = vld [vmem:[#allocation9 + $0xb08] sm:$0xf]  ;;  %v12766_v41 = vor.u32 %v16588_v27, %v12763_v49  ;;  %v12715_v2 = vld [vmem:[#allocation9 + $0xb8] sm:$0xf0]  ;;  %v16828_v27 = vld [vmem:[#allocation9 + $0x86c] sm:$0xf] }
 0x4f0   :  { %9590 = vmatpush.bf16.msra.mxu0 %v14298_v7  ;;  %v17235_v7 = vld [vmem:[#allocation9 + $0x1524] sm:$0xf]  ;;  %9526 = vmatpush.bf16.msra.mxu3 %v15398_v14  ;;  %v13243_v14 = vld [vmem:[#allocation9 + $0x4d8] sm:$0xf0] }
 0x4f1   :  { %9611 = vmatpush.bf16.msra.mxu2 %v15306_v44  ;;  %v15350_v30 = vor.u32 %v17235_v7, %v15347_v4  ;;  %v12862_v44 = vor.u32 %v16612_v12, %v12859_v24  ;;  %v16906_v4 = vld [vmem:[#allocation9 + $0xad4] sm:$0xf0]  ;;  %v13246_v21 = vor.u32 %v16708_v20, %v13243_v14  ;;  %v13147_v28 = vld [vmem:[#allocation9 + $0x418] sm:$0xf0]  ;;  %v13913_v24 = vld [vmem:[#allocation9 + $0x9e8] sm:$0xf] }
 0x4f2   :  { %9602 = vmatpush.bf16.msra.mxu1 %v14730_v46  ;;  %v16744_v46 = vld [vmem:[#allocation9 + $0x5cc] sm:$0xf]  ;;  %9567 = vmatmul.bf16.vlgmr.msrb.gmra.mxu2 %v17869_v9 }
 0x4f3   :  { %v13390_v32 = vor.u32 %v16744_v46, %v13387_v15  ;;  %v12814_v46 = vor.u32 %v16600_v25, %v12811_v36  ;;  %v15065_v15 = vld [vmem:[#allocation9 + $0x12e8] sm:$0xf]  ;;  %v14539_v25 = vld [vmem:[#allocation9 + $0xef8] sm:$0xf0]  ;;  %v16672_v36 = vld [vmem:[#allocation9 + $0x38c] sm:$0xf] }
 0x4f4   :  { %9591 = vmatpush.bf16.msra.mxu0 %v14250_v43  ;;  %v16624_v43 = vld [vmem:[#allocation9 + $0x20c] sm:$0xf]  ;;  %9527 = vmatpush.bf16.msra.mxu3 %v15350_v30  ;;  %v13961_v30 = vld [vmem:[#allocation9 + $0xa48] sm:$0xf] }
 0x4f5   :  { %9612 = vmatpush.bf16.msra.mxu2 %v15258_v45  ;;  %v12910_v13 = vor.u32 %v16624_v43, %v12907_v23  ;;  %v17170_v45 = vld [vmem:[#allocation9 + $0x1314] sm:$0xf0]  ;;  %v9360_v43 = vpop.f32.mrf.mxu2 }
 0x4f6   :  { %9603 = vmatpush.bf16.msra.mxu1 %v14682_v50  ;;  %v16732_v50 = vld [vmem:[#allocation9 + $0x56c] sm:$0xf]  ;;  %v15066_v26 = vor.u32 %v17170_v45, %v15065_v15 }
 0x4f7   :  { %v13342_v47 = vor.u32 %v16732_v50, %v13339_v35  ;;  %9528 = vmatmul.bf16.vlgmr.msra.gmra.mxu3 %v17929_v62  ;;  %v17158_v50 = vld [vmem:[#allocation9 + $0x12b4] sm:$0xf0]  ;;  %v18173_v35 = vadd.f32 %v9360_v43, %v18156_v18  ;;  %v12667_v18 = vld [vmem:[#allocation9 + $0x58] sm:$0xf0]  ;;  %v16660_v43 = vld [vmem:[#allocation9 + $0x32c] sm:$0xf] }
 0x4f8   :  { %9592 = vmatpush.bf16.msra.mxu0 %v14202_v60  ;;  %9572 = vmatpush.bf16.msrb.mxu3 %v14154_v57  ;;  %v16918_v60 = vld [vmem:[#allocation9 + $0xb34] sm:$0xf0]  ;;  %v18168_v7 = vpop.f32.mrf.mxu0  ;;  %v15017_v57 = vld [vmem:[#allocation9 + $0x1288] sm:$0xf] }
 0x4f9   :  { %9613 = vmatpush.bf16.msra.mxu2 %v15210_v48  ;;  %v14058_v55 = vor.u32 %v16918_v60, %v14057_v3  ;;  %v15018_v12 = vor.u32 %v17158_v50, %v15017_v57  ;;  %v16564_v3 = vld [vmem:[#allocation9 + $0x2c] sm:$0xf]  ;;  %v13150_v60 = vor.u32 %v16684_v11, %v13147_v28  ;;  %v14923_v50 = vld [vmem:[#allocation9 + $0x11f8] sm:$0xf0] }
 0x4fa   :  { %9604 = vmatpush.bf16.msra.mxu1 %v14634_v16  ;;  %v13294_v16 = vor.u32 %v16720_v59, %v13291_v38  ;;  %v14969_v59 = vld [vmem:[#allocation9 + $0x1228] sm:$0xf]  ;;  %v12718_v38 = vor.u32 %v16576_v51, %v12715_v2  ;;  %v9321_v20 = vpop.f32.mrf.mxu3  ;;  %v12670_v45 = vor.u32 %v16564_v3, %v12667_v18  ;;  %v17128_v57 = vld [vmem:[#allocation9 + $0x11cc] sm:$0xf]  ;;  %v17326_v2 = vld [vmem:[#allocation9 + $0x17f4] sm:$0xf0] }
 0x4fb   :  { %9593 = vmatmul.bf16.vlgmr.msra.gmra.mxu0 %v17893_v33  ;;  %v15689_v51 = vld [vmem:[#allocation9 + $0x17c8] sm:$0xf]  ;;  %v16816_v28 = vld [vmem:[#allocation9 + $0x80c] sm:$0xf]  ;;  %v14875_v18 = vld [vmem:[#allocation9 + $0x1198] sm:$0xf0] }
 0x4fc   :  { %9637 = vmatpush.bf16.msrb.mxu0 %v13006_v8  ;;  %v17182_v8 = vld [vmem:[#allocation9 + $0x1374] sm:$0xf0]  ;;  %9573 = vmatpush.bf16.msrb.mxu3 %v14106_v53  ;;  %v17116_v3 = vld [vmem:[#allocation9 + $0x116c] sm:$0xf] }
 0x4fd   :  { %9614 = vmatpush.bf16.msra.mxu2 %v15162_v54  ;;  %v15114_v42 = vor.u32 %v17182_v8, %v15113_v61  ;;  %v16882_v53 = vld [vmem:[#allocation9 + $0xa14] sm:$0xf0]  ;;  %v13771_v61 = vld [vmem:[#allocation9 + $0x8f8] sm:$0xf0]  ;;  %v17032_v8 = vld [vmem:[#allocation9 + $0xecc] sm:$0xf] }
 0x4fe   :  { %9605 = vmatpush.bf16.msra.mxu1 %v14586_v37  ;;  %v16696_v37 = vld [vmem:[#allocation9 + $0x44c] sm:$0xf]  ;;  %v18170_v23 = vpop.f32.mrf.mxu1  ;;  %v17146_v54 = vld [vmem:[#allocation9 + $0x1254] sm:$0xf0]  ;;  %v14542_v49 = vor.u32 %v17032_v8, %v14539_v25  ;;  %v13627_v25 = vld [vmem:[#allocation9 + $0x7d8] sm:$0xf0] }
 0x4ff   :  { %v13198_v48 = vor.u32 %v16696_v37, %v13195_v5  ;;  %v14970_v14 = vor.u32 %v17146_v54, %v14969_v59  ;;  %v13723_v37 = vld [vmem:[#allocation9 + $0x898] sm:$0xf0]  ;;  %v17020_v5 = vld [vmem:[#allocation9 + $0xe6c] sm:$0xf]  ;;  %v15690_v54 = vor.u32 %v17326_v2, %v15689_v51 }
 0x500   :  { %9638 = vmatpush.bf16.msrb.mxu0 %v12958_v0  ;;  %9574 = vmatpush.bf16.msrb.mxu3 %v14058_v55  ;;  %v14010_v0 = vor.u32 %v16906_v4, %v14009_v22  ;;  %v13099_v55 = vld [vmem:[#allocation9 + $0x3b8] sm:$0xf0]  ;;  %v16870_v22 = vld [vmem:[#allocation9 + $0x9b4] sm:$0xf0]  ;;  %v18176_v4 = vadd.f32 %v9321_v20, %v18163_v17  ;;  %v16972_v2 = vld [vmem:[#allocation9 + $0xcec] sm:$0xf] }
 0x501   :  { %9606 = vmatmul.bf16.vlgmr.msra.gmra.mxu1 %v17896_v52  ;;  %9615 = vmatpush.bf16.msra.mxu2 %v15114_v42  ;;  %v13865_v42 = vld [vmem:[#allocation9 + $0x988] sm:$0xf]  ;;  %v16858_v17 = vld [vmem:[#allocation9 + $0x954] sm:$0xf0]  ;;  %v14443_v59 = vld [vmem:[#allocation9 + $0xe38] sm:$0xf0] }
 0x502   :  { %9650 = vmatpush.bf16.msrb.mxu1 %v13390_v32  ;;  %v16894_v32 = vld [vmem:[#allocation9 + $0xa74] sm:$0xf0]  ;;  %v14395_v20 = vld [vmem:[#allocation9 + $0xdd8] sm:$0xf0] }
 0x504   :  { %9639 = vmatpush.bf16.msrb.mxu0 %v12910_v13  ;;  %9575 = vmatpush.bf16.msrb.mxu3 %v14010_v0  ;;  %v13962_v13 = vor.u32 %v16894_v32, %v13961_v30  ;;  %v13102_v0 = vor.u32 %v16672_v36, %v13099_v55  ;;  %v13866_v30 = vor.u32 %v16870_v22, %v13865_v42  ;;  %v13817_v32 = vld [vmem:[#allocation9 + $0x928] sm:$0xf]  ;;  %v16996_v55 = vld [vmem:[#allocation9 + $0xdac] sm:$0xf]  ;;  %v14827_v42 = vld [vmem:[#allocation9 + $0x1138] sm:$0xf0] }
 0x505   :  { %9616 = vmatpush.bf16.msra.mxu2 %v15066_v26  ;;  %v14491_v26 = vld [vmem:[#allocation9 + $0xe98] sm:$0xf0]  ;;  %v14878_v36 = vor.u32 %v17116_v3, %v14875_v18  ;;  %v16768_v3 = vld [vmem:[#allocation9 + $0x68c] sm:$0xf] }
 0x506   :  { %9651 = vmatpush.bf16.msrb.mxu1 %v13342_v47  ;;  %v9388_v47 = vpop.f32.mrf.mxu0  ;;  %v9401_v15 = vpop.f32.mrf.mxu1  ;;  %v13483_v18 = vld [vmem:[#allocation9 + $0x6b8] sm:$0xf0] }
 0x507   :  { %v13675_v47 = vld [vmem:[#allocation9 + $0x838] sm:$0xf0]  ;;  %v17302_v15 = vld [vmem:[#allocation9 + $0x1734] sm:$0xf0] }
 0x508   :  { %9640 = vmatpush.bf16.msrb.mxu0 %v12862_v44  ;;  %v16840_v44 = vld [vmem:[#allocation9 + $0x8cc] sm:$0xf]  ;;  %9576 = vmatpush.bf16.msrb.mxu3 %v13962_v13  ;;  %v14494_v13 = vor.u32 %v17020_v5, %v14491_v26 }
 0x509   :  { %9617 = vmatpush.bf16.msra.mxu2 %v15018_v12  ;;  %v13818_v12 = vor.u32 %v16858_v17, %v13817_v32  ;;  %v17092_v26 = vld [vmem:[#allocation9 + $0x10ac] sm:$0xf]  ;;  %v17290_v17 = vld [vmem:[#allocation9 + $0x16d4] sm:$0xf0] }
 0x50a   :  { %9652 = vmatpush.bf16.msrb.mxu1 %v13294_v16  ;;  %v13914_v16 = vor.u32 %v16882_v53, %v13913_v24  ;;  %v14926_v24 = vor.u32 %v17128_v57, %v14923_v50  ;;  %v17008_v53 = vld [vmem:[#allocation9 + $0xe0c] sm:$0xf] }
 0x50b   :  { %v14446_v8 = vor.u32 %v17008_v53, %v14443_v59  ;;  %v16780_v50 = vld [vmem:[#allocation9 + $0x6ec] sm:$0xf]  ;;  %v17278_v53 = vld [vmem:[#allocation9 + $0x1674] sm:$0xf0] }
 0x50c   :  { %9641 = vmatpush.bf16.msrb.mxu0 %v12814_v46  ;;  %v9362_v46 = vpop.f32.mrf.mxu2  ;;  %9577 = vmatpush.bf16.msrb.mxu3 %v13914_v16  ;;  %v16804_v16 = vld [vmem:[#allocation9 + $0x7ac] sm:$0xf] }
 0x50d   :  { %9618 = vmatpush.bf16.msra.mxu2 %v14970_v14  ;;  %v13630_v22 = vor.u32 %v16804_v16, %v13627_v25  ;;  %v15593_v46 = vld [vmem:[#allocation9 + $0x1708] sm:$0xf]  ;;  %v17068_v25 = vld [vmem:[#allocation9 + $0xfec] sm:$0xf] }
 0x50e   :  { %9653 = vmatpush.bf16.msrb.mxu1 %v13246_v21  ;;  %v13774_v21 = vor.u32 %v16840_v44, %v13771_v61  ;;  %v15641_v44 = vld [vmem:[#allocation9 + $0x1768] sm:$0xf]  ;;  %v17314_v61 = vld [vmem:[#allocation9 + $0x1794] sm:$0xf0]  ;;  %v15594_v5 = vor.u32 %v17302_v15, %v15593_v46  ;;  %v13435_v46 = vld [vmem:[#allocation9 + $0x658] sm:$0xf0] }
 0x50f   :  { %v15642_v14 = vor.u32 %v17314_v61, %v15641_v44  ;;  %v16960_v61 = vld [vmem:[#allocation9 + $0xc8c] sm:$0xf] }
 0x510   :  { %9642 = vmatpush.bf16.msrb.mxu0 %v12766_v41  ;;  %v13051_v41 = vld [vmem:[#allocation9 + $0x358] sm:$0xf0]  ;;  %9578 = vmatpush.bf16.msrb.mxu3 %v13866_v30  ;;  %v16948_v15 = vld [vmem:[#allocation9 + $0xc2c] sm:$0xf] }
 0x511   :  { %9663 = vmatpush.bf16.msrb.mxu2 %v13774_v21  ;;  %v13054_v11 = vor.u32 %v16660_v43, %v13051_v41  ;;  %v16792_v21 = vld [vmem:[#allocation9 + $0x74c] sm:$0xf]  ;;  %v14779_v30 = vld [vmem:[#allocation9 + $0x10d8] sm:$0xf0]  ;;  %v15545_v41 = vld [vmem:[#allocation9 + $0x16a8] sm:$0xf] }
 0x512   :  { %9654 = vmatpush.bf16.msrb.mxu1 %v13198_v48  ;;  %v13726_v48 = vor.u32 %v16828_v27, %v13723_v37  ;;  %9619 = vmatmul.bf16.vlgmr.msra.gmra.mxu2 %v17918_v63  ;;  %v13579_v27 = vld [vmem:[#allocation9 + $0x778] sm:$0xf0]  ;;  %v14782_v51 = vor.u32 %v17092_v26, %v14779_v30 }
 0x513   :  { %v14347_v37 = vld [vmem:[#allocation9 + $0xd78] sm:$0xf0]  ;;  %v13582_v43 = vor.u32 %v16792_v21, %v13579_v27  ;;  %v17224_v27 = vld [vmem:[#allocation9 + $0x14cc] sm:$0xf] }
 0x514   :  { %9643 = vmatpush.bf16.msrb.mxu0 %v12718_v38  ;;  %v9323_v38 = vpop.f32.mrf.mxu3  ;;  %9579 = vmatpush.bf16.msrb.mxu3 %v13818_v12  ;;  %v14203_v21 = vld [vmem:[#allocation9 + $0xc58] sm:$0xf0] }
 0x515   :  { %9664 = vmatpush.bf16.msrb.mxu2 %v13726_v48  ;;  %v13531_v48 = vld [vmem:[#allocation9 + $0x718] sm:$0xf0]  ;;  %v18183_v59 = vpop.f32.mrf.mxu2 }
 0x516   :  { %9655 = vmatpush.bf16.msrb.mxu1 %v13150_v60  ;;  %v13678_v60 = vor.u32 %v16816_v28, %v13675_v47  ;;  %v17080_v28 = vld [vmem:[#allocation9 + $0x104c] sm:$0xf]  ;;  %v14731_v47 = vld [vmem:[#allocation9 + $0x1078] sm:$0xf0] }
 0x517   :  { %9580 = vmatmul.bf16.vlgmr.msrb.gmra.mxu3 %v17879_v1  ;;  %v14734_v44 = vor.u32 %v17080_v28, %v14731_v47  ;;  %v17044_v47 = vld [vmem:[#allocation9 + $0xf2c] sm:$0xf] }
 0x518   :  { %9644 = vmatpush.bf16.msrb.mxu0 %v12670_v45  ;;  %9624 = vmatpush.bf16.msra.mxu3 %v15690_v54  ;;  %v14398_v45 = vor.u32 %v16996_v55, %v14395_v20  ;;  %v9438_v32 = vpop.f32.mrf.mxu0  ;;  %v13486_v20 = vor.u32 %v16768_v3, %v13483_v18  ;;  %v17200_v18 = vld [vmem:[#allocation9 + $0x140c] sm:$0xf] }
 0x519   :  { %9665 = vmatpush.bf16.msrb.mxu2 %v13678_v60 }
 0x51a   :  { %9656 = vmatpush.bf16.msrb.mxu1 %v13102_v0  ;;  %v16984_v0 = vld [vmem:[#allocation9 + $0xd4c] sm:$0xf] }
 0x51b   :  { %9645 = vmatmul.bf16.vlgmr.msrb.gmra.mxu0 %v17871_v10  ;;  %v17104_v10 = vld [vmem:[#allocation9 + $0x110c] sm:$0xf]  ;;  %v14350_v57 = vor.u32 %v16984_v0, %v14347_v37 }
 0x51c   :  { %9689 = vmatpush.bf16.msra.mxu0 %v14542_v49  ;;  %v14830_v49 = vor.u32 %v17104_v10, %v14827_v42  ;;  %9625 = vmatpush.bf16.msra.mxu3 %v15642_v14  ;;  %v15449_v14 = vld [vmem:[#allocation9 + $0x15e8] sm:$0xf]  ;;  %v17266_v10 = vld [vmem:[#allocation9 + $0x1614] sm:$0xf0]  ;;  %v17056_v37 = vld [vmem:[#allocation9 + $0xf8c] sm:$0xf]  ;;  %v9373_v26 = vpop.f32.mrf.mxu3 }
 0x51d   :  { %9666 = vmatpush.bf16.msrb.mxu2 %v13630_v22  ;;  %v16756_v22 = vld [vmem:[#allocation9 + $0x62c] sm:$0xf]  ;;  %v15450_v0 = vor.u32 %v17266_v10, %v15449_v14  ;;  %v15163_v10 = vld [vmem:[#allocation9 + $0x13d8] sm:$0xf0] }
 0x51e   :  { %9657 = vmatpush.bf16.msrb.mxu1 %v13054_v11  ;;  %v15546_v11 = vor.u32 %v17290_v17, %v15545_v41  ;;  %v9451_v38 = vpop.f32.mrf.mxu1  ;;  %v13438_v30 = vor.u32 %v16756_v22, %v13435_v46  ;;  %v9414_v41 = vpop.f32.mrf.mxu2  ;;  %v17188_v14 = vld [vmem:[#allocation9 + $0x13ac] sm:$0xf]  ;;  %v14059_v46 = vld [vmem:[#allocation9 + $0xb38] sm:$0xf0] }
 0x51f   :  { %v16912_v22 = vld [vmem:[#allocation9 + $0xb0c] sm:$0xf] }
 0x520   :  { %9690 = vmatpush.bf16.msra.mxu0 %v14494_v13  ;;  %v14299_v13 = vld [vmem:[#allocation9 + $0xd18] sm:$0xf0]  ;;  %9626 = vmatpush.bf16.msra.mxu3 %v15594_v5  ;;  %v9440_v55 = vpop.f32.mrf.mxu0 }
 0x521   :  { %9658 = vmatmul.bf16.vlgmr.msrb.gmra.mxu1 %v17877_v31  ;;  %v4638_v31 = vperm.slane %v18151_v58, 1  ;;  %9667 = vmatpush.bf16.msrb.mxu2 %v13582_v43  ;;  %v13534_v58 = vor.u32 %v16780_v50, %v13531_v48  ;;  %v14302_v54 = vor.u32 %v16972_v2, %v14299_v13  ;;  %v14635_v5 = vld [vmem:[#allocation9 + $0xfb8] sm:$0xf0]  ;;  %v9374_v43 = vadd.f32 %v9373_v26, %v18173_v35  ;;  %v17334_v48 = vld [vmem:[%s18542_s7 + $0x38] sm:$0xff] }
 0x522   :  { %9702 = vmatpush.bf16.msra.mxu1 %v14926_v24  ;;  %v15497_v24 = vld [vmem:[#allocation9 + $0x1648] sm:$0xf]  ;;  %v17212_v2 = vld [vmem:[#allocation9 + $0x146c] sm:$0xf]  ;;  %v15259_v13 = vld [vmem:[#allocation9 + $0x1498] sm:$0xf0] }
 0x523   :  { %v9439_v12 = vadd.f32 %v9438_v32, %v4638_v31  ;;  %v15498_v16 = vor.u32 %v17278_v53, %v15497_v24  ;;  %v15401_v31 = vld [vmem:[#allocation9 + $0x1588] sm:$0xf]  ;;  %v17254_v32 = vld [vmem:[#allocation9 + $0x15b4] sm:$0xf0]  ;;  %v15262_v24 = vor.u32 %v17212_v2, %v15259_v13  ;;  %v16936_v53 = vld [vmem:[#allocation9 + $0xbcc] sm:$0xf] }
 0x524   :  { %9691 = vmatpush.bf16.msra.mxu0 %v14446_v8  ;;  %v14251_v8 = vld [vmem:[#allocation9 + $0xcb8] sm:$0xf0]  ;;  %9627 = vmatpush.bf16.msra.mxu3 %v15546_v11  ;;  %v9387_v11 = vadd.f32 %v18168_v7, %v9374_v43  ;;  %v15402_v28 = vor.u32 %v17254_v32, %v15401_v31  ;;  %v15353_v35 = vld [vmem:[#allocation9 + $0x1528] sm:$0xf]  ;;  %v16924_v55 = vld [vmem:[#allocation9 + $0xb6c] sm:$0xf] }
 0x525   :  { %v18185_v60 = vadd.f32 %v9451_v38, %v9439_v12  ;;  %9668 = vmatpush.bf16.msrb.mxu2 %v13534_v58  ;;  %v14254_v42 = vor.u32 %v16960_v61, %v14251_v8  ;;  %v14587_v12 = vld [vmem:[#allocation9 + $0xf58] sm:$0xf0]  ;;  %v17242_v58 = vld [vmem:[#allocation9 + $0x1554] sm:$0xf0]  ;;  %v17333_v7 = vld [vmem:[%s18542_s7 + $0x30] sm:$0xff] }
 0x526   :  { %9703 = vmatpush.bf16.msra.mxu1 %v14878_v36  ;;  %v14683_v36 = vld [vmem:[#allocation9 + $0x1018] sm:$0xf0]  ;;  %v9453_v17 = vpop.f32.mrf.mxu1  ;;  %v14590_v3 = vor.u32 %v17044_v47, %v14587_v12  ;;  %v15354_v61 = vor.u32 %v17242_v58, %v15353_v35  ;;  %v17342_v8 = vld [vmem:[%s18542_s7 + $0x78] sm:$0xff]  ;;  %v17339_v32 = vld [vmem:[%s18542_s7 + $0x60] sm:$0xff] }
 0x527   :  { %v14155_v38 = vld [vmem:[#allocation9 + $0xbf8] sm:$0xf0]  ;;  %v17330_v26 = vld [vmem:[%s18542_s7 + $0x18] sm:$0xff] }
 0x528   :  { %9692 = vmatpush.bf16.msra.mxu0 %v14398_v45  ;;  %v14686_v45 = vor.u32 %v17068_v25, %v14683_v36  ;;  %9628 = vmatpush.bf16.msra.mxu3 %v15498_v16  ;;  %v14158_v25 = vor.u32 %v16936_v53, %v14155_v38  ;;  %v15067_v31 = vld [vmem:[#allocation9 + $0x1318] sm:$0xf0]  ;;  %v16888_v17 = vld [vmem:[#allocation9 + $0xa4c] sm:$0xf] }
 0x529   :  { %9669 = vmatpush.bf16.msrb.mxu2 %v13486_v20  ;;  %v14107_v20 = vld [vmem:[#allocation9 + $0xb98] sm:$0xf0]  ;;  %v17152_v2 = vld [vmem:[#allocation9 + $0x128c] sm:$0xf] }
 0x52a   :  { %9704 = vmatpush.bf16.msra.mxu1 %v14830_v49  ;;  %v15307_v49 = vld [vmem:[#allocation9 + $0x14f8] sm:$0xf0]  ;;  %v16876_v35 = vld [vmem:[#allocation9 + $0x9ec] sm:$0xf] }
 0x52b   :  { %v15310_v50 = vor.u32 %v17224_v27, %v15307_v49  ;;  %v17340_v27 = vld [vmem:[%s18542_s7 + $0x68] sm:$0xff]  ;;  %v17140_v53 = vld [vmem:[#allocation9 + $0x122c] sm:$0xf] }
 0x52c   :  { %9693 = vmatpush.bf16.msra.mxu0 %v14350_v57  ;;  %v14206_v57 = vor.u32 %v16948_v15, %v14203_v21  ;;  %9629 = vmatpush.bf16.msra.mxu3 %v15450_v0  ;;  %v17331_v15 = vld [vmem:[%s18542_s7 + $0x20] sm:$0xff]  ;;  %v15115_v21 = vld [vmem:[#allocation9 + $0x1378] sm:$0xf0] }
 0x52d   :  { %9670 = vmatpush.bf16.msrb.mxu2 %v13438_v30  ;;  %v17164_v30 = vld [vmem:[#allocation9 + $0x12ec] sm:$0xf]  ;;  %v15019_v13 = vld [vmem:[#allocation9 + $0x12b8] sm:$0xf0] }
 0x52e   :  { %9705 = vmatpush.bf16.msra.mxu1 %v14782_v51  ;;  %v14638_v51 = vor.u32 %v17056_v37, %v14635_v5  ;;  %v16900_v37 = vld [vmem:[#allocation9 + $0xaac] sm:$0xf]  ;;  %v14011_v5 = vld [vmem:[#allocation9 + $0xad8] sm:$0xf0]  ;;  %v15070_v41 = vor.u32 %v17164_v30, %v15067_v31  ;;  %v15022_v12 = vor.u32 %v17152_v2, %v15019_v13  ;;  %v17373_v30 = vld [vmem:[%s18542_s7 + $0x170] sm:$0xff] }
 0x52f   :  { %v14014_v43 = vor.u32 %v16900_v37, %v14011_v5  ;;  %v13915_v58 = vld [vmem:[#allocation9 + $0xa18] sm:$0xf0]  ;;  %v17308_v5 = vld [vmem:[#allocation9 + $0x176c] sm:$0xf]  ;;  %v18290_v2 = vld [vmem:[#allocation10 + $0x8] sm:$0xf] }
 0x530   :  { %9694 = vmatpush.bf16.msra.mxu0 %v14302_v54  ;;  %v9400_v54 = vadd.f32 %v18170_v23, %v9387_v11  ;;  %9630 = vmatpush.bf16.msra.mxu3 %v15402_v28  ;;  %v9375_v23 = vpop.f32.mrf.mxu3  ;;  %v17338_v11 = vld [vmem:[%s18542_s7 + $0x58] sm:$0xff]  ;;  %v14971_v38 = vld [vmem:[#allocation9 + $0x1258] sm:$0xf0]  ;;  %v4639_v13 = vperm.slane %v18290_v2, 2 }
 0x531   :  { %9715 = vmatpush.bf16.msra.mxu2 %v15310_v50  ;;  %v17348_v37 = vld [vmem:[%s18542_s7 + $0xa8] sm:$0xff] }
 0x532   :  { %9706 = vmatpush.bf16.msra.mxu1 %v14734_v44  ;;  %v15211_v44 = vld [vmem:[#allocation9 + $0x1438] sm:$0xf0]  ;;  %9671 = vmatmul.bf16.vlgmr.msrb.gmra.mxu2 %v17869_v9  ;;  %v18201_v16 = vadd.f32 %v18183_v59, %v9400_v54  ;;  %v17341_v59 = vld [vmem:[%s18542_s7 + $0x70] sm:$0xff] }
 0x533   :  { %v15214_v36 = vor.u32 %v17200_v18, %v15211_v44  ;;  %v17332_v9 = vld [vmem:[%s18542_s7 + $0x28] sm:$0xff]  ;;  %v17337_v54 = vld [vmem:[%s18542_s7 + $0x50] sm:$0xff]  ;;  %v14974_v18 = vor.u32 %v17140_v53, %v14971_v38  ;;  %v16864_v44 = vld [vmem:[#allocation9 + $0x98c] sm:$0xf] }
 0x534   :  { %9695 = vmatpush.bf16.msra.mxu0 %v14254_v42  ;;  %9631 = vmatpush.bf16.msra.mxu3 %v15354_v61  ;;  %v15166_v42 = vor.u32 %v17188_v14, %v15163_v10  ;;  %v13867_v61 = vld [vmem:[#allocation9 + $0x9b8] sm:$0xf0]  ;;  %v16852_v10 = vld [vmem:[#allocation9 + $0x92c] sm:$0xf]  ;;  %v17345_v53 = vld [vmem:[%s18542_s7 + $0x90] sm:$0xff] }
 0x535   :  { %9716 = vmatpush.bf16.msra.mxu2 %v15262_v24  ;;  %v18226_v50 = vpop.f32.mrf.mxu2  ;;  %v17328_v24 = vld [vmem:[%s18542_s7 + $0x8] sm:$0xff]  ;;  %v13870_v14 = vor.u32 %v16864_v44, %v13867_v61  ;;  %v17272_v38 = vld [vmem:[#allocation9 + $0x164c] sm:$0xf]  ;;  %v17361_v44 = vld [vmem:[%s18542_s7 + $0x110] sm:$0xff] }
 0x536   :  { %9707 = vmatpush.bf16.msra.mxu1 %v14686_v45  ;;  %v17176_v45 = vld [vmem:[#allocation9 + $0x134c] sm:$0xf] }
 0x537   :  { %9632 = vmatmul.bf16.vlgmr.msra.gmra.mxu3 %v17929_v62  ;;  %v15118_v0 = vor.u32 %v17176_v45, %v15115_v21  ;;  %v9742_v45 = vmax.f32 %v17996_v56, 0.0 }
 0x538   :  { %9696 = vmatpush.bf16.msra.mxu0 %v14206_v57  ;;  %9676 = vmatpush.bf16.msrb.mxu3 %v14158_v25  ;;  %v18218_v49 = vpop.f32.mrf.mxu0  ;;  %v13963_v57 = vld [vmem:[#allocation9 + $0xa78] sm:$0xf0]  ;;  %v17327_v25 = vld [vmem:[%s18542_s7] sm:$0xff] }
 0x539   :  { %9717 = vmatpush.bf16.msra.mxu2 %v15214_v36  ;;  %v13966_v28 = vor.u32 %v16888_v17, %v13963_v57  ;;  %v17350_v36 = vld [vmem:[%s18542_s7 + $0xb8] sm:$0xff]  ;;  %v9754_v56 = vpack.c.bf16 %v9742_v45, %v9742_v45  ;;  %v17363_v17 = vld [vmem:[%s18542_s7 + $0x120] sm:$0xff]  ;;  %v17372_v57 = vld [vmem:[%s18542_s7 + $0x168] sm:$0xff] }
 0x53a   :  { %9708 = vmatpush.bf16.msra.mxu1 %v14638_v51  ;;  %v17329_v51 = vld [vmem:[%s18542_s7 + $0x10] sm:$0xff] }
 0x53b   :  { %9697 = vmatmul.bf16.vlgmr.msra.gmra.mxu0 %v17893_v33  ;;  %v14110_v33 = vor.u32 %v16924_v55, %v14107_v20  ;;  %v9741_v55 = vmax.f32 %v17979_v19, 0.0  ;;  %v17366_v20 = vld [vmem:[%s18542_s7 + $0x138] sm:$0xff]  ;;  %v17349_v19 = vld [vmem:[%s18542_s7 + $0xb0] sm:$0xff] }
 0x53c   :  { %10537 = vmatpush.bf16.msrb.mxu0 %v17334_v48 }
 0x53d   :  { %9677 = vmatpush.bf16.msrb.mxu3 %v14110_v33  ;;  %9718 = vmatpush.bf16.msra.mxu2 %v15166_v42  ;;  %v17320_v33 = vld [vmem:[#allocation9 + $0x17cc] sm:$0xf]  ;;  %v15691_v42 = vld [vmem:[#allocation9 + $0x17f8] sm:$0xf0] }
 0x53e   :  { %9709 = vmatpush.bf16.msra.mxu1 %v14590_v3  ;;  %v18228_v48 = vpop.f32.mrf.mxu1  ;;  %v18242_v3 = vpop.f32.mrf.mxu3 }
 0x540   :  { %10538 = vmatpush.bf16.msrb.mxu0 %v17333_v7  ;;  %v9492_v47 = vpop.f32.mrf.mxu0  ;;  %v13918_v7 = vor.u32 %v16876_v35, %v13915_v58  ;;  %v17371_v35 = vld [vmem:[%s18542_s7 + $0x160] sm:$0xff] }
 0x541   :  { %9710 = vmatmul.bf16.vlgmr.msra.gmra.mxu1 %v17896_v52  ;;  %v14062_v52 = vor.u32 %v16912_v22, %v14059_v46  ;;  %9719 = vmatpush.bf16.msra.mxu2 %v15118_v0  ;;  %v9753_v22 = vpack.c.bf16 %v9741_v55, %v9741_v55  ;;  %v17365_v46 = vld [vmem:[%s18542_s7 + $0x130] sm:$0xff]  ;;  %v15694_v0 = vor.u32 %v17320_v33, %v15691_v42  ;;  %v15547_v47 = vld [vmem:[#allocation9 + $0x16d8] sm:$0xf0]  ;;  %v17260_v55 = vld [vmem:[#allocation9 + $0x15ec] sm:$0xf] }
 0x542   :  { %10550 = vmatpush.bf16.msrb.mxu1 %v17342_v8  ;;  %v9466_v8 = vpop.f32.mrf.mxu2  ;;  %v17343_v33 = vld [vmem:[%s18542_s7 + $0x80] sm:$0xff]  ;;  %v17248_v42 = vld [vmem:[#allocation9 + $0x158c] sm:$0xf] }
 0x543   :  { %9678 = vmatpush.bf16.msrb.mxu3 %v14062_v52  ;;  %v17370_v8 = vld [vmem:[%s18542_s7 + $0x158] sm:$0xff] }
 0x544   :  { %10539 = vmatpush.bf16.msrb.mxu0 %v17332_v9  ;;  %v17336_v9 = vld [vmem:[%s18542_s7 + $0x48] sm:$0xff] }
 0x545   :  { %9720 = vmatpush.bf16.msra.mxu2 %v15070_v41  ;;  %v15595_v41 = vld [vmem:[#allocation9 + $0x1738] sm:$0xf0] }
 0x546   :  { %10551 = vmatpush.bf16.msrb.mxu1 %v17341_v59  ;;  %v9505_v23 = vpop.f32.mrf.mxu1  ;;  %v13819_v59 = vld [vmem:[#allocation9 + $0x958] sm:$0xf0]  ;;  %v9427_v52 = vpop.f32.mrf.mxu3 }
 0x547   :  { %9679 = vmatpush.bf16.msrb.mxu3 %v14014_v43  ;;  %v13822_v21 = vor.u32 %v16852_v10, %v13819_v59  ;;  %v17296_v43 = vld [vmem:[#allocation9 + $0x170c] sm:$0xf]  ;;  %v9465_v10 = vadd.f32 %v18226_v50, %v18185_v60  ;;  %v17359_v60 = vld [vmem:[%s18542_s7 + $0x100] sm:$0xff] }
 0x548   :  { %10540 = vmatpush.bf16.msrb.mxu0 %v17331_v15  ;;  %v17335_v15 = vld [vmem:[%s18542_s7 + $0x40] sm:$0xff]  ;;  %v17382_v50 = vld [vmem:[%s18542_s7 + $0x1b8] sm:$0xff] }
 0x549   :  { %9721 = vmatpush.bf16.msra.mxu2 %v15022_v12  ;;  %v17362_v12 = vld [vmem:[%s18542_s7 + $0x118] sm:$0xff] }
 0x54a   :  { %10552 = vmatpush.bf16.msrb.mxu1 %v17340_v27  ;;  %v17374_v27 = vld [vmem:[%s18542_s7 + $0x178] sm:$0xff] }
 0x54b   :  { %9680 = vmatpush.bf16.msrb.mxu3 %v13966_v28  ;;  %v17284_v28 = vld [vmem:[#allocation9 + $0x16ac] sm:$0xf] }
 0x54c   :  { %10541 = vmatpush.bf16.msrb.mxu0 %v17330_v26  ;;  %v15643_v26 = vld [vmem:[#allocation9 + $0x1798] sm:$0xf0]  ;;  %v15550_v58 = vor.u32 %v17284_v28, %v15547_v47  ;;  %v17398_v52 = vld [vmem:[%s18542_s7 + $0x238] sm:$0xff]  ;;  %v17395_v28 = vld [vmem:[%s18542_s7 + $0x220] sm:$0xff] }
 0x54d   :  { %9722 = vmatpush.bf16.msra.mxu2 %v14974_v18  ;;  %v15646_v31 = vor.u32 %v17308_v5, %v15643_v26  ;;  %v17236_v5 = vld [vmem:[#allocation9 + $0x152c] sm:$0xf]  ;;  %v15355_v26 = vld [vmem:[#allocation9 + $0x1558] sm:$0xf0] }
 0x54e   :  { %10553 = vmatpush.bf16.msrb.mxu1 %v17339_v32  ;;  %v17347_v32 = vld [vmem:[%s18542_s7 + $0xa0] sm:$0xff]  ;;  %v17404_v47 = vld [vmem:[%s18542_s7 + $0x268] sm:$0xff] }
 0x54f   :  { %9681 = vmatpush.bf16.msrb.mxu3 %v13918_v7 }
 0x550   :  { %10542 = vmatpush.bf16.msrb.mxu0 %v17329_v51  ;;  %9723 = vmatmul.bf16.vlgmr.msra.gmra.mxu2 %v17918_v63  ;;  %v17364_v63 = vld [vmem:[%s18542_s7 + $0x128] sm:$0xff]  ;;  %v15598_v51 = vor.u32 %v17296_v43, %v15595_v41  ;;  %v15358_v43 = vor.u32 %v17236_v5, %v15355_v26 }
 0x551   :  { %10563 = vmatpush.bf16.msrb.mxu2 %v17350_v36  ;;  %v17344_v36 = vld [vmem:[%s18542_s7 + $0x88] sm:$0xff] }
 0x552   :  { %10554 = vmatpush.bf16.msrb.mxu1 %v17338_v11  ;;  %v17412_v5 = vld [vmem:[%s18542_s7 + $0x2a8] sm:$0xff] }
 0x553   :  { %9682 = vmatpush.bf16.msrb.mxu3 %v13870_v14  ;;  %v17369_v14 = vld [vmem:[%s18542_s7 + $0x150] sm:$0xff] }
 0x554   :  { %10543 = vmatpush.bf16.msrb.mxu0 %v17328_v24 }
 0x555   :  { %10564 = vmatpush.bf16.msrb.mxu2 %v17349_v19  ;;  %v18305_v7 = vpop.f32.mrf.mxu2 }
 0x556   :  { %10555 = vmatpush.bf16.msrb.mxu1 %v17337_v54  ;;  %v15499_v54 = vld [vmem:[#allocation9 + $0x1678] sm:$0xf0] }
 0x557   :  { %9683 = vmatpush.bf16.msrb.mxu3 %v13822_v21  ;;  %v15502_v23 = vor.u32 %v17272_v38, %v15499_v54  ;;  %v17377_v38 = vld [vmem:[%s18542_s7 + $0x190] sm:$0xff] }
 0x558   :  { %10544 = vmatpush.bf16.msrb.mxu0 %v17327_v25  ;;  %v9542_v11 = vpop.f32.mrf.mxu0 }
 0x559   :  { %10565 = vmatpush.bf16.msrb.mxu2 %v17348_v37  ;;  %v9543_v24 = vadd.f32 %v9542_v11, %v4639_v13  ;;  %v17405_v13 = vld [vmem:[%s18542_s7 + $0x270] sm:$0xff] }
 0x55a   :  { %10556 = vmatpush.bf16.msrb.mxu1 %v17336_v9  ;;  %9684 = vmatmul.bf16.vlgmr.msrb.gmra.mxu3 %v17879_v1  ;;  %v17346_v1 = vld [vmem:[%s18542_s7 + $0x98] sm:$0xff]  ;;  %v17360_v9 = vld [vmem:[%s18542_s7 + $0x108] sm:$0xff]  ;;  %v9477_v19 = vpop.f32.mrf.mxu3  ;;  %v17357_v11 = vld [vmem:[%s18542_s7 + $0xf0] sm:$0xff] }
 0x55b   :  { %10545 = vmatmul.bf16.vlgmr.msrb.gmra.mxu0 %v9753_v22  ;;  %9728 = vmatpush.bf16.msra.mxu3 %v15694_v0  ;;  %v15403_v22 = vld [vmem:[#allocation9 + $0x15b8] sm:$0xf0] }
 0x55c   :  { %10589 = vmatpush.bf16.msra.mxu0 %v17366_v20  ;;  %v15451_v20 = vld [vmem:[#allocation9 + $0x1618] sm:$0xf0]  ;;  %v15406_v37 = vor.u32 %v17248_v42, %v15403_v22  ;;  %v17391_v42 = vld [vmem:[%s18542_s7 + $0x200] sm:$0xff]  ;;  %v17414_v22 = vld [vmem:[%s18542_s7 + $0x2b8] sm:$0xff] }
 0x55d   :  { %10566 = vmatpush.bf16.msrb.mxu2 %v17347_v32  ;;  %v15454_v59 = vor.u32 %v17260_v55, %v15451_v20  ;;  %v9518_v45 = vpop.f32.mrf.mxu2  ;;  %v9746_v32 = vmax.f32 %v18116_v39, 0.0  ;;  %v17396_v39 = vld [vmem:[%s18542_s7 + $0x228] sm:$0xff]  ;;  %v9426_v20 = vadd.f32 %v18242_v3, %v18201_v16 }
 0x55e   :  { %10557 = vmatpush.bf16.msrb.mxu1 %v17335_v15  ;;  %v9555_v18 = vpop.f32.mrf.mxu1  ;;  %v9478_v15 = vadd.f32 %v9477_v19, %v9465_v10  ;;  %v17392_v55 = vld [vmem:[%s18542_s7 + $0x208] sm:$0xff]  ;;  %v9747_v19 = vmax.f32 %v18145_v29, 0.0 }
 0x55f   :  { %9729 = vmatpush.bf16.msra.mxu3 %v15646_v31  ;;  %v18310_v61 = vadd.f32 %v9555_v18, %v9543_v24  ;;  %v17367_v31 = vld [vmem:[%s18542_s7 + $0x140] sm:$0xff]  ;;  %v17400_v29 = vld [vmem:[%s18542_s7 + $0x248] sm:$0xff] }
 0x560   :  { %10590 = vmatpush.bf16.msra.mxu0 %v17365_v46  ;;  %v9544_v25 = vpop.f32.mrf.mxu0  ;;  %v9743_v46 = vmax.f32 %v18025_v40, 0.0  ;;  %v17368_v40 = vld [vmem:[%s18542_s7 + $0x148] sm:$0xff]  ;;  %v9491_v0 = vadd.f32 %v18218_v49, %v9478_v15  ;;  %v17397_v49 = vld [vmem:[%s18542_s7 + $0x230] sm:$0xff]  ;;  %v17403_v24 = vld [vmem:[%s18542_s7 + $0x260] sm:$0xff]  ;;  %v9759_v45 = vpack.c.bf16 %v9747_v19, %v9747_v19 }
 0x561   :  { %10558 = vmatmul.bf16.vlgmr.msrb.gmra.mxu1 %v9754_v56  ;;  %10567 = vmatpush.bf16.msrb.mxu2 %v17346_v1  ;;  %v17379_v1 = vld [vmem:[%s18542_s7 + $0x1a0] sm:$0xff] }
 0x562   :  { %10602 = vmatpush.bf16.msra.mxu1 %v17374_v27  ;;  %v9745_v27 = vmax.f32 %v18085_v34, 0.0  ;;  %v17381_v34 = vld [vmem:[%s18542_s7 + $0x1b0] sm:$0xff]  ;;  %v18348_v56 = vadd.f32 %v18228_v48, %v9491_v0  ;;  %v17406_v48 = vld [vmem:[%s18542_s7 + $0x278] sm:$0xff]  ;;  %v9479_v41 = vpop.f32.mrf.mxu3 }
 0x563   :  { %9730 = vmatpush.bf16.msra.mxu3 %v15598_v51  ;;  %v9758_v51 = vpack.c.bf16 %v9746_v32, %v9746_v32  ;;  %v17387_v32 = vld [vmem:[%s18542_s7 + $0x1e0] sm:$0xff] }
 0x564   :  { %10591 = vmatpush.bf16.msra.mxu0 %v17364_v63  ;;  %v9755_v63 = vpack.c.bf16 %v9743_v46, %v9743_v46  ;;  %v9517_v16 = vadd.f32 %v18305_v7, %v18348_v56  ;;  %v9749_v46 = vmax.f32 %v9426_v20, 0.0  ;;  %v17352_v7 = vld [vmem:[%s18542_s7 + $0xc8] sm:$0xff]  ;;  %v17422_v20 = vld [vmem:[%s18542_s7 + $0x2f8] sm:$0xff] }
 0x565   :  { %10568 = vmatpush.bf16.msrb.mxu2 %v17345_v53  ;;  %v17355_v53 = vld [vmem:[%s18542_s7 + $0xe0] sm:$0xff]  ;;  %v17388_v56 = vld [vmem:[%s18542_s7 + $0x1e8] sm:$0xff] }
 0x566   :  { %10603 = vmatpush.bf16.msra.mxu1 %v17373_v30  ;;  %v9557_v21 = vpop.f32.mrf.mxu1  ;;  %v9757_v30 = vpack.c.bf16 %v9745_v27, %v9745_v27 }
 0x567   :  { %9731 = vmatpush.bf16.msra.mxu3 %v15550_v58  ;;  %v17394_v58 = vld [vmem:[%s18542_s7 + $0x218] sm:$0xff]  ;;  %v17413_v21 = vld [vmem:[%s18542_s7 + $0x2b0] sm:$0xff] }
 0x568   :  { %10592 = vmatpush.bf16.msra.mxu0 %v17363_v17  ;;  %v17358_v17 = vld [vmem:[%s18542_s7 + $0xf8] sm:$0xff] }
 0x569   :  { %10569 = vmatpush.bf16.msrb.mxu2 %v17344_v36  ;;  %v17376_v36 = vld [vmem:[%s18542_s7 + $0x188] sm:$0xff] }
 0x56a   :  { %10604 = vmatpush.bf16.msra.mxu1 %v17372_v57  ;;  %v17380_v57 = vld [vmem:[%s18542_s7 + $0x1a8] sm:$0xff] }
 0x56b   :  { %9732 = vmatpush.bf16.msra.mxu3 %v15502_v23  ;;  %v17354_v23 = vld [vmem:[%s18542_s7 + $0xd8] sm:$0xff] }
 0x56c   :  { %10593 = vmatpush.bf16.msra.mxu0 %v17362_v12  ;;  %v17356_v12 = vld [vmem:[%s18542_s7 + $0xe8] sm:$0xff] }
 0x56d   :  { %10570 = vmatpush.bf16.msrb.mxu2 %v17343_v33 }
 0x56e   :  { %10605 = vmatpush.bf16.msra.mxu1 %v17371_v35 }
 0x56f   :  { %9733 = vmatpush.bf16.msra.mxu3 %v15454_v59  ;;  %v17375_v59 = vld [vmem:[%s18542_s7 + $0x180] sm:$0xff] }
 0x570   :  { %10594 = vmatpush.bf16.msra.mxu0 %v17361_v44  ;;  %10571 = vmatmul.bf16.vlgmr.msrb.gmra.mxu2 %v9755_v63  ;;  %v17393_v44 = vld [vmem:[%s18542_s7 + $0x210] sm:$0xff] }
 0x571   :  { %10615 = vmatpush.bf16.msra.mxu2 %v17382_v50  ;;  %v17399_v50 = vld [vmem:[%s18542_s7 + $0x240] sm:$0xff] }
 0x572   :  { %10606 = vmatpush.bf16.msra.mxu1 %v17370_v8  ;;  %v17402_v8 = vld [vmem:[%s18542_s7 + $0x258] sm:$0xff] }
 0x573   :  { %9734 = vmatpush.bf16.msra.mxu3 %v15406_v37  ;;  %v17390_v37 = vld [vmem:[%s18542_s7 + $0x1f8] sm:$0xff] }
 0x574   :  { %10595 = vmatpush.bf16.msra.mxu0 %v17360_v9  ;;  %v17401_v9 = vld [vmem:[%s18542_s7 + $0x250] sm:$0xff] }
 0x575   :  { %10616 = vmatpush.bf16.msra.mxu2 %v17381_v34  ;;  %v18405_v54 = vpop.f32.mrf.mxu2  ;;  %v17411_v34 = vld [vmem:[%s18542_s7 + $0x2a0] sm:$0xff] }
 0x576   :  { %10607 = vmatpush.bf16.msra.mxu1 %v17369_v14  ;;  %v17353_v14 = vld [vmem:[%s18542_s7 + $0xd0] sm:$0xff] }
 0x577   :  { %9735 = vmatpush.bf16.msra.mxu3 %v15358_v43 }
 0x578   :  { %10596 = vmatpush.bf16.msra.mxu0 %v17359_v60  ;;  %v18388_v35 = vpop.f32.mrf.mxu0  ;;  %v9761_v60 = vpack.c.bf16 %v9749_v46, %v9749_v46  ;;  %v17417_v46 = vld [vmem:[%s18542_s7 + $0x2d0] sm:$0xff] }
 0x579   :  { %10617 = vmatpush.bf16.msra.mxu2 %v17380_v57  ;;  %v17386_v57 = vld [vmem:[%s18542_s7 + $0x1d8] sm:$0xff] }
 0x57a   :  { %10608 = vmatpush.bf16.msra.mxu1 %v17368_v40  ;;  %9736 = vmatmul.bf16.vlgmr.msra.gmra.mxu3 %v17929_v62  ;;  %v17378_v62 = vld [vmem:[%s18542_s7 + $0x198] sm:$0xff]  ;;  %v9529_v10 = vpop.f32.mrf.mxu3  ;;  %v9744_v40 = vmax.f32 %v18056_v6, 0.0  ;;  %v17389_v6 = vld [vmem:[%s18542_s7 + $0x1f0] sm:$0xff] }
 0x57b   :  { %10597 = vmatmul.bf16.vlgmr.msra.gmra.mxu0 %v9757_v30  ;;  %10576 = vmatpush.bf16.msrb.mxu3 %v17358_v17  ;;  %v9530_v15 = vadd.f32 %v9529_v10, %v9517_v16  ;;  %v4640_v30 = vperm.slane %v18290_v2, 3 }
 0x57c   :  { %10641 = vmatpush.bf16.msrb.mxu0 %v17398_v52  ;;  %v17351_v52 = vld [vmem:[%s18542_s7 + $0xc0] sm:$0xff]  ;;  %v9756_v63 = vpack.c.bf16 %v9744_v40, %v9744_v40 }
 0x57d   :  { %10618 = vmatpush.bf16.msra.mxu2 %v17379_v1  ;;  %v9570_v3 = vpop.f32.mrf.mxu2  ;;  %v9750_v27 = vmax.f32 %v9530_v15, 0.0 }
 0x57e   :  { %10609 = vmatpush.bf16.msra.mxu1 %v17367_v31  ;;  %v18407_v18 = vpop.f32.mrf.mxu1  ;;  %v17410_v31 = vld [vmem:[%s18542_s7 + $0x298] sm:$0xff]  ;;  %v17419_v3 = vld [vmem:[%s18542_s7 + $0x2e0] sm:$0xff] }
 0x57f   :  { %10577 = vmatpush.bf16.msrb.mxu3 %v17357_v11  ;;  %v9762_v26 = vpack.c.bf16 %v9750_v27, %v9750_v27  ;;  %v17385_v11 = vld [vmem:[%s18542_s7 + $0x1d0] sm:$0xff]  ;;  %v17415_v27 = vld [vmem:[%s18542_s7 + $0x2c0] sm:$0xff] }
 0x580   :  { %10642 = vmatpush.bf16.msrb.mxu0 %v17397_v49  ;;  %v9596_v25 = vpop.f32.mrf.mxu0 }
 0x581   :  { %10610 = vmatmul.bf16.vlgmr.msra.gmra.mxu1 %v9758_v51  ;;  %10619 = vmatpush.bf16.msra.mxu2 %v17378_v62  ;;  %v17408_v51 = vld [vmem:[%s18542_s7 + $0x288] sm:$0xff] }
 0x582   :  { %10654 = vmatpush.bf16.msrb.mxu1 %v17406_v48  ;;  %v9531_v0 = vpop.f32.mrf.mxu3  ;;  %v17409_v48 = vld [vmem:[%s18542_s7 + $0x290] sm:$0xff] }
 0x583   :  { %10578 = vmatpush.bf16.msrb.mxu3 %v17356_v12 }
 0x584   :  { %10643 = vmatpush.bf16.msrb.mxu0 %v17396_v39 }
 0x585   :  { %10620 = vmatpush.bf16.msra.mxu2 %v17377_v38 }
 0x586   :  { %10655 = vmatpush.bf16.msrb.mxu1 %v17405_v13  ;;  %v9609_v33 = vpop.f32.mrf.mxu1  ;;  %v9569_v13 = vadd.f32 %v18405_v54, %v18310_v61  ;;  %v17384_v61 = vld [vmem:[%s18542_s7 + $0x1c8] sm:$0xff] }
 0x587   :  { %10579 = vmatpush.bf16.msrb.mxu3 %v17355_v53  ;;  %v9748_v53 = vmax.f32 %v18176_v4, 0.0  ;;  %v17418_v33 = vld [vmem:[%s18542_s7 + $0x2d8] sm:$0xff] }
 0x588   :  { %10644 = vmatpush.bf16.msrb.mxu0 %v17395_v28  ;;  %v17407_v28 = vld [vmem:[%s18542_s7 + $0x280] sm:$0xff] }
 0x589   :  { %10621 = vmatpush.bf16.msra.mxu2 %v17376_v36  ;;  %v9760_v54 = vpack.c.bf16 %v9748_v53, %v9748_v53 }
 0x58a   :  { %10656 = vmatpush.bf16.msrb.mxu1 %v17404_v47 }
 0x58b   :  { %10580 = vmatpush.bf16.msrb.mxu3 %v17354_v23 }
 0x58c   :  { %10645 = vmatpush.bf16.msrb.mxu0 %v17394_v58 }
 0x58d   :  { %10622 = vmatpush.bf16.msra.mxu2 %v17375_v59  ;;  %v17421_v59 = vld [vmem:[%s18542_s7 + $0x2f0] sm:$0xff] }
 0x58e   :  { %10657 = vmatpush.bf16.msrb.mxu1 %v17403_v24  ;;  %v17383_v24 = vld [vmem:[%s18542_s7 + $0x1c0] sm:$0xff] }
 0x58f   :  { %10581 = vmatpush.bf16.msrb.mxu3 %v17353_v14 }
 0x590   :  { %10646 = vmatpush.bf16.msrb.mxu0 %v17393_v44  ;;  %10623 = vmatmul.bf16.vlgmr.msra.gmra.mxu2 %v9759_v45 }
 0x591   :  { %10667 = vmatpush.bf16.msrb.mxu2 %v17414_v22 }
 0x592   :  { %10658 = vmatpush.bf16.msrb.mxu1 %v17402_v8 }
 0x593   :  { %10582 = vmatpush.bf16.msrb.mxu3 %v17352_v7 }
 0x594   :  { %10647 = vmatpush.bf16.msrb.mxu0 %v17392_v55 }
 0x595   :  { %10668 = vmatpush.bf16.msrb.mxu2 %v17413_v21  ;;  %v9620_v41 = vpop.f32.mrf.mxu2  ;;  %v17416_v21 = vld [vmem:[%s18542_s7 + $0x2c8] sm:$0xff] }
 0x596   :  { %10659 = vmatpush.bf16.msrb.mxu1 %v17401_v9 }
 0x597   :  { %10583 = vmatpush.bf16.msrb.mxu3 %v17351_v52 }
 0x598   :  { %10648 = vmatpush.bf16.msrb.mxu0 %v17391_v42  ;;  %v9646_v49 = vpop.f32.mrf.mxu0  ;;  %v17436_v42 = vld [vmem:[#allocation12] ss:$0 sm:$0xff] }
 0x599   :  { %10669 = vmatpush.bf16.msrb.mxu2 %v17412_v5  ;;  %v9647_v43 = vadd.f32 %v9646_v49, %v4640_v30 }
 0x59a   :  { %10660 = vmatpush.bf16.msrb.mxu1 %v17400_v29  ;;  %10584 = vmatmul.bf16.vlgmr.msrb.gmra.mxu3 %v9756_v63  ;;  %v9581_v1 = vpop.f32.mrf.mxu3 }
 0x59b   :  { %10649 = vmatmul.bf16.vlgmr.msrb.gmra.mxu0 %v9761_v60  ;;  %10628 = vmatpush.bf16.msra.mxu3 %v17390_v37  ;;  %v9582_v47 = vadd.f32 %v9581_v1, %v9569_v13 }
 0x59d   :  { %10670 = vmatpush.bf16.msrb.mxu2 %v17411_v34  ;;  %v9622_v12 = vpop.f32.mrf.mxu2  ;;  %v9595_v58 = vadd.f32 %v18388_v35, %v9582_v47 }
 0x59e   :  { %10661 = vmatpush.bf16.msrb.mxu1 %v17399_v50  ;;  %v9659_v17 = vpop.f32.mrf.mxu1 }
 0x59f   :  { %10629 = vmatpush.bf16.msra.mxu3 %v17389_v6  ;;  %v9660_v2 = vadd.f32 %v9659_v17, %v9647_v43  ;;  %v9608_v23 = vadd.f32 %v18407_v18, %v9595_v58  ;;  %v17420_v18 = vld [vmem:[%s18542_s7 + $0x2e8] sm:$0xff] }
 0x5a0   :  { %v9648_v39 = vpop.f32.mrf.mxu0 }
 0x5a1   :  { %10662 = vmatmul.bf16.vlgmr.msrb.gmra.mxu1 %v9762_v26  ;;  %10671 = vmatpush.bf16.msrb.mxu2 %v17410_v31  ;;  %v9621_v36 = vadd.f32 %v9620_v41, %v9608_v23 }
 0x5a2   :  { %v9583_v38 = vpop.f32.mrf.mxu3 }
 0x5a3   :  { %10630 = vmatpush.bf16.msra.mxu3 %v17388_v56 }
 0x5a5   :  { %10672 = vmatpush.bf16.msrb.mxu2 %v17409_v48 }
 0x5a6   :  { %v9661_v62 = vpop.f32.mrf.mxu1 }
 0x5a7   :  { %10631 = vmatpush.bf16.msra.mxu3 %v17387_v32 }
 0x5a9   :  { %10673 = vmatpush.bf16.msrb.mxu2 %v17408_v51 }
 0x5ab   :  { %10632 = vmatpush.bf16.msra.mxu3 %v17386_v57 }
 0x5ad   :  { %10674 = vmatpush.bf16.msrb.mxu2 %v17407_v28 }
 0x5af   :  { %10633 = vmatpush.bf16.msra.mxu3 %v17385_v11 }
 0x5b3   :  { %10634 = vmatpush.bf16.msra.mxu3 %v17384_v61 }
 0x5b5   :  { %v9672_v8 = vpop.f32.mrf.mxu2 }
 0x5b6   :  { %v9673_v50 = vadd.f32 %v9672_v8, %v9660_v2 }
 0x5b7   :  { %10635 = vmatpush.bf16.msra.mxu3 %v17383_v24 }
 0x5b8   :  { %v9698_v44 = vpop.f32.mrf.mxu0 }
 0x5ba   :  { %10636 = vmatmul.bf16.vlgmr.msra.gmra.mxu3 %v9760_v54  ;;  %v9633_v55 = vpop.f32.mrf.mxu3 }
 0x5bb   :  { %v9634_v9 = vadd.f32 %v9633_v55, %v9621_v36  ;;  %10680 = vmatpush.bf16.msrb.mxu3 %v17422_v20 }
 0x5bd   :  { %v9674_v14 = vpop.f32.mrf.mxu2  ;;  %v9751_v4 = vmax.f32 %v9634_v9, 0.0 }
 0x5be   :  { %v9711_v35 = vpop.f32.mrf.mxu1 }
 0x5bf   :  { %v9763_v19 = vpack.c.bf16 %v9751_v4, %v9751_v4  ;;  %10681 = vmatpush.bf16.msrb.mxu3 %v17421_v59 }
 0x5c0   :  { %v9700_v25 = vpop.f32.mrf.mxu0 }
 0x5c1   :  { %10675 = vmatmul.bf16.vlgmr.msrb.gmra.mxu2 %v9763_v19 }
 0x5c2   :  { %v9635_v16 = vpop.f32.mrf.mxu3 }
 0x5c3   :  { %10682 = vmatpush.bf16.msrb.mxu3 %v17420_v18 }
 0x5c6   :  { %v9713_v10 = vpop.f32.mrf.mxu1 }
 0x5c7   :  { %10683 = vmatpush.bf16.msrb.mxu3 %v17419_v3 }
 0x5cb   :  { %10684 = vmatpush.bf16.msrb.mxu3 %v17418_v33 }
 0x5cf   :  { %10685 = vmatpush.bf16.msrb.mxu3 %v17417_v46 }
 0x5d3   :  { %v9724_v15 = vpop.f32.mrf.mxu2  ;;  %10686 = vmatpush.bf16.msrb.mxu3 %v17416_v21 }
 0x5d7   :  { %10687 = vmatpush.bf16.msrb.mxu3 %v17415_v27 }
 0x5d8   :  { %v10546_v22 = vpop.f32.mrf.mxu0 }
 0x5d9   :  { %v10547_v29 = vadd.f32 %v17436_v42, %v10546_v22 }
 0x5db   :  { %v9726_v0 = vpop.f32.mrf.mxu2 }
 0x5dd   :  { %v9685_v52 = vpop.f32.mrf.mxu3 }
 0x5de   :  { %v10559_v7 = vpop.f32.mrf.mxu1  ;;  %v9686_v40 = vadd.f32 %v9685_v52, %v9673_v50 }
 0x5df   :  { %v10560_v45 = vadd.f32 %v10559_v7, %v10547_v29 }
 0x5e0   :  { %v10548_v60 = vpop.f32.mrf.mxu0  ;;  %v9699_v5 = vadd.f32 %v9698_v44, %v9686_v40 }
 0x5e2   :  { %v9712_v30 = vadd.f32 %v9711_v35, %v9699_v5 }
 0x5e4   :  { %v9725_v31 = vadd.f32 %v9724_v15, %v9712_v30 }
 0x5e5   :  { %v9687_v26 = vpop.f32.mrf.mxu3 }
 0x5e6   :  { %v10561_v37 = vpop.f32.mrf.mxu1 }
 0x5f3   :  { %v10572_v6 = vpop.f32.mrf.mxu2 }
 0x5f4   :  { %v10573_v56 = vadd.f32 %v10572_v6, %v10560_v45 }
 0x5f8   :  { %v10598_v63 = vpop.f32.mrf.mxu0 }
 0x5fb   :  { %v10574_v48 = vpop.f32.mrf.mxu2 }
 0x5fd   :  { %v9737_v32 = vpop.f32.mrf.mxu3 }
 0x5fe   :  { %v10611_v34 = vpop.f32.mrf.mxu1  ;;  %v9738_v43 = vadd.f32 %v9737_v32, %v9725_v31 }
 0x600   :  { %v10600_v49 = vpop.f32.mrf.mxu0  ;;  %v9752_v17 = vmax.f32 %v9738_v43, 0.0 }
 0x602   :  { %v9764_v2 = vpack.c.bf16 %v9752_v17, %v9752_v17 }
 0x604   :  { %10688 = vmatmul.bf16.vlgmr.msrb.gmra.mxu3 %v9764_v2 }
 0x605   :  { %v9739_v57 = vpop.f32.mrf.mxu3 }
 0x606   :  { %v10613_v41 = vpop.f32.mrf.mxu1 }
 0x613   :  { %v10624_v51 = vpop.f32.mrf.mxu2 }
 0x618   :  { %v10650_v39 = vpop.f32.mrf.mxu0 }
 0x61b   :  { %v10626_v47 = vpop.f32.mrf.mxu2 }
 0x61d   :  { %v10585_v1 = vpop.f32.mrf.mxu3 }
 0x61e   :  { %v10663_v13 = vpop.f32.mrf.mxu1  ;;  %v10586_v28 = vadd.f32 %v10585_v1, %v10573_v56 }
 0x620   :  { %v10652_v11 = vpop.f32.mrf.mxu0  ;;  %v10599_v62 = vadd.f32 %v10598_v63, %v10586_v28 }
 0x622   :  { %v10612_v58 = vadd.f32 %v10611_v34, %v10599_v62 }
 0x624   :  { %v10625_v61 = vadd.f32 %v10624_v51, %v10612_v58 }
 0x625   :  { %v10587_v24 = vpop.f32.mrf.mxu3 }
 0x626   :  { %v10665_v12 = vpop.f32.mrf.mxu1 }
 0x63d   :  { %v10637_v53 = vpop.f32.mrf.mxu3 }
 0x63e   :  { %v10638_v38 = vadd.f32 %v10637_v53, %v10625_v61 }
 0x640   :  { %v10651_v54 = vadd.f32 %v10650_v39, %v10638_v38 }
 0x642   :  { %v10664_v44 = vadd.f32 %v10663_v13, %v10651_v54 }
 0x644   :  { %v10676_v35 = vpop.f32.mrf.mxu2 }
 0x645   :  { %v10639_v8 = vpop.f32.mrf.mxu3  ;;  %v10677_v25 = vadd.f32 %v10676_v35, %v10664_v44 }
 0x64c   :  { %v10678_v23 = vpop.f32.mrf.mxu2 }
 0x687   :  { %v10689_v36 = vpop.f32.mrf.mxu3 }
 0x688   :  { %v10690_v55 = vadd.f32 %v10689_v36, %v10677_v25 }
 0x68a   :  { %10694 = vst.msk [vmem:[%s18544_s9] sm:$0xff] %vm10693_vm0, %v10690_v55 }
 0x68f   :  { %v10691_v20 = vpop.f32.mrf.mxu3 }
 0x690   :  { %10699 = vsyncpa [#allocation3], 1 }
 0x691   :  { %10700 = vsyncpa [#allocation5], 1 }
 0x692   :  { %10701 = vsyncpa [#allocation8], 1 }
 0x693   :  { %10702 = vsyncpa [#allocation11], 1 }

</bundles_post_ra>
